<compile_context>
chip_gen: v5e
topology: v5e:2x2
jax: 0.10.0
libtpu: 0.0.40
codegen_flags: <defaults>
</compile_context>

<pallas_src>
import functools
import jax
import jax.numpy as jnp
from jax.experimental import pallas as pl
from jax.experimental.pallas import tpu as pltpu

BN_EPS = 1e-5
CPAD = 128                      # lane-dense channel padding for activations
MXU_DTYPE = jnp.bfloat16        # matmul-input dtype (f32 accumulate/epilogue);
                                # set to jnp.float32 for exact-f32 matmuls.

_DIMSEM = pltpu.CompilerParams(dimension_semantics=("parallel",))


def _round_up(x, m):
    return (x + m - 1) // m * m


def _m_tiling(m):
    """Choose (padded_M, tile_M): one block for small M, divisor tiles else."""
    m8 = _round_up(m, 8)
    if m8 <= 512:
        return m8, m8
    for tm in (512, 448, 384, 320, 256, 192, 128):
        if m8 % tm == 0:
            return m8, tm
    return _round_up(m8, 256), 256


# ----------------------------- Pallas kernels ------------------------------

def _conv_gemm_kernel(a_ref, w_ref, b_ref, o_ref, *, act):
    """out = act(A @ W + b); bias/act in f32, matmul inputs in MXU_DTYPE."""
    a = a_ref[...].astype(MXU_DTYPE)
    w = w_ref[...].astype(MXU_DTYPE)
    acc = jnp.dot(a, w, preferred_element_type=jnp.float32) + b_ref[...]
    if act == "relu":
        acc = jnp.maximum(acc, 0.0)
    o_ref[...] = acc.astype(o_ref.dtype)


def conv_gemm(a, w, b, act):
    """a: (M, K) im2col patches, w: (K, Np), b: (1, Np) -> (M, Np) f32."""
    M, K = a.shape
    _, Np = w.shape
    Mp, tm = _m_tiling(M)
    if Mp != M:
        a = jnp.pad(a, ((0, Mp - M), (0, 0)))
    out = pl.pallas_call(
        functools.partial(_conv_gemm_kernel, act=act),
        out_shape=jax.ShapeDtypeStruct((Mp, Np), jnp.float32),
        grid=(Mp // tm,),
        in_specs=[pl.BlockSpec((tm, K), lambda i: (i, 0)),
                  pl.BlockSpec((K, Np), lambda i: (0, 0)),
                  pl.BlockSpec((1, Np), lambda i: (0, 0))],
        out_specs=pl.BlockSpec((tm, Np), lambda i: (i, 0)),
        compiler_params=_DIMSEM,
        cost_estimate=pl.CostEstimate(
            flops=2 * Mp * K * Np, transcendentals=0,
            bytes_accessed=4 * (Mp * K + K * Np + Np + Mp * Np)),
    )(a, w, b)
    return out if Mp == M else out[:M]


def _resblock_kernel(p_ref, skip_ref, w1_ref, b1_ref, w2_ref, b2_ref, o_ref):
    """Fused ResBlock: relu -> 3x3 conv+BN+relu -> 1x1 conv+BN -> + skip."""
    p = jnp.maximum(p_ref[...], 0.0)                      # pre-activation ReLU
    h = jnp.dot(p.astype(MXU_DTYPE), w1_ref[...].astype(MXU_DTYPE),
                preferred_element_type=jnp.float32) + b1_ref[...]
    h = jnp.maximum(h, 0.0)
    y = jnp.dot(h.astype(MXU_DTYPE), w2_ref[...].astype(MXU_DTYPE),
                preferred_element_type=jnp.float32) + b2_ref[...]
    o_ref[...] = (skip_ref[...] + y).astype(o_ref.dtype)


def resblock_gemm(col, skip, w1, b1, w2, b2):
    """col: (M, K1) im2col of x, skip: (M, Cp) rows of x -> (M, Cp) f32."""
    M, K1 = col.shape
    Cp = skip.shape[1]
    Mp, tm = _m_tiling(M)
    if Mp != M:
        col = jnp.pad(col, ((0, Mp - M), (0, 0)))
        skip = jnp.pad(skip, ((0, Mp - M), (0, 0)))
    out = pl.pallas_call(
        _resblock_kernel,
        out_shape=jax.ShapeDtypeStruct((Mp, Cp), jnp.float32),
        grid=(Mp // tm,),
        in_specs=[pl.BlockSpec((tm, K1), lambda i: (i, 0)),
                  pl.BlockSpec((tm, Cp), lambda i: (i, 0)),
                  pl.BlockSpec((K1, Cp), lambda i: (0, 0)),
                  pl.BlockSpec((1, Cp), lambda i: (0, 0)),
                  pl.BlockSpec((Cp, Cp), lambda i: (0, 0)),
                  pl.BlockSpec((1, Cp), lambda i: (0, 0))],
        out_specs=pl.BlockSpec((tm, Cp), lambda i: (i, 0)),
        compiler_params=_DIMSEM,
        cost_estimate=pl.CostEstimate(
            flops=2 * Mp * K1 * Cp + 2 * Mp * Cp * Cp, transcendentals=0,
            bytes_accessed=4 * (Mp * K1 + 2 * Mp * Cp + K1 * Cp + Cp * Cp)),
    )(col, skip, w1, b1, w2, b2)
    return out if Mp == M else out[:M]


# ------------------------------- conv glue ---------------------------------

def fold_bn(w, b, bn):
    """Fold eval-mode BatchNorm into conv weights/bias (w: (OC, C, KH, KW))."""
    scale = bn["gamma"] * jax.lax.rsqrt(bn["var"] + BN_EPS)
    return w * scale[:, None, None, None], (b - bn["mean"]) * scale + bn["beta"]


def pack_conv(w, b, bn=None, cin_pad=None, cout_pad=CPAD):
    """(OC, C, KH, KW) torch weight -> (KH*KW*cin_pad, cout_pad) GEMM matrix
    matching the NHWC im2col patch order (kh, kw, c-inner), plus (1, cout_pad)
    bias.  BN folded; padded rows/cols are zero."""
    if bn is not None:
        w, b = fold_bn(w, b, bn)
    OC, C, KH, KW = w.shape
    cin_pad = C if cin_pad is None else cin_pad
    wt = jnp.transpose(w, (2, 3, 1, 0))                       # (KH, KW, C, OC)
    wt = jnp.pad(wt, ((0, 0), (0, 0), (0, cin_pad - C), (0, cout_pad - OC)))
    wm = wt.reshape(KH * KW * cin_pad, cout_pad)
    bm = jnp.pad(b, (0, cout_pad - OC)).reshape(1, cout_pad)
    return wm, bm


def im2col_nhwc(x, kh, kw, stride, pad):
    """x: (N, H, W, C) -> ((N*OH*OW, KH*KW*C) patches, OH, OW); c innermost."""
    N, H, W, C = x.shape
    xp = jnp.pad(x, ((0, 0), (pad, pad), (pad, pad), (0, 0)))
    OH = (H + 2 * pad - kh) // stride + 1
    OW = (W + 2 * pad - kw) // stride + 1
    cols = []
    for i in range(kh):
        for j in range(kw):
            cols.append(xp[:, i:i + stride * OH:stride,
                           j:j + stride * OW:stride, :])
    col = jnp.concatenate(cols, axis=-1)                 # (N, OH, OW, KH*KW*C)
    return col.reshape(N * OH * OW, kh * kw * C), OH, OW


def conv_layer(x, cp, bn, kh, kw, stride, pad, act):
    """NHWC (channel-padded) conv: im2col + fused Pallas GEMM/bias/BN/act."""
    N = x.shape[0]
    w, b = pack_conv(cp["w"], cp["b"], bn, cin_pad=x.shape[-1])
    col, OH, OW = im2col_nhwc(x, kh, kw, stride, pad)
    out = conv_gemm(col, w, b, act)
    return out.reshape(N, OH, OW, CPAD)


# ----------------------------- model forward -------------------------------

def resblock_forward(x, rp):
    N, H, W, Cp = x.shape
    w1, b1 = pack_conv(rp["c1"]["w"], rp["c1"]["b"], rp["bn1"], cin_pad=Cp)
    w2, b2 = pack_conv(rp["c2"]["w"], rp["c2"]["b"], rp["bn2"], cin_pad=Cp)
    col, _, _ = im2col_nhwc(x, 3, 3, 1, 1)               # (M, 9*Cp)
    skip = x.reshape(-1, Cp)
    out = resblock_gemm(col, skip, w1, b1, w2, b2)
    return out.reshape(N, H, W, Cp)


def encoder_forward(x_nchw, p):
    """PyTorch Encoder.forward; input/output NCHW, NHWC+padded internally."""
    x = jnp.transpose(x_nchw, (0, 2, 3, 1))              # NHWC, real channels
    x = conv_layer(x, p["c1"], p["bn1"], 4, 4, 2, 1, "relu")
    x = conv_layer(x, p["c3"], p["bn3"], 4, 4, 2, 1, "relu")
    x = conv_layer(x, p["c4"], p["bn4"], 4, 4, 2, 1, "relu")
    x = resblock_forward(x, p["r1"])
    x = resblock_forward(x, p["r2"])
    x = conv_layer(x, p["c5"], None, 3, 3, 3, 0, "none")
    oc = p["c5"]["w"].shape[0]
    return jnp.transpose(x[..., :oc], (0, 3, 1, 2))      # back to NCHW


# ------------------------------ parameters ---------------------------------

def _conv_p(key, oc, ic, kh, kw, scale=0.05):
    kw_, kb_ = jax.random.split(key)
    return {"w": jax.random.normal(kw_, (oc, ic, kh, kw), jnp.float32) * scale,
            "b": jax.random.normal(kb_, (oc,), jnp.float32) * scale}


def _bn_p(dim):
    return {"gamma": jnp.ones((dim,), jnp.float32),
            "beta": jnp.zeros((dim,), jnp.float32),
            "mean": jnp.zeros((dim,), jnp.float32),
            "var": jnp.ones((dim,), jnp.float32)}


def _res_p(key, dim):
    k1, k2 = jax.random.split(key)
    return {"c1": _conv_p(k1, dim, dim, 3, 3), "c2": _conv_p(k2, dim, dim, 1, 1),
            "bn1": _bn_p(dim), "bn2": _bn_p(dim)}


def init_encoder_params(key, input_dim, emb_dim):
    ks = jax.random.split(key, 6)
    return {"c1": _conv_p(ks[0], emb_dim, input_dim, 4, 4),
            "c3": _conv_p(ks[1], emb_dim, emb_dim, 4, 4),
            "c4": _conv_p(ks[2], emb_dim, emb_dim, 4, 4),
            "c5": _conv_p(ks[3], emb_dim, emb_dim, 3, 3),
            "r1": _res_p(ks[4], emb_dim), "r2": _res_p(ks[5], emb_dim),
            "bn1": _bn_p(emb_dim), "bn3": _bn_p(emb_dim), "bn4": _bn_p(emb_dim)}


# ---------------------------------- main ------------------------------------

if __name__ == "__main__":
    # H, W must be multiples of 24 (Encoder downsamples /2/2/2 then /3).
    B, CIN, H, W = 2, 4, 48, 48
    EMB = 32

    key = jax.random.PRNGKey(0)
    k_x, k_p = jax.random.split(key)
    x = jax.random.normal(k_x, (B, CIN, H, W), jnp.float32)
    params = init_encoder_params(k_p, CIN, EMB)

    fwd = jax.jit(encoder_forward)
    out = fwd(x, params)
    jax.block_until_ready(out)

    assert out.shape == (B, EMB, H // 24, W // 24), out.shape
    assert out.dtype == jnp.float32
    print("KERNEL_OK")
</pallas_src>

<mosaic_0001>
module attributes {stable_mosaic.version = 11 : i64} {
  func.func @_conv_gemm_kernel(%arg0: i32, %arg1: memref<384x64xf32, #tpu.memory_space<vmem>>, %arg2: memref<64x128xf32, #tpu.memory_space<vmem>>, %arg3: memref<1x128xf32, #tpu.memory_space<vmem>>, %arg4: memref<384x128xf32, #tpu.memory_space<vmem>>) attributes {dimension_semantics = [#tpu.dimension_semantics<parallel>], iteration_bounds = array<i64: 3>, scalar_prefetch = 0 : i64, scratch_operands = 0 : i64, tpu.core_type = #tpu.core_type<tc>, window_params = [{transform_indices = @transform_0, window_bounds = array<i64: 384, 64>}, {pipeline_mode = #tpu.pipeline_mode<synchronous>, transform_indices = @transform_1, window_bounds = array<i64: 64, 128>}, {pipeline_mode = #tpu.pipeline_mode<synchronous>, transform_indices = @transform_2, window_bounds = array<i64: 1, 128>}, {transform_indices = @transform_3, window_bounds = array<i64: 384, 128>}]} {
    %c0 = arith.constant 0 : index
    %c0_0 = arith.constant 0 : index
    %0 = vector.load %arg1[%c0, %c0_0] : memref<384x64xf32, #tpu.memory_space<vmem>>, vector<384x64xf32>
    %1 = arith.truncf %0 : vector<384x64xf32> to vector<384x64xbf16>
    %c0_1 = arith.constant 0 : index
    %c0_2 = arith.constant 0 : index
    %2 = vector.load %arg2[%c0_1, %c0_2] : memref<64x128xf32, #tpu.memory_space<vmem>>, vector<64x128xf32>
    %3 = arith.truncf %2 : vector<64x128xf32> to vector<64x128xbf16>
    %cst = arith.constant dense<0.000000e+00> : vector<384x128xf32>
    %4 = tpu.matmul %1, %3, %cst {dimension_numbers = #tpu.dot_dimension_numbers<[1], [0], [0], [1], [0, 0, 1, 1], [], []>} : vector<384x64xbf16>, vector<64x128xbf16>, vector<384x128xf32> -> vector<384x128xf32>
    %c0_3 = arith.constant 0 : index
    %c0_4 = arith.constant 0 : index
    %5 = vector.load %arg3[%c0_3, %c0_4] : memref<1x128xf32, #tpu.memory_space<vmem>>, vector<1x128xf32>
    %6 = vector.broadcast %5 : vector<1x128xf32> to vector<384x128xf32>
    %7 = arith.addf %4, %6 : vector<384x128xf32>
    %cst_5 = arith.constant 0.000000e+00 : f32
    %8 = vector.broadcast %cst_5 : f32 to vector<384x128xf32>
    %9 = arith.maximumf %7, %8 : vector<384x128xf32>
    %c0_6 = arith.constant 0 : index
    %c0_7 = arith.constant 0 : index
    %10 = vector.load %arg4[%c0_6, %c0_7] : memref<384x128xf32, #tpu.memory_space<vmem>>, vector<384x128xf32>
    tpu.vector_store %arg4[%c0_6, %c0_7], %9 {strides = array<i32>} : memref<384x128xf32, #tpu.memory_space<vmem>>, vector<384x128xf32>,
    return
  }
  func.func @transform_0(%arg0: i32) -> (i32, i32) {
    %c0_i32 = arith.constant 0 : i32
    %c0_i32_0 = arith.constant 0 : i32
    return %arg0, %c0_i32 : i32, i32
  }
  func.func @transform_1(%arg0: i32) -> (i32, i32) {
    %c0_i32 = arith.constant 0 : i32
    %c0_i32_0 = arith.constant 0 : i32
    %c0_i32_1 = arith.constant 0 : i32
    return %c0_i32, %c0_i32_0 : i32, i32
  }
  func.func @transform_2(%arg0: i32) -> (i32, i32) {
    %c0_i32 = arith.constant 0 : i32
    %c0_i32_0 = arith.constant 0 : i32
    %c0_i32_1 = arith.constant 0 : i32
    return %c0_i32, %c0_i32_0 : i32, i32
  }
  func.func @transform_3(%arg0: i32) -> (i32, i32) {
    %c0_i32 = arith.constant 0 : i32
    %c0_i32_0 = arith.constant 0 : i32
    return %arg0, %c0_i32 : i32, i32
  }
}

module attributes {stable_mosaic.version = 11 : i64} {
  func.func @_conv_gemm_kernel(%arg0: i32, %arg1: memref<288x2048xf32, #tpu.memory_space<vmem>>, %arg2: memref<2048x128xf32, #tpu.memory_space<vmem>>, %arg3: memref<1x128xf32, #tpu.memory_space<vmem>>, %arg4: memref<288x128xf32, #tpu.memory_space<vmem>>) attributes {dimension_semantics = [#tpu.dimension_semantics<parallel>], iteration_bounds = array<i64: 1>, scalar_prefetch = 0 : i64, scratch_operands = 0 : i64, tpu.core_type = #tpu.core_type<tc>, window_params = [{transform_indices = @transform_0, window_bounds = array<i64: 288, 2048>}, {pipeline_mode = #tpu.pipeline_mode<synchronous>, transform_indices = @transform_1, window_bounds = array<i64: 2048, 128>}, {pipeline_mode = #tpu.pipeline_mode<synchronous>, transform_indices = @transform_2, window_bounds = array<i64: 1, 128>}, {transform_indices = @transform_3, window_bounds = array<i64: 288, 128>}]} {
    %c0 = arith.constant 0 : index
    %c0_0 = arith.constant 0 : index
    %0 = vector.load %arg1[%c0, %c0_0] : memref<288x2048xf32, #tpu.memory_space<vmem>>, vector<288x2048xf32>
    %1 = arith.truncf %0 : vector<288x2048xf32> to vector<288x2048xbf16>
    %c0_1 = arith.constant 0 : index
    %c0_2 = arith.constant 0 : index
    %2 = vector.load %arg2[%c0_1, %c0_2] : memref<2048x128xf32, #tpu.memory_space<vmem>>, vector<2048x128xf32>
    %3 = arith.truncf %2 : vector<2048x128xf32> to vector<2048x128xbf16>
    %cst = arith.constant dense<0.000000e+00> : vector<288x128xf32>
    %4 = tpu.matmul %1, %3, %cst {dimension_numbers = #tpu.dot_dimension_numbers<[1], [0], [0], [1], [0, 0, 1, 1], [], []>} : vector<288x2048xbf16>, vector<2048x128xbf16>, vector<288x128xf32> -> vector<288x128xf32>
    %c0_3 = arith.constant 0 : index
    %c0_4 = arith.constant 0 : index
    %5 = vector.load %arg3[%c0_3, %c0_4] : memref<1x128xf32, #tpu.memory_space<vmem>>, vector<1x128xf32>
    %6 = vector.broadcast %5 : vector<1x128xf32> to vector<288x128xf32>
    %7 = arith.addf %4, %6 : vector<288x128xf32>
    %cst_5 = arith.constant 0.000000e+00 : f32
    %8 = vector.broadcast %cst_5 : f32 to vector<288x128xf32>
    %9 = arith.maximumf %7, %8 : vector<288x128xf32>
    %c0_6 = arith.constant 0 : index
    %c0_7 = arith.constant 0 : index
    %10 = vector.load %arg4[%c0_6, %c0_7] : memref<288x128xf32, #tpu.memory_space<vmem>>, vector<288x128xf32>
    tpu.vector_store %arg4[%c0_6, %c0_7], %9 {strides = array<i32>} : memref<288x128xf32, #tpu.memory_space<vmem>>, vector<288x128xf32>,
    return
  }
  func.func @transform_0(%arg0: i32) -> (i32, i32) {
    %c0_i32 = arith.constant 0 : i32
    %c0_i32_0 = arith.constant 0 : i32
    return %arg0, %c0_i32 : i32, i32
  }
  func.func @transform_1(%arg0: i32) -> (i32, i32) {
    %c0_i32 = arith.constant 0 : i32
    %c0_i32_0 = arith.constant 0 : i32
    %c0_i32_1 = arith.constant 0 : i32
    return %c0_i32, %c0_i32_0 : i32, i32
  }
  func.func @transform_2(%arg0: i32) -> (i32, i32) {
    %c0_i32 = arith.constant 0 : i32
    %c0_i32_0 = arith.constant 0 : i32
    %c0_i32_1 = arith.constant 0 : i32
    return %c0_i32, %c0_i32_0 : i32, i32
  }
  func.func @transform_3(%arg0: i32) -> (i32, i32) {
    %c0_i32 = arith.constant 0 : i32
    %c0_i32_0 = arith.constant 0 : i32
    return %arg0, %c0_i32 : i32, i32
  }
}

module attributes {stable_mosaic.version = 11 : i64} {
  func.func @_conv_gemm_kernel(%arg0: i32, %arg1: memref<72x2048xf32, #tpu.memory_space<vmem>>, %arg2: memref<2048x128xf32, #tpu.memory_space<vmem>>, %arg3: memref<1x128xf32, #tpu.memory_space<vmem>>, %arg4: memref<72x128xf32, #tpu.memory_space<vmem>>) attributes {dimension_semantics = [#tpu.dimension_semantics<parallel>], iteration_bounds = array<i64: 1>, scalar_prefetch = 0 : i64, scratch_operands = 0 : i64, tpu.core_type = #tpu.core_type<tc>, window_params = [{transform_indices = @transform_0, window_bounds = array<i64: 72, 2048>}, {pipeline_mode = #tpu.pipeline_mode<synchronous>, transform_indices = @transform_1, window_bounds = array<i64: 2048, 128>}, {pipeline_mode = #tpu.pipeline_mode<synchronous>, transform_indices = @transform_2, window_bounds = array<i64: 1, 128>}, {transform_indices = @transform_3, window_bounds = array<i64: 72, 128>}]} {
    %c0 = arith.constant 0 : index
    %c0_0 = arith.constant 0 : index
    %0 = vector.load %arg1[%c0, %c0_0] : memref<72x2048xf32, #tpu.memory_space<vmem>>, vector<72x2048xf32>
    %1 = arith.truncf %0 : vector<72x2048xf32> to vector<72x2048xbf16>
    %c0_1 = arith.constant 0 : index
    %c0_2 = arith.constant 0 : index
    %2 = vector.load %arg2[%c0_1, %c0_2] : memref<2048x128xf32, #tpu.memory_space<vmem>>, vector<2048x128xf32>
    %3 = arith.truncf %2 : vector<2048x128xf32> to vector<2048x128xbf16>
    %cst = arith.constant dense<0.000000e+00> : vector<72x128xf32>
    %4 = tpu.matmul %1, %3, %cst {dimension_numbers = #tpu.dot_dimension_numbers<[1], [0], [0], [1], [0, 0, 1, 1], [], []>} : vector<72x2048xbf16>, vector<2048x128xbf16>, vector<72x128xf32> -> vector<72x128xf32>
    %c0_3 = arith.constant 0 : index
    %c0_4 = arith.constant 0 : index
    %5 = vector.load %arg3[%c0_3, %c0_4] : memref<1x128xf32, #tpu.memory_space<vmem>>, vector<1x128xf32>
    %6 = vector.broadcast %5 : vector<1x128xf32> to vector<72x128xf32>
    %7 = arith.addf %4, %6 : vector<72x128xf32>
    %cst_5 = arith.constant 0.000000e+00 : f32
    %8 = vector.broadcast %cst_5 : f32 to vector<72x128xf32>
    %9 = arith.maximumf %7, %8 : vector<72x128xf32>
    %c0_6 = arith.constant 0 : index
    %c0_7 = arith.constant 0 : index
    %10 = vector.load %arg4[%c0_6, %c0_7] : memref<72x128xf32, #tpu.memory_space<vmem>>, vector<72x128xf32>
    tpu.vector_store %arg4[%c0_6, %c0_7], %9 {strides = array<i32>} : memref<72x128xf32, #tpu.memory_space<vmem>>, vector<72x128xf32>,
    return
  }
  func.func @transform_0(%arg0: i32) -> (i32, i32) {
    %c0_i32 = arith.constant 0 : i32
    %c0_i32_0 = arith.constant 0 : i32
    return %arg0, %c0_i32 : i32, i32
  }
  func.func @transform_1(%arg0: i32) -> (i32, i32) {
    %c0_i32 = arith.constant 0 : i32
    %c0_i32_0 = arith.constant 0 : i32
    %c0_i32_1 = arith.constant 0 : i32
    return %c0_i32, %c0_i32_0 : i32, i32
  }
  func.func @transform_2(%arg0: i32) -> (i32, i32) {
    %c0_i32 = arith.constant 0 : i32
    %c0_i32_0 = arith.constant 0 : i32
    %c0_i32_1 = arith.constant 0 : i32
    return %c0_i32, %c0_i32_0 : i32, i32
  }
  func.func @transform_3(%arg0: i32) -> (i32, i32) {
    %c0_i32 = arith.constant 0 : i32
    %c0_i32_0 = arith.constant 0 : i32
    return %arg0, %c0_i32 : i32, i32
  }
}

module attributes {stable_mosaic.version = 11 : i64} {
  func.func @_resblock_kernel(%arg0: i32, %arg1: memref<72x1152xf32, #tpu.memory_space<vmem>>, %arg2: memref<72x128xf32, #tpu.memory_space<vmem>>, %arg3: memref<1152x128xf32, #tpu.memory_space<vmem>>, %arg4: memref<1x128xf32, #tpu.memory_space<vmem>>, %arg5: memref<128x128xf32, #tpu.memory_space<vmem>>, %arg6: memref<1x128xf32, #tpu.memory_space<vmem>>, %arg7: memref<72x128xf32, #tpu.memory_space<vmem>>) attributes {dimension_semantics = [#tpu.dimension_semantics<parallel>], iteration_bounds = array<i64: 1>, scalar_prefetch = 0 : i64, scratch_operands = 0 : i64, tpu.core_type = #tpu.core_type<tc>, window_params = [{transform_indices = @transform_0, window_bounds = array<i64: 72, 1152>}, {transform_indices = @transform_1, window_bounds = array<i64: 72, 128>}, {pipeline_mode = #tpu.pipeline_mode<synchronous>, transform_indices = @transform_2, window_bounds = array<i64: 1152, 128>}, {pipeline_mode = #tpu.pipeline_mode<synchronous>, transform_indices = @transform_3, window_bounds = array<i64: 1, 128>}, {pipeline_mode = #tpu.pipeline_mode<synchronous>, transform_indices = @transform_4, window_bounds = array<i64: 128, 128>}, {pipeline_mode = #tpu.pipeline_mode<synchronous>, transform_indices = @transform_5, window_bounds = array<i64: 1, 128>}, {transform_indices = @transform_6, window_bounds = array<i64: 72, 128>}]} {
    %c0 = arith.constant 0 : index
    %c0_0 = arith.constant 0 : index
    %0 = vector.load %arg1[%c0, %c0_0] : memref<72x1152xf32, #tpu.memory_space<vmem>>, vector<72x1152xf32>
    %cst = arith.constant 0.000000e+00 : f32
    %1 = vector.broadcast %cst : f32 to vector<72x1152xf32>
    %2 = arith.maximumf %0, %1 : vector<72x1152xf32>
    %3 = arith.truncf %2 : vector<72x1152xf32> to vector<72x1152xbf16>
    %c0_1 = arith.constant 0 : index
    %c0_2 = arith.constant 0 : index
    %4 = vector.load %arg3[%c0_1, %c0_2] : memref<1152x128xf32, #tpu.memory_space<vmem>>, vector<1152x128xf32>
    %5 = arith.truncf %4 : vector<1152x128xf32> to vector<1152x128xbf16>
    %cst_3 = arith.constant dense<0.000000e+00> : vector<72x128xf32>
    %6 = tpu.matmul %3, %5, %cst_3 {dimension_numbers = #tpu.dot_dimension_numbers<[1], [0], [0], [1], [0, 0, 1, 1], [], []>} : vector<72x1152xbf16>, vector<1152x128xbf16>, vector<72x128xf32> -> vector<72x128xf32>
    %c0_4 = arith.constant 0 : index
    %c0_5 = arith.constant 0 : index
    %7 = vector.load %arg4[%c0_4, %c0_5] : memref<1x128xf32, #tpu.memory_space<vmem>>, vector<1x128xf32>
    %8 = vector.broadcast %7 : vector<1x128xf32> to vector<72x128xf32>
    %9 = arith.addf %6, %8 : vector<72x128xf32>
    %cst_6 = arith.constant 0.000000e+00 : f32
    %10 = vector.broadcast %cst_6 : f32 to vector<72x128xf32>
    %11 = arith.maximumf %9, %10 : vector<72x128xf32>
    %12 = arith.truncf %11 : vector<72x128xf32> to vector<72x128xbf16>
    %c0_7 = arith.constant 0 : index
    %c0_8 = arith.constant 0 : index
    %13 = vector.load %arg5[%c0_7, %c0_8] : memref<128x128xf32, #tpu.memory_space<vmem>>, vector<128x128xf32>
    %14 = arith.truncf %13 : vector<128x128xf32> to vector<128x128xbf16>
    %cst_9 = arith.constant dense<0.000000e+00> : vector<72x128xf32>
    %15 = tpu.matmul %12, %14, %cst_9 {dimension_numbers = #tpu.dot_dimension_numbers<[1], [0], [0], [1], [0, 0, 1, 1], [], []>} : vector<72x128xbf16>, vector<128x128xbf16>, vector<72x128xf32> -> vector<72x128xf32>
    %c0_10 = arith.constant 0 : index
    %c0_11 = arith.constant 0 : index
    %16 = vector.load %arg6[%c0_10, %c0_11] : memref<1x128xf32, #tpu.memory_space<vmem>>, vector<1x128xf32>
    %17 = vector.broadcast %16 : vector<1x128xf32> to vector<72x128xf32>
    %18 = arith.addf %15, %17 : vector<72x128xf32>
    %c0_12 = arith.constant 0 : index
    %c0_13 = arith.constant 0 : index
    %19 = vector.load %arg2[%c0_12, %c0_13] : memref<72x128xf32, #tpu.memory_space<vmem>>, vector<72x128xf32>
    %20 = arith.addf %19, %18 : vector<72x128xf32>
    %c0_14 = arith.constant 0 : index
    %c0_15 = arith.constant 0 : index
    %21 = vector.load %arg7[%c0_14, %c0_15] : memref<72x128xf32, #tpu.memory_space<vmem>>, vector<72x128xf32>
    tpu.vector_store %arg7[%c0_14, %c0_15], %20 {strides = array<i32>} : memref<72x128xf32, #tpu.memory_space<vmem>>, vector<72x128xf32>,
    return
  }
  func.func @transform_0(%arg0: i32) -> (i32, i32) {
    %c0_i32 = arith.constant 0 : i32
    %c0_i32_0 = arith.constant 0 : i32
    return %arg0, %c0_i32 : i32, i32
  }
  func.func @transform_1(%arg0: i32) -> (i32, i32) {
    %c0_i32 = arith.constant 0 : i32
    %c0_i32_0 = arith.constant 0 : i32
    return %arg0, %c0_i32 : i32, i32
  }
  func.func @transform_2(%arg0: i32) -> (i32, i32) {
    %c0_i32 = arith.constant 0 : i32
    %c0_i32_0 = arith.constant 0 : i32
    %c0_i32_1 = arith.constant 0 : i32
    return %c0_i32, %c0_i32_0 : i32, i32
  }
  func.func @transform_3(%arg0: i32) -> (i32, i32) {
    %c0_i32 = arith.constant 0 : i32
    %c0_i32_0 = arith.constant 0 : i32
    %c0_i32_1 = arith.constant 0 : i32
    return %c0_i32, %c0_i32_0 : i32, i32
  }
  func.func @transform_4(%arg0: i32) -> (i32, i32) {
    %c0_i32 = arith.constant 0 : i32
    %c0_i32_0 = arith.constant 0 : i32
    %c0_i32_1 = arith.constant 0 : i32
    return %c0_i32, %c0_i32_0 : i32, i32
  }
  func.func @transform_5(%arg0: i32) -> (i32, i32) {
    %c0_i32 = arith.constant 0 : i32
    %c0_i32_0 = arith.constant 0 : i32
    %c0_i32_1 = arith.constant 0 : i32
    return %c0_i32, %c0_i32_0 : i32, i32
  }
  func.func @transform_6(%arg0: i32) -> (i32, i32) {
    %c0_i32 = arith.constant 0 : i32
    %c0_i32_0 = arith.constant 0 : i32
    return %arg0, %c0_i32 : i32, i32
  }
}

module attributes {stable_mosaic.version = 11 : i64} {
  func.func @_conv_gemm_kernel(%arg0: i32, %arg1: memref<8x1152xf32, #tpu.memory_space<vmem>>, %arg2: memref<1152x128xf32, #tpu.memory_space<vmem>>, %arg3: memref<1x128xf32, #tpu.memory_space<vmem>>, %arg4: memref<8x128xf32, #tpu.memory_space<vmem>>) attributes {dimension_semantics = [#tpu.dimension_semantics<parallel>], iteration_bounds = array<i64: 1>, scalar_prefetch = 0 : i64, scratch_operands = 0 : i64, tpu.core_type = #tpu.core_type<tc>, window_params = [{transform_indices = @transform_0, window_bounds = array<i64: 8, 1152>}, {pipeline_mode = #tpu.pipeline_mode<synchronous>, transform_indices = @transform_1, window_bounds = array<i64: 1152, 128>}, {pipeline_mode = #tpu.pipeline_mode<synchronous>, transform_indices = @transform_2, window_bounds = array<i64: 1, 128>}, {transform_indices = @transform_3, window_bounds = array<i64: 8, 128>}]} {
    %c0 = arith.constant 0 : index
    %c0_0 = arith.constant 0 : index
    %0 = vector.load %arg1[%c0, %c0_0] : memref<8x1152xf32, #tpu.memory_space<vmem>>, vector<8x1152xf32>
    %1 = arith.truncf %0 : vector<8x1152xf32> to vector<8x1152xbf16>
    %c0_1 = arith.constant 0 : index
    %c0_2 = arith.constant 0 : index
    %2 = vector.load %arg2[%c0_1, %c0_2] : memref<1152x128xf32, #tpu.memory_space<vmem>>, vector<1152x128xf32>
    %3 = arith.truncf %2 : vector<1152x128xf32> to vector<1152x128xbf16>
    %cst = arith.constant dense<0.000000e+00> : vector<8x128xf32>
    %4 = tpu.matmul %1, %3, %cst {dimension_numbers = #tpu.dot_dimension_numbers<[1], [0], [0], [1], [0, 0, 1, 1], [], []>} : vector<8x1152xbf16>, vector<1152x128xbf16>, vector<8x128xf32> -> vector<8x128xf32>
    %c0_3 = arith.constant 0 : index
    %c0_4 = arith.constant 0 : index
    %5 = vector.load %arg3[%c0_3, %c0_4] : memref<1x128xf32, #tpu.memory_space<vmem>>, vector<1x128xf32>
    %6 = vector.broadcast %5 : vector<1x128xf32> to vector<8x128xf32>
    %7 = arith.addf %4, %6 : vector<8x128xf32>
    %c0_5 = arith.constant 0 : index
    %c0_6 = arith.constant 0 : index
    %8 = vector.load %arg4[%c0_5, %c0_6] : memref<8x128xf32, #tpu.memory_space<vmem>>, vector<8x128xf32>
    tpu.vector_store %arg4[%c0_5, %c0_6], %7 {strides = array<i32>} : memref<8x128xf32, #tpu.memory_space<vmem>>, vector<8x128xf32>,
    return
  }
  func.func @transform_0(%arg0: i32) -> (i32, i32) {
    %c0_i32 = arith.constant 0 : i32
    %c0_i32_0 = arith.constant 0 : i32
    return %arg0, %c0_i32 : i32, i32
  }
  func.func @transform_1(%arg0: i32) -> (i32, i32) {
    %c0_i32 = arith.constant 0 : i32
    %c0_i32_0 = arith.constant 0 : i32
    %c0_i32_1 = arith.constant 0 : i32
    return %c0_i32, %c0_i32_0 : i32, i32
  }
  func.func @transform_2(%arg0: i32) -> (i32, i32) {
    %c0_i32 = arith.constant 0 : i32
    %c0_i32_0 = arith.constant 0 : i32
    %c0_i32_1 = arith.constant 0 : i32
    return %c0_i32, %c0_i32_0 : i32, i32
  }
  func.func @transform_3(%arg0: i32) -> (i32, i32) {
    %c0_i32 = arith.constant 0 : i32
    %c0_i32_0 = arith.constant 0 : i32
    return %arg0, %c0_i32 : i32, i32
  }
}

</mosaic_0001>

<bundles_post_ra>
// kernel: encoder_forward.6
= control target key start
LH: loop header
LB: loop body
LE: loop exit
PB: predicated region body
PF: predicated region fallthrough
CT: control target
= control target key end

     0   :  { %s699_s12 = smov 0   ;;  %s924_s0 = inlined_call_operand.vmem [shape: f32[1152,64], index: 0, kind: input, shape index: {}]   ;;  %s925_s1 = inlined_call_operand.vmem [shape: f32[64,128], index: 1, kind: input, shape index: {}]   ;;  %s926_s2 = inlined_call_operand.vmem [shape: f32[1,128], index: 2, kind: input, shape index: {}]   ;;  %s927_s3 = inlined_call_operand.vmem [shape: f32[1152,128], index: 3, kind: output, shape index: {}]  }
   0x1 LB: > { %s617_s13 = sadd.s32 4294967295, %s677_s12   ;;  %p621_p0 = scmp.ge.s32.totalorder %s677_s12, 1  ;;  %s677_s12 = sphi %s699_s12, %s13_s12  }
   0x2   : > { %p138_p1 = scmp.lt.s32.totalorder %s677_s12, 4 }
   0x4   : > { %p139_p2 = pnand %p621_p0, %p138_p1 }
   0x5   : > { %s162_s20 = smul.u32 (!%p139_p2), 48, %s617_s13 }
   0x6   : > { %142 = sbr.rel (%p139_p2) target bundleno = 256 (0x100), region = 32 }
   0x7   : > { %p163_p3 = scmp.lt.s32.totalorder (!%p139_p2), %s162_s20, 143 }
   0xb   : > { %v253_v0 = vld [vmem:[%s925_s1 + $0x30] sm:$0xff]  ;;  %v254_v1 = vld [vmem:[%s925_s1 + $0x38] sm:$0xff]  ;;  %v251_v2 = vld [vmem:[%s925_s1 + $0x20] sm:$0xff]  ;;  %s929_s20 = smov (!%p163_p3, %s162_s20), 143  ;;  %vm263_vm0 = vcmask 523264  }
   0xc   : > { %v258_v3 = vpack.c.bf16 %v254_v1, %v253_v0  ;;  %v252_v4 = vld [vmem:[%s925_s1 + $0x28] sm:$0xff]  ;;  %v249_v6 = vld [vmem:[%s925_s1 + $0x10] sm:$0xff]  ;;  %v250_v7 = vld [vmem:[%s925_s1 + $0x18] sm:$0xff]  ;;  %s622_s27 = sshll.u32 %s929_s20, 3 }
   0xd   : > { %v257_v5 = vpack.c.bf16 %v252_v4, %v251_v2  ;;  %v256_v8 = vpack.c.bf16 %v250_v7, %v249_v6  ;;  %s733_s30 = scalar_lea.vmem %s924_s0, %s622_s27  ;;  %v247_v9 = vld [vmem:[%s925_s1] sm:$0xff]  ;;  %v248_v10 = vld [vmem:[%s925_s1 + $0x8] sm:$0xff]  ;;  %s825_s13 = scalar_lea.vmem %s927_s3, %s622_s27 }
   0xe   : > { %340 = vmatpush.bf16.msra.mxu0 %v258_v3  ;;  %650 = vmatpush.bf16.msra.mxu1 %v258_v3  ;;  %v175_v11 = vld [vmem:[%s733_s30] sm:$0xff]  ;;  %v176_v12 = vld [vmem:[%s733_s30 + $0x8] sm:$0xff]  ;;  %v255_v13 = vpack.c.bf16 %v248_v10, %v247_v9  ;;  %v177_v24 = vld [vmem:[%s733_s30 + $0x10] sm:$0xff] }
   0xf   : > { %651 = vmatpush.bf16.msra.mxu2 %v258_v3  ;;  %652 = vmatpush.bf16.msra.mxu3 %v258_v3  ;;  %v187_v14 = vld [vmem:[%s733_s30 + $0x60] sm:$0xff]  ;;  %v188_v15 = vld [vmem:[%s733_s30 + $0x68] sm:$0xff]  ;;  %v223_v20 = vpack.c.bf16 %v176_v12, %v175_v11  ;;  %v178_v25 = vld [vmem:[%s733_s30 + $0x18] sm:$0xff] }
  0x10   : > { %v199_v16 = vld [vmem:[%s733_s30 + $0xc0] sm:$0xff]  ;;  %v200_v17 = vld [vmem:[%s733_s30 + $0xc8] sm:$0xff]  ;;  %v229_v21 = vpack.c.bf16 %v188_v15, %v187_v14  ;;  %v189_v26 = vld [vmem:[%s733_s30 + $0x70] sm:$0xff]  ;;  %v224_v32 = vpack.c.bf16 %v178_v25, %v177_v24 }
  0x11   : > { %v211_v18 = vld [vmem:[%s733_s30 + $0x120] sm:$0xff]  ;;  %v212_v19 = vld [vmem:[%s733_s30 + $0x128] sm:$0xff]  ;;  %v235_v22 = vpack.c.bf16 %v200_v17, %v199_v16  ;;  %v190_v27 = vld [vmem:[%s733_s30 + $0x78] sm:$0xff] }
  0x12   : > { %341 = vmatpush.bf16.msra.mxu0 %v257_v5  ;;  %653 = vmatpush.bf16.msra.mxu1 %v257_v5  ;;  %v241_v23 = vpack.c.bf16 %v212_v19, %v211_v18  ;;  %v201_v28 = vld [vmem:[%s733_s30 + $0xd0] sm:$0xff]  ;;  %v202_v29 = vld [vmem:[%s733_s30 + $0xd8] sm:$0xff]  ;;  %v230_v33 = vpack.c.bf16 %v190_v27, %v189_v26  ;;  %v179_v36 = vld [vmem:[%s733_s30 + $0x20] sm:$0xff] }
  0x13   : > { %654 = vmatpush.bf16.msra.mxu2 %v257_v5  ;;  %655 = vmatpush.bf16.msra.mxu3 %v257_v5  ;;  %v213_v30 = vld [vmem:[%s733_s30 + $0x130] sm:$0xff]  ;;  %v214_v31 = vld [vmem:[%s733_s30 + $0x138] sm:$0xff]  ;;  %v236_v34 = vpack.c.bf16 %v202_v29, %v201_v28  ;;  %v180_v37 = vld [vmem:[%s733_s30 + $0x28] sm:$0xff] }
  0x14   : > { %v242_v35 = vpack.c.bf16 %v214_v31, %v213_v30  ;;  %v191_v38 = vld [vmem:[%s733_s30 + $0x80] sm:$0xff]  ;;  %v192_v39 = vld [vmem:[%s733_s30 + $0x88] sm:$0xff]  ;;  %v225_v44 = vpack.c.bf16 %v180_v37, %v179_v36  ;;  %v181_v48 = vld [vmem:[%s733_s30 + $0x30] sm:$0xff] }
  0x15   : > { %v203_v40 = vld [vmem:[%s733_s30 + $0xe0] sm:$0xff]  ;;  %v204_v41 = vld [vmem:[%s733_s30 + $0xe8] sm:$0xff]  ;;  %v231_v45 = vpack.c.bf16 %v192_v39, %v191_v38  ;;  %v182_v49 = vld [vmem:[%s733_s30 + $0x38] sm:$0xff] }
  0x16   : > { %342 = vmatpush.bf16.msra.mxu0 %v256_v8  ;;  %656 = vmatpush.bf16.msra.mxu1 %v256_v8  ;;  %v215_v42 = vld [vmem:[%s733_s30 + $0x140] sm:$0xff]  ;;  %v216_v43 = vld [vmem:[%s733_s30 + $0x148] sm:$0xff]  ;;  %v237_v46 = vpack.c.bf16 %v204_v41, %v203_v40  ;;  %v193_v50 = vld [vmem:[%s733_s30 + $0x90] sm:$0xff]  ;;  %v226_v56 = vpack.c.bf16 %v182_v49, %v181_v48 }
  0x17   : > { %657 = vmatpush.bf16.msra.mxu2 %v256_v8  ;;  %658 = vmatpush.bf16.msra.mxu3 %v256_v8  ;;  %v243_v47 = vpack.c.bf16 %v216_v43, %v215_v42  ;;  %v194_v51 = vld [vmem:[%s733_s30 + $0x98] sm:$0xff]  ;;  %v205_v52 = vld [vmem:[%s733_s30 + $0xf0] sm:$0xff]  ;;  %v183_v60 = vld [vmem:[%s733_s30 + $0x40] sm:$0xff] }
  0x18   : > { %v206_v53 = vld [vmem:[%s733_s30 + $0xf8] sm:$0xff]  ;;  %v217_v54 = vld [vmem:[%s733_s30 + $0x150] sm:$0xff]  ;;  %v232_v57 = vpack.c.bf16 %v194_v51, %v193_v50  ;;  %v184_v61 = vld [vmem:[%s733_s30 + $0x48] sm:$0xff] }
  0x19   : > { %v218_v55 = vld [vmem:[%s733_s30 + $0x158] sm:$0xff]  ;;  %v238_v58 = vpack.c.bf16 %v206_v53, %v205_v52  ;;  %v195_v62 = vld [vmem:[%s733_s30 + $0xa0] sm:$0xff]  ;;  %v196_v63 = vld [vmem:[%s733_s30 + $0xa8] sm:$0xff]  ;;  %v227_v4 = vpack.c.bf16 %v184_v61, %v183_v60 }
  0x1a   : > { %343 = vmatpush.bf16.msra.mxu0 %v255_v13  ;;  %659 = vmatpush.bf16.msra.mxu1 %v255_v13  ;;  %v244_v59 = vpack.c.bf16 %v218_v55, %v217_v54  ;;  %v207_v0 = vld [vmem:[%s733_s30 + $0x100] sm:$0xff]  ;;  %v208_v1 = vld [vmem:[%s733_s30 + $0x108] sm:$0xff]  ;;  %v233_v5 = vpack.c.bf16 %v196_v63, %v195_v62  ;;  %v185_v8 = vld [vmem:[%s733_s30 + $0x50] sm:$0xff] }
  0x1b   : > { %660 = vmatpush.bf16.msra.mxu2 %v255_v13  ;;  %661 = vmatpush.bf16.msra.mxu3 %v255_v13  ;;  %v219_v2 = vld [vmem:[%s733_s30 + $0x160] sm:$0xff]  ;;  %v220_v3 = vld [vmem:[%s733_s30 + $0x168] sm:$0xff]  ;;  %v239_v6 = vpack.c.bf16 %v208_v1, %v207_v0  ;;  %v186_v9 = vld [vmem:[%s733_s30 + $0x58] sm:$0xff] }
  0x1c   : > { %v245_v7 = vpack.c.bf16 %v220_v3, %v219_v2  ;;  %v197_v10 = vld [vmem:[%s733_s30 + $0xb0] sm:$0xff]  ;;  %v198_v11 = vld [vmem:[%s733_s30 + $0xb8] sm:$0xff]  ;;  %v228_v16 = vpack.c.bf16 %v186_v9, %v185_v8 }
  0x1d   : > { %624 = vmatmul.msk.bf16.vlgmr.msra.gmra.mxu0 %vm263_vm0, %v223_v20  ;;  %630 = vmatmul.msk.bf16.vlgmr.msra.gmra.mxu1 %vm263_vm0, %v229_v21  ;;  %v209_v12 = vld [vmem:[%s733_s30 + $0x110] sm:$0xff]  ;;  %v210_v13 = vld [vmem:[%s733_s30 + $0x118] sm:$0xff]  ;;  %v234_v17 = vpack.c.bf16 %v198_v11, %v197_v10  ;;  %v816_v20 = vld [vmem:[%s926_s2] ss:$0 sm:$0xff] }
  0x1e   : > { %636 = vmatmul.msk.bf16.vlgmr.msra.gmra.mxu2 %vm263_vm0, %v235_v22  ;;  %642 = vmatmul.msk.bf16.vlgmr.msra.gmra.mxu3 %vm263_vm0, %v241_v23  ;;  %v221_v14 = vld [vmem:[%s733_s30 + $0x170] sm:$0xff]  ;;  %v222_v15 = vld [vmem:[%s733_s30 + $0x178] sm:$0xff]  ;;  %v240_v18 = vpack.c.bf16 %v210_v13, %v209_v12 }
  0x1f   : > { %v246_v19 = vpack.c.bf16 %v222_v15, %v221_v14 }
  0x2d   : > { %625 = vmatmul.msk.bf16.gmra.mxu0 %vm263_vm0, %v224_v32  ;;  %631 = vmatmul.msk.bf16.gmra.mxu1 %vm263_vm0, %v230_v33 }
  0x2e   : > { %637 = vmatmul.msk.bf16.gmra.mxu2 %vm263_vm0, %v236_v34  ;;  %643 = vmatmul.msk.bf16.gmra.mxu3 %vm263_vm0, %v242_v35 }
  0x3d   : > { %626 = vmatmul.msk.bf16.gmra.mxu0 %vm263_vm0, %v225_v44  ;;  %632 = vmatmul.msk.bf16.gmra.mxu1 %vm263_vm0, %v231_v45 }
  0x3e   : > { %638 = vmatmul.msk.bf16.gmra.mxu2 %vm263_vm0, %v237_v46  ;;  %644 = vmatmul.msk.bf16.gmra.mxu3 %vm263_vm0, %v243_v47 }
  0x4d   : > { %627 = vmatmul.msk.bf16.gmra.mxu0 %vm263_vm0, %v226_v56  ;;  %633 = vmatmul.msk.bf16.gmra.mxu1 %vm263_vm0, %v232_v57 }
  0x4e   : > { %639 = vmatmul.msk.bf16.gmra.mxu2 %vm263_vm0, %v238_v58  ;;  %645 = vmatmul.msk.bf16.gmra.mxu3 %vm263_vm0, %v244_v59 }
  0x5d   : > { %628 = vmatmul.msk.bf16.gmra.mxu0 %vm263_vm0, %v227_v4  ;;  %634 = vmatmul.msk.bf16.gmra.mxu1 %vm263_vm0, %v233_v5 }
  0x5e   : > { %640 = vmatmul.msk.bf16.gmra.mxu2 %vm263_vm0, %v239_v6  ;;  %646 = vmatmul.msk.bf16.gmra.mxu3 %vm263_vm0, %v245_v7 }
  0x6d   : > { %629 = vmatmul.msk.bf16.gmra.mxu0 %vm263_vm0, %v228_v16  ;;  %635 = vmatmul.msk.bf16.gmra.mxu1 %vm263_vm0, %v234_v17 }
  0x6e   : > { %641 = vmatmul.msk.bf16.gmra.mxu2 %vm263_vm0, %v240_v18  ;;  %647 = vmatmul.msk.bf16.gmra.mxu3 %vm263_vm0, %v246_v19 }
  0x9a   : > { %v345_v21 = vpop.f32.mrf.mxu0  ;;  %v375_v22 = vpop.f32.mrf.mxu1 }
  0x9b   : > { %v346_v23 = vadd.f32 %v816_v20, %v345_v21  ;;  %v376_v24 = vadd.f32 %v816_v20, %v375_v22 }
  0x9d   : > { %v465_v25 = vmax.f32 %v346_v23, 0.0  ;;  %v477_v26 = vmax.f32 %v376_v24, 0.0 }
  0x9f   : > { %513 = vst [vmem:[%s825_s13] sm:$0xff] %v465_v25 }
  0xa0   : > { %525 = vst [vmem:[%s825_s13 + $0x60] sm:$0xff] %v477_v26 }
  0xa1   : > { %v405_v27 = vpop.f32.mrf.mxu2  ;;  %v435_v28 = vpop.f32.mrf.mxu3 }
  0xa2   : > { %v406_v29 = vadd.f32 %v816_v20, %v405_v27  ;;  %v436_v30 = vadd.f32 %v816_v20, %v435_v28  ;;  %v347_v31 = vpop.f32.mrf.mxu0  ;;  %v377_v32 = vpop.f32.mrf.mxu1 }
  0xa3   : > { %v348_v33 = vadd.f32 %v816_v20, %v347_v31  ;;  %v378_v34 = vadd.f32 %v816_v20, %v377_v32 }
  0xa4   : > { %v489_v35 = vmax.f32 %v406_v29, 0.0  ;;  %v501_v36 = vmax.f32 %v436_v30, 0.0 }
  0xa5   : > { %v466_v37 = vmax.f32 %v348_v33, 0.0  ;;  %v478_v38 = vmax.f32 %v378_v34, 0.0 }
  0xa6   : > { %537 = vst [vmem:[%s825_s13 + $0xc0] sm:$0xff] %v489_v35 }
  0xa7   : > { %549 = vst [vmem:[%s825_s13 + $0x120] sm:$0xff] %v501_v36 }
  0xa8   : > { %514 = vst [vmem:[%s825_s13 + $0x8] sm:$0xff] %v466_v37 }
  0xa9   : > { %526 = vst [vmem:[%s825_s13 + $0x68] sm:$0xff] %v478_v38  ;;  %v407_v39 = vpop.f32.mrf.mxu2  ;;  %v437_v40 = vpop.f32.mrf.mxu3 }
  0xaa   : > { %v408_v41 = vadd.f32 %v816_v20, %v407_v39  ;;  %v438_v42 = vadd.f32 %v816_v20, %v437_v40  ;;  %v350_v43 = vpop.f32.mrf.mxu0  ;;  %v380_v44 = vpop.f32.mrf.mxu1 }
  0xab   : > { %v351_v45 = vadd.f32 %v816_v20, %v350_v43  ;;  %v381_v46 = vadd.f32 %v816_v20, %v380_v44 }
  0xac   : > { %v490_v47 = vmax.f32 %v408_v41, 0.0  ;;  %v502_v48 = vmax.f32 %v438_v42, 0.0 }
  0xad   : > { %v467_v49 = vmax.f32 %v351_v45, 0.0  ;;  %v479_v50 = vmax.f32 %v381_v46, 0.0 }
  0xae   : > { %538 = vst [vmem:[%s825_s13 + $0xc8] sm:$0xff] %v490_v47 }
  0xaf   : > { %550 = vst [vmem:[%s825_s13 + $0x128] sm:$0xff] %v502_v48 }
  0xb0   : > { %515 = vst [vmem:[%s825_s13 + $0x10] sm:$0xff] %v467_v49 }
  0xb1   : > { %527 = vst [vmem:[%s825_s13 + $0x70] sm:$0xff] %v479_v50  ;;  %v410_v51 = vpop.f32.mrf.mxu2  ;;  %v440_v52 = vpop.f32.mrf.mxu3 }
  0xb2   : > { %v411_v53 = vadd.f32 %v816_v20, %v410_v51  ;;  %v441_v54 = vadd.f32 %v816_v20, %v440_v52  ;;  %v352_v55 = vpop.f32.mrf.mxu0  ;;  %v382_v56 = vpop.f32.mrf.mxu1 }
  0xb3   : > { %v353_v57 = vadd.f32 %v816_v20, %v352_v55  ;;  %v383_v58 = vadd.f32 %v816_v20, %v382_v56 }
  0xb4   : > { %v491_v59 = vmax.f32 %v411_v53, 0.0  ;;  %v503_v60 = vmax.f32 %v441_v54, 0.0 }
  0xb5   : > { %v468_v61 = vmax.f32 %v353_v57, 0.0  ;;  %v480_v62 = vmax.f32 %v383_v58, 0.0 }
  0xb6   : > { %539 = vst [vmem:[%s825_s13 + $0xd0] sm:$0xff] %v491_v59 }
  0xb7   : > { %551 = vst [vmem:[%s825_s13 + $0x130] sm:$0xff] %v503_v60 }
  0xb8   : > { %516 = vst [vmem:[%s825_s13 + $0x18] sm:$0xff] %v468_v61 }
  0xb9   : > { %528 = vst [vmem:[%s825_s13 + $0x78] sm:$0xff] %v480_v62  ;;  %v412_v63 = vpop.f32.mrf.mxu2  ;;  %v442_v0 = vpop.f32.mrf.mxu3 }
  0xba   : > { %v413_v1 = vadd.f32 %v816_v20, %v412_v63  ;;  %v443_v2 = vadd.f32 %v816_v20, %v442_v0  ;;  %v355_v3 = vpop.f32.mrf.mxu0  ;;  %v385_v4 = vpop.f32.mrf.mxu1 }
  0xbb   : > { %v356_v5 = vadd.f32 %v816_v20, %v355_v3  ;;  %v386_v6 = vadd.f32 %v816_v20, %v385_v4 }
  0xbc   : > { %v492_v7 = vmax.f32 %v413_v1, 0.0  ;;  %v504_v8 = vmax.f32 %v443_v2, 0.0 }
  0xbd   : > { %v469_v9 = vmax.f32 %v356_v5, 0.0  ;;  %v481_v10 = vmax.f32 %v386_v6, 0.0 }
  0xbe   : > { %540 = vst [vmem:[%s825_s13 + $0xd8] sm:$0xff] %v492_v7 }
  0xbf   : > { %552 = vst [vmem:[%s825_s13 + $0x138] sm:$0xff] %v504_v8 }
  0xc0   : > { %517 = vst [vmem:[%s825_s13 + $0x20] sm:$0xff] %v469_v9 }
  0xc1   : > { %529 = vst [vmem:[%s825_s13 + $0x80] sm:$0xff] %v481_v10  ;;  %v415_v11 = vpop.f32.mrf.mxu2  ;;  %v445_v12 = vpop.f32.mrf.mxu3 }
  0xc2   : > { %v416_v13 = vadd.f32 %v816_v20, %v415_v11  ;;  %v446_v14 = vadd.f32 %v816_v20, %v445_v12  ;;  %v357_v15 = vpop.f32.mrf.mxu0  ;;  %v387_v16 = vpop.f32.mrf.mxu1 }
  0xc3   : > { %v358_v17 = vadd.f32 %v816_v20, %v357_v15  ;;  %v388_v18 = vadd.f32 %v816_v20, %v387_v16 }
  0xc4   : > { %v493_v19 = vmax.f32 %v416_v13, 0.0  ;;  %v505_v21 = vmax.f32 %v446_v14, 0.0 }
  0xc5   : > { %v470_v22 = vmax.f32 %v358_v17, 0.0  ;;  %v482_v23 = vmax.f32 %v388_v18, 0.0 }
  0xc6   : > { %541 = vst [vmem:[%s825_s13 + $0xe0] sm:$0xff] %v493_v19 }
  0xc7   : > { %553 = vst [vmem:[%s825_s13 + $0x140] sm:$0xff] %v505_v21 }
  0xc8   : > { %518 = vst [vmem:[%s825_s13 + $0x28] sm:$0xff] %v470_v22 }
  0xc9   : > { %530 = vst [vmem:[%s825_s13 + $0x88] sm:$0xff] %v482_v23  ;;  %v417_v24 = vpop.f32.mrf.mxu2  ;;  %v447_v25 = vpop.f32.mrf.mxu3 }
  0xca   : > { %v418_v26 = vadd.f32 %v816_v20, %v417_v24  ;;  %v448_v27 = vadd.f32 %v816_v20, %v447_v25  ;;  %v360_v28 = vpop.f32.mrf.mxu0  ;;  %v390_v29 = vpop.f32.mrf.mxu1 }
  0xcb   : > { %v361_v30 = vadd.f32 %v816_v20, %v360_v28  ;;  %v391_v31 = vadd.f32 %v816_v20, %v390_v29 }
  0xcc   : > { %v494_v32 = vmax.f32 %v418_v26, 0.0  ;;  %v506_v33 = vmax.f32 %v448_v27, 0.0 }
  0xcd   : > { %v471_v34 = vmax.f32 %v361_v30, 0.0  ;;  %v483_v35 = vmax.f32 %v391_v31, 0.0 }
  0xce   : > { %542 = vst [vmem:[%s825_s13 + $0xe8] sm:$0xff] %v494_v32 }
  0xcf   : > { %554 = vst [vmem:[%s825_s13 + $0x148] sm:$0xff] %v506_v33 }
  0xd0   : > { %519 = vst [vmem:[%s825_s13 + $0x30] sm:$0xff] %v471_v34 }
  0xd1   : > { %531 = vst [vmem:[%s825_s13 + $0x90] sm:$0xff] %v483_v35  ;;  %v420_v36 = vpop.f32.mrf.mxu2  ;;  %v450_v37 = vpop.f32.mrf.mxu3 }
  0xd2   : > { %v421_v38 = vadd.f32 %v816_v20, %v420_v36  ;;  %v451_v39 = vadd.f32 %v816_v20, %v450_v37  ;;  %v362_v40 = vpop.f32.mrf.mxu0  ;;  %v392_v41 = vpop.f32.mrf.mxu1 }
  0xd3   : > { %v363_v42 = vadd.f32 %v816_v20, %v362_v40  ;;  %v393_v43 = vadd.f32 %v816_v20, %v392_v41 }
  0xd4   : > { %v495_v44 = vmax.f32 %v421_v38, 0.0  ;;  %v507_v45 = vmax.f32 %v451_v39, 0.0 }
  0xd5   : > { %v472_v46 = vmax.f32 %v363_v42, 0.0  ;;  %v484_v47 = vmax.f32 %v393_v43, 0.0 }
  0xd6   : > { %543 = vst [vmem:[%s825_s13 + $0xf0] sm:$0xff] %v495_v44 }
  0xd7   : > { %555 = vst [vmem:[%s825_s13 + $0x150] sm:$0xff] %v507_v45 }
  0xd8   : > { %520 = vst [vmem:[%s825_s13 + $0x38] sm:$0xff] %v472_v46 }
  0xd9   : > { %532 = vst [vmem:[%s825_s13 + $0x98] sm:$0xff] %v484_v47  ;;  %v422_v48 = vpop.f32.mrf.mxu2  ;;  %v452_v49 = vpop.f32.mrf.mxu3 }
  0xda   : > { %v423_v50 = vadd.f32 %v816_v20, %v422_v48  ;;  %v453_v51 = vadd.f32 %v816_v20, %v452_v49  ;;  %v365_v52 = vpop.f32.mrf.mxu0  ;;  %v395_v53 = vpop.f32.mrf.mxu1 }
  0xdb   : > { %v366_v54 = vadd.f32 %v816_v20, %v365_v52  ;;  %v396_v55 = vadd.f32 %v816_v20, %v395_v53 }
  0xdc   : > { %v496_v56 = vmax.f32 %v423_v50, 0.0  ;;  %v508_v57 = vmax.f32 %v453_v51, 0.0 }
  0xdd   : > { %v473_v58 = vmax.f32 %v366_v54, 0.0  ;;  %v485_v59 = vmax.f32 %v396_v55, 0.0 }
  0xde   : > { %544 = vst [vmem:[%s825_s13 + $0xf8] sm:$0xff] %v496_v56 }
  0xdf   : > { %556 = vst [vmem:[%s825_s13 + $0x158] sm:$0xff] %v508_v57 }
  0xe0   : > { %521 = vst [vmem:[%s825_s13 + $0x40] sm:$0xff] %v473_v58 }
  0xe1   : > { %533 = vst [vmem:[%s825_s13 + $0xa0] sm:$0xff] %v485_v59  ;;  %v425_v60 = vpop.f32.mrf.mxu2  ;;  %v455_v61 = vpop.f32.mrf.mxu3 }
  0xe2   : > { %v426_v62 = vadd.f32 %v816_v20, %v425_v60  ;;  %v456_v63 = vadd.f32 %v816_v20, %v455_v61  ;;  %v367_v0 = vpop.f32.mrf.mxu0  ;;  %v397_v1 = vpop.f32.mrf.mxu1 }
  0xe3   : > { %v368_v2 = vadd.f32 %v816_v20, %v367_v0  ;;  %v398_v3 = vadd.f32 %v816_v20, %v397_v1 }
  0xe4   : > { %v497_v4 = vmax.f32 %v426_v62, 0.0  ;;  %v509_v5 = vmax.f32 %v456_v63, 0.0 }
  0xe5   : > { %v474_v6 = vmax.f32 %v368_v2, 0.0  ;;  %v486_v7 = vmax.f32 %v398_v3, 0.0 }
  0xe6   : > { %545 = vst [vmem:[%s825_s13 + $0x100] sm:$0xff] %v497_v4 }
  0xe7   : > { %557 = vst [vmem:[%s825_s13 + $0x160] sm:$0xff] %v509_v5 }
  0xe8   : > { %522 = vst [vmem:[%s825_s13 + $0x48] sm:$0xff] %v474_v6 }
  0xe9   : > { %534 = vst [vmem:[%s825_s13 + $0xa8] sm:$0xff] %v486_v7  ;;  %v427_v8 = vpop.f32.mrf.mxu2  ;;  %v457_v9 = vpop.f32.mrf.mxu3 }
  0xea   : > { %v428_v10 = vadd.f32 %v816_v20, %v427_v8  ;;  %v458_v11 = vadd.f32 %v816_v20, %v457_v9  ;;  %v370_v12 = vpop.f32.mrf.mxu0  ;;  %v400_v13 = vpop.f32.mrf.mxu1 }
  0xeb   : > { %v371_v14 = vadd.f32 %v816_v20, %v370_v12  ;;  %v401_v15 = vadd.f32 %v816_v20, %v400_v13 }
  0xec   : > { %v498_v16 = vmax.f32 %v428_v10, 0.0  ;;  %v510_v17 = vmax.f32 %v458_v11, 0.0 }
  0xed   : > { %v475_v18 = vmax.f32 %v371_v14, 0.0  ;;  %v487_v19 = vmax.f32 %v401_v15, 0.0 }
  0xee   : > { %546 = vst [vmem:[%s825_s13 + $0x108] sm:$0xff] %v498_v16 }
  0xef   : > { %558 = vst [vmem:[%s825_s13 + $0x168] sm:$0xff] %v510_v17 }
  0xf0   : > { %523 = vst [vmem:[%s825_s13 + $0x50] sm:$0xff] %v475_v18 }
  0xf1   : > { %535 = vst [vmem:[%s825_s13 + $0xb0] sm:$0xff] %v487_v19  ;;  %v430_v21 = vpop.f32.mrf.mxu2  ;;  %v460_v22 = vpop.f32.mrf.mxu3 }
  0xf2   : > { %v431_v23 = vadd.f32 %v816_v20, %v430_v21  ;;  %v461_v24 = vadd.f32 %v816_v20, %v460_v22  ;;  %v372_v25 = vpop.f32.mrf.mxu0  ;;  %v402_v26 = vpop.f32.mrf.mxu1 }
  0xf3   : > { %v373_v27 = vadd.f32 %v816_v20, %v372_v25  ;;  %v403_v28 = vadd.f32 %v816_v20, %v402_v26 }
  0xf4   : > { %v499_v29 = vmax.f32 %v431_v23, 0.0  ;;  %v511_v30 = vmax.f32 %v461_v24, 0.0 }
  0xf5   : > { %v476_v31 = vmax.f32 %v373_v27, 0.0  ;;  %v488_v32 = vmax.f32 %v403_v28, 0.0 }
  0xf6   : > { %547 = vst [vmem:[%s825_s13 + $0x110] sm:$0xff] %v499_v29 }
  0xf7   : > { %559 = vst [vmem:[%s825_s13 + $0x170] sm:$0xff] %v511_v30 }
  0xf8   : > { %524 = vst [vmem:[%s825_s13 + $0x58] sm:$0xff] %v476_v31 }
  0xf9   : > { %536 = vst [vmem:[%s825_s13 + $0xb8] sm:$0xff] %v488_v32  ;;  %v432_v33 = vpop.f32.mrf.mxu2  ;;  %v462_v34 = vpop.f32.mrf.mxu3 }
  0xfa   : > { %v433_v35 = vadd.f32 %v816_v20, %v432_v33  ;;  %v463_v36 = vadd.f32 %v816_v20, %v462_v34 }
  0xfc   : > { %v500_v37 = vmax.f32 %v433_v35, 0.0  ;;  %v512_v38 = vmax.f32 %v463_v36, 0.0 }
  0xfe   : > { %548 = vst [vmem:[%s825_s13 + $0x118] sm:$0xff] %v500_v37 }
  0xff   : > { %560 = vst [vmem:[%s825_s13 + $0x178] sm:$0xff] %v512_v38 }
 0x100 PF: > { %s13_s12 = sadd.s32 1, %s677_s12  }
 0x101   : > { %p10_p4 = scmp.ge.s32.totalorder %s13_s12, 5  }
 0x103   :  { %12 = sbr.rel (!%p10_p4) target bundleno = 1 (0x1), region = 62 }

// kernel: encoder_forward.7
= control target key start
LH: loop header
LB: loop body
LE: loop exit
PB: predicated region body
PF: predicated region fallthrough
CT: control target
= control target key end

     0   :  { %s5922_s1 = inlined_call_operand.vmem [shape: f32[2048,128], index: 1, kind: input, shape index: {}]   ;;  %s5923_s0 = inlined_call_operand.vmem [shape: f32[288,2048], index: 0, kind: input, shape index: {}]   ;;  %s5924_s2 = inlined_call_operand.vmem [shape: f32[1,128], index: 2, kind: input, shape index: {}]   ;;  %s5925_s3 = inlined_call_operand.vmem [shape: f32[288,128], index: 3, kind: output, shape index: {}]  }
   0x1   :  { %v892_v0 = vld [vmem:[%s5922_s1 + $0x70] sm:$0xff]  ;;  %v893_v1 = vld [vmem:[%s5922_s1 + $0x78] sm:$0xff]  ;;  %v890_v11 = vld [vmem:[%s5922_s1 + $0x60] sm:$0xff] }
   0x2   :  { %v908_v2 = vld [vmem:[%s5922_s1 + $0xf0] sm:$0xff]  ;;  %v1141_v3 = vpack.c.bf16 %v893_v1, %v892_v0  ;;  %v909_v4 = vld [vmem:[%s5922_s1 + $0xf8] sm:$0xff]  ;;  %v891_v13 = vld [vmem:[%s5922_s1 + $0x68] sm:$0xff] }
   0x3   :  { %v924_v5 = vld [vmem:[%s5922_s1 + $0x170] sm:$0xff]  ;;  %v925_v6 = vld [vmem:[%s5922_s1 + $0x178] sm:$0xff]  ;;  %v1149_v7 = vpack.c.bf16 %v909_v4, %v908_v2  ;;  %v906_v14 = vld [vmem:[%s5922_s1 + $0xe0] sm:$0xff]  ;;  %v1140_v16 = vpack.c.bf16 %v891_v13, %v890_v11 }
   0x4   :  { %v1157_v8 = vpack.c.bf16 %v925_v6, %v924_v5  ;;  %v940_v9 = vld [vmem:[%s5922_s1 + $0x1f0] sm:$0xff]  ;;  %v941_v10 = vld [vmem:[%s5922_s1 + $0x1f8] sm:$0xff]  ;;  %1266 = vmatpush.bf16.msra.mxu0 %v1141_v3  ;;  %v907_v15 = vld [vmem:[%s5922_s1 + $0xe8] sm:$0xff] }
   0x5   :  { %v1165_v12 = vpack.c.bf16 %v941_v10, %v940_v9  ;;  %1365 = vmatpush.bf16.msra.mxu1 %v1149_v7  ;;  %v1148_v17 = vpack.c.bf16 %v907_v15, %v906_v14  ;;  %v922_v18 = vld [vmem:[%s5922_s1 + $0x160] sm:$0xff]  ;;  %v923_v19 = vld [vmem:[%s5922_s1 + $0x168] sm:$0xff]  ;;  %v888_v23 = vld [vmem:[%s5922_s1 + $0x50] sm:$0xff] }
   0x6   :  { %1464 = vmatpush.bf16.msra.mxu2 %v1157_v8  ;;  %v938_v20 = vld [vmem:[%s5922_s1 + $0x1e0] sm:$0xff]  ;;  %v1156_v21 = vpack.c.bf16 %v923_v19, %v922_v18  ;;  %v939_v22 = vld [vmem:[%s5922_s1 + $0x1e8] sm:$0xff]  ;;  %v889_v24 = vld [vmem:[%s5922_s1 + $0x58] sm:$0xff] }
   0x7   :  { %1563 = vmatpush.bf16.msra.mxu3 %v1165_v12  ;;  %v1164_v25 = vpack.c.bf16 %v939_v22, %v938_v20  ;;  %v904_v26 = vld [vmem:[%s5922_s1 + $0xd0] sm:$0xff]  ;;  %v905_v27 = vld [vmem:[%s5922_s1 + $0xd8] sm:$0xff]  ;;  %v1139_v29 = vpack.c.bf16 %v889_v24, %v888_v23  ;;  %v886_v35 = vld [vmem:[%s5922_s1 + $0x40] sm:$0xff] }
   0x8   :  { %v920_v28 = vld [vmem:[%s5922_s1 + $0x150] sm:$0xff]  ;;  %1267 = vmatpush.bf16.msra.mxu0 %v1140_v16  ;;  %v921_v30 = vld [vmem:[%s5922_s1 + $0x158] sm:$0xff]  ;;  %v1147_v33 = vpack.c.bf16 %v905_v27, %v904_v26  ;;  %v887_v36 = vld [vmem:[%s5922_s1 + $0x48] sm:$0xff] }
   0x9   :  { %v936_v31 = vld [vmem:[%s5922_s1 + $0x1d0] sm:$0xff]  ;;  %v937_v32 = vld [vmem:[%s5922_s1 + $0x1d8] sm:$0xff]  ;;  %1366 = vmatpush.bf16.msra.mxu1 %v1148_v17  ;;  %v1155_v34 = vpack.c.bf16 %v921_v30, %v920_v28  ;;  %v902_v37 = vld [vmem:[%s5922_s1 + $0xc0] sm:$0xff]  ;;  %v1138_v44 = vpack.c.bf16 %v887_v36, %v886_v35 }
   0xa   :  { %1465 = vmatpush.bf16.msra.mxu2 %v1156_v21  ;;  %v1163_v38 = vpack.c.bf16 %v937_v32, %v936_v31  ;;  %v903_v39 = vld [vmem:[%s5922_s1 + $0xc8] sm:$0xff]  ;;  %v918_v40 = vld [vmem:[%s5922_s1 + $0x140] sm:$0xff]  ;;  %v884_v47 = vld [vmem:[%s5922_s1 + $0x30] sm:$0xff] }
   0xb   :  { %1564 = vmatpush.bf16.msra.mxu3 %v1164_v25  ;;  %v919_v41 = vld [vmem:[%s5922_s1 + $0x148] sm:$0xff]  ;;  %v934_v42 = vld [vmem:[%s5922_s1 + $0x1c0] sm:$0xff]  ;;  %v1146_v45 = vpack.c.bf16 %v903_v39, %v902_v37  ;;  %v885_v48 = vld [vmem:[%s5922_s1 + $0x38] sm:$0xff] }
   0xc   :  { %v935_v43 = vld [vmem:[%s5922_s1 + $0x1c8] sm:$0xff]  ;;  %1268 = vmatpush.bf16.msra.mxu0 %v1139_v29  ;;  %v1154_v46 = vpack.c.bf16 %v919_v41, %v918_v40  ;;  %v900_v49 = vld [vmem:[%s5922_s1 + $0xb0] sm:$0xff]  ;;  %v901_v51 = vld [vmem:[%s5922_s1 + $0xb8] sm:$0xff]  ;;  %v1137_v56 = vpack.c.bf16 %v885_v48, %v884_v47 }
   0xd   :  { %1367 = vmatpush.bf16.msra.mxu1 %v1147_v33  ;;  %v1162_v50 = vpack.c.bf16 %v935_v43, %v934_v42  ;;  %v916_v52 = vld [vmem:[%s5922_s1 + $0x130] sm:$0xff]  ;;  %v917_v53 = vld [vmem:[%s5922_s1 + $0x138] sm:$0xff]  ;;  %v1145_v57 = vpack.c.bf16 %v901_v51, %v900_v49  ;;  %v882_v59 = vld [vmem:[%s5922_s1 + $0x20] sm:$0xff] }
   0xe   :  { %1466 = vmatpush.bf16.msra.mxu2 %v1155_v34  ;;  %v932_v54 = vld [vmem:[%s5922_s1 + $0x1b0] sm:$0xff]  ;;  %v933_v55 = vld [vmem:[%s5922_s1 + $0x1b8] sm:$0xff]  ;;  %v1153_v58 = vpack.c.bf16 %v917_v53, %v916_v52  ;;  %v883_v60 = vld [vmem:[%s5922_s1 + $0x28] sm:$0xff] }
   0xf   :  { %1565 = vmatpush.bf16.msra.mxu3 %v1163_v38  ;;  %v898_v61 = vld [vmem:[%s5922_s1 + $0xa0] sm:$0xff]  ;;  %v1161_v62 = vpack.c.bf16 %v933_v55, %v932_v54  ;;  %v899_v63 = vld [vmem:[%s5922_s1 + $0xa8] sm:$0xff]  ;;  %v1136_v4 = vpack.c.bf16 %v883_v60, %v882_v59  ;;  %v880_v7 = vld [vmem:[%s5922_s1 + $0x10] sm:$0xff] }
  0x10   :  { %1269 = vmatpush.bf16.msra.mxu0 %v1138_v44  ;;  %v914_v0 = vld [vmem:[%s5922_s1 + $0x120] sm:$0xff]  ;;  %v915_v1 = vld [vmem:[%s5922_s1 + $0x128] sm:$0xff]  ;;  %v1144_v5 = vpack.c.bf16 %v899_v63, %v898_v61  ;;  %v881_v8 = vld [vmem:[%s5922_s1 + $0x18] sm:$0xff] }
  0x11   :  { %1368 = vmatpush.bf16.msra.mxu1 %v1146_v45  ;;  %v930_v2 = vld [vmem:[%s5922_s1 + $0x1a0] sm:$0xff]  ;;  %v931_v3 = vld [vmem:[%s5922_s1 + $0x1a8] sm:$0xff]  ;;  %v1152_v6 = vpack.c.bf16 %v915_v1, %v914_v0  ;;  %v896_v9 = vld [vmem:[%s5922_s1 + $0x90] sm:$0xff]  ;;  %v1135_v17 = vpack.c.bf16 %v881_v8, %v880_v7 }
  0x12   :  { %1467 = vmatpush.bf16.msra.mxu2 %v1154_v46  ;;  %v1160_v10 = vpack.c.bf16 %v931_v3, %v930_v2  ;;  %v897_v11 = vld [vmem:[%s5922_s1 + $0x98] sm:$0xff]  ;;  %v912_v12 = vld [vmem:[%s5922_s1 + $0x110] sm:$0xff]  ;;  %v878_v16 = vld [vmem:[%s5922_s1] sm:$0xff] }
  0x13   :  { %1566 = vmatpush.bf16.msra.mxu3 %v1162_v50  ;;  %v913_v13 = vld [vmem:[%s5922_s1 + $0x118] sm:$0xff]  ;;  %v928_v14 = vld [vmem:[%s5922_s1 + $0x190] sm:$0xff]  ;;  %v879_v18 = vld [vmem:[%s5922_s1 + $0x8] sm:$0xff]  ;;  %v1143_v21 = vpack.c.bf16 %v897_v11, %v896_v9 }
  0x14   :  { %1270 = vmatpush.bf16.msra.mxu0 %v1137_v56  ;;  %v929_v15 = vld [vmem:[%s5922_s1 + $0x198] sm:$0xff]  ;;  %v894_v19 = vld [vmem:[%s5922_s1 + $0x80] sm:$0xff]  ;;  %v895_v20 = vld [vmem:[%s5922_s1 + $0x88] sm:$0xff]  ;;  %v1151_v22 = vpack.c.bf16 %v913_v13, %v912_v12  ;;  %v1134_v33 = vpack.c.bf16 %v879_v18, %v878_v16 }
  0x15   :  { %1369 = vmatpush.bf16.msra.mxu1 %v1145_v57  ;;  %v910_v23 = vld [vmem:[%s5922_s1 + $0x100] sm:$0xff]  ;;  %v911_v24 = vld [vmem:[%s5922_s1 + $0x108] sm:$0xff]  ;;  %v1159_v26 = vpack.c.bf16 %v929_v15, %v928_v14  ;;  %v988_v31 = vld [vmem:[%s5922_s1 + $0x370] sm:$0xff]  ;;  %v1142_v37 = vpack.c.bf16 %v895_v20, %v894_v19 }
  0x16   :  { %1468 = vmatpush.bf16.msra.mxu2 %v1153_v58  ;;  %v926_v25 = vld [vmem:[%s5922_s1 + $0x180] sm:$0xff]  ;;  %v927_v27 = vld [vmem:[%s5922_s1 + $0x188] sm:$0xff]  ;;  %v989_v32 = vld [vmem:[%s5922_s1 + $0x378] sm:$0xff]  ;;  %v1150_v38 = vpack.c.bf16 %v911_v24, %v910_v23 }
  0x17   :  { %1567 = vmatpush.bf16.msra.mxu3 %v1161_v62  ;;  %v14_v28 = vld [vmem:[%s5923_s0] sm:$0xff]  ;;  %v15_v30 = vld [vmem:[%s5923_s0 + $0x8] sm:$0xff]  ;;  %v1004_v35 = vld [vmem:[%s5922_s1 + $0x3f0] sm:$0xff]  ;;  %v1158_v42 = vpack.c.bf16 %v927_v27, %v926_v25  ;;  %v1189_v44 = vpack.c.bf16 %v989_v32, %v988_v31 }
  0x18   :  { %1271 = vmatpush.bf16.msra.mxu0 %v1136_v4  ;;  %v30_v29 = vld [vmem:[%s5923_s0 + $0x80] sm:$0xff]  ;;  %v31_v34 = vld [vmem:[%s5923_s0 + $0x88] sm:$0xff]  ;;  %v1005_v36 = vld [vmem:[%s5922_s1 + $0x3f8] sm:$0xff] }
  0x19   :  { %1370 = vmatpush.bf16.msra.mxu1 %v1144_v5  ;;  %v16_v39 = vld [vmem:[%s5923_s0 + $0x10] sm:$0xff]  ;;  %v17_v41 = vld [vmem:[%s5923_s0 + $0x18] sm:$0xff]  ;;  %v590_v47 = vpack.c.bf16 %v30_v29, %v14_v28  ;;  %v1197_v48 = vpack.c.bf16 %v1005_v36, %v1004_v35  ;;  %v591_v51 = vpack.c.bf16 %v31_v34, %v15_v30  ;;  %v986_v56 = vld [vmem:[%s5922_s1 + $0x360] sm:$0xff] }
  0x1a   :  { %1469 = vmatpush.bf16.msra.mxu2 %v1152_v6  ;;  %v32_v40 = vld [vmem:[%s5923_s0 + $0x90] sm:$0xff]  ;;  %v33_v43 = vld [vmem:[%s5923_s0 + $0x98] sm:$0xff]  ;;  %v987_v57 = vld [vmem:[%s5922_s1 + $0x368] sm:$0xff] }
  0x1b   :  { %1568 = vmatpush.bf16.msra.mxu3 %v1160_v10  ;;  %v956_v45 = vld [vmem:[%s5922_s1 + $0x270] sm:$0xff]  ;;  %v957_v46 = vld [vmem:[%s5922_s1 + $0x278] sm:$0xff]  ;;  %v592_v52 = vpack.c.bf16 %v32_v40, %v16_v39  ;;  %v593_v53 = vpack.c.bf16 %v33_v43, %v17_v41  ;;  %v954_v58 = vld [vmem:[%s5922_s1 + $0x260] sm:$0xff]  ;;  %v1188_v59 = vpack.c.bf16 %v987_v57, %v986_v56 }
  0x1c   :  { %1272 = vmatpush.bf16.msra.mxu0 %v1135_v17  ;;  %v972_v49 = vld [vmem:[%s5922_s1 + $0x2f0] sm:$0xff]  ;;  %v973_v50 = vld [vmem:[%s5922_s1 + $0x2f8] sm:$0xff]  ;;  %v1173_v54 = vpack.c.bf16 %v957_v46, %v956_v45  ;;  %v955_v60 = vld [vmem:[%s5922_s1 + $0x268] sm:$0xff] }
  0x1d   :  { %1371 = vmatpush.bf16.msra.mxu1 %v1143_v21  ;;  %v1181_v55 = vpack.c.bf16 %v973_v50, %v972_v49  ;;  %v1002_v61 = vld [vmem:[%s5922_s1 + $0x3e0] sm:$0xff]  ;;  %v1003_v62 = vld [vmem:[%s5922_s1 + $0x3e8] sm:$0xff]  ;;  %v1172_v63 = vpack.c.bf16 %v955_v60, %v954_v58  ;;  %v48_v8 = vld [vmem:[%s5923_s0 + $0x110] sm:$0xff] }
  0x1e   :  { %1470 = vmatpush.bf16.msra.mxu2 %v1151_v22  ;;  %v1196_v0 = vpack.c.bf16 %v1003_v62, %v1002_v61  ;;  %v970_v1 = vld [vmem:[%s5922_s1 + $0x2e0] sm:$0xff]  ;;  %v971_v2 = vld [vmem:[%s5922_s1 + $0x2e8] sm:$0xff]  ;;  %v64_v9 = vld [vmem:[%s5923_s0 + $0x190] sm:$0xff] }
  0x1f   :  { %1569 = vmatpush.bf16.msra.mxu3 %v1159_v26  ;;  %v1180_v3 = vpack.c.bf16 %v971_v2, %v970_v1  ;;  %v46_v4 = vld [vmem:[%s5923_s0 + $0x100] sm:$0xff]  ;;  %v47_v6 = vld [vmem:[%s5923_s0 + $0x108] sm:$0xff]  ;;  %v49_v10 = vld [vmem:[%s5923_s0 + $0x118] sm:$0xff]  ;;  %v608_v14 = vpack.c.bf16 %v64_v9, %v48_v8 }
  0x20   :  { %1273 = vmatpush.bf16.msra.mxu0 %v1134_v33  ;;  %v62_v5 = vld [vmem:[%s5923_s0 + $0x180] sm:$0xff]  ;;  %v63_v7 = vld [vmem:[%s5923_s0 + $0x188] sm:$0xff]  ;;  %v65_v11 = vld [vmem:[%s5923_s0 + $0x198] sm:$0xff] }
  0x21   :  { %1372 = vmatpush.bf16.msra.mxu1 %v1142_v37  ;;  %v606_v12 = vpack.c.bf16 %v62_v5, %v46_v4  ;;  %v607_v13 = vpack.c.bf16 %v63_v7, %v47_v6  ;;  %v609_v15 = vpack.c.bf16 %v65_v11, %v49_v10  ;;  %v78_v16 = vld [vmem:[%s5923_s0 + $0x200] sm:$0xff]  ;;  %v79_v18 = vld [vmem:[%s5923_s0 + $0x208] sm:$0xff]  ;;  %v80_v20 = vld [vmem:[%s5923_s0 + $0x210] sm:$0xff] }
  0x22   :  { %1471 = vmatpush.bf16.msra.mxu2 %v1150_v38  ;;  %v94_v17 = vld [vmem:[%s5923_s0 + $0x280] sm:$0xff]  ;;  %v95_v19 = vld [vmem:[%s5923_s0 + $0x288] sm:$0xff]  ;;  %v96_v21 = vld [vmem:[%s5923_s0 + $0x290] sm:$0xff] }
  0x23   :  { %1570 = vmatpush.bf16.msra.mxu3 %v1158_v42  ;;  %1274 = vmatmul.bf16.vlgmr.msra.gmra.mxu0 %v590_v47  ;;  %v81_v22 = vld [vmem:[%s5923_s0 + $0x218] sm:$0xff]  ;;  %v622_v24 = vpack.c.bf16 %v94_v17, %v78_v16  ;;  %v623_v25 = vpack.c.bf16 %v95_v19, %v79_v18  ;;  %v624_v26 = vpack.c.bf16 %v96_v21, %v80_v20  ;;  %v984_v28 = vld [vmem:[%s5922_s1 + $0x350] sm:$0xff]  ;;  %v110_v40 = vld [vmem:[%s5923_s0 + $0x300] sm:$0xff] }
  0x24   :  { %1373 = vmatmul.bf16.vlgmr.msra.gmra.mxu1 %v591_v51  ;;  %1662 = vmatpush.bf16.msrb.mxu0 %v1173_v54  ;;  %v97_v23 = vld [vmem:[%s5923_s0 + $0x298] sm:$0xff]  ;;  %v952_v30 = vld [vmem:[%s5922_s1 + $0x250] sm:$0xff]  ;;  %v126_v41 = vld [vmem:[%s5923_s0 + $0x380] sm:$0xff] }
  0x25   :  { %1472 = vmatmul.bf16.vlgmr.msra.gmra.mxu2 %v592_v52  ;;  %1761 = vmatpush.bf16.msrb.mxu1 %v1181_v55  ;;  %v625_v27 = vpack.c.bf16 %v97_v23, %v81_v22  ;;  %v985_v29 = vld [vmem:[%s5922_s1 + $0x358] sm:$0xff]  ;;  %v1000_v33 = vld [vmem:[%s5922_s1 + $0x3d0] sm:$0xff]  ;;  %v111_v42 = vld [vmem:[%s5923_s0 + $0x308] sm:$0xff] }
  0x26   :  { %1860 = vmatpush.bf16.msrb.mxu2 %v1189_v44  ;;  %1571 = vmatmul.bf16.vlgmr.msra.gmra.mxu3 %v593_v53  ;;  %v1187_v31 = vpack.c.bf16 %v985_v29, %v984_v28  ;;  %v953_v32 = vld [vmem:[%s5922_s1 + $0x258] sm:$0xff]  ;;  %v968_v37 = vld [vmem:[%s5922_s1 + $0x2d0] sm:$0xff]  ;;  %v127_v43 = vld [vmem:[%s5923_s0 + $0x388] sm:$0xff] }
  0x27   :  { %1959 = vmatpush.bf16.msrb.mxu3 %v1197_v48  ;;  %v1001_v34 = vld [vmem:[%s5922_s1 + $0x3d8] sm:$0xff]  ;;  %v1171_v35 = vpack.c.bf16 %v953_v32, %v952_v30  ;;  %v112_v44 = vld [vmem:[%s5923_s0 + $0x310] sm:$0xff]  ;;  %v638_v48 = vpack.c.bf16 %v126_v41, %v110_v40  ;;  %v639_v49 = vpack.c.bf16 %v127_v43, %v111_v42  ;;  %v142_v52 = vld [vmem:[%s5923_s0 + $0x400] sm:$0xff] }
  0x28   :  { %1663 = vmatpush.bf16.msrb.mxu0 %v1172_v63  ;;  %v1195_v36 = vpack.c.bf16 %v1001_v34, %v1000_v33  ;;  %v969_v38 = vld [vmem:[%s5922_s1 + $0x2d8] sm:$0xff]  ;;  %v128_v45 = vld [vmem:[%s5923_s0 + $0x390] sm:$0xff]  ;;  %v158_v53 = vld [vmem:[%s5923_s0 + $0x480] sm:$0xff] }
  0x29   :  { %1762 = vmatpush.bf16.msrb.mxu1 %v1180_v3  ;;  %v1179_v39 = vpack.c.bf16 %v969_v38, %v968_v37  ;;  %v113_v46 = vld [vmem:[%s5923_s0 + $0x318] sm:$0xff]  ;;  %v640_v50 = vpack.c.bf16 %v128_v45, %v112_v44  ;;  %v143_v54 = vld [vmem:[%s5923_s0 + $0x408] sm:$0xff]  ;;  %v144_v56 = vld [vmem:[%s5923_s0 + $0x410] sm:$0xff]  ;;  %v654_v60 = vpack.c.bf16 %v158_v53, %v142_v52 }
  0x2a   :  { %1861 = vmatpush.bf16.msrb.mxu2 %v1188_v59  ;;  %v129_v47 = vld [vmem:[%s5923_s0 + $0x398] sm:$0xff]  ;;  %v159_v55 = vld [vmem:[%s5923_s0 + $0x488] sm:$0xff]  ;;  %v160_v57 = vld [vmem:[%s5923_s0 + $0x490] sm:$0xff] }
  0x2b   :  { %1960 = vmatpush.bf16.msrb.mxu3 %v1196_v0  ;;  %v641_v51 = vpack.c.bf16 %v129_v47, %v113_v46  ;;  %v145_v58 = vld [vmem:[%s5923_s0 + $0x418] sm:$0xff]  ;;  %v655_v61 = vpack.c.bf16 %v159_v55, %v143_v54  ;;  %v656_v62 = vpack.c.bf16 %v160_v57, %v144_v56  ;;  %v982_v0 = vld [vmem:[%s5922_s1 + $0x340] sm:$0xff]  ;;  %v983_v1 = vld [vmem:[%s5922_s1 + $0x348] sm:$0xff] }
  0x2c   :  { %1664 = vmatpush.bf16.msrb.mxu0 %v1171_v35  ;;  %v161_v59 = vld [vmem:[%s5923_s0 + $0x498] sm:$0xff]  ;;  %v950_v2 = vld [vmem:[%s5922_s1 + $0x240] sm:$0xff]  ;;  %v1186_v3 = vpack.c.bf16 %v983_v1, %v982_v0  ;;  %v951_v4 = vld [vmem:[%s5922_s1 + $0x248] sm:$0xff] }
  0x2d   :  { %1763 = vmatpush.bf16.msrb.mxu1 %v1179_v39  ;;  %v657_v63 = vpack.c.bf16 %v161_v59, %v145_v58  ;;  %v998_v5 = vld [vmem:[%s5922_s1 + $0x3c0] sm:$0xff]  ;;  %v999_v6 = vld [vmem:[%s5922_s1 + $0x3c8] sm:$0xff]  ;;  %v1170_v7 = vpack.c.bf16 %v951_v4, %v950_v2  ;;  %v193_v16 = vld [vmem:[%s5923_s0 + $0x598] sm:$0xff] }
  0x2e   :  { %1862 = vmatpush.bf16.msrb.mxu2 %v1187_v31  ;;  %v1194_v8 = vpack.c.bf16 %v999_v6, %v998_v5  ;;  %v174_v9 = vld [vmem:[%s5923_s0 + $0x500] sm:$0xff]  ;;  %v175_v11 = vld [vmem:[%s5923_s0 + $0x508] sm:$0xff]  ;;  %v208_v28 = vld [vmem:[%s5923_s0 + $0x610] sm:$0xff] }
  0x2f   :  { %1961 = vmatpush.bf16.msrb.mxu3 %v1195_v36  ;;  %v190_v10 = vld [vmem:[%s5923_s0 + $0x580] sm:$0xff]  ;;  %v967_v22 = vld [vmem:[%s5922_s1 + $0x2c8] sm:$0xff]  ;;  %v224_v29 = vld [vmem:[%s5923_s0 + $0x690] sm:$0xff] }
  0x30   :  { %1665 = vmatpush.bf16.msrb.mxu0 %v1170_v7  ;;  %v670_v17 = vpack.c.bf16 %v190_v10, %v174_v9  ;;  %v966_v21 = vld [vmem:[%s5922_s1 + $0x2c0] sm:$0xff]  ;;  %v209_v30 = vld [vmem:[%s5923_s0 + $0x618] sm:$0xff]  ;;  %v688_v34 = vpack.c.bf16 %v224_v29, %v208_v28  ;;  %v239_v38 = vld [vmem:[%s5923_s0 + $0x708] sm:$0xff] }
  0x31   :  { %v1178_v23 = vpack.c.bf16 %v967_v22, %v966_v21  ;;  %v225_v31 = vld [vmem:[%s5923_s0 + $0x698] sm:$0xff]  ;;  %v238_v36 = vld [vmem:[%s5923_s0 + $0x700] sm:$0xff]  ;;  %v255_v39 = vld [vmem:[%s5923_s0 + $0x788] sm:$0xff] }
  0x32   :  { %1863 = vmatpush.bf16.msrb.mxu2 %v1186_v3  ;;  %v689_v35 = vpack.c.bf16 %v225_v31, %v209_v30  ;;  %v254_v37 = vld [vmem:[%s5923_s0 + $0x780] sm:$0xff]  ;;  %v240_v40 = vld [vmem:[%s5923_s0 + $0x710] sm:$0xff]  ;;  %v241_v42 = vld [vmem:[%s5923_s0 + $0x718] sm:$0xff]  ;;  %v703_v45 = vpack.c.bf16 %v255_v39, %v239_v38 }
  0x33   :  { %1279 = vmatmul.bf16.gmra.mxu0 %v606_v12  ;;  %1962 = vmatpush.bf16.msrb.mxu3 %v1194_v8  ;;  %v191_v12 = vld [vmem:[%s5923_s0 + $0x588] sm:$0xff]  ;;  %v256_v41 = vld [vmem:[%s5923_s0 + $0x790] sm:$0xff]  ;;  %v257_v43 = vld [vmem:[%s5923_s0 + $0x798] sm:$0xff]  ;;  %v702_v44 = vpack.c.bf16 %v254_v37, %v238_v36 }
  0x34   :  { %1378 = vmatmul.bf16.gmra.mxu1 %v607_v13  ;;  %v176_v13 = vld [vmem:[%s5923_s0 + $0x510] sm:$0xff]  ;;  %v671_v18 = vpack.c.bf16 %v191_v12, %v175_v11  ;;  %v704_v46 = vpack.c.bf16 %v256_v41, %v240_v40  ;;  %v705_v47 = vpack.c.bf16 %v257_v43, %v241_v42  ;;  %v949_v52 = vld [vmem:[%s5922_s1 + $0x238] sm:$0xff]  ;;  %v3455_v59 = vld [vmem:[%s5924_s2] ss:$0 sm:$0xff] }
  0x35   :  { %1477 = vmatmul.bf16.gmra.mxu2 %v608_v14  ;;  %v192_v14 = vld [vmem:[%s5923_s0 + $0x590] sm:$0xff]  ;;  %1764 = vmatpush.bf16.msrb.mxu1 %v1178_v23  ;;  %v997_v54 = vld [vmem:[%s5922_s1 + $0x3b8] sm:$0xff]  ;;  %v287_v0 = vld [vmem:[%s5923_s0 + $0x888] sm:$0xff] }
  0x36   :  { %1576 = vmatmul.bf16.gmra.mxu3 %v609_v15  ;;  %v177_v15 = vld [vmem:[%s5923_s0 + $0x518] sm:$0xff]  ;;  %v672_v19 = vpack.c.bf16 %v192_v14, %v176_v13  ;;  %v996_v53 = vld [vmem:[%s5922_s1 + $0x3b0] sm:$0xff]  ;;  %v302_v21 = vld [vmem:[%s5923_s0 + $0x900] sm:$0xff] }
  0x37   :  { %v673_v20 = vpack.c.bf16 %v193_v16, %v177_v15  ;;  %v1193_v56 = vpack.c.bf16 %v997_v54, %v996_v53  ;;  %v964_v57 = vld [vmem:[%s5922_s1 + $0x2b0] sm:$0xff]  ;;  %v965_v58 = vld [vmem:[%s5922_s1 + $0x2b8] sm:$0xff]  ;;  %v318_v22 = vld [vmem:[%s5923_s0 + $0x980] sm:$0xff] }
  0x38   :  { %v272_v1 = vld [vmem:[%s5923_s0 + $0x810] sm:$0xff]  ;;  %v273_v3 = vld [vmem:[%s5923_s0 + $0x818] sm:$0xff]  ;;  %v303_v23 = vld [vmem:[%s5923_s0 + $0x908] sm:$0xff]  ;;  %v734_v30 = vpack.c.bf16 %v318_v22, %v302_v21 }
  0x39   :  { %1963 = vmatpush.bf16.msrb.mxu3 %v1193_v56  ;;  %v288_v2 = vld [vmem:[%s5923_s0 + $0x890] sm:$0xff]  ;;  %v289_v4 = vld [vmem:[%s5923_s0 + $0x898] sm:$0xff]  ;;  %v335_v53 = vld [vmem:[%s5923_s0 + $0xa08] sm:$0xff] }
  0x3a   :  { %v720_v8 = vpack.c.bf16 %v288_v2, %v272_v1  ;;  %v721_v11 = vpack.c.bf16 %v289_v4, %v273_v3  ;;  %v321_v28 = vld [vmem:[%s5923_s0 + $0x998] sm:$0xff]  ;;  %v947_v56 = vld [vmem:[%s5922_s1 + $0x228] sm:$0xff]  ;;  %v352_v1 = vld [vmem:[%s5923_s0 + $0xa90] sm:$0xff] }
  0x3b   :  { %v337_v4 = vld [vmem:[%s5923_s0 + $0xa18] sm:$0xff] }
  0x43   :  { %1284 = vmatmul.bf16.gmra.mxu0 %v622_v24  ;;  %v206_v24 = vld [vmem:[%s5923_s0 + $0x600] sm:$0xff] }
  0x44   :  { %1383 = vmatmul.bf16.gmra.mxu1 %v623_v25  ;;  %v222_v25 = vld [vmem:[%s5923_s0 + $0x680] sm:$0xff] }
  0x45   :  { %1482 = vmatmul.bf16.gmra.mxu2 %v624_v26  ;;  %v207_v26 = vld [vmem:[%s5923_s0 + $0x608] sm:$0xff]  ;;  %v686_v32 = vpack.c.bf16 %v222_v25, %v206_v24  ;;  %v304_v25 = vld [vmem:[%s5923_s0 + $0x910] sm:$0xff] }
  0x46   :  { %1581 = vmatmul.bf16.gmra.mxu3 %v625_v27  ;;  %v223_v27 = vld [vmem:[%s5923_s0 + $0x688] sm:$0xff] }
  0x47   :  { %v687_v33 = vpack.c.bf16 %v223_v27, %v207_v26  ;;  %v319_v24 = vld [vmem:[%s5923_s0 + $0x988] sm:$0xff]  ;;  %v320_v26 = vld [vmem:[%s5923_s0 + $0x990] sm:$0xff]  ;;  %v305_v27 = vld [vmem:[%s5923_s0 + $0x918] sm:$0xff] }
  0x48   :  { %v737_v38 = vpack.c.bf16 %v321_v28, %v305_v27  ;;  %v366_v27 = vld [vmem:[%s5923_s0 + $0xb00] sm:$0xff] }
  0x49   :  { %v382_v28 = vld [vmem:[%s5923_s0 + $0xb80] sm:$0xff] }
  0x53   :  { %1289 = vmatmul.bf16.gmra.mxu0 %v638_v48  ;;  %v980_v48 = vld [vmem:[%s5922_s1 + $0x330] sm:$0xff] }
  0x54   :  { %1388 = vmatmul.bf16.gmra.mxu1 %v639_v49  ;;  %v981_v49 = vld [vmem:[%s5922_s1 + $0x338] sm:$0xff] }
  0x55   :  { %1487 = vmatmul.bf16.gmra.mxu2 %v640_v50  ;;  %v948_v50 = vld [vmem:[%s5922_s1 + $0x230] sm:$0xff] }
  0x56   :  { %1586 = vmatmul.bf16.gmra.mxu3 %v641_v51  ;;  %v1185_v51 = vpack.c.bf16 %v981_v49, %v980_v48  ;;  %v1169_v55 = vpack.c.bf16 %v949_v52, %v948_v50  ;;  %v334_v48 = vld [vmem:[%s5923_s0 + $0xa00] sm:$0xff] }
  0x57   :  { %v350_v49 = vld [vmem:[%s5923_s0 + $0xa80] sm:$0xff] }
  0x58   :  { %1864 = vmatpush.bf16.msrb.mxu2 %v1185_v51  ;;  %1666 = vmatpush.bf16.msrb.mxu0 %v1169_v55  ;;  %v978_v50 = vld [vmem:[%s5922_s1 + $0x320] sm:$0xff]  ;;  %v979_v51 = vld [vmem:[%s5922_s1 + $0x328] sm:$0xff] }
  0x59   :  { %v1184_v54 = vpack.c.bf16 %v979_v51, %v978_v50  ;;  %v946_v55 = vld [vmem:[%s5922_s1 + $0x220] sm:$0xff] }
  0x5c   :  { %1865 = vmatpush.bf16.msrb.mxu2 %v1184_v54 }
  0x63   :  { %1294 = vmatmul.bf16.gmra.mxu0 %v654_v60  ;;  %v1177_v60 = vpack.c.bf16 %v965_v58, %v964_v57  ;;  %v994_v57 = vld [vmem:[%s5922_s1 + $0x3a0] sm:$0xff]  ;;  %v1168_v58 = vpack.c.bf16 %v947_v56, %v946_v55 }
  0x64   :  { %1393 = vmatmul.bf16.gmra.mxu1 %v655_v61  ;;  %v270_v61 = vld [vmem:[%s5923_s0 + $0x800] sm:$0xff] }
  0x65   :  { %1492 = vmatmul.bf16.gmra.mxu2 %v656_v62  ;;  %v286_v62 = vld [vmem:[%s5923_s0 + $0x880] sm:$0xff]  ;;  %1765 = vmatpush.bf16.msrb.mxu1 %v1177_v60  ;;  %v995_v60 = vld [vmem:[%s5922_s1 + $0x3a8] sm:$0xff] }
  0x66   :  { %1591 = vmatmul.bf16.gmra.mxu3 %v657_v63  ;;  %v271_v63 = vld [vmem:[%s5923_s0 + $0x808] sm:$0xff]  ;;  %v718_v5 = vpack.c.bf16 %v286_v62, %v270_v61  ;;  %v962_v61 = vld [vmem:[%s5922_s1 + $0x2a0] sm:$0xff]  ;;  %v1192_v2 = vpack.c.bf16 %v995_v60, %v994_v57  ;;  %1667 = vmatpush.bf16.msrb.mxu0 %v1168_v58 }
  0x67   :  { %v719_v7 = vpack.c.bf16 %v287_v0, %v271_v63  ;;  %v963_v62 = vld [vmem:[%s5922_s1 + $0x2a8] sm:$0xff]  ;;  %v336_v0 = vld [vmem:[%s5923_s0 + $0xa10] sm:$0xff]  ;;  %v398_v56 = vld [vmem:[%s5923_s0 + $0xc00] sm:$0xff] }
  0x68   :  { %v351_v63 = vld [vmem:[%s5923_s0 + $0xa88] sm:$0xff]  ;;  %v1176_v3 = vpack.c.bf16 %v963_v62, %v962_v61  ;;  %1964 = vmatpush.bf16.msrb.mxu3 %v1192_v2  ;;  %v414_v57 = vld [vmem:[%s5923_s0 + $0xc80] sm:$0xff]  ;;  %v976_v61 = vld [vmem:[%s5922_s1 + $0x310] sm:$0xff] }
  0x69   :  { %v399_v60 = vld [vmem:[%s5923_s0 + $0xc08] sm:$0xff]  ;;  %v977_v62 = vld [vmem:[%s5922_s1 + $0x318] sm:$0xff]  ;;  %v992_v2 = vld [vmem:[%s5922_s1 + $0x390] sm:$0xff] }
  0x6a   :  { %1766 = vmatpush.bf16.msrb.mxu1 %v1176_v3  ;;  %v993_v3 = vld [vmem:[%s5922_s1 + $0x398] sm:$0xff] }
  0x73   :  { %1299 = vmatmul.bf16.gmra.mxu0 %v670_v17 }
  0x74   :  { %1398 = vmatmul.bf16.gmra.mxu1 %v671_v18 }
  0x75   :  { %1497 = vmatmul.bf16.gmra.mxu2 %v672_v19 }
  0x76   :  { %1596 = vmatmul.bf16.gmra.mxu3 %v673_v20 }
  0x83   :  { %1304 = vmatmul.bf16.gmra.mxu0 %v686_v32 }
  0x84   :  { %1403 = vmatmul.bf16.gmra.mxu1 %v687_v33 }
  0x85   :  { %1502 = vmatmul.bf16.gmra.mxu2 %v688_v34  ;;  %v735_v34 = vpack.c.bf16 %v319_v24, %v303_v23 }
  0x86   :  { %1601 = vmatmul.bf16.gmra.mxu3 %v689_v35  ;;  %v736_v35 = vpack.c.bf16 %v320_v26, %v304_v25 }
  0x93   :  { %1309 = vmatmul.bf16.gmra.mxu0 %v702_v44 }
  0x94   :  { %1408 = vmatmul.bf16.gmra.mxu1 %v703_v45 }
  0x95   :  { %1507 = vmatmul.bf16.gmra.mxu2 %v704_v46 }
  0x96   :  { %1606 = vmatmul.bf16.gmra.mxu3 %v705_v47 }
  0xa0   :  { %v1275_v6 = vpop.f32.mrf.mxu0 }
  0xa1   :  { %v1276_v9 = vadd.f32 %v3455_v59, %v1275_v6  ;;  %v1374_v10 = vpop.f32.mrf.mxu1 }
  0xa3   :  { %v1375_v12 = vadd.f32 %v1374_v10, %v1276_v9  ;;  %1314 = vmatmul.bf16.gmra.mxu0 %v718_v5  ;;  %v353_v5 = vld [vmem:[%s5923_s0 + $0xa98] sm:$0xff] }
  0xa4   :  { %1413 = vmatmul.bf16.gmra.mxu1 %v719_v7  ;;  %v750_v7 = vpack.c.bf16 %v350_v49, %v334_v48 }
  0xa5   :  { %1512 = vmatmul.bf16.gmra.mxu2 %v720_v8 }
  0xa6   :  { %1611 = vmatmul.bf16.gmra.mxu3 %v721_v11  ;;  %v751_v11 = vpack.c.bf16 %v351_v63, %v335_v53  ;;  %v944_v63 = vld [vmem:[%s5922_s1 + $0x210] sm:$0xff] }
  0xa8   :  { %v1473_v13 = vpop.f32.mrf.mxu2  ;;  %v1277_v16 = vpop.f32.mrf.mxu0 }
  0xa9   :  { %v1474_v14 = vadd.f32 %v1473_v13, %v1375_v12  ;;  %v1572_v15 = vpop.f32.mrf.mxu3  ;;  %v1278_v17 = vadd.f32 %v3455_v59, %v1277_v16  ;;  %v1376_v18 = vpop.f32.mrf.mxu1  ;;  %v752_v12 = vpack.c.bf16 %v352_v1, %v336_v0  ;;  %v1183_v0 = vpack.c.bf16 %v977_v62, %v976_v61  ;;  %v945_v1 = vld [vmem:[%s5922_s1 + $0x218] sm:$0xff] }
  0xab   :  { %v3483_v19 = vadd.f32 %v1572_v15, %v1474_v14  ;;  %v1377_v20 = vadd.f32 %v1376_v18, %v1278_v17  ;;  %v753_v15 = vpack.c.bf16 %v353_v5, %v337_v4  ;;  %v415_v4 = vld [vmem:[%s5923_s0 + $0xc88] sm:$0xff]  ;;  %v400_v5 = vld [vmem:[%s5923_s0 + $0xc10] sm:$0xff]  ;;  %1866 = vmatpush.bf16.msrb.mxu2 %v1183_v0 }
  0xb0   :  { %v1475_v29 = vpop.f32.mrf.mxu2  ;;  %v1280_v33 = vpop.f32.mrf.mxu0 }
  0xb1   :  { %v1476_v31 = vadd.f32 %v1475_v29, %v1377_v20  ;;  %v1574_v32 = vpop.f32.mrf.mxu3  ;;  %v1281_v36 = vadd.f32 %v3455_v59, %v1280_v33  ;;  %v1379_v37 = vpop.f32.mrf.mxu1  ;;  %v367_v29 = vld [vmem:[%s5923_s0 + $0xb08] sm:$0xff]  ;;  %v369_v33 = vld [vmem:[%s5923_s0 + $0xb18] sm:$0xff] }
  0xb3   :  { %v3510_v39 = vadd.f32 %v1574_v32, %v1476_v31  ;;  %v1380_v40 = vadd.f32 %v1379_v37, %v1281_v36  ;;  %1319 = vmatmul.bf16.gmra.mxu0 %v734_v30  ;;  %v383_v30 = vld [vmem:[%s5923_s0 + $0xb88] sm:$0xff]  ;;  %v368_v31 = vld [vmem:[%s5923_s0 + $0xb10] sm:$0xff]  ;;  %v766_v36 = vpack.c.bf16 %v382_v28, %v366_v27 }
  0xb4   :  { %1418 = vmatmul.bf16.gmra.mxu1 %v735_v34  ;;  %v384_v32 = vld [vmem:[%s5923_s0 + $0xb90] sm:$0xff]  ;;  %v385_v34 = vld [vmem:[%s5923_s0 + $0xb98] sm:$0xff] }
  0xb5   :  { %1517 = vmatmul.bf16.gmra.mxu2 %v736_v35 }
  0xb6   :  { %1616 = vmatmul.bf16.gmra.mxu3 %v737_v38 }
  0xb8   :  { %v1478_v41 = vpop.f32.mrf.mxu2  ;;  %v1282_v44 = vpop.f32.mrf.mxu0 }
  0xb9   :  { %v1479_v42 = vadd.f32 %v1478_v41, %v1380_v40  ;;  %v1577_v43 = vpop.f32.mrf.mxu3  ;;  %v1283_v45 = vadd.f32 %v3455_v59, %v1282_v44  ;;  %v1381_v46 = vpop.f32.mrf.mxu1  ;;  %v767_v41 = vpack.c.bf16 %v383_v30, %v367_v29 }
  0xbb   :  { %v3513_v47 = vadd.f32 %v1577_v43, %v1479_v42  ;;  %v1382_v52 = vadd.f32 %v1381_v46, %v1283_v45  ;;  %v768_v42 = vpack.c.bf16 %v384_v32, %v368_v31  ;;  %v769_v45 = vpack.c.bf16 %v385_v34, %v369_v33 }
  0xc0   :  { %v1480_v6 = vpop.f32.mrf.mxu2  ;;  %v1285_v10 = vpop.f32.mrf.mxu0 }
  0xc1   :  { %v1481_v8 = vadd.f32 %v1480_v6, %v1382_v52  ;;  %v1579_v9 = vpop.f32.mrf.mxu3  ;;  %v1286_v13 = vadd.f32 %v3455_v59, %v1285_v10  ;;  %v1384_v14 = vpop.f32.mrf.mxu1  ;;  %v416_v6 = vld [vmem:[%s5923_s0 + $0xc90] sm:$0xff]  ;;  %v417_v10 = vld [vmem:[%s5923_s0 + $0xc98] sm:$0xff] }
  0xc3   :  { %v3564_v16 = vadd.f32 %v1579_v9, %v1481_v8  ;;  %v1385_v17 = vadd.f32 %v1384_v14, %v1286_v13  ;;  %1324 = vmatmul.bf16.gmra.mxu0 %v750_v7  ;;  %v1167_v7 = vpack.c.bf16 %v945_v1, %v944_v63  ;;  %v1191_v8 = vpack.c.bf16 %v993_v3, %v992_v2  ;;  %v401_v9 = vld [vmem:[%s5923_s0 + $0xc18] sm:$0xff] }
  0xc4   :  { %1423 = vmatmul.bf16.gmra.mxu1 %v751_v11 }
  0xc5   :  { %1522 = vmatmul.bf16.gmra.mxu2 %v752_v12  ;;  %v782_v12 = vpack.c.bf16 %v414_v57, %v398_v56  ;;  %1668 = vmatpush.bf16.msrb.mxu0 %v1167_v7  ;;  %v478_v7 = vld [vmem:[%s5923_s0 + $0xe80] sm:$0xff] }
  0xc6   :  { %1621 = vmatmul.bf16.gmra.mxu3 %v753_v15 }
  0xc7   :  { %1965 = vmatpush.bf16.msrb.mxu3 %v1191_v8  ;;  %v463_v8 = vld [vmem:[%s5923_s0 + $0xe08] sm:$0xff] }
  0xc8   :  { %v1483_v18 = vpop.f32.mrf.mxu2  ;;  %v1287_v22 = vpop.f32.mrf.mxu0 }
  0xc9   :  { %v1484_v20 = vadd.f32 %v1483_v18, %v1385_v17  ;;  %v1582_v21 = vpop.f32.mrf.mxu3  ;;  %v1288_v23 = vadd.f32 %v3455_v59, %v1287_v22  ;;  %v1386_v24 = vpop.f32.mrf.mxu1  ;;  %v783_v17 = vpack.c.bf16 %v415_v4, %v399_v60  ;;  %v784_v18 = vpack.c.bf16 %v416_v6, %v400_v5  ;;  %v462_v6 = vld [vmem:[%s5923_s0 + $0xe00] sm:$0xff] }
  0xca   :  { %v785_v22 = vpack.c.bf16 %v417_v10, %v401_v9  ;;  %v479_v9 = vld [vmem:[%s5923_s0 + $0xe88] sm:$0xff]  ;;  %v464_v10 = vld [vmem:[%s5923_s0 + $0xe10] sm:$0xff] }
  0xcb   :  { %v3567_v25 = vadd.f32 %v1582_v21, %v1484_v20  ;;  %v1387_v26 = vadd.f32 %v1386_v24, %v1288_v23  ;;  %v960_v24 = vld [vmem:[%s5922_s1 + $0x290] sm:$0xff] }
  0xd0   :  { %v1485_v35 = vpop.f32.mrf.mxu2  ;;  %v1290_v40 = vpop.f32.mrf.mxu0 }
  0xd1   :  { %v1486_v37 = vadd.f32 %v1485_v35, %v1387_v26  ;;  %v1584_v38 = vpop.f32.mrf.mxu3  ;;  %v1291_v43 = vadd.f32 %v3455_v59, %v1290_v40  ;;  %v1389_v44 = vpop.f32.mrf.mxu1  ;;  %v961_v26 = vld [vmem:[%s5922_s1 + $0x298] sm:$0xff]  ;;  %v431_v40 = vld [vmem:[%s5923_s0 + $0xd08] sm:$0xff] }
  0xd2   :  { %v1175_v28 = vpack.c.bf16 %v961_v26, %v960_v24 }
  0xd3   :  { %v3594_v46 = vadd.f32 %v1584_v38, %v1486_v37  ;;  %v1390_v48 = vadd.f32 %v1389_v44, %v1291_v43  ;;  %1329 = vmatmul.bf16.gmra.mxu0 %v766_v36  ;;  %v430_v37 = vld [vmem:[%s5923_s0 + $0xd00] sm:$0xff]  ;;  %v448_v43 = vld [vmem:[%s5923_s0 + $0xd90] sm:$0xff]  ;;  %v433_v44 = vld [vmem:[%s5923_s0 + $0xd18] sm:$0xff] }
  0xd4   :  { %1428 = vmatmul.bf16.gmra.mxu1 %v767_v41  ;;  %v446_v38 = vld [vmem:[%s5923_s0 + $0xd80] sm:$0xff]  ;;  %v447_v41 = vld [vmem:[%s5923_s0 + $0xd88] sm:$0xff] }
  0xd5   :  { %1527 = vmatmul.bf16.gmra.mxu2 %v768_v42  ;;  %1767 = vmatpush.bf16.msrb.mxu1 %v1175_v28  ;;  %v432_v42 = vld [vmem:[%s5923_s0 + $0xd10] sm:$0xff] }
  0xd6   :  { %1626 = vmatmul.bf16.gmra.mxu3 %v769_v45  ;;  %v449_v45 = vld [vmem:[%s5923_s0 + $0xd98] sm:$0xff] }
  0xd8   :  { %v1488_v49 = vpop.f32.mrf.mxu2  ;;  %v1292_v52 = vpop.f32.mrf.mxu0 }
  0xd9   :  { %v1489_v50 = vadd.f32 %v1488_v49, %v1390_v48  ;;  %v1587_v51 = vpop.f32.mrf.mxu3  ;;  %v1293_v53 = vadd.f32 %v3455_v59, %v1292_v52  ;;  %v1391_v54 = vpop.f32.mrf.mxu1  ;;  %v798_v49 = vpack.c.bf16 %v446_v38, %v430_v37  ;;  %v991_v38 = vld [vmem:[%s5922_s1 + $0x388] sm:$0xff] }
  0xdb   :  { %v3597_v55 = vadd.f32 %v1587_v51, %v1489_v50  ;;  %v1392_v58 = vadd.f32 %v1391_v54, %v1293_v53  ;;  %v799_v53 = vpack.c.bf16 %v447_v41, %v431_v40  ;;  %v800_v54 = vpack.c.bf16 %v448_v43, %v432_v42  ;;  %v958_v41 = vld [vmem:[%s5922_s1 + $0x280] sm:$0xff]  ;;  %v959_v43 = vld [vmem:[%s5922_s1 + $0x288] sm:$0xff] }
  0xe0   :  { %v1490_v11 = vpop.f32.mrf.mxu2  ;;  %v1295_v15 = vpop.f32.mrf.mxu0 }
  0xe1   :  { %v1491_v13 = vadd.f32 %v1490_v11, %v1392_v58  ;;  %v1589_v14 = vpop.f32.mrf.mxu3  ;;  %v1296_v20 = vadd.f32 %v3455_v59, %v1295_v15  ;;  %v1394_v21 = vpop.f32.mrf.mxu1  ;;  %v801_v58 = vpack.c.bf16 %v449_v45, %v433_v44  ;;  %v480_v11 = vld [vmem:[%s5923_s0 + $0xe90] sm:$0xff]  ;;  %v814_v15 = vpack.c.bf16 %v478_v7, %v462_v6 }
  0xe3   :  { %v3642_v23 = vadd.f32 %v1589_v14, %v1491_v13  ;;  %v1395_v27 = vadd.f32 %v1394_v21, %v1296_v20  ;;  %1334 = vmatmul.bf16.gmra.mxu0 %v782_v12  ;;  %v465_v12 = vld [vmem:[%s5923_s0 + $0xe18] sm:$0xff]  ;;  %v815_v21 = vpack.c.bf16 %v479_v9, %v463_v8 }
  0xe4   :  { %1433 = vmatmul.bf16.gmra.mxu1 %v783_v17  ;;  %v481_v13 = vld [vmem:[%s5923_s0 + $0xe98] sm:$0xff] }
  0xe5   :  { %1532 = vmatmul.bf16.gmra.mxu2 %v784_v18 }
  0xe6   :  { %1631 = vmatmul.bf16.gmra.mxu3 %v785_v22  ;;  %v816_v22 = vpack.c.bf16 %v480_v11, %v464_v10 }
  0xe8   :  { %v1493_v29 = vpop.f32.mrf.mxu2  ;;  %v1297_v32 = vpop.f32.mrf.mxu0 }
  0xe9   :  { %v1494_v30 = vadd.f32 %v1493_v29, %v1395_v27  ;;  %v1592_v31 = vpop.f32.mrf.mxu3  ;;  %v1298_v33 = vadd.f32 %v3455_v59, %v1297_v32  ;;  %v1396_v34 = vpop.f32.mrf.mxu1  ;;  %v817_v27 = vpack.c.bf16 %v481_v13, %v465_v12  ;;  %v974_v29 = vld [vmem:[%s5922_s1 + $0x300] sm:$0xff] }
  0xeb   :  { %v3651_v35 = vadd.f32 %v1592_v31, %v1494_v30  ;;  %v1397_v36 = vadd.f32 %v1396_v34, %v1298_v33  ;;  %v975_v30 = vld [vmem:[%s5922_s1 + $0x308] sm:$0xff]  ;;  %v942_v33 = vld [vmem:[%s5922_s1 + $0x200] sm:$0xff] }
  0xec   :  { %v1182_v32 = vpack.c.bf16 %v975_v30, %v974_v29  ;;  %v943_v34 = vld [vmem:[%s5922_s1 + $0x208] sm:$0xff] }
  0xed   :  { %v1166_v37 = vpack.c.bf16 %v943_v34, %v942_v33  ;;  %v527_v29 = vld [vmem:[%s5923_s0 + $0x1008] sm:$0xff]  ;;  %v529_v33 = vld [vmem:[%s5923_s0 + $0x1018] sm:$0xff] }
  0xee   :  { %1867 = vmatpush.bf16.msrb.mxu2 %v1182_v32  ;;  %v543_v30 = vld [vmem:[%s5923_s0 + $0x1088] sm:$0xff]  ;;  %v544_v32 = vld [vmem:[%s5923_s0 + $0x1090] sm:$0xff]  ;;  %v545_v34 = vld [vmem:[%s5923_s0 + $0x1098] sm:$0xff] }
  0xef   :  { %1669 = vmatpush.bf16.msrb.mxu0 %v1166_v37 }
  0xf0   :  { %v1495_v48 = vpop.f32.mrf.mxu2  ;;  %v1300_v52 = vpop.f32.mrf.mxu0 }
  0xf1   :  { %v1496_v50 = vadd.f32 %v1495_v48, %v1397_v36  ;;  %v1594_v51 = vpop.f32.mrf.mxu3  ;;  %v1301_v56 = vadd.f32 %v3455_v59, %v1300_v52  ;;  %v1399_v57 = vpop.f32.mrf.mxu1  ;;  %v990_v36 = vld [vmem:[%s5922_s1 + $0x380] sm:$0xff] }
  0xf2   :  { %v1190_v40 = vpack.c.bf16 %v991_v38, %v990_v36 }
  0xf3   :  { %v3678_v60 = vadd.f32 %v1594_v51, %v1496_v50  ;;  %v1400_v61 = vadd.f32 %v1399_v57, %v1301_v56  ;;  %1339 = vmatmul.bf16.gmra.mxu0 %v798_v49  ;;  %v1174_v49 = vpack.c.bf16 %v959_v43, %v958_v41  ;;  %v510_v56 = vld [vmem:[%s5923_s0 + $0xf80] sm:$0xff]  ;;  %v495_v57 = vld [vmem:[%s5923_s0 + $0xf08] sm:$0xff] }
  0xf4   :  { %1438 = vmatmul.bf16.gmra.mxu1 %v799_v53  ;;  %1966 = vmatpush.bf16.msrb.mxu3 %v1190_v40 }
  0xf5   :  { %1537 = vmatmul.bf16.gmra.mxu2 %v800_v54  ;;  %1768 = vmatpush.bf16.msrb.mxu1 %v1174_v49  ;;  %v494_v54 = vld [vmem:[%s5923_s0 + $0xf00] sm:$0xff] }
  0xf6   :  { %1636 = vmatmul.bf16.gmra.mxu3 %v801_v58  ;;  %v511_v58 = vld [vmem:[%s5923_s0 + $0xf88] sm:$0xff] }
  0xf7   :  { %v831_v7 = vpack.c.bf16 %v511_v58, %v495_v57  ;;  %v1021_v57 = vld [vmem:[%s5922_s1 + $0x478] sm:$0xff]  ;;  %v1068_v58 = vld [vmem:[%s5922_s1 + $0x5f0] sm:$0xff] }
  0xf8   :  { %v1498_v62 = vpop.f32.mrf.mxu2  ;;  %v1302_v1 = vpop.f32.mrf.mxu0 }
  0xf9   :  { %v1499_v63 = vadd.f32 %v1498_v62, %v1400_v61  ;;  %v1597_v0 = vpop.f32.mrf.mxu3  ;;  %v1303_v2 = vadd.f32 %v3455_v59, %v1302_v1  ;;  %v1401_v3 = vpop.f32.mrf.mxu1  ;;  %v496_v61 = vld [vmem:[%s5923_s0 + $0xf10] sm:$0xff] }
  0xfa   :  { %v512_v62 = vld [vmem:[%s5923_s0 + $0xf90] sm:$0xff] }
  0xfb   :  { %v3681_v4 = vadd.f32 %v1597_v0, %v1499_v63  ;;  %v1402_v5 = vadd.f32 %v1401_v3, %v1303_v2  ;;  %v497_v63 = vld [vmem:[%s5923_s0 + $0xf18] sm:$0xff]  ;;  %v830_v2 = vpack.c.bf16 %v510_v56, %v494_v54  ;;  %v832_v8 = vpack.c.bf16 %v512_v62, %v496_v61  ;;  %v1020_v54 = vld [vmem:[%s5922_s1 + $0x470] sm:$0xff] }
  0xfc   :  { %v513_v0 = vld [vmem:[%s5923_s0 + $0xf98] sm:$0xff] }
  0xfd   :  { %v833_v11 = vpack.c.bf16 %v513_v0, %v497_v63  ;;  %v1069_v61 = vld [vmem:[%s5922_s1 + $0x5f8] sm:$0xff]  ;;  %v1205_v63 = vpack.c.bf16 %v1021_v57, %v1020_v54  ;;  %v34_v54 = vld [vmem:[%s5923_s0 + $0xa0] sm:$0xff]  ;;  %v35_v57 = vld [vmem:[%s5923_s0 + $0xa8] sm:$0xff] }
  0xfe   :  { %v1229_v0 = vpack.c.bf16 %v1069_v61, %v1068_v58  ;;  %v20_v58 = vld [vmem:[%s5923_s0 + $0x30] sm:$0xff] }
  0xff   :  { %2058 = vmatpush.bf16.msra.mxu0 %v1205_v63  ;;  %v36_v61 = vld [vmem:[%s5923_s0 + $0xb0] sm:$0xff]  ;;  %v37_v63 = vld [vmem:[%s5923_s0 + $0xb8] sm:$0xff] }
 0x100   :  { %v1500_v14 = vpop.f32.mrf.mxu2  ;;  %v1305_v20 = vpop.f32.mrf.mxu0  ;;  %2355 = vmatpush.bf16.msra.mxu3 %v1229_v0 }
 0x101   :  { %v1501_v17 = vadd.f32 %v1500_v14, %v1402_v5  ;;  %v1599_v18 = vpop.f32.mrf.mxu3  ;;  %v1306_v24 = vadd.f32 %v3455_v59, %v1305_v20  ;;  %v1404_v26 = vpop.f32.mrf.mxu1 }
 0x103   :  { %v3708_v28 = vadd.f32 %v1599_v18, %v1501_v17  ;;  %v1405_v31 = vadd.f32 %v1404_v26, %v1306_v24  ;;  %1344 = vmatmul.bf16.gmra.mxu0 %v814_v15  ;;  %v526_v26 = vld [vmem:[%s5923_s0 + $0x1000] sm:$0xff] }
 0x104   :  { %1443 = vmatmul.bf16.gmra.mxu1 %v815_v21 }
 0x105   :  { %1542 = vmatmul.bf16.gmra.mxu2 %v816_v22 }
 0x106   :  { %1641 = vmatmul.bf16.gmra.mxu3 %v817_v27  ;;  %v542_v27 = vld [vmem:[%s5923_s0 + $0x1080] sm:$0xff] }
 0x107   :  { %v846_v37 = vpack.c.bf16 %v542_v27, %v526_v26 }
 0x108   :  { %v1503_v42 = vpop.f32.mrf.mxu2  ;;  %v1307_v48 = vpop.f32.mrf.mxu0 }
 0x109   :  { %v1504_v44 = vadd.f32 %v1503_v42, %v1405_v31  ;;  %v1602_v45 = vpop.f32.mrf.mxu3  ;;  %v1308_v50 = vadd.f32 %v3455_v59, %v1307_v48  ;;  %v1406_v51 = vpop.f32.mrf.mxu1  ;;  %v528_v31 = vld [vmem:[%s5923_s0 + $0x1010] sm:$0xff]  ;;  %v847_v42 = vpack.c.bf16 %v543_v30, %v527_v29  ;;  %v849_v48 = vpack.c.bf16 %v545_v34, %v529_v33 }
 0x10a   :  { %v848_v43 = vpack.c.bf16 %v544_v32, %v528_v31 }
 0x10b   :  { %v3735_v52 = vadd.f32 %v1602_v45, %v1504_v44  ;;  %v1407_v53 = vadd.f32 %v1406_v51, %v1308_v50  ;;  %v1052_v51 = vld [vmem:[%s5922_s1 + $0x570] sm:$0xff] }
 0x110   :  { %v1505_v1 = vpop.f32.mrf.mxu2  ;;  %v1310_v6 = vpop.f32.mrf.mxu0 }
 0x111   :  { %v1506_v3 = vadd.f32 %v1505_v1, %v1407_v53  ;;  %v1604_v5 = vpop.f32.mrf.mxu3  ;;  %v1311_v9 = vadd.f32 %v3455_v59, %v1310_v6  ;;  %v1409_v10 = vpop.f32.mrf.mxu1  ;;  %v1053_v53 = vld [vmem:[%s5922_s1 + $0x578] sm:$0xff] }
 0x112   :  { %v1221_v56 = vpack.c.bf16 %v1053_v53, %v1052_v51  ;;  %v18_v53 = vld [vmem:[%s5923_s0 + $0x20] sm:$0xff] }
 0x113   :  { %v3762_v12 = vadd.f32 %v1604_v5, %v1506_v3  ;;  %v1410_v13 = vadd.f32 %v1409_v10, %v1311_v9  ;;  %1349 = vmatmul.bf16.gmra.mxu0 %v830_v2  ;;  %v1037_v9 = vld [vmem:[%s5922_s1 + $0x4f8] sm:$0xff] }
 0x114   :  { %1448 = vmatmul.bf16.gmra.mxu1 %v831_v7  ;;  %2256 = vmatpush.bf16.msra.mxu2 %v1221_v56  ;;  %v19_v56 = vld [vmem:[%s5923_s0 + $0x28] sm:$0xff] }
 0x115   :  { %1547 = vmatmul.bf16.gmra.mxu2 %v832_v8  ;;  %v1036_v8 = vld [vmem:[%s5922_s1 + $0x4f0] sm:$0xff] }
 0x116   :  { %1646 = vmatmul.bf16.gmra.mxu3 %v833_v11  ;;  %v1213_v11 = vpack.c.bf16 %v1037_v9, %v1036_v8  ;;  %v596_v8 = vpack.c.bf16 %v36_v61, %v20_v58 }
 0x118   :  { %v1508_v14 = vpop.f32.mrf.mxu2  ;;  %v1312_v18 = vpop.f32.mrf.mxu0  ;;  %2157 = vmatpush.bf16.msra.mxu1 %v1213_v11 }
 0x119   :  { %v1509_v15 = vadd.f32 %v1508_v14, %v1410_v13  ;;  %v1607_v17 = vpop.f32.mrf.mxu3  ;;  %v1313_v20 = vadd.f32 %v3455_v59, %v1312_v18  ;;  %v1411_v21 = vpop.f32.mrf.mxu1  ;;  %v558_v13 = vld [vmem:[%s5923_s0 + $0x1100] sm:$0xff]  ;;  %v560_v18 = vld [vmem:[%s5923_s0 + $0x1110] sm:$0xff] }
 0x11a   :  { %v574_v14 = vld [vmem:[%s5923_s0 + $0x1180] sm:$0xff] }
 0x11b   :  { %v3765_v22 = vadd.f32 %v1607_v17, %v1509_v15  ;;  %v1412_v24 = vadd.f32 %v1411_v21, %v1313_v20  ;;  %v559_v15 = vld [vmem:[%s5923_s0 + $0x1108] sm:$0xff]  ;;  %v576_v20 = vld [vmem:[%s5923_s0 + $0x1190] sm:$0xff]  ;;  %v561_v21 = vld [vmem:[%s5923_s0 + $0x1118] sm:$0xff]  ;;  %v862_v27 = vpack.c.bf16 %v574_v14, %v558_v13 }
 0x11c   :  { %v575_v17 = vld [vmem:[%s5923_s0 + $0x1188] sm:$0xff]  ;;  %v864_v33 = vpack.c.bf16 %v576_v20, %v560_v18 }
 0x11d   :  { %v863_v32 = vpack.c.bf16 %v575_v17, %v559_v15 }
 0x120   :  { %v1510_v36 = vpop.f32.mrf.mxu2  ;;  %v1315_v41 = vpop.f32.mrf.mxu0 }
 0x121   :  { %v1511_v38 = vadd.f32 %v1510_v36, %v1412_v24  ;;  %v1609_v40 = vpop.f32.mrf.mxu3  ;;  %v1316_v44 = vadd.f32 %v3455_v59, %v1315_v41  ;;  %v1414_v45 = vpop.f32.mrf.mxu1  ;;  %v577_v24 = vld [vmem:[%s5923_s0 + $0x1198] sm:$0xff] }
 0x123   :  { %v3792_v49 = vadd.f32 %v1609_v40, %v1511_v38  ;;  %v1415_v50 = vadd.f32 %v1414_v45, %v1316_v44  ;;  %1354 = vmatmul.bf16.gmra.mxu0 %v846_v37  ;;  %v865_v37 = vpack.c.bf16 %v577_v24, %v561_v21 }
 0x124   :  { %1453 = vmatmul.bf16.gmra.mxu1 %v847_v42 }
 0x125   :  { %1552 = vmatmul.bf16.gmra.mxu2 %v848_v43 }
 0x126   :  { %1651 = vmatmul.bf16.gmra.mxu3 %v849_v48 }
 0x128   :  { %v1513_v62 = vpop.f32.mrf.mxu2  ;;  %v1317_v3 = vpop.f32.mrf.mxu0 }
 0x129   :  { %v1514_v1 = vadd.f32 %v1513_v62, %v1415_v50  ;;  %v1612_v2 = vpop.f32.mrf.mxu3  ;;  %v1318_v5 = vadd.f32 %v3455_v59, %v1317_v3  ;;  %v1416_v6 = vpop.f32.mrf.mxu1  ;;  %v21_v62 = vld [vmem:[%s5923_s0 + $0x38] sm:$0xff] }
 0x12a   :  { %v597_v11 = vpack.c.bf16 %v37_v63, %v21_v62 }
 0x12b   :  { %v3813_v7 = vadd.f32 %v1612_v2, %v1514_v1  ;;  %v1417_v10 = vadd.f32 %v1416_v6, %v1318_v5  ;;  %v594_v1 = vpack.c.bf16 %v34_v54, %v18_v53  ;;  %v595_v6 = vpack.c.bf16 %v35_v57, %v19_v56  ;;  %v53_v56 = vld [vmem:[%s5923_s0 + $0x138] sm:$0xff] }
 0x12c   :  { %v69_v57 = vld [vmem:[%s5923_s0 + $0x1b8] sm:$0xff] }
 0x130   :  { %v1515_v26 = vpop.f32.mrf.mxu2  ;;  %v1320_v31 = vpop.f32.mrf.mxu0 }
 0x131   :  { %v1516_v29 = vadd.f32 %v1515_v26, %v1417_v10  ;;  %v1614_v30 = vpop.f32.mrf.mxu3  ;;  %v1321_v34 = vadd.f32 %v3455_v59, %v1320_v31  ;;  %v1419_v36 = vpop.f32.mrf.mxu1  ;;  %v1051_v31 = vld [vmem:[%s5922_s1 + $0x568] sm:$0xff] }
 0x133   :  { %v3846_v38 = vadd.f32 %v1614_v30, %v1516_v29  ;;  %v1420_v40 = vadd.f32 %v1419_v36, %v1321_v34  ;;  %1359 = vmatmul.bf16.gmra.mxu0 %v862_v27  ;;  %v50_v27 = vld [vmem:[%s5923_s0 + $0x120] sm:$0xff] }
 0x134   :  { %1458 = vmatmul.bf16.gmra.mxu1 %v863_v32  ;;  %v66_v29 = vld [vmem:[%s5923_s0 + $0x1a0] sm:$0xff] }
 0x135   :  { %1557 = vmatmul.bf16.gmra.mxu2 %v864_v33  ;;  %v1050_v30 = vld [vmem:[%s5922_s1 + $0x560] sm:$0xff]  ;;  %v51_v33 = vld [vmem:[%s5923_s0 + $0x128] sm:$0xff]  ;;  %v610_v61 = vpack.c.bf16 %v66_v29, %v50_v27 }
 0x136   :  { %1656 = vmatmul.bf16.gmra.mxu3 %v865_v37  ;;  %v1220_v34 = vpack.c.bf16 %v1051_v31, %v1050_v30  ;;  %v1018_v36 = vld [vmem:[%s5922_s1 + $0x460] sm:$0xff]  ;;  %v1019_v37 = vld [vmem:[%s5922_s1 + $0x468] sm:$0xff]  ;;  %v84_v31 = vld [vmem:[%s5923_s0 + $0x230] sm:$0xff] }
 0x137   :  { %v98_v27 = vld [vmem:[%s5923_s0 + $0x2a0] sm:$0xff]  ;;  %v83_v29 = vld [vmem:[%s5923_s0 + $0x228] sm:$0xff] }
 0x138   :  { %v1518_v41 = vpop.f32.mrf.mxu2  ;;  %v1322_v44 = vpop.f32.mrf.mxu0  ;;  %2257 = vmatpush.bf16.msra.mxu2 %v1220_v34  ;;  %v99_v30 = vld [vmem:[%s5923_s0 + $0x2a8] sm:$0xff]  ;;  %v101_v34 = vld [vmem:[%s5923_s0 + $0x2b8] sm:$0xff] }
 0x139   :  { %v1519_v42 = vadd.f32 %v1518_v41, %v1420_v40  ;;  %v1617_v43 = vpop.f32.mrf.mxu3  ;;  %v1323_v45 = vadd.f32 %v3455_v59, %v1322_v44  ;;  %v1421_v48 = vpop.f32.mrf.mxu1  ;;  %v1066_v40 = vld [vmem:[%s5922_s1 + $0x5e0] sm:$0xff]  ;;  %v1204_v41 = vpack.c.bf16 %v1019_v37, %v1018_v36  ;;  %v1035_v44 = vld [vmem:[%s5922_s1 + $0x4e8] sm:$0xff] }
 0x13b   :  { %v3849_v50 = vadd.f32 %v1617_v43, %v1519_v42  ;;  %v1422_v51 = vadd.f32 %v1421_v48, %v1323_v45  ;;  %v1067_v42 = vld [vmem:[%s5922_s1 + $0x5e8] sm:$0xff]  ;;  %v1034_v43 = vld [vmem:[%s5922_s1 + $0x4e0] sm:$0xff]  ;;  %v52_v48 = vld [vmem:[%s5923_s0 + $0x130] sm:$0xff]  ;;  %2059 = vmatpush.bf16.msra.mxu0 %v1204_v41 }
 0x13c   :  { %v67_v45 = vld [vmem:[%s5923_s0 + $0x1a8] sm:$0xff]  ;;  %v1228_v53 = vpack.c.bf16 %v1067_v42, %v1066_v40  ;;  %v1212_v54 = vpack.c.bf16 %v1035_v44, %v1034_v43  ;;  %v627_v43 = vpack.c.bf16 %v99_v30, %v83_v29  ;;  %v117_v29 = vld [vmem:[%s5923_s0 + $0x338] sm:$0xff] }
 0x13d   :  { %v133_v30 = vld [vmem:[%s5923_s0 + $0x3b8] sm:$0xff] }
 0x13e   :  { %2356 = vmatpush.bf16.msra.mxu3 %v1228_v53  ;;  %2158 = vmatpush.bf16.msra.mxu1 %v1212_v54 }
 0x140   :  { %v1520_v0 = vpop.f32.mrf.mxu2  ;;  %v1325_v5 = vpop.f32.mrf.mxu0 }
 0x141   :  { %v1521_v2 = vadd.f32 %v1520_v0, %v1422_v51  ;;  %v1619_v3 = vpop.f32.mrf.mxu3  ;;  %v1326_v9 = vadd.f32 %v3455_v59, %v1325_v5  ;;  %v1424_v10 = vpop.f32.mrf.mxu1  ;;  %v68_v51 = vld [vmem:[%s5923_s0 + $0x1b0] sm:$0xff] }
 0x143   :  { %v3876_v13 = vadd.f32 %v1619_v3, %v1521_v2  ;;  %v1425_v14 = vadd.f32 %v1424_v10, %v1326_v9  ;;  %1670 = vmatmul.bf16.vlgmr.msrb.gmra.mxu0 %v594_v1  ;;  %v611_v1 = vpack.c.bf16 %v67_v45, %v51_v33  ;;  %v612_v2 = vpack.c.bf16 %v68_v51, %v52_v48  ;;  %v85_v33 = vld [vmem:[%s5923_s0 + $0x238] sm:$0xff] }
 0x144   :  { %1769 = vmatmul.bf16.vlgmr.msrb.gmra.mxu1 %v595_v6  ;;  %v613_v6 = vpack.c.bf16 %v69_v57, %v53_v56  ;;  %v629_v51 = vpack.c.bf16 %v101_v34, %v85_v33 }
 0x145   :  { %1868 = vmatmul.bf16.vlgmr.msrb.gmra.mxu2 %v596_v8 }
 0x146   :  { %1967 = vmatmul.bf16.vlgmr.msrb.gmra.mxu3 %v597_v11 }
 0x148   :  { %v1523_v15 = vpop.f32.mrf.mxu2  ;;  %v1327_v20 = vpop.f32.mrf.mxu0 }
 0x149   :  { %v1524_v17 = vadd.f32 %v1523_v15, %v1425_v14  ;;  %v1622_v18 = vpop.f32.mrf.mxu3  ;;  %v1328_v21 = vadd.f32 %v3455_v59, %v1327_v20  ;;  %v1426_v24 = vpop.f32.mrf.mxu1 }
 0x14b   :  { %v3879_v26 = vadd.f32 %v1622_v18, %v1524_v17  ;;  %v1427_v32 = vadd.f32 %v1426_v24, %v1328_v21  ;;  %v82_v24 = vld [vmem:[%s5923_s0 + $0x220] sm:$0xff] }
 0x14c   :  { %v626_v37 = vpack.c.bf16 %v98_v27, %v82_v24 }
 0x150   :  { %v1525_v58 = vpop.f32.mrf.mxu2  ;;  %v1330_v0 = vpop.f32.mrf.mxu0 }
 0x151   :  { %v1526_v62 = vadd.f32 %v1525_v58, %v1427_v32  ;;  %v1624_v63 = vpop.f32.mrf.mxu3  ;;  %v1331_v3 = vadd.f32 %v3455_v59, %v1330_v0  ;;  %v1429_v5 = vpop.f32.mrf.mxu1  ;;  %v100_v32 = vld [vmem:[%s5923_s0 + $0x2b0] sm:$0xff] }
 0x152   :  { %v628_v44 = vpack.c.bf16 %v100_v32, %v84_v31 }
 0x153   :  { %v3930_v8 = vadd.f32 %v1624_v63, %v1526_v62  ;;  %v1430_v9 = vadd.f32 %v1429_v5, %v1331_v3  ;;  %1675 = vmatmul.bf16.gmra.mxu0 %v610_v61  ;;  %v115_v5 = vld [vmem:[%s5923_s0 + $0x328] sm:$0xff] }
 0x154   :  { %1774 = vmatmul.bf16.gmra.mxu1 %v611_v1  ;;  %v114_v1 = vld [vmem:[%s5923_s0 + $0x320] sm:$0xff] }
 0x155   :  { %1873 = vmatmul.bf16.gmra.mxu2 %v612_v2  ;;  %v130_v2 = vld [vmem:[%s5923_s0 + $0x3a0] sm:$0xff] }
 0x156   :  { %1972 = vmatmul.bf16.gmra.mxu3 %v613_v6  ;;  %v1049_v6 = vld [vmem:[%s5922_s1 + $0x558] sm:$0xff]  ;;  %v642_v32 = vpack.c.bf16 %v130_v2, %v114_v1 }
 0x158   :  { %v1528_v10 = vpop.f32.mrf.mxu2  ;;  %v1332_v15 = vpop.f32.mrf.mxu0 }
 0x159   :  { %v1529_v11 = vadd.f32 %v1528_v10, %v1430_v9  ;;  %v1627_v14 = vpop.f32.mrf.mxu3  ;;  %v1333_v17 = vadd.f32 %v3455_v59, %v1332_v15  ;;  %v1431_v18 = vpop.f32.mrf.mxu1  ;;  %v1016_v9 = vld [vmem:[%s5922_s1 + $0x450] sm:$0xff]  ;;  %v1065_v15 = vld [vmem:[%s5922_s1 + $0x5d8] sm:$0xff] }
 0x15b   :  { %v3933_v20 = vadd.f32 %v1627_v14, %v1529_v11  ;;  %v1432_v21 = vadd.f32 %v1431_v18, %v1333_v17  ;;  %v1017_v11 = vld [vmem:[%s5922_s1 + $0x458] sm:$0xff]  ;;  %v1064_v14 = vld [vmem:[%s5922_s1 + $0x5d0] sm:$0xff]  ;;  %v131_v17 = vld [vmem:[%s5923_s0 + $0x3a8] sm:$0xff] }
 0x15c   :  { %v116_v18 = vld [vmem:[%s5923_s0 + $0x330] sm:$0xff]  ;;  %v1203_v24 = vpack.c.bf16 %v1017_v11, %v1016_v9  ;;  %v1227_v27 = vpack.c.bf16 %v1065_v15, %v1064_v14  ;;  %v163_v9 = vld [vmem:[%s5923_s0 + $0x4a8] sm:$0xff]  ;;  %v149_v14 = vld [vmem:[%s5923_s0 + $0x438] sm:$0xff] }
 0x15d   :  { %v164_v11 = vld [vmem:[%s5923_s0 + $0x4b0] sm:$0xff]  ;;  %v165_v15 = vld [vmem:[%s5923_s0 + $0x4b8] sm:$0xff] }
 0x15e   :  { %2060 = vmatpush.bf16.msra.mxu0 %v1203_v24  ;;  %2357 = vmatpush.bf16.msra.mxu3 %v1227_v27 }
 0x160   :  { %v1530_v36 = vpop.f32.mrf.mxu2  ;;  %v1335_v42 = vpop.f32.mrf.mxu0 }
 0x161   :  { %v1531_v40 = vadd.f32 %v1530_v36, %v1432_v21  ;;  %v1629_v41 = vpop.f32.mrf.mxu3  ;;  %v1336_v45 = vadd.f32 %v3455_v59, %v1335_v42  ;;  %v1434_v48 = vpop.f32.mrf.mxu1  ;;  %v132_v21 = vld [vmem:[%s5923_s0 + $0x3b0] sm:$0xff] }
 0x163   :  { %v3960_v53 = vadd.f32 %v1629_v41, %v1531_v40  ;;  %v1435_v54 = vadd.f32 %v1434_v48, %v1336_v45  ;;  %1680 = vmatmul.bf16.gmra.mxu0 %v626_v37  ;;  %v643_v37 = vpack.c.bf16 %v131_v17, %v115_v5  ;;  %v644_v40 = vpack.c.bf16 %v132_v21, %v116_v18  ;;  %v4010_v41 = vld [vmem:[%s5924_s2] ss:$0 sm:$0xff]  ;;  %v1032_v48 = vld [vmem:[%s5922_s1 + $0x4d0] sm:$0xff] }
 0x164   :  { %1779 = vmatmul.bf16.gmra.mxu1 %v627_v43  ;;  %v146_v5 = vld [vmem:[%s5923_s0 + $0x420] sm:$0xff] }
 0x165   :  { %1878 = vmatmul.bf16.gmra.mxu2 %v628_v44  ;;  %v645_v44 = vpack.c.bf16 %v133_v30, %v117_v29 }
 0x166   :  { %1977 = vmatmul.bf16.gmra.mxu3 %v629_v51  ;;  %v1033_v51 = vld [vmem:[%s5922_s1 + $0x4d8] sm:$0xff] }
 0x168   :  { %v1533_v56 = vpop.f32.mrf.mxu2  ;;  %v1337_v61 = vpop.f32.mrf.mxu0 }
 0x169   :  { %v1534_v57 = vadd.f32 %v1533_v56, %v1435_v54  ;;  %v1632_v58 = vpop.f32.mrf.mxu3  ;;  %v1338_v62 = vadd.f32 %v3455_v59, %v1337_v61  ;;  %v1436_v63 = vpop.f32.mrf.mxu1  ;;  %v1048_v59 = vld [vmem:[%s5922_s1 + $0x550] sm:$0xff]  ;;  %v1211_v56 = vpack.c.bf16 %v1033_v51, %v1032_v48 }
 0x16a   :  { %v1219_v10 = vpack.c.bf16 %v1049_v6, %v1048_v59  ;;  %v162_v59 = vld [vmem:[%s5923_s0 + $0x4a0] sm:$0xff]  ;;  %v147_v6 = vld [vmem:[%s5923_s0 + $0x428] sm:$0xff] }
 0x16b   :  { %v3963_v0 = vadd.f32 %v1632_v58, %v1534_v57  ;;  %v1437_v3 = vadd.f32 %v1436_v63, %v1338_v62  ;;  %2159 = vmatpush.bf16.msra.mxu1 %v1211_v56  ;;  %v658_v18 = vpack.c.bf16 %v162_v59, %v146_v5  ;;  %v659_v29 = vpack.c.bf16 %v163_v9, %v147_v6  ;;  %v178_v56 = vld [vmem:[%s5923_s0 + $0x520] sm:$0xff] }
 0x16c   :  { %2258 = vmatpush.bf16.msra.mxu2 %v1219_v10  ;;  %v148_v10 = vld [vmem:[%s5923_s0 + $0x430] sm:$0xff] }
 0x16d   :  { %v660_v30 = vpack.c.bf16 %v164_v11, %v148_v10 }
 0x170   :  { %v1535_v31 = vpop.f32.mrf.mxu2  ;;  %v1340_v36 = vpop.f32.mrf.mxu0 }
 0x171   :  { %v1536_v33 = vadd.f32 %v1535_v31, %v1437_v3  ;;  %v1634_v34 = vpop.f32.mrf.mxu3  ;;  %v1341_v42 = vadd.f32 %v4010_v41, %v1340_v36  ;;  %v1439_v43 = vpop.f32.mrf.mxu1 }
 0x173   :  { %v4013_v45 = vadd.f32 %v1634_v34, %v1536_v33  ;;  %v1440_v54 = vadd.f32 %v1439_v43, %v1341_v42  ;;  %1685 = vmatmul.bf16.gmra.mxu0 %v642_v32  ;;  %v661_v33 = vpack.c.bf16 %v165_v15, %v149_v14 }
 0x174   :  { %1784 = vmatmul.bf16.gmra.mxu1 %v643_v37 }
 0x175   :  { %1883 = vmatmul.bf16.gmra.mxu2 %v644_v40 }
 0x176   :  { %1982 = vmatmul.bf16.gmra.mxu3 %v645_v44 }
 0x178   :  { %v1538_v57 = vpop.f32.mrf.mxu2  ;;  %v1342_v62 = vpop.f32.mrf.mxu0 }
 0x179   :  { %v1539_v58 = vadd.f32 %v1538_v57, %v1440_v54  ;;  %v1637_v61 = vpop.f32.mrf.mxu3  ;;  %v1343_v63 = vadd.f32 %v4010_v41, %v1342_v62  ;;  %v1441_v1 = vpop.f32.mrf.mxu1  ;;  %v194_v57 = vld [vmem:[%s5923_s0 + $0x5a0] sm:$0xff]  ;;  %v180_v62 = vld [vmem:[%s5923_s0 + $0x530] sm:$0xff] }
 0x17a   :  { %v674_v59 = vpack.c.bf16 %v194_v57, %v178_v56 }
 0x17b   :  { %v4022_v2 = vadd.f32 %v1637_v61, %v1539_v58  ;;  %v1442_v3 = vadd.f32 %v1441_v1, %v1343_v63  ;;  %v179_v58 = vld [vmem:[%s5923_s0 + $0x528] sm:$0xff]  ;;  %v196_v63 = vld [vmem:[%s5923_s0 + $0x5b0] sm:$0xff]  ;;  %v181_v1 = vld [vmem:[%s5923_s0 + $0x538] sm:$0xff] }
 0x17c   :  { %v195_v61 = vld [vmem:[%s5923_s0 + $0x5a8] sm:$0xff]  ;;  %v676_v14 = vpack.c.bf16 %v196_v63, %v180_v62 }
 0x17d   :  { %v675_v11 = vpack.c.bf16 %v195_v61, %v179_v58 }
 0x180   :  { %v1540_v17 = vpop.f32.mrf.mxu2  ;;  %v1345_v27 = vpop.f32.mrf.mxu0 }
 0x181   :  { %v1541_v21 = vadd.f32 %v1540_v17, %v1442_v3  ;;  %v1639_v24 = vpop.f32.mrf.mxu3  ;;  %v1346_v31 = vadd.f32 %v4010_v41, %v1345_v27  ;;  %v1444_v32 = vpop.f32.mrf.mxu1  ;;  %v197_v3 = vld [vmem:[%s5923_s0 + $0x5b8] sm:$0xff]  ;;  %v1047_v27 = vld [vmem:[%s5922_s1 + $0x548] sm:$0xff] }
 0x183   :  { %v4049_v34 = vadd.f32 %v1639_v24, %v1541_v21  ;;  %v1445_v36 = vadd.f32 %v1444_v32, %v1346_v31  ;;  %1690 = vmatmul.bf16.gmra.mxu0 %v658_v18  ;;  %v677_v18 = vpack.c.bf16 %v197_v3, %v181_v1  ;;  %v1046_v24 = vld [vmem:[%s5922_s1 + $0x540] sm:$0xff]  ;;  %v1015_v32 = vld [vmem:[%s5922_s1 + $0x448] sm:$0xff] }
 0x184   :  { %1789 = vmatmul.bf16.gmra.mxu1 %v659_v29  ;;  %v1014_v31 = vld [vmem:[%s5922_s1 + $0x440] sm:$0xff] }
 0x185   :  { %1888 = vmatmul.bf16.gmra.mxu2 %v660_v30  ;;  %v1218_v30 = vpack.c.bf16 %v1047_v27, %v1046_v24  ;;  %v210_v1 = vld [vmem:[%s5923_s0 + $0x620] sm:$0xff] }
 0x186   :  { %1987 = vmatmul.bf16.gmra.mxu3 %v661_v33  ;;  %v1062_v33 = vld [vmem:[%s5922_s1 + $0x5c0] sm:$0xff] }
 0x187   :  { %2259 = vmatpush.bf16.msra.mxu2 %v1218_v30  ;;  %v226_v3 = vld [vmem:[%s5923_s0 + $0x6a0] sm:$0xff] }
 0x188   :  { %v1543_v37 = vpop.f32.mrf.mxu2  ;;  %v1347_v43 = vpop.f32.mrf.mxu0 }
 0x189   :  { %v1544_v40 = vadd.f32 %v1543_v37, %v1445_v36  ;;  %v1642_v42 = vpop.f32.mrf.mxu3  ;;  %v1348_v44 = vadd.f32 %v4010_v41, %v1347_v43  ;;  %v1446_v48 = vpop.f32.mrf.mxu1  ;;  %v1202_v36 = vpack.c.bf16 %v1015_v32, %v1014_v31  ;;  %v1063_v37 = vld [vmem:[%s5922_s1 + $0x5c8] sm:$0xff] }
 0x18b   :  { %v4052_v51 = vadd.f32 %v1642_v42, %v1544_v40  ;;  %v1447_v54 = vadd.f32 %v1446_v48, %v1348_v44  ;;  %v1226_v40 = vpack.c.bf16 %v1063_v37, %v1062_v33  ;;  %2061 = vmatpush.bf16.msra.mxu0 %v1202_v36  ;;  %v1030_v42 = vld [vmem:[%s5922_s1 + $0x4c0] sm:$0xff]  ;;  %v1031_v44 = vld [vmem:[%s5922_s1 + $0x4c8] sm:$0xff] }
 0x18c   :  { %v1210_v57 = vpack.c.bf16 %v1031_v44, %v1030_v42 }
 0x18d   :  { %2358 = vmatpush.bf16.msra.mxu3 %v1226_v40 }
 0x18e   :  { %2160 = vmatpush.bf16.msra.mxu1 %v1210_v57  ;;  %v242_v57 = vld [vmem:[%s5923_s0 + $0x720] sm:$0xff] }
 0x190   :  { %v1545_v5 = vpop.f32.mrf.mxu2  ;;  %v1350_v10 = vpop.f32.mrf.mxu0 }
 0x191   :  { %v1546_v6 = vadd.f32 %v1545_v5, %v1447_v54  ;;  %v1644_v9 = vpop.f32.mrf.mxu3  ;;  %v1351_v15 = vadd.f32 %v4010_v41, %v1350_v10  ;;  %v1449_v17 = vpop.f32.mrf.mxu1  ;;  %v211_v5 = vld [vmem:[%s5923_s0 + $0x628] sm:$0xff]  ;;  %v213_v10 = vld [vmem:[%s5923_s0 + $0x638] sm:$0xff] }
 0x193   :  { %v4079_v21 = vadd.f32 %v1644_v9, %v1546_v6  ;;  %v1450_v29 = vadd.f32 %v1449_v17, %v1351_v15  ;;  %1695 = vmatmul.bf16.gmra.mxu0 %v674_v59  ;;  %v227_v59 = vld [vmem:[%s5923_s0 + $0x6a8] sm:$0xff]  ;;  %v212_v6 = vld [vmem:[%s5923_s0 + $0x630] sm:$0xff]  ;;  %v690_v15 = vpack.c.bf16 %v226_v3, %v210_v1 }
 0x194   :  { %1794 = vmatmul.bf16.gmra.mxu1 %v675_v11  ;;  %v228_v9 = vld [vmem:[%s5923_s0 + $0x6b0] sm:$0xff]  ;;  %v229_v11 = vld [vmem:[%s5923_s0 + $0x6b8] sm:$0xff]  ;;  %v691_v27 = vpack.c.bf16 %v227_v59, %v211_v5 }
 0x195   :  { %1893 = vmatmul.bf16.gmra.mxu2 %v676_v14  ;;  %v693_v32 = vpack.c.bf16 %v229_v11, %v213_v10  ;;  %v244_v1 = vld [vmem:[%s5923_s0 + $0x730] sm:$0xff]  ;;  %v245_v5 = vld [vmem:[%s5923_s0 + $0x738] sm:$0xff] }
 0x196   :  { %1992 = vmatmul.bf16.gmra.mxu3 %v677_v18  ;;  %v260_v3 = vld [vmem:[%s5923_s0 + $0x7b0] sm:$0xff]  ;;  %v261_v59 = vld [vmem:[%s5923_s0 + $0x7b8] sm:$0xff] }
 0x198   :  { %v1548_v43 = vpop.f32.mrf.mxu2  ;;  %v1352_v56 = vpop.f32.mrf.mxu0 }
 0x199   :  { %v1549_v48 = vadd.f32 %v1548_v43, %v1450_v29  ;;  %v1647_v54 = vpop.f32.mrf.mxu3  ;;  %v1353_v58 = vadd.f32 %v4010_v41, %v1352_v56  ;;  %v1451_v61 = vpop.f32.mrf.mxu1  ;;  %v692_v29 = vpack.c.bf16 %v228_v9, %v212_v6 }
 0x19b   :  { %v4106_v62 = vadd.f32 %v1647_v54, %v1549_v48  ;;  %v1452_v63 = vadd.f32 %v1451_v61, %v1353_v58  ;;  %v258_v58 = vld [vmem:[%s5923_s0 + $0x7a0] sm:$0xff]  ;;  %v243_v61 = vld [vmem:[%s5923_s0 + $0x728] sm:$0xff] }
 0x19c   :  { %v706_v9 = vpack.c.bf16 %v258_v58, %v242_v57 }
 0x1a0   :  { %v1550_v14 = vpop.f32.mrf.mxu2  ;;  %v1355_v24 = vpop.f32.mrf.mxu0 }
 0x1a1   :  { %v1551_v17 = vadd.f32 %v1550_v14, %v1452_v63  ;;  %v1649_v18 = vpop.f32.mrf.mxu3  ;;  %v1356_v30 = vadd.f32 %v4010_v41, %v1355_v24  ;;  %v1454_v31 = vpop.f32.mrf.mxu1  ;;  %v259_v63 = vld [vmem:[%s5923_s0 + $0x7a8] sm:$0xff] }
 0x1a3   :  { %v4133_v33 = vadd.f32 %v1649_v18, %v1551_v17  ;;  %v1455_v36 = vadd.f32 %v1454_v31, %v1356_v30  ;;  %1700 = vmatmul.bf16.gmra.mxu0 %v690_v15  ;;  %v707_v15 = vpack.c.bf16 %v259_v63, %v243_v61  ;;  %v708_v17 = vpack.c.bf16 %v260_v3, %v244_v1  ;;  %v1044_v31 = vld [vmem:[%s5922_s1 + $0x530] sm:$0xff] }
 0x1a4   :  { %1799 = vmatmul.bf16.gmra.mxu1 %v691_v27  ;;  %v709_v27 = vpack.c.bf16 %v261_v59, %v245_v5  ;;  %v1028_v5 = vld [vmem:[%s5922_s1 + $0x4b0] sm:$0xff]  ;;  %v1029_v59 = vld [vmem:[%s5922_s1 + $0x4b8] sm:$0xff] }
 0x1a5   :  { %1898 = vmatmul.bf16.gmra.mxu2 %v692_v29 }
 0x1a6   :  { %1997 = vmatmul.bf16.gmra.mxu3 %v693_v32  ;;  %v1045_v32 = vld [vmem:[%s5922_s1 + $0x538] sm:$0xff] }
 0x1a8   :  { %v1553_v37 = vpop.f32.mrf.mxu2  ;;  %v1357_v43 = vpop.f32.mrf.mxu0 }
 0x1a9   :  { %v1554_v40 = vadd.f32 %v1553_v37, %v1455_v36  ;;  %v1652_v42 = vpop.f32.mrf.mxu3  ;;  %v1358_v44 = vadd.f32 %v4010_v41, %v1357_v43  ;;  %v1456_v48 = vpop.f32.mrf.mxu1  ;;  %v1012_v36 = vld [vmem:[%s5922_s1 + $0x430] sm:$0xff]  ;;  %v1217_v37 = vpack.c.bf16 %v1045_v32, %v1044_v31  ;;  %v1061_v43 = vld [vmem:[%s5922_s1 + $0x5b8] sm:$0xff] }
 0x1ab   :  { %v4136_v54 = vadd.f32 %v1652_v42, %v1554_v40  ;;  %v1457_v56 = vadd.f32 %v1456_v48, %v1358_v44  ;;  %v1013_v40 = vld [vmem:[%s5922_s1 + $0x438] sm:$0xff]  ;;  %v1060_v42 = vld [vmem:[%s5922_s1 + $0x5b0] sm:$0xff]  ;;  %2260 = vmatpush.bf16.msra.mxu2 %v1217_v37 }
 0x1ac   :  { %v1201_v48 = vpack.c.bf16 %v1013_v40, %v1012_v36 }
 0x1ae   :  { %2062 = vmatpush.bf16.msra.mxu0 %v1201_v48 }
 0x1b0   :  { %v1555_v6 = vpop.f32.mrf.mxu2  ;;  %v1360_v14 = vpop.f32.mrf.mxu0 }
 0x1b1   :  { %v1556_v10 = vadd.f32 %v1555_v6, %v1457_v56  ;;  %v1654_v11 = vpop.f32.mrf.mxu3  ;;  %v1361_v18 = vadd.f32 %v4010_v41, %v1360_v14  ;;  %v1459_v24 = vpop.f32.mrf.mxu1  ;;  %v1225_v56 = vpack.c.bf16 %v1061_v43, %v1060_v42  ;;  %v291_v14 = vld [vmem:[%s5923_s0 + $0x8a8] sm:$0xff] }
 0x1b3   :  { %v4163_v29 = vadd.f32 %v1654_v11, %v1556_v10  ;;  %v1460_v30 = vadd.f32 %v1459_v24, %v1361_v18  ;;  %1705 = vmatmul.bf16.gmra.mxu0 %v706_v9  ;;  %2359 = vmatpush.bf16.msra.mxu3 %v1225_v56  ;;  %v1209_v9 = vpack.c.bf16 %v1029_v59, %v1028_v5  ;;  %v274_v10 = vld [vmem:[%s5923_s0 + $0x820] sm:$0xff]  ;;  %v275_v11 = vld [vmem:[%s5923_s0 + $0x828] sm:$0xff]  ;;  %v277_v18 = vld [vmem:[%s5923_s0 + $0x838] sm:$0xff] }
 0x1b4   :  { %1804 = vmatmul.bf16.gmra.mxu1 %v707_v15  ;;  %v276_v15 = vld [vmem:[%s5923_s0 + $0x830] sm:$0xff]  ;;  %v293_v24 = vld [vmem:[%s5923_s0 + $0x8b8] sm:$0xff]  ;;  %v723_v37 = vpack.c.bf16 %v291_v14, %v275_v11 }
 0x1b5   :  { %1903 = vmatmul.bf16.gmra.mxu2 %v708_v17  ;;  %v292_v17 = vld [vmem:[%s5923_s0 + $0x8b0] sm:$0xff]  ;;  %2161 = vmatpush.bf16.msra.mxu1 %v1209_v9  ;;  %v322_v9 = vld [vmem:[%s5923_s0 + $0x9a0] sm:$0xff]  ;;  %v309_v14 = vld [vmem:[%s5923_s0 + $0x938] sm:$0xff] }
 0x1b6   :  { %2002 = vmatmul.bf16.gmra.mxu3 %v709_v27  ;;  %v724_v40 = vpack.c.bf16 %v292_v17, %v276_v15  ;;  %v324_v11 = vld [vmem:[%s5923_s0 + $0x9b0] sm:$0xff]  ;;  %v325_v15 = vld [vmem:[%s5923_s0 + $0x9b8] sm:$0xff] }
 0x1b8   :  { %v1558_v44 = vpop.f32.mrf.mxu2  ;;  %v1362_v61 = vpop.f32.mrf.mxu0 }
 0x1b9   :  { %v1559_v57 = vadd.f32 %v1558_v44, %v1460_v30  ;;  %v1657_v58 = vpop.f32.mrf.mxu3  ;;  %v1363_v63 = vadd.f32 %v4010_v41, %v1362_v61  ;;  %v1461_v1 = vpop.f32.mrf.mxu1  ;;  %v290_v41 = vld [vmem:[%s5923_s0 + $0x8a0] sm:$0xff]  ;;  %v725_v44 = vpack.c.bf16 %v293_v24, %v277_v18 }
 0x1ba   :  { %v722_v30 = vpack.c.bf16 %v290_v41, %v274_v10  ;;  %v307_v10 = vld [vmem:[%s5923_s0 + $0x928] sm:$0xff]  ;;  %v308_v41 = vld [vmem:[%s5923_s0 + $0x930] sm:$0xff] }
 0x1bb   :  { %v4184_v3 = vadd.f32 %v1657_v58, %v1559_v57  ;;  %v1462_v6 = vadd.f32 %v1461_v1, %v1363_v63 }
 0x1c0   :  { %v1560_v27 = vpop.f32.mrf.mxu2  ;;  %v1671_v36 = vpop.f32.mrf.mxu0 }
 0x1c1   :  { %v1561_v31 = vadd.f32 %v1560_v27, %v1462_v6  ;;  %v1659_v32 = vpop.f32.mrf.mxu3  ;;  %v1672_v42 = vadd.f32 %v1671_v36, %v3483_v19  ;;  %v1770_v43 = vpop.f32.mrf.mxu1  ;;  %v306_v19 = vld [vmem:[%s5923_s0 + $0x920] sm:$0xff] }
 0x1c2   :  { %v738_v18 = vpack.c.bf16 %v322_v9, %v306_v19  ;;  %v1043_v19 = vld [vmem:[%s5922_s1 + $0x528] sm:$0xff] }
 0x1c3   :  { %v4217_v48 = vadd.f32 %v1659_v32, %v1561_v31  ;;  %v1771_v56 = vadd.f32 %v1770_v43, %v1672_v42  ;;  %1710 = vmatmul.bf16.gmra.mxu0 %v722_v30  ;;  %v740_v32 = vpack.c.bf16 %v324_v11, %v308_v41  ;;  %v339_v9 = vld [vmem:[%s5923_s0 + $0xa28] sm:$0xff]  ;;  %v1058_v11 = vld [vmem:[%s5922_s1 + $0x5a0] sm:$0xff] }
 0x1c4   :  { %1809 = vmatmul.bf16.gmra.mxu1 %v723_v37  ;;  %v1011_v41 = vld [vmem:[%s5922_s1 + $0x428] sm:$0xff] }
 0x1c5   :  { %1908 = vmatmul.bf16.gmra.mxu2 %v724_v40  ;;  %v741_v40 = vpack.c.bf16 %v325_v15, %v309_v14  ;;  %v1059_v15 = vld [vmem:[%s5922_s1 + $0x5a8] sm:$0xff] }
 0x1c6   :  { %2007 = vmatmul.bf16.gmra.mxu3 %v725_v44 }
 0x1c8   :  { %v1869_v57 = vpop.f32.mrf.mxu2  ;;  %v1673_v63 = vpop.f32.mrf.mxu0 }
 0x1c9   :  { %v1870_v58 = vadd.f32 %v1869_v57, %v1771_v56  ;;  %v1968_v61 = vpop.f32.mrf.mxu3  ;;  %v1674_v1 = vadd.f32 %v1673_v63, %v3510_v39  ;;  %v1772_v5 = vpop.f32.mrf.mxu1  ;;  %v323_v39 = vld [vmem:[%s5923_s0 + $0x9a8] sm:$0xff] }
 0x1ca   :  { %v739_v31 = vpack.c.bf16 %v323_v39, %v307_v10  ;;  %v1010_v39 = vld [vmem:[%s5922_s1 + $0x420] sm:$0xff] }
 0x1cb   :  { %v4220_v59 = vadd.f32 %v1968_v61, %v1870_v58  ;;  %v1773_v6 = vadd.f32 %v1772_v5, %v1674_v1  ;;  %v354_v5 = vld [vmem:[%s5923_s0 + $0xaa0] sm:$0xff]  ;;  %v1200_v14 = vpack.c.bf16 %v1011_v41, %v1010_v39 }
 0x1cd   :  { %2063 = vmatpush.bf16.msra.mxu0 %v1200_v14 }
 0x1d0   :  { %v1871_v17 = vpop.f32.mrf.mxu2  ;;  %v1676_v30 = vpop.f32.mrf.mxu0 }
 0x1d1   :  { %v1872_v24 = vadd.f32 %v1871_v17, %v1773_v6  ;;  %v1970_v27 = vpop.f32.mrf.mxu3  ;;  %v1677_v36 = vadd.f32 %v1676_v30, %v3513_v47  ;;  %v1775_v37 = vpop.f32.mrf.mxu1  ;;  %v338_v47 = vld [vmem:[%s5923_s0 + $0xa20] sm:$0xff]  ;;  %v356_v30 = vld [vmem:[%s5923_s0 + $0xab0] sm:$0xff] }
 0x1d2   :  { %v1042_v6 = vld [vmem:[%s5922_s1 + $0x520] sm:$0xff] }
 0x1d3   :  { %v4247_v42 = vadd.f32 %v1970_v27, %v1872_v24  ;;  %v1776_v43 = vadd.f32 %v1775_v37, %v1677_v36  ;;  %1715 = vmatmul.bf16.gmra.mxu0 %v738_v18  ;;  %v1216_v10 = vpack.c.bf16 %v1043_v19, %v1042_v6  ;;  %v1026_v17 = vld [vmem:[%s5922_s1 + $0x4a0] sm:$0xff]  ;;  %v1027_v18 = vld [vmem:[%s5922_s1 + $0x4a8] sm:$0xff]  ;;  %v340_v27 = vld [vmem:[%s5923_s0 + $0xa30] sm:$0xff] }
 0x1d4   :  { %1814 = vmatmul.bf16.gmra.mxu1 %v739_v31  ;;  %v355_v24 = vld [vmem:[%s5923_s0 + $0xaa8] sm:$0xff]  ;;  %v1224_v31 = vpack.c.bf16 %v1059_v15, %v1058_v11  ;;  %v341_v36 = vld [vmem:[%s5923_s0 + $0xa38] sm:$0xff] }
 0x1d5   :  { %1913 = vmatmul.bf16.gmra.mxu2 %v740_v32  ;;  %v1208_v32 = vpack.c.bf16 %v1027_v18, %v1026_v17  ;;  %v357_v37 = vld [vmem:[%s5923_s0 + $0xab8] sm:$0xff]  ;;  %v386_v17 = vld [vmem:[%s5923_s0 + $0xba0] sm:$0xff]  ;;  %v371_v18 = vld [vmem:[%s5923_s0 + $0xb28] sm:$0xff] }
 0x1d6   :  { %2012 = vmatmul.bf16.gmra.mxu3 %v741_v40  ;;  %2261 = vmatpush.bf16.msra.mxu2 %v1216_v10  ;;  %v757_v19 = vpack.c.bf16 %v357_v37, %v341_v36 }
 0x1d7   :  { %2360 = vmatpush.bf16.msra.mxu3 %v1224_v31  ;;  %2162 = vmatpush.bf16.msra.mxu1 %v1208_v32  ;;  %v389_v31 = vld [vmem:[%s5923_s0 + $0xbb8] sm:$0xff] }
 0x1d8   :  { %v1874_v44 = vpop.f32.mrf.mxu2  ;;  %v1678_v58 = vpop.f32.mrf.mxu0 }
 0x1d9   :  { %v1875_v56 = vadd.f32 %v1874_v44, %v1776_v43  ;;  %v1973_v57 = vpop.f32.mrf.mxu3  ;;  %v1679_v61 = vadd.f32 %v1678_v58, %v3564_v16  ;;  %v1777_v63 = vpop.f32.mrf.mxu1  ;;  %v754_v43 = vpack.c.bf16 %v354_v5, %v338_v47  ;;  %v755_v58 = vpack.c.bf16 %v355_v24, %v339_v9  ;;  %v372_v24 = vld [vmem:[%s5923_s0 + $0xb30] sm:$0xff] }
 0x1db   :  { %v4250_v1 = vadd.f32 %v1973_v57, %v1875_v56  ;;  %v1778_v16 = vadd.f32 %v1777_v63, %v1679_v61  ;;  %v756_v61 = vpack.c.bf16 %v356_v30, %v340_v27  ;;  %v388_v27 = vld [vmem:[%s5923_s0 + $0xbb0] sm:$0xff]  ;;  %v373_v30 = vld [vmem:[%s5923_s0 + $0xb38] sm:$0xff] }
 0x1e0   :  { %v1876_v40 = vpop.f32.mrf.mxu2  ;;  %v1681_v57 = vpop.f32.mrf.mxu0 }
 0x1e1   :  { %v1877_v44 = vadd.f32 %v1876_v40, %v1778_v16  ;;  %v1975_v56 = vpop.f32.mrf.mxu3  ;;  %v1682_v63 = vadd.f32 %v1681_v57, %v3567_v25  ;;  %v1780_v6 = vpop.f32.mrf.mxu1  ;;  %v370_v25 = vld [vmem:[%s5923_s0 + $0xb20] sm:$0xff] }
 0x1e2   :  { %v770_v36 = vpack.c.bf16 %v386_v17, %v370_v25  ;;  %v403_v25 = vld [vmem:[%s5923_s0 + $0xc28] sm:$0xff]  ;;  %v1041_v17 = vld [vmem:[%s5922_s1 + $0x518] sm:$0xff] }
 0x1e3   :  { %v4301_v10 = vadd.f32 %v1975_v56, %v1877_v44  ;;  %v1781_v39 = vadd.f32 %v1780_v6, %v1682_v63  ;;  %1720 = vmatmul.bf16.gmra.mxu0 %v754_v43  ;;  %v772_v56 = vpack.c.bf16 %v388_v27, %v372_v24  ;;  %v1009_v24 = vld [vmem:[%s5922_s1 + $0x418] sm:$0xff]  ;;  %v1056_v27 = vld [vmem:[%s5922_s1 + $0x590] sm:$0xff] }
 0x1e4   :  { %1819 = vmatmul.bf16.gmra.mxu1 %v755_v58 }
 0x1e5   :  { %1918 = vmatmul.bf16.gmra.mxu2 %v756_v61  ;;  %v773_v61 = vpack.c.bf16 %v389_v31, %v373_v30  ;;  %v1057_v30 = vld [vmem:[%s5922_s1 + $0x598] sm:$0xff]  ;;  %v419_v31 = vld [vmem:[%s5923_s0 + $0xca8] sm:$0xff] }
 0x1e6   :  { %2017 = vmatmul.bf16.gmra.mxu3 %v757_v19 }
 0x1e8   :  { %v1879_v41 = vpop.f32.mrf.mxu2  ;;  %v1683_v11 = vpop.f32.mrf.mxu0 }
 0x1e9   :  { %v1880_v47 = vadd.f32 %v1879_v41, %v1781_v39  ;;  %v1978_v5 = vpop.f32.mrf.mxu3  ;;  %v1684_v16 = vadd.f32 %v1683_v11, %v3594_v46  ;;  %v1782_v14 = vpop.f32.mrf.mxu1  ;;  %v387_v46 = vld [vmem:[%s5923_s0 + $0xba8] sm:$0xff] }
 0x1ea   :  { %v771_v44 = vpack.c.bf16 %v387_v46, %v371_v18  ;;  %v1008_v18 = vld [vmem:[%s5922_s1 + $0x410] sm:$0xff] }
 0x1eb   :  { %v4304_v9 = vadd.f32 %v1978_v5, %v1880_v47  ;;  %v1783_v15 = vadd.f32 %v1782_v14, %v1684_v16  ;;  %v418_v14 = vld [vmem:[%s5923_s0 + $0xca0] sm:$0xff] }
 0x1f0   :  { %v1881_v32 = vpop.f32.mrf.mxu2  ;;  %v1686_v43 = vpop.f32.mrf.mxu0 }
 0x1f1   :  { %v1882_v37 = vadd.f32 %v1881_v32, %v1783_v15  ;;  %v1980_v40 = vpop.f32.mrf.mxu3  ;;  %v1687_v57 = vadd.f32 %v1686_v43, %v3597_v55  ;;  %v1785_v58 = vpop.f32.mrf.mxu1  ;;  %v402_v55 = vld [vmem:[%s5923_s0 + $0xc20] sm:$0xff]  ;;  %v404_v32 = vld [vmem:[%s5923_s0 + $0xc30] sm:$0xff]  ;;  %v405_v43 = vld [vmem:[%s5923_s0 + $0xc38] sm:$0xff] }
 0x1f3   :  { %v4331_v63 = vadd.f32 %v1980_v40, %v1882_v37  ;;  %v1786_v6 = vadd.f32 %v1785_v58, %v1687_v57  ;;  %1725 = vmatmul.bf16.gmra.mxu0 %v770_v36  ;;  %v420_v36 = vld [vmem:[%s5923_s0 + $0xcb0] sm:$0xff]  ;;  %v1199_v37 = vpack.c.bf16 %v1009_v24, %v1008_v18  ;;  %v1223_v40 = vpack.c.bf16 %v1057_v30, %v1056_v27 }
 0x1f4   :  { %1824 = vmatmul.bf16.gmra.mxu1 %v771_v44  ;;  %v421_v44 = vld [vmem:[%s5923_s0 + $0xcb8] sm:$0xff]  ;;  %v786_v57 = vpack.c.bf16 %v418_v14, %v402_v55 }
 0x1f5   :  { %1923 = vmatmul.bf16.gmra.mxu2 %v772_v56  ;;  %2064 = vmatpush.bf16.msra.mxu0 %v1199_v37  ;;  %v1025_v55 = vld [vmem:[%s5922_s1 + $0x498] sm:$0xff]  ;;  %v436_v37 = vld [vmem:[%s5923_s0 + $0xd30] sm:$0xff] }
 0x1f6   :  { %2022 = vmatmul.bf16.gmra.mxu3 %v773_v61 }
 0x1f7   :  { %2361 = vmatpush.bf16.msra.mxu3 %v1223_v40  ;;  %v452_v40 = vld [vmem:[%s5923_s0 + $0xdb0] sm:$0xff] }
 0x1f8   :  { %v1884_v19 = vpop.f32.mrf.mxu2  ;;  %v1688_v47 = vpop.f32.mrf.mxu0 }
 0x1f9   :  { %v1885_v39 = vadd.f32 %v1884_v19, %v1786_v6  ;;  %v1983_v41 = vpop.f32.mrf.mxu3  ;;  %v1689_v5 = vadd.f32 %v1688_v47, %v3642_v23  ;;  %v1787_v11 = vpop.f32.mrf.mxu1  ;;  %v1040_v23 = vld [vmem:[%s5922_s1 + $0x510] sm:$0xff]  ;;  %v787_v19 = vpack.c.bf16 %v419_v31, %v403_v25  ;;  %v434_v31 = vld [vmem:[%s5923_s0 + $0xd20] sm:$0xff] }
 0x1fa   :  { %v1215_v46 = vpack.c.bf16 %v1041_v17, %v1040_v23  ;;  %v1024_v23 = vld [vmem:[%s5922_s1 + $0x490] sm:$0xff] }
 0x1fb   :  { %v4334_v16 = vadd.f32 %v1983_v41, %v1885_v39  ;;  %v1788_v15 = vadd.f32 %v1787_v11, %v1689_v5  ;;  %v788_v39 = vpack.c.bf16 %v420_v36, %v404_v32  ;;  %v789_v5 = vpack.c.bf16 %v421_v44, %v405_v43  ;;  %v450_v32 = vld [vmem:[%s5923_s0 + $0xda0] sm:$0xff]  ;;  %v435_v36 = vld [vmem:[%s5923_s0 + $0xd28] sm:$0xff]  ;;  %v437_v43 = vld [vmem:[%s5923_s0 + $0xd38] sm:$0xff] }
 0x1fc   :  { %2262 = vmatpush.bf16.msra.mxu2 %v1215_v46  ;;  %v453_v44 = vld [vmem:[%s5923_s0 + $0xdb8] sm:$0xff] }
 0x200   :  { %v1886_v56 = vpop.f32.mrf.mxu2  ;;  %v1691_v6 = vpop.f32.mrf.mxu0 }
 0x201   :  { %v1887_v58 = vadd.f32 %v1886_v56, %v1788_v15  ;;  %v1985_v61 = vpop.f32.mrf.mxu3  ;;  %v1692_v41 = vadd.f32 %v1691_v6, %v3651_v35  ;;  %v1790_v47 = vpop.f32.mrf.mxu1  ;;  %v1207_v15 = vpack.c.bf16 %v1025_v55, %v1024_v23 }
 0x203   :  { %v4379_v11 = vadd.f32 %v1985_v61, %v1887_v58  ;;  %v1791_v14 = vadd.f32 %v1790_v47, %v1692_v41  ;;  %1730 = vmatmul.bf16.gmra.mxu0 %v786_v57  ;;  %2163 = vmatpush.bf16.msra.mxu1 %v1207_v15  ;;  %v802_v57 = vpack.c.bf16 %v450_v32, %v434_v31  ;;  %v467_v31 = vld [vmem:[%s5923_s0 + $0xe28] sm:$0xff]  ;;  %v468_v32 = vld [vmem:[%s5923_s0 + $0xe30] sm:$0xff] }
 0x204   :  { %1829 = vmatmul.bf16.gmra.mxu1 %v787_v19 }
 0x205   :  { %1928 = vmatmul.bf16.gmra.mxu2 %v788_v39  ;;  %v804_v39 = vpack.c.bf16 %v452_v40, %v436_v37  ;;  %v485_v37 = vld [vmem:[%s5923_s0 + $0xeb8] sm:$0xff] }
 0x206   :  { %2027 = vmatmul.bf16.gmra.mxu3 %v789_v5  ;;  %v805_v5 = vpack.c.bf16 %v453_v44, %v437_v43 }
 0x208   :  { %v1889_v35 = vpop.f32.mrf.mxu2  ;;  %v1693_v18 = vpop.f32.mrf.mxu0 }
 0x209   :  { %v1890_v25 = vadd.f32 %v1889_v35, %v1791_v14  ;;  %v1988_v17 = vpop.f32.mrf.mxu3  ;;  %v1694_v46 = vadd.f32 %v1693_v18, %v3678_v60  ;;  %v1792_v24 = vpop.f32.mrf.mxu1  ;;  %v451_v60 = vld [vmem:[%s5923_s0 + $0xda8] sm:$0xff] }
 0x20a   :  { %v803_v19 = vpack.c.bf16 %v451_v60, %v435_v36  ;;  %v484_v36 = vld [vmem:[%s5923_s0 + $0xeb0] sm:$0xff]  ;;  %v469_v60 = vld [vmem:[%s5923_s0 + $0xe38] sm:$0xff] }
 0x20b   :  { %v4388_v27 = vadd.f32 %v1988_v17, %v1890_v25  ;;  %v1793_v30 = vadd.f32 %v1792_v24, %v1694_v46 }
 0x210   :  { %v1891_v56 = vpop.f32.mrf.mxu2  ;;  %v1696_v6 = vpop.f32.mrf.mxu0 }
 0x211   :  { %v1892_v58 = vadd.f32 %v1891_v56, %v1793_v30  ;;  %v1990_v61 = vpop.f32.mrf.mxu3  ;;  %v1697_v41 = vadd.f32 %v1696_v6, %v3681_v4  ;;  %v1795_v47 = vpop.f32.mrf.mxu1  ;;  %v466_v4 = vld [vmem:[%s5923_s0 + $0xe20] sm:$0xff] }
 0x212   :  { %v482_v30 = vld [vmem:[%s5923_s0 + $0xea0] sm:$0xff] }
 0x213   :  { %v4415_v23 = vadd.f32 %v1990_v61, %v1892_v58  ;;  %v1796_v55 = vadd.f32 %v1795_v47, %v1697_v41  ;;  %1735 = vmatmul.bf16.gmra.mxu0 %v802_v57  ;;  %v818_v43 = vpack.c.bf16 %v482_v30, %v466_v4  ;;  %v820_v61 = vpack.c.bf16 %v484_v36, %v468_v32  ;;  %v1038_v47 = vld [vmem:[%s5922_s1 + $0x500] sm:$0xff]  ;;  %v1023_v30 = vld [vmem:[%s5922_s1 + $0x488] sm:$0xff] }
 0x214   :  { %1834 = vmatmul.bf16.gmra.mxu1 %v803_v19 }
 0x215   :  { %1933 = vmatmul.bf16.gmra.mxu2 %v804_v39  ;;  %v821_v39 = vpack.c.bf16 %v485_v37, %v469_v60 }
 0x216   :  { %2032 = vmatmul.bf16.gmra.mxu3 %v805_v5  ;;  %v1039_v5 = vld [vmem:[%s5922_s1 + $0x508] sm:$0xff] }
 0x218   :  { %v1894_v14 = vpop.f32.mrf.mxu2  ;;  %v1698_v25 = vpop.f32.mrf.mxu0 }
 0x219   :  { %v1895_v15 = vadd.f32 %v1894_v14, %v1796_v55  ;;  %v1993_v35 = vpop.f32.mrf.mxu3  ;;  %v1699_v17 = vadd.f32 %v1698_v25, %v3708_v28  ;;  %v1797_v18 = vpop.f32.mrf.mxu1  ;;  %v483_v28 = vld [vmem:[%s5923_s0 + $0xea8] sm:$0xff]  ;;  %v1214_v14 = vpack.c.bf16 %v1039_v5, %v1038_v47 }
 0x21a   :  { %v819_v58 = vpack.c.bf16 %v483_v28, %v467_v31 }
 0x21b   :  { %v4418_v46 = vadd.f32 %v1993_v35, %v1895_v15  ;;  %v1798_v24 = vadd.f32 %v1797_v18, %v1699_v17  ;;  %v1006_v15 = vld [vmem:[%s5922_s1 + $0x400] sm:$0xff]  ;;  %v1055_v17 = vld [vmem:[%s5922_s1 + $0x588] sm:$0xff]  ;;  %2263 = vmatpush.bf16.msra.mxu2 %v1214_v14 }
 0x21c   :  { %v1054_v35 = vld [vmem:[%s5922_s1 + $0x580] sm:$0xff] }
 0x21d   :  { %v1222_v18 = vpack.c.bf16 %v1055_v17, %v1054_v35 }
 0x21f   :  { %2362 = vmatpush.bf16.msra.mxu3 %v1222_v18 }
 0x220   :  { %v1896_v40 = vpop.f32.mrf.mxu2  ;;  %v1701_v57 = vpop.f32.mrf.mxu0 }
 0x221   :  { %v1897_v44 = vadd.f32 %v1896_v40, %v1798_v24  ;;  %v1995_v56 = vpop.f32.mrf.mxu3  ;;  %v1702_v6 = vadd.f32 %v1701_v57, %v3735_v52  ;;  %v1800_v19 = vpop.f32.mrf.mxu1  ;;  %v1007_v52 = vld [vmem:[%s5922_s1 + $0x408] sm:$0xff]  ;;  %v1022_v24 = vld [vmem:[%s5922_s1 + $0x480] sm:$0xff] }
 0x222   :  { %v1198_v25 = vpack.c.bf16 %v1007_v52, %v1006_v15  ;;  %v1206_v36 = vpack.c.bf16 %v1023_v30, %v1022_v24  ;;  %v499_v57 = vld [vmem:[%s5923_s0 + $0xf28] sm:$0xff] }
 0x223   :  { %v4445_v41 = vadd.f32 %v1995_v56, %v1897_v44  ;;  %v1801_v55 = vadd.f32 %v1800_v19, %v1702_v6  ;;  %1740 = vmatmul.bf16.gmra.mxu0 %v818_v43  ;;  %v498_v44 = vld [vmem:[%s5923_s0 + $0xf20] sm:$0xff]  ;;  %v501_v6 = vld [vmem:[%s5923_s0 + $0xf38] sm:$0xff] }
 0x224   :  { %1839 = vmatmul.bf16.gmra.mxu1 %v819_v58  ;;  %2065 = vmatpush.bf16.msra.mxu0 %v1198_v25  ;;  %v514_v56 = vld [vmem:[%s5923_s0 + $0xfa0] sm:$0xff]  ;;  %v500_v58 = vld [vmem:[%s5923_s0 + $0xf30] sm:$0xff]  ;;  %v517_v19 = vld [vmem:[%s5923_s0 + $0xfb8] sm:$0xff] }
 0x225   :  { %1938 = vmatmul.bf16.gmra.mxu2 %v820_v61  ;;  %2164 = vmatpush.bf16.msra.mxu1 %v1206_v36  ;;  %v516_v61 = vld [vmem:[%s5923_s0 + $0xfb0] sm:$0xff]  ;;  %v834_v47 = vpack.c.bf16 %v514_v56, %v498_v44  ;;  %v837_v17 = vpack.c.bf16 %v517_v19, %v501_v6  ;;  %v531_v44 = vld [vmem:[%s5923_s0 + $0x1028] sm:$0xff] }
 0x226   :  { %2037 = vmatmul.bf16.gmra.mxu3 %v821_v39  ;;  %v836_v52 = vpack.c.bf16 %v516_v61, %v500_v58  ;;  %v532_v56 = vld [vmem:[%s5923_s0 + $0x1030] sm:$0xff]  ;;  %v549_v58 = vld [vmem:[%s5923_s0 + $0x10b8] sm:$0xff] }
 0x228   :  { %v1899_v4 = vpop.f32.mrf.mxu2  ;;  %v1703_v32 = vpop.f32.mrf.mxu0 }
 0x229   :  { %v1900_v31 = vadd.f32 %v1899_v4, %v1801_v55  ;;  %v1998_v28 = vpop.f32.mrf.mxu3  ;;  %v1704_v60 = vadd.f32 %v1703_v32, %v3762_v12  ;;  %v1802_v37 = vpop.f32.mrf.mxu1  ;;  %v515_v12 = vld [vmem:[%s5923_s0 + $0xfa8] sm:$0xff] }
 0x22a   :  { %v835_v15 = vpack.c.bf16 %v515_v12, %v499_v57  ;;  %v548_v57 = vld [vmem:[%s5923_s0 + $0x10b0] sm:$0xff]  ;;  %v533_v12 = vld [vmem:[%s5923_s0 + $0x1038] sm:$0xff] }
 0x22b   :  { %v4472_v40 = vadd.f32 %v1998_v28, %v1900_v31  ;;  %v1803_v43 = vadd.f32 %v1802_v37, %v1704_v60 }
 0x230   :  { %v1901_v39 = vpop.f32.mrf.mxu2  ;;  %v1706_v14 = vpop.f32.mrf.mxu0 }
 0x231   :  { %v1902_v5 = vadd.f32 %v1901_v39, %v1803_v43  ;;  %v2000_v55 = vpop.f32.mrf.mxu3  ;;  %v1707_v35 = vadd.f32 %v1706_v14, %v3765_v22  ;;  %v1805_v25 = vpop.f32.mrf.mxu1  ;;  %v530_v22 = vld [vmem:[%s5923_s0 + $0x1020] sm:$0xff] }
 0x232   :  { %v546_v43 = vld [vmem:[%s5923_s0 + $0x10a0] sm:$0xff] }
 0x233   :  { %v4499_v18 = vadd.f32 %v2000_v55, %v1902_v5  ;;  %v1806_v24 = vadd.f32 %v1805_v25, %v1707_v35  ;;  %1745 = vmatmul.bf16.gmra.mxu0 %v834_v47  ;;  %v850_v6 = vpack.c.bf16 %v546_v43, %v530_v22  ;;  %v852_v55 = vpack.c.bf16 %v548_v57, %v532_v56 }
 0x234   :  { %1844 = vmatmul.bf16.gmra.mxu1 %v835_v15 }
 0x235   :  { %1943 = vmatmul.bf16.gmra.mxu2 %v836_v52  ;;  %v853_v52 = vpack.c.bf16 %v549_v58, %v533_v12  ;;  %v1100_v12 = vld [vmem:[%s5922_s1 + $0x6f0] sm:$0xff]  ;;  %v1101_v58 = vld [vmem:[%s5922_s1 + $0x6f8] sm:$0xff] }
 0x236   :  { %2042 = vmatmul.bf16.gmra.mxu3 %v837_v17  ;;  %v1116_v17 = vld [vmem:[%s5922_s1 + $0x770] sm:$0xff] }
 0x238   :  { %v1904_v4 = vpop.f32.mrf.mxu2  ;;  %v1708_v28 = vpop.f32.mrf.mxu0 }
 0x239   :  { %v1905_v30 = vadd.f32 %v1904_v4, %v1806_v24  ;;  %v2003_v31 = vpop.f32.mrf.mxu3  ;;  %v1709_v32 = vadd.f32 %v1708_v28, %v3792_v49  ;;  %v1807_v36 = vpop.f32.mrf.mxu1  ;;  %v547_v49 = vld [vmem:[%s5923_s0 + $0x10a8] sm:$0xff]  ;;  %v1117_v24 = vld [vmem:[%s5922_s1 + $0x778] sm:$0xff] }
 0x23a   :  { %v851_v5 = vpack.c.bf16 %v547_v49, %v531_v44  ;;  %v1253_v4 = vpack.c.bf16 %v1117_v24, %v1116_v17  ;;  %v1133_v28 = vld [vmem:[%s5922_s1 + $0x7f8] sm:$0xff] }
 0x23b   :  { %v4502_v60 = vadd.f32 %v2003_v31, %v1905_v30  ;;  %v1808_v37 = vadd.f32 %v1807_v36, %v1709_v32  ;;  %v1085_v30 = vld [vmem:[%s5922_s1 + $0x678] sm:$0xff]  ;;  %v1132_v31 = vld [vmem:[%s5922_s1 + $0x7f0] sm:$0xff] }
 0x23c   :  { %2652 = vmatpush.bf16.msrb.mxu2 %v1253_v4 }
 0x240   :  { %v1906_v61 = vpop.f32.mrf.mxu2  ;;  %v1711_v47 = vpop.f32.mrf.mxu0 }
 0x241   :  { %v1907_v19 = vadd.f32 %v1906_v61, %v1808_v37  ;;  %v2005_v39 = vpop.f32.mrf.mxu3  ;;  %v1712_v14 = vadd.f32 %v1711_v47, %v3813_v7  ;;  %v1810_v15 = vpop.f32.mrf.mxu1  ;;  %v1084_v7 = vld [vmem:[%s5922_s1 + $0x670] sm:$0xff]  ;;  %v1261_v37 = vpack.c.bf16 %v1133_v28, %v1132_v31  ;;  %v579_v47 = vld [vmem:[%s5923_s0 + $0x11a8] sm:$0xff] }
 0x242   :  { %v1237_v36 = vpack.c.bf16 %v1085_v30, %v1084_v7 }
 0x243   :  { %v4529_v35 = vadd.f32 %v2005_v39, %v1907_v19  ;;  %v1811_v25 = vadd.f32 %v1810_v15, %v1712_v14  ;;  %1750 = vmatmul.bf16.gmra.mxu0 %v850_v6  ;;  %2751 = vmatpush.bf16.msrb.mxu3 %v1261_v37  ;;  %v1245_v6 = vpack.c.bf16 %v1101_v58, %v1100_v12  ;;  %v562_v19 = vld [vmem:[%s5923_s0 + $0x1120] sm:$0xff]  ;;  %v563_v39 = vld [vmem:[%s5923_s0 + $0x1128] sm:$0xff]  ;;  %v565_v14 = vld [vmem:[%s5923_s0 + $0x1138] sm:$0xff] }
 0x244   :  { %1849 = vmatmul.bf16.gmra.mxu1 %v851_v5  ;;  %2454 = vmatpush.bf16.msrb.mxu0 %v1237_v36  ;;  %v564_v5 = vld [vmem:[%s5923_s0 + $0x1130] sm:$0xff]  ;;  %v581_v15 = vld [vmem:[%s5923_s0 + $0x11b8] sm:$0xff]  ;;  %v867_v4 = vpack.c.bf16 %v579_v47, %v563_v39 }
 0x245   :  { %1948 = vmatmul.bf16.gmra.mxu2 %v852_v55  ;;  %v580_v55 = vld [vmem:[%s5923_s0 + $0x11b0] sm:$0xff]  ;;  %2553 = vmatpush.bf16.msrb.mxu1 %v1245_v6  ;;  %v38_v6 = vld [vmem:[%s5923_s0 + $0xc0] sm:$0xff]  ;;  %v25_v47 = vld [vmem:[%s5923_s0 + $0x58] sm:$0xff] }
 0x246   :  { %2047 = vmatmul.bf16.gmra.mxu3 %v853_v52  ;;  %v868_v30 = vpack.c.bf16 %v580_v55, %v564_v5  ;;  %v40_v39 = vld [vmem:[%s5923_s0 + $0xd0] sm:$0xff]  ;;  %v41_v5 = vld [vmem:[%s5923_s0 + $0xd8] sm:$0xff] }
 0x248   :  { %v1909_v32 = vpop.f32.mrf.mxu2  ;;  %v1713_v44 = vpop.f32.mrf.mxu0 }
 0x249   :  { %v1910_v22 = vadd.f32 %v1909_v32, %v1811_v25  ;;  %v2008_v43 = vpop.f32.mrf.mxu3  ;;  %v1714_v49 = vadd.f32 %v1713_v44, %v3846_v38  ;;  %v1812_v56 = vpop.f32.mrf.mxu1  ;;  %v578_v38 = vld [vmem:[%s5923_s0 + $0x11a0] sm:$0xff]  ;;  %v869_v32 = vpack.c.bf16 %v581_v15, %v565_v14 }
 0x24a   :  { %v866_v25 = vpack.c.bf16 %v578_v38, %v562_v19  ;;  %v23_v19 = vld [vmem:[%s5923_s0 + $0x48] sm:$0xff]  ;;  %v24_v38 = vld [vmem:[%s5923_s0 + $0x50] sm:$0xff] }
 0x24b   :  { %v4550_v57 = vadd.f32 %v2008_v43, %v1910_v22  ;;  %v1813_v61 = vadd.f32 %v1812_v56, %v1714_v49 }
 0x250   :  { %v1911_v52 = vpop.f32.mrf.mxu2  ;;  %v1716_v7 = vpop.f32.mrf.mxu0 }
 0x251   :  { %v1912_v17 = vadd.f32 %v1911_v52, %v1813_v61  ;;  %v2010_v24 = vpop.f32.mrf.mxu3  ;;  %v1717_v31 = vadd.f32 %v1716_v7, %v3849_v50  ;;  %v1815_v28 = vpop.f32.mrf.mxu1  ;;  %v22_v50 = vld [vmem:[%s5923_s0 + $0x40] sm:$0xff] }
 0x252   :  { %v598_v14 = vpack.c.bf16 %v38_v6, %v22_v50  ;;  %v1115_v50 = vld [vmem:[%s5922_s1 + $0x768] sm:$0xff] }
 0x253   :  { %v4583_v36 = vadd.f32 %v2010_v24, %v1912_v17  ;;  %v1816_v37 = vadd.f32 %v1815_v28, %v1717_v31  ;;  %1755 = vmatmul.bf16.gmra.mxu0 %v866_v25  ;;  %v600_v24 = vpack.c.bf16 %v40_v39, %v24_v38  ;;  %v55_v6 = vld [vmem:[%s5923_s0 + $0x148] sm:$0xff]  ;;  %v1130_v39 = vld [vmem:[%s5922_s1 + $0x7e0] sm:$0xff] }
 0x254   :  { %1854 = vmatmul.bf16.gmra.mxu1 %v867_v4  ;;  %v1083_v38 = vld [vmem:[%s5922_s1 + $0x668] sm:$0xff] }
 0x255   :  { %1953 = vmatmul.bf16.gmra.mxu2 %v868_v30  ;;  %v601_v30 = vpack.c.bf16 %v41_v5, %v25_v47  ;;  %v1131_v5 = vld [vmem:[%s5922_s1 + $0x7e8] sm:$0xff] }
 0x256   :  { %2052 = vmatmul.bf16.gmra.mxu3 %v869_v32 }
 0x258   :  { %v1914_v22 = vpop.f32.mrf.mxu2  ;;  %v1718_v49 = vpop.f32.mrf.mxu0 }
 0x259   :  { %v1915_v43 = vadd.f32 %v1914_v22, %v1816_v37  ;;  %v2013_v44 = vpop.f32.mrf.mxu3  ;;  %v1719_v56 = vadd.f32 %v1718_v49, %v3876_v13  ;;  %v1817_v12 = vpop.f32.mrf.mxu1  ;;  %v39_v13 = vld [vmem:[%s5923_s0 + $0xc8] sm:$0xff] }
 0x25a   :  { %v599_v17 = vpack.c.bf16 %v39_v13, %v23_v19  ;;  %v1082_v13 = vld [vmem:[%s5922_s1 + $0x660] sm:$0xff] }
 0x25b   :  { %v4586_v58 = vadd.f32 %v2013_v44, %v1915_v43  ;;  %v1818_v61 = vadd.f32 %v1817_v12, %v1719_v56  ;;  %v70_v12 = vld [vmem:[%s5923_s0 + $0x1c0] sm:$0xff]  ;;  %v1236_v47 = vpack.c.bf16 %v1083_v38, %v1082_v13 }
 0x25d   :  { %2455 = vmatpush.bf16.msrb.mxu0 %v1236_v47 }
 0x260   :  { %v1916_v55 = vpop.f32.mrf.mxu2  ;;  %v1721_v25 = vpop.f32.mrf.mxu0 }
 0x261   :  { %v1917_v15 = vadd.f32 %v1916_v55, %v1818_v61  ;;  %v2015_v52 = vpop.f32.mrf.mxu3  ;;  %v1722_v7 = vadd.f32 %v1721_v25, %v3879_v26  ;;  %v1820_v4 = vpop.f32.mrf.mxu1  ;;  %v54_v26 = vld [vmem:[%s5923_s0 + $0x140] sm:$0xff]  ;;  %v72_v25 = vld [vmem:[%s5923_s0 + $0x1d0] sm:$0xff] }
 0x262   :  { %v1114_v61 = vld [vmem:[%s5922_s1 + $0x760] sm:$0xff] }
 0x263   :  { %v4613_v31 = vadd.f32 %v2015_v52, %v1917_v15  ;;  %v1821_v28 = vadd.f32 %v1820_v4, %v1722_v7  ;;  %2066 = vmatmul.bf16.vlgmr.msra.gmra.mxu0 %v598_v14  ;;  %v1252_v19 = vpack.c.bf16 %v1115_v50, %v1114_v61  ;;  %v1098_v55 = vld [vmem:[%s5922_s1 + $0x6e0] sm:$0xff]  ;;  %v1099_v14 = vld [vmem:[%s5922_s1 + $0x6e8] sm:$0xff]  ;;  %v56_v52 = vld [vmem:[%s5923_s0 + $0x150] sm:$0xff] }
 0x264   :  { %2165 = vmatmul.bf16.vlgmr.msra.gmra.mxu1 %v599_v17  ;;  %v71_v15 = vld [vmem:[%s5923_s0 + $0x1c8] sm:$0xff]  ;;  %v1260_v17 = vpack.c.bf16 %v1131_v5, %v1130_v39  ;;  %v57_v7 = vld [vmem:[%s5923_s0 + $0x158] sm:$0xff] }
 0x265   :  { %2264 = vmatmul.bf16.vlgmr.msra.gmra.mxu2 %v600_v24  ;;  %v1244_v24 = vpack.c.bf16 %v1099_v14, %v1098_v55  ;;  %v73_v4 = vld [vmem:[%s5923_s0 + $0x1d8] sm:$0xff]  ;;  %v102_v55 = vld [vmem:[%s5923_s0 + $0x2c0] sm:$0xff]  ;;  %v87_v14 = vld [vmem:[%s5923_s0 + $0x248] sm:$0xff] }
 0x266   :  { %2363 = vmatmul.bf16.vlgmr.msra.gmra.mxu3 %v601_v30  ;;  %2653 = vmatpush.bf16.msrb.mxu2 %v1252_v19  ;;  %v617_v50 = vpack.c.bf16 %v73_v4, %v57_v7 }
 0x267   :  { %2752 = vmatpush.bf16.msrb.mxu3 %v1260_v17  ;;  %2554 = vmatpush.bf16.msrb.mxu1 %v1244_v24  ;;  %v105_v17 = vld [vmem:[%s5923_s0 + $0x2d8] sm:$0xff] }
 0x268   :  { %v1919_v32 = vpop.f32.mrf.mxu2  ;;  %v1723_v43 = vpop.f32.mrf.mxu0 }
 0x269   :  { %v1920_v37 = vadd.f32 %v1919_v32, %v1821_v28  ;;  %v2018_v22 = vpop.f32.mrf.mxu3  ;;  %v1724_v44 = vadd.f32 %v1723_v43, %v3930_v8  ;;  %v1822_v49 = vpop.f32.mrf.mxu1  ;;  %v614_v28 = vpack.c.bf16 %v70_v12, %v54_v26  ;;  %v615_v43 = vpack.c.bf16 %v71_v15, %v55_v6  ;;  %v88_v15 = vld [vmem:[%s5923_s0 + $0x250] sm:$0xff] }
 0x26b   :  { %v4616_v56 = vadd.f32 %v2018_v22, %v1920_v37  ;;  %v1823_v8 = vadd.f32 %v1822_v49, %v1724_v44  ;;  %v616_v44 = vpack.c.bf16 %v72_v25, %v56_v52  ;;  %v104_v52 = vld [vmem:[%s5923_s0 + $0x2d0] sm:$0xff]  ;;  %v89_v25 = vld [vmem:[%s5923_s0 + $0x258] sm:$0xff] }
 0x270   :  { %v1921_v30 = vpop.f32.mrf.mxu2  ;;  %v1726_v22 = vpop.f32.mrf.mxu0 }
 0x271   :  { %v1922_v32 = vadd.f32 %v1921_v30, %v1823_v8  ;;  %v2020_v37 = vpop.f32.mrf.mxu3  ;;  %v1727_v49 = vadd.f32 %v1726_v22, %v3933_v20  ;;  %v1825_v61 = vpop.f32.mrf.mxu1  ;;  %v86_v20 = vld [vmem:[%s5923_s0 + $0x240] sm:$0xff] }
 0x272   :  { %v630_v7 = vpack.c.bf16 %v102_v55, %v86_v20  ;;  %v119_v20 = vld [vmem:[%s5923_s0 + $0x348] sm:$0xff]  ;;  %v1113_v55 = vld [vmem:[%s5922_s1 + $0x758] sm:$0xff] }
 0x273   :  { %v4667_v19 = vadd.f32 %v2020_v37, %v1922_v32  ;;  %v1826_v13 = vadd.f32 %v1825_v61, %v1727_v49  ;;  %2071 = vmatmul.bf16.gmra.mxu0 %v614_v28  ;;  %v632_v37 = vpack.c.bf16 %v104_v52, %v88_v15  ;;  %v1081_v15 = vld [vmem:[%s5922_s1 + $0x658] sm:$0xff]  ;;  %v1128_v52 = vld [vmem:[%s5922_s1 + $0x7d0] sm:$0xff] }
 0x274   :  { %2170 = vmatmul.bf16.gmra.mxu1 %v615_v43 }
 0x275   :  { %2269 = vmatmul.bf16.gmra.mxu2 %v616_v44  ;;  %v633_v44 = vpack.c.bf16 %v105_v17, %v89_v25  ;;  %v1129_v25 = vld [vmem:[%s5922_s1 + $0x7d8] sm:$0xff]  ;;  %v135_v17 = vld [vmem:[%s5923_s0 + $0x3c8] sm:$0xff] }
 0x276   :  { %2368 = vmatmul.bf16.gmra.mxu3 %v617_v50 }
 0x278   :  { %v1924_v38 = vpop.f32.mrf.mxu2  ;;  %v1728_v39 = vpop.f32.mrf.mxu0 }
 0x279   :  { %v1925_v26 = vadd.f32 %v1924_v38, %v1826_v13  ;;  %v2023_v12 = vpop.f32.mrf.mxu3  ;;  %v1729_v8 = vadd.f32 %v1728_v39, %v3960_v53  ;;  %v1827_v47 = vpop.f32.mrf.mxu1  ;;  %v103_v53 = vld [vmem:[%s5923_s0 + $0x2c8] sm:$0xff] }
 0x27a   :  { %v631_v32 = vpack.c.bf16 %v103_v53, %v87_v14  ;;  %v1080_v14 = vld [vmem:[%s5922_s1 + $0x650] sm:$0xff] }
 0x27b   :  { %v4670_v6 = vadd.f32 %v2023_v12, %v1925_v26  ;;  %v1828_v5 = vadd.f32 %v1827_v47, %v1729_v8  ;;  %v134_v47 = vld [vmem:[%s5923_s0 + $0x3c0] sm:$0xff] }
 0x280   :  { %v1926_v24 = vpop.f32.mrf.mxu2  ;;  %v1731_v28 = vpop.f32.mrf.mxu0 }
 0x281   :  { %v1927_v4 = vadd.f32 %v1926_v24, %v1828_v5  ;;  %v2025_v30 = vpop.f32.mrf.mxu3  ;;  %v1732_v22 = vadd.f32 %v1731_v28, %v3963_v0  ;;  %v1830_v43 = vpop.f32.mrf.mxu1  ;;  %v118_v0 = vld [vmem:[%s5923_s0 + $0x340] sm:$0xff]  ;;  %v120_v24 = vld [vmem:[%s5923_s0 + $0x350] sm:$0xff]  ;;  %v121_v28 = vld [vmem:[%s5923_s0 + $0x358] sm:$0xff] }
 0x283   :  { %v4697_v49 = vadd.f32 %v2025_v30, %v1927_v4  ;;  %v1831_v61 = vadd.f32 %v1830_v43, %v1732_v22  ;;  %2076 = vmatmul.bf16.gmra.mxu0 %v630_v7  ;;  %v136_v7 = vld [vmem:[%s5923_s0 + $0x3d0] sm:$0xff]  ;;  %v1235_v4 = vpack.c.bf16 %v1081_v15, %v1080_v14  ;;  %v1259_v30 = vpack.c.bf16 %v1129_v25, %v1128_v52 }
 0x284   :  { %2175 = vmatmul.bf16.gmra.mxu1 %v631_v32  ;;  %v137_v32 = vld [vmem:[%s5923_s0 + $0x3d8] sm:$0xff]  ;;  %v646_v22 = vpack.c.bf16 %v134_v47, %v118_v0 }
 0x285   :  { %2274 = vmatmul.bf16.gmra.mxu2 %v632_v37  ;;  %2456 = vmatpush.bf16.msrb.mxu0 %v1235_v4  ;;  %v1097_v0 = vld [vmem:[%s5922_s1 + $0x6d8] sm:$0xff]  ;;  %v152_v4 = vld [vmem:[%s5923_s0 + $0x450] sm:$0xff] }
 0x286   :  { %2373 = vmatmul.bf16.gmra.mxu3 %v633_v44 }
 0x287   :  { %2753 = vmatpush.bf16.msrb.mxu3 %v1259_v30  ;;  %v168_v30 = vld [vmem:[%s5923_s0 + $0x4d0] sm:$0xff] }
 0x288   :  { %v1929_v50 = vpop.f32.mrf.mxu2  ;;  %v1733_v26 = vpop.f32.mrf.mxu0 }
 0x289   :  { %v1930_v13 = vadd.f32 %v1929_v50, %v1831_v61  ;;  %v2028_v38 = vpop.f32.mrf.mxu3  ;;  %v1734_v12 = vadd.f32 %v1733_v26, %v4013_v45  ;;  %v1832_v39 = vpop.f32.mrf.mxu1  ;;  %v1112_v45 = vld [vmem:[%s5922_s1 + $0x750] sm:$0xff]  ;;  %v647_v50 = vpack.c.bf16 %v135_v17, %v119_v20  ;;  %v150_v17 = vld [vmem:[%s5923_s0 + $0x440] sm:$0xff] }
 0x28a   :  { %v1251_v53 = vpack.c.bf16 %v1113_v55, %v1112_v45  ;;  %v1096_v45 = vld [vmem:[%s5922_s1 + $0x6d0] sm:$0xff] }
 0x28b   :  { %v4700_v8 = vadd.f32 %v2028_v38, %v1930_v13  ;;  %v1833_v5 = vadd.f32 %v1832_v39, %v1734_v12  ;;  %v648_v13 = vpack.c.bf16 %v136_v7, %v120_v24  ;;  %v649_v12 = vpack.c.bf16 %v137_v32, %v121_v28  ;;  %v166_v24 = vld [vmem:[%s5923_s0 + $0x4c0] sm:$0xff]  ;;  %v151_v7 = vld [vmem:[%s5923_s0 + $0x448] sm:$0xff]  ;;  %v153_v28 = vld [vmem:[%s5923_s0 + $0x458] sm:$0xff] }
 0x28c   :  { %2654 = vmatpush.bf16.msrb.mxu2 %v1251_v53  ;;  %v169_v32 = vld [vmem:[%s5923_s0 + $0x4d8] sm:$0xff] }
 0x290   :  { %v1931_v37 = vpop.f32.mrf.mxu2  ;;  %v1736_v61 = vpop.f32.mrf.mxu0 }
 0x291   :  { %v1932_v43 = vadd.f32 %v1931_v37, %v1833_v5  ;;  %v2030_v44 = vpop.f32.mrf.mxu3  ;;  %v1737_v38 = vadd.f32 %v1736_v61, %v4022_v2  ;;  %v1835_v26 = vpop.f32.mrf.mxu1  ;;  %v1243_v5 = vpack.c.bf16 %v1097_v0, %v1096_v45 }
 0x293   :  { %v4745_v39 = vadd.f32 %v2030_v44, %v1932_v43  ;;  %v1836_v47 = vadd.f32 %v1835_v26, %v1737_v38  ;;  %2081 = vmatmul.bf16.gmra.mxu0 %v646_v22  ;;  %2555 = vmatpush.bf16.msrb.mxu1 %v1243_v5  ;;  %v662_v22 = vpack.c.bf16 %v166_v24, %v150_v17  ;;  %v183_v17 = vld [vmem:[%s5923_s0 + $0x548] sm:$0xff]  ;;  %v184_v24 = vld [vmem:[%s5923_s0 + $0x550] sm:$0xff] }
 0x294   :  { %2180 = vmatmul.bf16.gmra.mxu1 %v647_v50 }
 0x295   :  { %2279 = vmatmul.bf16.gmra.mxu2 %v648_v13  ;;  %v664_v13 = vpack.c.bf16 %v168_v30, %v152_v4  ;;  %v201_v4 = vld [vmem:[%s5923_s0 + $0x5d8] sm:$0xff] }
 0x296   :  { %2378 = vmatmul.bf16.gmra.mxu3 %v649_v12  ;;  %v665_v12 = vpack.c.bf16 %v169_v32, %v153_v28 }
 0x298   :  { %v1934_v2 = vpop.f32.mrf.mxu2  ;;  %v1738_v14 = vpop.f32.mrf.mxu0 }
 0x299   :  { %v1935_v20 = vadd.f32 %v1934_v2, %v1836_v47  ;;  %v2033_v55 = vpop.f32.mrf.mxu3  ;;  %v1739_v53 = vadd.f32 %v1738_v14, %v4049_v34  ;;  %v1837_v15 = vpop.f32.mrf.mxu1  ;;  %v167_v34 = vld [vmem:[%s5923_s0 + $0x4c8] sm:$0xff] }
 0x29a   :  { %v663_v50 = vpack.c.bf16 %v167_v34, %v151_v7  ;;  %v200_v7 = vld [vmem:[%s5923_s0 + $0x5d0] sm:$0xff]  ;;  %v185_v34 = vld [vmem:[%s5923_s0 + $0x558] sm:$0xff] }
 0x29b   :  { %v4754_v52 = vadd.f32 %v2033_v55, %v1935_v20  ;;  %v1838_v25 = vadd.f32 %v1837_v15, %v1739_v53 }
 0x2a0   :  { %v1936_v37 = vpop.f32.mrf.mxu2  ;;  %v1741_v61 = vpop.f32.mrf.mxu0 }
 0x2a1   :  { %v1937_v43 = vadd.f32 %v1936_v37, %v1838_v25  ;;  %v2035_v44 = vpop.f32.mrf.mxu3  ;;  %v1742_v38 = vadd.f32 %v1741_v61, %v4052_v51  ;;  %v1840_v26 = vpop.f32.mrf.mxu1  ;;  %v182_v51 = vld [vmem:[%s5923_s0 + $0x540] sm:$0xff] }
 0x2a2   :  { %v198_v25 = vld [vmem:[%s5923_s0 + $0x5c0] sm:$0xff] }
 0x2a3   :  { %v4781_v45 = vadd.f32 %v2035_v44, %v1937_v43  ;;  %v1841_v0 = vadd.f32 %v1840_v26, %v1742_v38  ;;  %2086 = vmatmul.bf16.gmra.mxu0 %v662_v22  ;;  %v678_v28 = vpack.c.bf16 %v198_v25, %v182_v51  ;;  %v680_v44 = vpack.c.bf16 %v200_v7, %v184_v24  ;;  %v1110_v26 = vld [vmem:[%s5922_s1 + $0x740] sm:$0xff]  ;;  %v1095_v25 = vld [vmem:[%s5922_s1 + $0x6c8] sm:$0xff] }
 0x2a4   :  { %2185 = vmatmul.bf16.gmra.mxu1 %v663_v50 }
 0x2a5   :  { %2284 = vmatmul.bf16.gmra.mxu2 %v664_v13  ;;  %v681_v13 = vpack.c.bf16 %v201_v4, %v185_v34 }
 0x2a6   :  { %2383 = vmatmul.bf16.gmra.mxu3 %v665_v12  ;;  %v1111_v12 = vld [vmem:[%s5922_s1 + $0x748] sm:$0xff] }
 0x2a8   :  { %v1939_v47 = vpop.f32.mrf.mxu2  ;;  %v1743_v20 = vpop.f32.mrf.mxu0 }
 0x2a9   :  { %v1940_v5 = vadd.f32 %v1939_v47, %v1841_v0  ;;  %v2038_v2 = vpop.f32.mrf.mxu3  ;;  %v1744_v55 = vadd.f32 %v1743_v20, %v4079_v21  ;;  %v1842_v14 = vpop.f32.mrf.mxu1  ;;  %v199_v21 = vld [vmem:[%s5923_s0 + $0x5c8] sm:$0xff]  ;;  %v1250_v47 = vpack.c.bf16 %v1111_v12, %v1110_v26 }
 0x2aa   :  { %v679_v43 = vpack.c.bf16 %v199_v21, %v183_v17 }
 0x2ab   :  { %v4784_v53 = vadd.f32 %v2038_v2, %v1940_v5  ;;  %v1843_v15 = vadd.f32 %v1842_v14, %v1744_v55  ;;  %v1078_v5 = vld [vmem:[%s5922_s1 + $0x640] sm:$0xff]  ;;  %v1127_v55 = vld [vmem:[%s5922_s1 + $0x7c8] sm:$0xff]  ;;  %2655 = vmatpush.bf16.msrb.mxu2 %v1250_v47 }
 0x2ac   :  { %v1126_v2 = vld [vmem:[%s5922_s1 + $0x7c0] sm:$0xff] }
 0x2ad   :  { %v1258_v14 = vpack.c.bf16 %v1127_v55, %v1126_v2 }
 0x2af   :  { %2754 = vmatpush.bf16.msrb.mxu3 %v1258_v14 }
 0x2b0   :  { %v1941_v30 = vpop.f32.mrf.mxu2  ;;  %v1746_v22 = vpop.f32.mrf.mxu0 }
 0x2b1   :  { %v1942_v32 = vadd.f32 %v1941_v30, %v1843_v15  ;;  %v2040_v37 = vpop.f32.mrf.mxu3  ;;  %v1747_v61 = vadd.f32 %v1746_v22, %v4106_v62  ;;  %v1845_v50 = vpop.f32.mrf.mxu1  ;;  %v1079_v62 = vld [vmem:[%s5922_s1 + $0x648] sm:$0xff]  ;;  %v1094_v15 = vld [vmem:[%s5922_s1 + $0x6c0] sm:$0xff] }
 0x2b2   :  { %v1234_v20 = vpack.c.bf16 %v1079_v62, %v1078_v5  ;;  %v1242_v7 = vpack.c.bf16 %v1095_v25, %v1094_v15  ;;  %v215_v22 = vld [vmem:[%s5923_s0 + $0x648] sm:$0xff] }
 0x2b3   :  { %v4811_v38 = vadd.f32 %v2040_v37, %v1942_v32  ;;  %v1846_v0 = vadd.f32 %v1845_v50, %v1747_v61  ;;  %2091 = vmatmul.bf16.gmra.mxu0 %v678_v28  ;;  %v214_v32 = vld [vmem:[%s5923_s0 + $0x640] sm:$0xff]  ;;  %v217_v61 = vld [vmem:[%s5923_s0 + $0x658] sm:$0xff] }
 0x2b4   :  { %2190 = vmatmul.bf16.gmra.mxu1 %v679_v43  ;;  %2457 = vmatpush.bf16.msrb.mxu0 %v1234_v20  ;;  %v230_v37 = vld [vmem:[%s5923_s0 + $0x6c0] sm:$0xff]  ;;  %v216_v43 = vld [vmem:[%s5923_s0 + $0x650] sm:$0xff]  ;;  %v233_v50 = vld [vmem:[%s5923_s0 + $0x6d8] sm:$0xff] }
 0x2b5   :  { %2289 = vmatmul.bf16.gmra.mxu2 %v680_v44  ;;  %2556 = vmatpush.bf16.msrb.mxu1 %v1242_v7  ;;  %v232_v44 = vld [vmem:[%s5923_s0 + $0x6d0] sm:$0xff]  ;;  %v694_v26 = vpack.c.bf16 %v230_v37, %v214_v32  ;;  %v697_v55 = vpack.c.bf16 %v233_v50, %v217_v61  ;;  %v247_v32 = vld [vmem:[%s5923_s0 + $0x748] sm:$0xff] }
 0x2b6   :  { %2388 = vmatmul.bf16.gmra.mxu3 %v681_v13  ;;  %v696_v62 = vpack.c.bf16 %v232_v44, %v216_v43  ;;  %v248_v37 = vld [vmem:[%s5923_s0 + $0x750] sm:$0xff]  ;;  %v265_v43 = vld [vmem:[%s5923_s0 + $0x7d8] sm:$0xff] }
 0x2b8   :  { %v1944_v51 = vpop.f32.mrf.mxu2  ;;  %v1748_v24 = vpop.f32.mrf.mxu0 }
 0x2b9   :  { %v1945_v17 = vadd.f32 %v1944_v51, %v1846_v0  ;;  %v2043_v21 = vpop.f32.mrf.mxu3  ;;  %v1749_v34 = vadd.f32 %v1748_v24, %v4133_v33  ;;  %v1847_v4 = vpop.f32.mrf.mxu1  ;;  %v231_v33 = vld [vmem:[%s5923_s0 + $0x6c8] sm:$0xff] }
 0x2ba   :  { %v695_v5 = vpack.c.bf16 %v231_v33, %v215_v22  ;;  %v264_v22 = vld [vmem:[%s5923_s0 + $0x7d0] sm:$0xff]  ;;  %v249_v33 = vld [vmem:[%s5923_s0 + $0x758] sm:$0xff] }
 0x2bb   :  { %v4838_v30 = vadd.f32 %v2043_v21, %v1945_v17  ;;  %v1848_v28 = vadd.f32 %v1847_v4, %v1749_v34 }
 0x2c0   :  { %v1946_v13 = vpop.f32.mrf.mxu2  ;;  %v1751_v47 = vpop.f32.mrf.mxu0 }
 0x2c1   :  { %v1947_v12 = vadd.f32 %v1946_v13, %v1848_v28  ;;  %v2045_v0 = vpop.f32.mrf.mxu3  ;;  %v1752_v2 = vadd.f32 %v1751_v47, %v4136_v54  ;;  %v1850_v20 = vpop.f32.mrf.mxu1  ;;  %v246_v54 = vld [vmem:[%s5923_s0 + $0x740] sm:$0xff] }
 0x2c2   :  { %v262_v28 = vld [vmem:[%s5923_s0 + $0x7c0] sm:$0xff] }
 0x2c3   :  { %v4865_v14 = vadd.f32 %v2045_v0, %v1947_v12  ;;  %v1851_v15 = vadd.f32 %v1850_v20, %v1752_v2  ;;  %2096 = vmatmul.bf16.gmra.mxu0 %v694_v26  ;;  %v710_v61 = vpack.c.bf16 %v262_v28, %v246_v54  ;;  %v712_v0 = vpack.c.bf16 %v264_v22, %v248_v37 }
 0x2c4   :  { %2195 = vmatmul.bf16.gmra.mxu1 %v695_v5 }
 0x2c5   :  { %2294 = vmatmul.bf16.gmra.mxu2 %v696_v62  ;;  %v713_v62 = vpack.c.bf16 %v265_v43, %v249_v33  ;;  %v1092_v33 = vld [vmem:[%s5922_s1 + $0x6b0] sm:$0xff]  ;;  %v1093_v43 = vld [vmem:[%s5922_s1 + $0x6b8] sm:$0xff] }
 0x2c6   :  { %2393 = vmatmul.bf16.gmra.mxu3 %v697_v55  ;;  %v1108_v55 = vld [vmem:[%s5922_s1 + $0x730] sm:$0xff] }
 0x2c8   :  { %v1949_v51 = vpop.f32.mrf.mxu2  ;;  %v1753_v21 = vpop.f32.mrf.mxu0 }
 0x2c9   :  { %v1950_v25 = vadd.f32 %v1949_v51, %v1851_v15  ;;  %v2048_v17 = vpop.f32.mrf.mxu3  ;;  %v1754_v24 = vadd.f32 %v1753_v21, %v4163_v29  ;;  %v1852_v7 = vpop.f32.mrf.mxu1  ;;  %v263_v29 = vld [vmem:[%s5923_s0 + $0x7c8] sm:$0xff]  ;;  %v1109_v15 = vld [vmem:[%s5922_s1 + $0x738] sm:$0xff] }
 0x2ca   :  { %v711_v12 = vpack.c.bf16 %v263_v29, %v247_v32  ;;  %v1249_v51 = vpack.c.bf16 %v1109_v15, %v1108_v55  ;;  %v1125_v21 = vld [vmem:[%s5922_s1 + $0x7b8] sm:$0xff] }
 0x2cb   :  { %v4868_v34 = vadd.f32 %v2048_v17, %v1950_v25  ;;  %v1853_v4 = vadd.f32 %v1852_v7, %v1754_v24  ;;  %v1077_v25 = vld [vmem:[%s5922_s1 + $0x638] sm:$0xff]  ;;  %v1124_v17 = vld [vmem:[%s5922_s1 + $0x7b0] sm:$0xff] }
 0x2cc   :  { %2656 = vmatpush.bf16.msrb.mxu2 %v1249_v51 }
 0x2d0   :  { %v1951_v44 = vpop.f32.mrf.mxu2  ;;  %v1756_v26 = vpop.f32.mrf.mxu0 }
 0x2d1   :  { %v1952_v50 = vadd.f32 %v1951_v44, %v1853_v4  ;;  %v2050_v13 = vpop.f32.mrf.mxu3  ;;  %v1757_v47 = vadd.f32 %v1756_v26, %v4184_v3  ;;  %v1855_v5 = vpop.f32.mrf.mxu1  ;;  %v1076_v3 = vld [vmem:[%s5922_s1 + $0x630] sm:$0xff]  ;;  %v1257_v4 = vpack.c.bf16 %v1125_v21, %v1124_v17  ;;  %v295_v26 = vld [vmem:[%s5923_s0 + $0x8c8] sm:$0xff] }
 0x2d2   :  { %v1233_v7 = vpack.c.bf16 %v1077_v25, %v1076_v3 }
 0x2d3   :  { %v4895_v2 = vadd.f32 %v2050_v13, %v1952_v50  ;;  %v1856_v20 = vadd.f32 %v1855_v5, %v1757_v47  ;;  %2101 = vmatmul.bf16.gmra.mxu0 %v710_v61  ;;  %2755 = vmatpush.bf16.msrb.mxu3 %v1257_v4  ;;  %v1241_v61 = vpack.c.bf16 %v1093_v43, %v1092_v33  ;;  %v278_v50 = vld [vmem:[%s5923_s0 + $0x840] sm:$0xff]  ;;  %v279_v13 = vld [vmem:[%s5923_s0 + $0x848] sm:$0xff]  ;;  %v281_v47 = vld [vmem:[%s5923_s0 + $0x858] sm:$0xff] }
 0x2d4   :  { %2200 = vmatmul.bf16.gmra.mxu1 %v711_v12  ;;  %2458 = vmatpush.bf16.msrb.mxu0 %v1233_v7  ;;  %v280_v12 = vld [vmem:[%s5923_s0 + $0x850] sm:$0xff]  ;;  %v297_v5 = vld [vmem:[%s5923_s0 + $0x8d8] sm:$0xff]  ;;  %v727_v51 = vpack.c.bf16 %v295_v26, %v279_v13 }
 0x2d5   :  { %2299 = vmatmul.bf16.gmra.mxu2 %v712_v0  ;;  %v296_v0 = vld [vmem:[%s5923_s0 + $0x8d0] sm:$0xff]  ;;  %2557 = vmatpush.bf16.msrb.mxu1 %v1241_v61  ;;  %v326_v61 = vld [vmem:[%s5923_s0 + $0x9c0] sm:$0xff]  ;;  %v313_v26 = vld [vmem:[%s5923_s0 + $0x958] sm:$0xff] }
 0x2d6   :  { %2398 = vmatmul.bf16.gmra.mxu3 %v713_v62  ;;  %v728_v25 = vpack.c.bf16 %v296_v0, %v280_v12  ;;  %v328_v13 = vld [vmem:[%s5923_s0 + $0x9d0] sm:$0xff]  ;;  %v329_v12 = vld [vmem:[%s5923_s0 + $0x9d8] sm:$0xff] }
 0x2d8   :  { %v1954_v24 = vpop.f32.mrf.mxu2  ;;  %v1758_v32 = vpop.f32.mrf.mxu0 }
 0x2d9   :  { %v1955_v54 = vadd.f32 %v1954_v24, %v1856_v20  ;;  %v2053_v28 = vpop.f32.mrf.mxu3  ;;  %v1759_v29 = vadd.f32 %v1758_v32, %v4217_v48  ;;  %v1857_v37 = vpop.f32.mrf.mxu1  ;;  %v294_v48 = vld [vmem:[%s5923_s0 + $0x8c0] sm:$0xff]  ;;  %v729_v24 = vpack.c.bf16 %v297_v5, %v281_v47 }
 0x2da   :  { %v726_v20 = vpack.c.bf16 %v294_v48, %v278_v50  ;;  %v311_v50 = vld [vmem:[%s5923_s0 + $0x948] sm:$0xff]  ;;  %v312_v48 = vld [vmem:[%s5923_s0 + $0x950] sm:$0xff] }
 0x2db   :  { %v4916_v22 = vadd.f32 %v2053_v28, %v1955_v54  ;;  %v1858_v44 = vadd.f32 %v1857_v37, %v1759_v29 }
 0x2e0   :  { %v1956_v62 = vpop.f32.mrf.mxu2  ;;  %v2067_v3 = vpop.f32.mrf.mxu0 }
 0x2e1   :  { %v1957_v55 = vadd.f32 %v1956_v62, %v1858_v44  ;;  %v2055_v15 = vpop.f32.mrf.mxu3  ;;  %v2068_v17 = vadd.f32 %v2067_v3, %v4220_v59  ;;  %v2166_v21 = vpop.f32.mrf.mxu1  ;;  %v310_v59 = vld [vmem:[%s5923_s0 + $0x940] sm:$0xff] }
 0x2e2   :  { %v742_v47 = vpack.c.bf16 %v326_v61, %v310_v59  ;;  %v1107_v59 = vld [vmem:[%s5922_s1 + $0x728] sm:$0xff] }
 0x2e3   :  { %v4949_v7 = vadd.f32 %v2055_v15, %v1957_v55  ;;  %v2167_v4 = vadd.f32 %v2166_v21, %v2068_v17  ;;  %2106 = vmatmul.bf16.gmra.mxu0 %v726_v20  ;;  %v744_v15 = vpack.c.bf16 %v328_v13, %v312_v48  ;;  %v343_v61 = vld [vmem:[%s5923_s0 + $0xa48] sm:$0xff]  ;;  %v1122_v13 = vld [vmem:[%s5922_s1 + $0x7a0] sm:$0xff] }
 0x2e4   :  { %2205 = vmatmul.bf16.gmra.mxu1 %v727_v51  ;;  %v1075_v48 = vld [vmem:[%s5922_s1 + $0x628] sm:$0xff] }
 0x2e5   :  { %2304 = vmatmul.bf16.gmra.mxu2 %v728_v25  ;;  %v745_v25 = vpack.c.bf16 %v329_v12, %v313_v26  ;;  %v1123_v12 = vld [vmem:[%s5922_s1 + $0x7a8] sm:$0xff] }
 0x2e6   :  { %2403 = vmatmul.bf16.gmra.mxu3 %v729_v24 }
 0x2e8   :  { %v2265_v54 = vpop.f32.mrf.mxu2  ;;  %v2069_v29 = vpop.f32.mrf.mxu0 }
 0x2e9   :  { %v2266_v28 = vadd.f32 %v2265_v54, %v2167_v4  ;;  %v2364_v32 = vpop.f32.mrf.mxu3  ;;  %v2070_v37 = vadd.f32 %v2069_v29, %v4247_v42  ;;  %v2168_v33 = vpop.f32.mrf.mxu1  ;;  %v327_v42 = vld [vmem:[%s5923_s0 + $0x9c8] sm:$0xff] }
 0x2ea   :  { %v743_v55 = vpack.c.bf16 %v327_v42, %v311_v50  ;;  %v1074_v42 = vld [vmem:[%s5922_s1 + $0x620] sm:$0xff] }
 0x2eb   :  { %v4952_v43 = vadd.f32 %v2364_v32, %v2266_v28  ;;  %v2169_v44 = vadd.f32 %v2168_v33, %v2070_v37  ;;  %v358_v33 = vld [vmem:[%s5923_s0 + $0xac0] sm:$0xff]  ;;  %v1232_v26 = vpack.c.bf16 %v1075_v48, %v1074_v42 }
 0x2ed   :  { %2459 = vmatpush.bf16.msrb.mxu0 %v1232_v26 }
 0x2f0   :  { %v2267_v0 = vpop.f32.mrf.mxu2  ;;  %v2072_v20 = vpop.f32.mrf.mxu0 }
 0x2f1   :  { %v2268_v5 = vadd.f32 %v2267_v0, %v2169_v44  ;;  %v2366_v62 = vpop.f32.mrf.mxu3  ;;  %v2073_v3 = vadd.f32 %v2072_v20, %v4250_v1  ;;  %v2171_v51 = vpop.f32.mrf.mxu1  ;;  %v342_v1 = vld [vmem:[%s5923_s0 + $0xa40] sm:$0xff]  ;;  %v360_v20 = vld [vmem:[%s5923_s0 + $0xad0] sm:$0xff] }
 0x2f2   :  { %v1106_v44 = vld [vmem:[%s5922_s1 + $0x720] sm:$0xff] }
 0x2f3   :  { %v4979_v17 = vadd.f32 %v2366_v62, %v2268_v5  ;;  %v2172_v21 = vadd.f32 %v2171_v51, %v2073_v3  ;;  %2111 = vmatmul.bf16.gmra.mxu0 %v742_v47  ;;  %v1248_v50 = vpack.c.bf16 %v1107_v59, %v1106_v44  ;;  %v1090_v0 = vld [vmem:[%s5922_s1 + $0x6a0] sm:$0xff]  ;;  %v1091_v47 = vld [vmem:[%s5922_s1 + $0x6a8] sm:$0xff]  ;;  %v344_v62 = vld [vmem:[%s5923_s0 + $0xa50] sm:$0xff] }
 0x2f4   :  { %2210 = vmatmul.bf16.gmra.mxu1 %v743_v55  ;;  %v359_v5 = vld [vmem:[%s5923_s0 + $0xac8] sm:$0xff]  ;;  %v1256_v55 = vpack.c.bf16 %v1123_v12, %v1122_v13  ;;  %v345_v3 = vld [vmem:[%s5923_s0 + $0xa58] sm:$0xff] }
 0x2f5   :  { %2309 = vmatmul.bf16.gmra.mxu2 %v744_v15  ;;  %v1240_v15 = vpack.c.bf16 %v1091_v47, %v1090_v0  ;;  %v361_v51 = vld [vmem:[%s5923_s0 + $0xad8] sm:$0xff]  ;;  %v390_v0 = vld [vmem:[%s5923_s0 + $0xbc0] sm:$0xff]  ;;  %v375_v47 = vld [vmem:[%s5923_s0 + $0xb48] sm:$0xff] }
 0x2f6   :  { %2408 = vmatmul.bf16.gmra.mxu3 %v745_v25  ;;  %2657 = vmatpush.bf16.msrb.mxu2 %v1248_v50  ;;  %v761_v59 = vpack.c.bf16 %v361_v51, %v345_v3 }
 0x2f7   :  { %2756 = vmatpush.bf16.msrb.mxu3 %v1256_v55  ;;  %2558 = vmatpush.bf16.msrb.mxu1 %v1240_v15  ;;  %v393_v55 = vld [vmem:[%s5923_s0 + $0xbd8] sm:$0xff] }
 0x2f8   :  { %v2270_v24 = vpop.f32.mrf.mxu2  ;;  %v2074_v28 = vpop.f32.mrf.mxu0 }
 0x2f9   :  { %v2271_v4 = vadd.f32 %v2270_v24, %v2172_v21  ;;  %v2369_v54 = vpop.f32.mrf.mxu3  ;;  %v2075_v32 = vadd.f32 %v2074_v28, %v4301_v10  ;;  %v2173_v29 = vpop.f32.mrf.mxu1  ;;  %v758_v21 = vpack.c.bf16 %v358_v33, %v342_v1  ;;  %v759_v28 = vpack.c.bf16 %v359_v5, %v343_v61  ;;  %v376_v5 = vld [vmem:[%s5923_s0 + $0xb50] sm:$0xff] }
 0x2fb   :  { %v4982_v37 = vadd.f32 %v2369_v54, %v2271_v4  ;;  %v2174_v10 = vadd.f32 %v2173_v29, %v2075_v32  ;;  %v760_v32 = vpack.c.bf16 %v360_v20, %v344_v62  ;;  %v392_v62 = vld [vmem:[%s5923_s0 + $0xbd0] sm:$0xff]  ;;  %v377_v20 = vld [vmem:[%s5923_s0 + $0xb58] sm:$0xff] }
 0x300   :  { %v2272_v25 = vpop.f32.mrf.mxu2  ;;  %v2077_v54 = vpop.f32.mrf.mxu0 }
 0x301   :  { %v2273_v24 = vadd.f32 %v2272_v25, %v2174_v10  ;;  %v2371_v4 = vpop.f32.mrf.mxu3  ;;  %v2078_v29 = vadd.f32 %v2077_v54, %v4304_v9  ;;  %v2176_v44 = vpop.f32.mrf.mxu1  ;;  %v374_v9 = vld [vmem:[%s5923_s0 + $0xb40] sm:$0xff] }
 0x302   :  { %v774_v3 = vpack.c.bf16 %v390_v0, %v374_v9  ;;  %v407_v9 = vld [vmem:[%s5923_s0 + $0xc48] sm:$0xff]  ;;  %v1105_v0 = vld [vmem:[%s5922_s1 + $0x718] sm:$0xff] }
 0x303   :  { %v5033_v50 = vadd.f32 %v2371_v4, %v2273_v24  ;;  %v2177_v42 = vadd.f32 %v2176_v44, %v2078_v29  ;;  %2116 = vmatmul.bf16.gmra.mxu0 %v758_v21  ;;  %v776_v4 = vpack.c.bf16 %v392_v62, %v376_v5  ;;  %v1073_v5 = vld [vmem:[%s5922_s1 + $0x618] sm:$0xff]  ;;  %v1120_v62 = vld [vmem:[%s5922_s1 + $0x790] sm:$0xff] }
 0x304   :  { %2215 = vmatmul.bf16.gmra.mxu1 %v759_v28 }
 0x305   :  { %2314 = vmatmul.bf16.gmra.mxu2 %v760_v32  ;;  %v777_v32 = vpack.c.bf16 %v393_v55, %v377_v20  ;;  %v1121_v20 = vld [vmem:[%s5922_s1 + $0x798] sm:$0xff]  ;;  %v423_v55 = vld [vmem:[%s5923_s0 + $0xcc8] sm:$0xff] }
 0x306   :  { %2413 = vmatmul.bf16.gmra.mxu3 %v761_v59 }
 0x308   :  { %v2275_v48 = vpop.f32.mrf.mxu2  ;;  %v2079_v13 = vpop.f32.mrf.mxu0 }
 0x309   :  { %v2276_v1 = vadd.f32 %v2275_v48, %v2177_v42  ;;  %v2374_v33 = vpop.f32.mrf.mxu3  ;;  %v2080_v10 = vadd.f32 %v2079_v13, %v4331_v63  ;;  %v2178_v26 = vpop.f32.mrf.mxu1  ;;  %v391_v63 = vld [vmem:[%s5923_s0 + $0xbc8] sm:$0xff] }
 0x30a   :  { %v775_v24 = vpack.c.bf16 %v391_v63, %v375_v47  ;;  %v1072_v47 = vld [vmem:[%s5922_s1 + $0x610] sm:$0xff] }
 0x30b   :  { %v5036_v61 = vadd.f32 %v2374_v33, %v2276_v1  ;;  %v2179_v12 = vadd.f32 %v2178_v26, %v2080_v10  ;;  %v422_v26 = vld [vmem:[%s5923_s0 + $0xcc0] sm:$0xff] }
 0x310   :  { %v2277_v15 = vpop.f32.mrf.mxu2  ;;  %v2082_v21 = vpop.f32.mrf.mxu0 }
 0x311   :  { %v2278_v51 = vadd.f32 %v2277_v15, %v2179_v12  ;;  %v2376_v25 = vpop.f32.mrf.mxu3  ;;  %v2083_v54 = vadd.f32 %v2082_v21, %v4334_v16  ;;  %v2181_v28 = vpop.f32.mrf.mxu1  ;;  %v406_v16 = vld [vmem:[%s5923_s0 + $0xc40] sm:$0xff]  ;;  %v408_v15 = vld [vmem:[%s5923_s0 + $0xc50] sm:$0xff]  ;;  %v409_v21 = vld [vmem:[%s5923_s0 + $0xc58] sm:$0xff] }
 0x313   :  { %v5063_v29 = vadd.f32 %v2376_v25, %v2278_v51  ;;  %v2182_v44 = vadd.f32 %v2181_v28, %v2083_v54  ;;  %2121 = vmatmul.bf16.gmra.mxu0 %v774_v3  ;;  %v424_v3 = vld [vmem:[%s5923_s0 + $0xcd0] sm:$0xff]  ;;  %v1231_v51 = vpack.c.bf16 %v1073_v5, %v1072_v47  ;;  %v1255_v25 = vpack.c.bf16 %v1121_v20, %v1120_v62 }
 0x314   :  { %2220 = vmatmul.bf16.gmra.mxu1 %v775_v24  ;;  %v425_v24 = vld [vmem:[%s5923_s0 + $0xcd8] sm:$0xff]  ;;  %v790_v54 = vpack.c.bf16 %v422_v26, %v406_v16 }
 0x315   :  { %2319 = vmatmul.bf16.gmra.mxu2 %v776_v4  ;;  %2460 = vmatpush.bf16.msrb.mxu0 %v1231_v51  ;;  %v1089_v16 = vld [vmem:[%s5922_s1 + $0x698] sm:$0xff]  ;;  %v440_v51 = vld [vmem:[%s5923_s0 + $0xd50] sm:$0xff] }
 0x316   :  { %2418 = vmatmul.bf16.gmra.mxu3 %v777_v32 }
 0x317   :  { %2757 = vmatpush.bf16.msrb.mxu3 %v1255_v25  ;;  %v456_v25 = vld [vmem:[%s5923_s0 + $0xdd0] sm:$0xff] }
 0x318   :  { %v2280_v59 = vpop.f32.mrf.mxu2  ;;  %v2084_v1 = vpop.f32.mrf.mxu0 }
 0x319   :  { %v2281_v42 = vadd.f32 %v2280_v59, %v2182_v44  ;;  %v2379_v48 = vpop.f32.mrf.mxu3  ;;  %v2085_v33 = vadd.f32 %v2084_v1, %v4379_v11  ;;  %v2183_v13 = vpop.f32.mrf.mxu1  ;;  %v1104_v11 = vld [vmem:[%s5922_s1 + $0x710] sm:$0xff]  ;;  %v791_v59 = vpack.c.bf16 %v423_v55, %v407_v9  ;;  %v438_v55 = vld [vmem:[%s5923_s0 + $0xd40] sm:$0xff] }
 0x31a   :  { %v1247_v63 = vpack.c.bf16 %v1105_v0, %v1104_v11  ;;  %v1088_v11 = vld [vmem:[%s5922_s1 + $0x690] sm:$0xff] }
 0x31b   :  { %v5066_v10 = vadd.f32 %v2379_v48, %v2281_v42  ;;  %v2184_v12 = vadd.f32 %v2183_v13, %v2085_v33  ;;  %v792_v42 = vpack.c.bf16 %v424_v3, %v408_v15  ;;  %v793_v33 = vpack.c.bf16 %v425_v24, %v409_v21  ;;  %v454_v15 = vld [vmem:[%s5923_s0 + $0xdc0] sm:$0xff]  ;;  %v439_v3 = vld [vmem:[%s5923_s0 + $0xd48] sm:$0xff]  ;;  %v441_v21 = vld [vmem:[%s5923_s0 + $0xd58] sm:$0xff] }
 0x31c   :  { %2658 = vmatpush.bf16.msrb.mxu2 %v1247_v63  ;;  %v457_v24 = vld [vmem:[%s5923_s0 + $0xdd8] sm:$0xff] }
 0x320   :  { %v2282_v4 = vpop.f32.mrf.mxu2  ;;  %v2087_v44 = vpop.f32.mrf.mxu0 }
 0x321   :  { %v2283_v28 = vadd.f32 %v2282_v4, %v2184_v12  ;;  %v2381_v32 = vpop.f32.mrf.mxu3  ;;  %v2088_v48 = vadd.f32 %v2087_v44, %v4388_v27  ;;  %v2186_v1 = vpop.f32.mrf.mxu1  ;;  %v1239_v12 = vpack.c.bf16 %v1089_v16, %v1088_v11 }
 0x323   :  { %v5111_v13 = vadd.f32 %v2381_v32, %v2283_v28  ;;  %v2187_v26 = vadd.f32 %v2186_v1, %v2088_v48  ;;  %2126 = vmatmul.bf16.gmra.mxu0 %v790_v54  ;;  %2559 = vmatpush.bf16.msrb.mxu1 %v1239_v12  ;;  %v806_v54 = vpack.c.bf16 %v454_v15, %v438_v55  ;;  %v471_v55 = vld [vmem:[%s5923_s0 + $0xe48] sm:$0xff]  ;;  %v472_v15 = vld [vmem:[%s5923_s0 + $0xe50] sm:$0xff] }
 0x324   :  { %2225 = vmatmul.bf16.gmra.mxu1 %v791_v59 }
 0x325   :  { %2324 = vmatmul.bf16.gmra.mxu2 %v792_v42  ;;  %v808_v42 = vpack.c.bf16 %v456_v25, %v440_v51  ;;  %v489_v51 = vld [vmem:[%s5923_s0 + $0xed8] sm:$0xff] }
 0x326   :  { %2423 = vmatmul.bf16.gmra.mxu3 %v793_v33  ;;  %v809_v33 = vpack.c.bf16 %v457_v24, %v441_v21 }
 0x328   :  { %v2285_v27 = vpop.f32.mrf.mxu2  ;;  %v2089_v47 = vpop.f32.mrf.mxu0 }
 0x329   :  { %v2286_v9 = vadd.f32 %v2285_v27, %v2187_v26  ;;  %v2384_v0 = vpop.f32.mrf.mxu3  ;;  %v2090_v63 = vadd.f32 %v2089_v47, %v4415_v23  ;;  %v2188_v5 = vpop.f32.mrf.mxu1  ;;  %v455_v23 = vld [vmem:[%s5923_s0 + $0xdc8] sm:$0xff] }
 0x32a   :  { %v807_v59 = vpack.c.bf16 %v455_v23, %v439_v3  ;;  %v488_v3 = vld [vmem:[%s5923_s0 + $0xed0] sm:$0xff]  ;;  %v473_v23 = vld [vmem:[%s5923_s0 + $0xe58] sm:$0xff] }
 0x32b   :  { %v5120_v62 = vadd.f32 %v2384_v0, %v2286_v9  ;;  %v2189_v20 = vadd.f32 %v2188_v5, %v2090_v63 }
 0x330   :  { %v2287_v4 = vpop.f32.mrf.mxu2  ;;  %v2092_v44 = vpop.f32.mrf.mxu0 }
 0x331   :  { %v2288_v28 = vadd.f32 %v2287_v4, %v2189_v20  ;;  %v2386_v32 = vpop.f32.mrf.mxu3  ;;  %v2093_v48 = vadd.f32 %v2092_v44, %v4418_v46  ;;  %v2191_v1 = vpop.f32.mrf.mxu1  ;;  %v470_v46 = vld [vmem:[%s5923_s0 + $0xe40] sm:$0xff] }
 0x332   :  { %v486_v20 = vld [vmem:[%s5923_s0 + $0xec0] sm:$0xff] }
 0x333   :  { %v5147_v11 = vadd.f32 %v2386_v32, %v2288_v28  ;;  %v2192_v16 = vadd.f32 %v2191_v1, %v2093_v48  ;;  %2131 = vmatmul.bf16.gmra.mxu0 %v806_v54  ;;  %v822_v21 = vpack.c.bf16 %v486_v20, %v470_v46  ;;  %v824_v32 = vpack.c.bf16 %v488_v3, %v472_v15  ;;  %v1102_v1 = vld [vmem:[%s5922_s1 + $0x700] sm:$0xff]  ;;  %v1087_v20 = vld [vmem:[%s5922_s1 + $0x688] sm:$0xff] }
 0x334   :  { %2230 = vmatmul.bf16.gmra.mxu1 %v807_v59 }
 0x335   :  { %2329 = vmatmul.bf16.gmra.mxu2 %v808_v42  ;;  %v825_v42 = vpack.c.bf16 %v489_v51, %v473_v23 }
 0x336   :  { %2428 = vmatmul.bf16.gmra.mxu3 %v809_v33  ;;  %v1103_v33 = vld [vmem:[%s5922_s1 + $0x708] sm:$0xff] }
 0x338   :  { %v2290_v26 = vpop.f32.mrf.mxu2  ;;  %v2094_v9 = vpop.f32.mrf.mxu0 }
 0x339   :  { %v2291_v12 = vadd.f32 %v2290_v26, %v2192_v16  ;;  %v2389_v27 = vpop.f32.mrf.mxu3  ;;  %v2095_v0 = vadd.f32 %v2094_v9, %v4445_v41  ;;  %v2193_v47 = vpop.f32.mrf.mxu1  ;;  %v487_v41 = vld [vmem:[%s5923_s0 + $0xec8] sm:$0xff]  ;;  %v1246_v26 = vpack.c.bf16 %v1103_v33, %v1102_v1 }
 0x33a   :  { %v823_v28 = vpack.c.bf16 %v487_v41, %v471_v55 }
 0x33b   :  { %v5150_v63 = vadd.f32 %v2389_v27, %v2291_v12  ;;  %v2194_v5 = vadd.f32 %v2193_v47, %v2095_v0  ;;  %v1070_v12 = vld [vmem:[%s5922_s1 + $0x600] sm:$0xff]  ;;  %v1119_v0 = vld [vmem:[%s5922_s1 + $0x788] sm:$0xff]  ;;  %2659 = vmatpush.bf16.msrb.mxu2 %v1246_v26 }
 0x33c   :  { %v1118_v27 = vld [vmem:[%s5922_s1 + $0x780] sm:$0xff] }
 0x33d   :  { %v1254_v47 = vpack.c.bf16 %v1119_v0, %v1118_v27 }
 0x33f   :  { %2758 = vmatpush.bf16.msrb.mxu3 %v1254_v47 }
 0x340   :  { %v2292_v25 = vpop.f32.mrf.mxu2  ;;  %v2097_v54 = vpop.f32.mrf.mxu0 }
 0x341   :  { %v2293_v24 = vadd.f32 %v2292_v25, %v2194_v5  ;;  %v2391_v4 = vpop.f32.mrf.mxu3  ;;  %v2098_v44 = vadd.f32 %v2097_v54, %v4472_v40  ;;  %v2196_v59 = vpop.f32.mrf.mxu1  ;;  %v1071_v40 = vld [vmem:[%s5922_s1 + $0x608] sm:$0xff]  ;;  %v1086_v5 = vld [vmem:[%s5922_s1 + $0x680] sm:$0xff] }
 0x342   :  { %v1230_v9 = vpack.c.bf16 %v1071_v40, %v1070_v12  ;;  %v1238_v3 = vpack.c.bf16 %v1087_v20, %v1086_v5  ;;  %v503_v54 = vld [vmem:[%s5923_s0 + $0xf48] sm:$0xff] }
 0x343   :  { %v5177_v48 = vadd.f32 %v2391_v4, %v2293_v24  ;;  %v2197_v16 = vadd.f32 %v2196_v59, %v2098_v44  ;;  %2136 = vmatmul.bf16.gmra.mxu0 %v822_v21  ;;  %v502_v24 = vld [vmem:[%s5923_s0 + $0xf40] sm:$0xff]  ;;  %v505_v44 = vld [vmem:[%s5923_s0 + $0xf58] sm:$0xff] }
 0x344   :  { %2235 = vmatmul.bf16.gmra.mxu1 %v823_v28  ;;  %2461 = vmatpush.bf16.msrb.mxu0 %v1230_v9  ;;  %v518_v4 = vld [vmem:[%s5923_s0 + $0xfc0] sm:$0xff]  ;;  %v504_v28 = vld [vmem:[%s5923_s0 + $0xf50] sm:$0xff]  ;;  %v521_v59 = vld [vmem:[%s5923_s0 + $0xfd8] sm:$0xff] }
 0x345   :  { %2334 = vmatmul.bf16.gmra.mxu2 %v824_v32  ;;  %2560 = vmatpush.bf16.msrb.mxu1 %v1238_v3  ;;  %v520_v32 = vld [vmem:[%s5923_s0 + $0xfd0] sm:$0xff]  ;;  %v838_v1 = vpack.c.bf16 %v518_v4, %v502_v24  ;;  %v841_v0 = vpack.c.bf16 %v521_v59, %v505_v44  ;;  %v535_v24 = vld [vmem:[%s5923_s0 + $0x1048] sm:$0xff] }
 0x346   :  { %2433 = vmatmul.bf16.gmra.mxu3 %v825_v42  ;;  %v840_v40 = vpack.c.bf16 %v520_v32, %v504_v28  ;;  %v536_v4 = vld [vmem:[%s5923_s0 + $0x1050] sm:$0xff]  ;;  %v553_v28 = vld [vmem:[%s5923_s0 + $0x10d8] sm:$0xff] }
 0x348   :  { %v2295_v46 = vpop.f32.mrf.mxu2  ;;  %v2099_v15 = vpop.f32.mrf.mxu0 }
 0x349   :  { %v2296_v55 = vadd.f32 %v2295_v46, %v2197_v16  ;;  %v2394_v41 = vpop.f32.mrf.mxu3  ;;  %v2100_v23 = vadd.f32 %v2099_v15, %v4499_v18  ;;  %v2198_v51 = vpop.f32.mrf.mxu1  ;;  %v519_v18 = vld [vmem:[%s5923_s0 + $0xfc8] sm:$0xff] }
 0x34a   :  { %v839_v12 = vpack.c.bf16 %v519_v18, %v503_v54  ;;  %v552_v54 = vld [vmem:[%s5923_s0 + $0x10d0] sm:$0xff]  ;;  %v537_v18 = vld [vmem:[%s5923_s0 + $0x1058] sm:$0xff] }
 0x34b   :  { %v5204_v25 = vadd.f32 %v2394_v41, %v2296_v55  ;;  %v2199_v21 = vadd.f32 %v2198_v51, %v2100_v23 }
 0x350   :  { %v2297_v42 = vpop.f32.mrf.mxu2  ;;  %v2102_v26 = vpop.f32.mrf.mxu0 }
 0x351   :  { %v2298_v33 = vadd.f32 %v2297_v42, %v2199_v21  ;;  %v2396_v16 = vpop.f32.mrf.mxu3  ;;  %v2103_v27 = vadd.f32 %v2102_v26, %v4502_v60  ;;  %v2201_v9 = vpop.f32.mrf.mxu1  ;;  %v534_v60 = vld [vmem:[%s5923_s0 + $0x1040] sm:$0xff] }
 0x352   :  { %v550_v21 = vld [vmem:[%s5923_s0 + $0x10c0] sm:$0xff] }
 0x353   :  { %v5231_v47 = vadd.f32 %v2396_v16, %v2298_v33  ;;  %v2202_v5 = vadd.f32 %v2201_v9, %v2103_v27  ;;  %2141 = vmatmul.bf16.gmra.mxu0 %v838_v1  ;;  %v854_v44 = vpack.c.bf16 %v550_v21, %v534_v60  ;;  %v856_v16 = vpack.c.bf16 %v552_v54, %v536_v4  ;;  %v567_v60 = vld [vmem:[%s5923_s0 + $0x1148] sm:$0xff]  ;;  %v568_v21 = vld [vmem:[%s5923_s0 + $0x1150] sm:$0xff]  ;;  %v585_v4 = vld [vmem:[%s5923_s0 + $0x11d8] sm:$0xff] }
 0x354   :  { %2240 = vmatmul.bf16.gmra.mxu1 %v839_v12 }
 0x355   :  { %2339 = vmatmul.bf16.gmra.mxu2 %v840_v40  ;;  %v857_v40 = vpack.c.bf16 %v553_v28, %v537_v18 }
 0x356   :  { %2438 = vmatmul.bf16.gmra.mxu3 %v841_v0 }
 0x358   :  { %v2300_v46 = vpop.f32.mrf.mxu2  ;;  %v2104_v41 = vpop.f32.mrf.mxu0 }
 0x359   :  { %v2301_v20 = vadd.f32 %v2300_v46, %v2202_v5  ;;  %v2399_v55 = vpop.f32.mrf.mxu3  ;;  %v2105_v15 = vadd.f32 %v2104_v41, %v4529_v35  ;;  %v2203_v3 = vpop.f32.mrf.mxu1  ;;  %v551_v35 = vld [vmem:[%s5923_s0 + $0x10c8] sm:$0xff] }
 0x35a   :  { %v855_v33 = vpack.c.bf16 %v551_v35, %v535_v24  ;;  %v584_v24 = vld [vmem:[%s5923_s0 + $0x11d0] sm:$0xff]  ;;  %v569_v35 = vld [vmem:[%s5923_s0 + $0x1158] sm:$0xff] }
 0x35b   :  { %v5234_v23 = vadd.f32 %v2399_v55, %v2301_v20  ;;  %v2204_v51 = vadd.f32 %v2203_v3, %v2105_v15 }
 0x360   :  { %v2302_v32 = vpop.f32.mrf.mxu2  ;;  %v2107_v1 = vpop.f32.mrf.mxu0 }
 0x361   :  { %v2303_v59 = vadd.f32 %v2302_v32, %v2204_v51  ;;  %v2401_v42 = vpop.f32.mrf.mxu3  ;;  %v2108_v26 = vadd.f32 %v2107_v1, %v4550_v57  ;;  %v2206_v12 = vpop.f32.mrf.mxu1  ;;  %v566_v57 = vld [vmem:[%s5923_s0 + $0x1140] sm:$0xff] }
 0x362   :  { %v582_v51 = vld [vmem:[%s5923_s0 + $0x11c0] sm:$0xff] }
 0x363   :  { %v5261_v27 = vadd.f32 %v2401_v42, %v2303_v59  ;;  %v2207_v9 = vadd.f32 %v2206_v12, %v2108_v26  ;;  %2146 = vmatmul.bf16.gmra.mxu0 %v854_v44  ;;  %v870_v18 = vpack.c.bf16 %v582_v51, %v566_v57  ;;  %v872_v42 = vpack.c.bf16 %v584_v24, %v568_v21  ;;  %v27_v57 = vld [vmem:[%s5923_s0 + $0x68] sm:$0xff]  ;;  %v28_v51 = vld [vmem:[%s5923_s0 + $0x70] sm:$0xff]  ;;  %v45_v21 = vld [vmem:[%s5923_s0 + $0xf8] sm:$0xff] }
 0x364   :  { %2245 = vmatmul.bf16.gmra.mxu1 %v855_v33 }
 0x365   :  { %2344 = vmatmul.bf16.gmra.mxu2 %v856_v16  ;;  %v873_v16 = vpack.c.bf16 %v585_v4, %v569_v35 }
 0x366   :  { %2443 = vmatmul.bf16.gmra.mxu3 %v857_v40 }
 0x368   :  { %v2305_v0 = vpop.f32.mrf.mxu2  ;;  %v2109_v20 = vpop.f32.mrf.mxu0 }
 0x369   :  { %v2306_v5 = vadd.f32 %v2305_v0, %v2207_v9  ;;  %v2404_v46 = vpop.f32.mrf.mxu3  ;;  %v2110_v55 = vadd.f32 %v2109_v20, %v4583_v36  ;;  %v2208_v41 = vpop.f32.mrf.mxu1  ;;  %v583_v36 = vld [vmem:[%s5923_s0 + $0x11c8] sm:$0xff] }
 0x36a   :  { %v871_v59 = vpack.c.bf16 %v583_v36, %v567_v60  ;;  %v44_v60 = vld [vmem:[%s5923_s0 + $0xf0] sm:$0xff]  ;;  %v29_v36 = vld [vmem:[%s5923_s0 + $0x78] sm:$0xff] }
 0x36b   :  { %v5264_v15 = vadd.f32 %v2404_v46, %v2306_v5  ;;  %v2209_v3 = vadd.f32 %v2208_v41, %v2110_v55 }
 0x370   :  { %v2307_v54 = vpop.f32.mrf.mxu2  ;;  %v2112_v44 = vpop.f32.mrf.mxu0 }
 0x371   :  { %v2308_v28 = vadd.f32 %v2307_v54, %v2209_v3  ;;  %v2406_v32 = vpop.f32.mrf.mxu3  ;;  %v2113_v1 = vadd.f32 %v2112_v44, %v4586_v58  ;;  %v2211_v33 = vpop.f32.mrf.mxu1  ;;  %v26_v58 = vld [vmem:[%s5923_s0 + $0x60] sm:$0xff] }
 0x372   :  { %v42_v3 = vld [vmem:[%s5923_s0 + $0xe0] sm:$0xff] }
 0x373   :  { %v5291_v26 = vadd.f32 %v2406_v32, %v2308_v28  ;;  %v2212_v12 = vadd.f32 %v2211_v33, %v2113_v1  ;;  %2151 = vmatmul.bf16.gmra.mxu0 %v870_v18  ;;  %v602_v35 = vpack.c.bf16 %v42_v3, %v26_v58  ;;  %v604_v32 = vpack.c.bf16 %v44_v60, %v28_v51  ;;  %v59_v58 = vld [vmem:[%s5923_s0 + $0x168] sm:$0xff]  ;;  %v60_v3 = vld [vmem:[%s5923_s0 + $0x170] sm:$0xff]  ;;  %v77_v51 = vld [vmem:[%s5923_s0 + $0x1f8] sm:$0xff] }
 0x374   :  { %2250 = vmatmul.bf16.gmra.mxu1 %v871_v59 }
 0x375   :  { %2349 = vmatmul.bf16.gmra.mxu2 %v872_v42  ;;  %v605_v42 = vpack.c.bf16 %v45_v21, %v29_v36 }
 0x376   :  { %2448 = vmatmul.bf16.gmra.mxu3 %v873_v16 }
 0x378   :  { %v2310_v40 = vpop.f32.mrf.mxu2  ;;  %v2114_v5 = vpop.f32.mrf.mxu0 }
 0x379   :  { %v2311_v9 = vadd.f32 %v2310_v40, %v2212_v12  ;;  %v2409_v0 = vpop.f32.mrf.mxu3  ;;  %v2115_v46 = vadd.f32 %v2114_v5, %v4613_v31  ;;  %v2213_v20 = vpop.f32.mrf.mxu1  ;;  %v43_v31 = vld [vmem:[%s5923_s0 + $0xe8] sm:$0xff] }
 0x37a   :  { %v603_v28 = vpack.c.bf16 %v43_v31, %v27_v57  ;;  %v76_v57 = vld [vmem:[%s5923_s0 + $0x1f0] sm:$0xff]  ;;  %v61_v31 = vld [vmem:[%s5923_s0 + $0x178] sm:$0xff] }
 0x37b   :  { %v5294_v55 = vadd.f32 %v2409_v0, %v2311_v9  ;;  %v2214_v41 = vadd.f32 %v2213_v20, %v2115_v46 }
 0x380   :  { %v2312_v24 = vpop.f32.mrf.mxu2  ;;  %v2117_v18 = vpop.f32.mrf.mxu0 }
 0x381   :  { %v2313_v4 = vadd.f32 %v2312_v24, %v2214_v41  ;;  %v2411_v54 = vpop.f32.mrf.mxu3  ;;  %v2118_v44 = vadd.f32 %v2117_v18, %v4616_v56  ;;  %v2216_v59 = vpop.f32.mrf.mxu1  ;;  %v58_v56 = vld [vmem:[%s5923_s0 + $0x160] sm:$0xff] }
 0x382   :  { %v74_v41 = vld [vmem:[%s5923_s0 + $0x1e0] sm:$0xff] }
 0x383   :  { %v5321_v1 = vadd.f32 %v2411_v54, %v2313_v4  ;;  %v2217_v33 = vadd.f32 %v2216_v59, %v2118_v44  ;;  %2462 = vmatmul.bf16.vlgmr.msrb.gmra.mxu0 %v602_v35  ;;  %v618_v36 = vpack.c.bf16 %v74_v41, %v58_v56  ;;  %v620_v54 = vpack.c.bf16 %v76_v57, %v60_v3  ;;  %v91_v56 = vld [vmem:[%s5923_s0 + $0x268] sm:$0xff]  ;;  %v92_v41 = vld [vmem:[%s5923_s0 + $0x270] sm:$0xff]  ;;  %v109_v3 = vld [vmem:[%s5923_s0 + $0x2f8] sm:$0xff] }
 0x384   :  { %2561 = vmatmul.bf16.vlgmr.msrb.gmra.mxu1 %v603_v28 }
 0x385   :  { %2660 = vmatmul.bf16.vlgmr.msrb.gmra.mxu2 %v604_v32  ;;  %v621_v32 = vpack.c.bf16 %v77_v51, %v61_v31 }
 0x386   :  { %2759 = vmatmul.bf16.vlgmr.msrb.gmra.mxu3 %v605_v42 }
 0x388   :  { %v2315_v16 = vpop.f32.mrf.mxu2  ;;  %v2119_v9 = vpop.f32.mrf.mxu0 }
 0x389   :  { %v2316_v12 = vadd.f32 %v2315_v16, %v2217_v33  ;;  %v2414_v40 = vpop.f32.mrf.mxu3  ;;  %v2120_v0 = vadd.f32 %v2119_v9, %v4667_v19  ;;  %v2218_v5 = vpop.f32.mrf.mxu1  ;;  %v75_v19 = vld [vmem:[%s5923_s0 + $0x1e8] sm:$0xff] }
 0x38a   :  { %v619_v4 = vpack.c.bf16 %v75_v19, %v59_v58  ;;  %v108_v58 = vld [vmem:[%s5923_s0 + $0x2f0] sm:$0xff]  ;;  %v93_v19 = vld [vmem:[%s5923_s0 + $0x278] sm:$0xff] }
 0x38b   :  { %v5324_v46 = vadd.f32 %v2414_v40, %v2316_v12  ;;  %v2219_v20 = vadd.f32 %v2218_v5, %v2120_v0 }
 0x390   :  { %v2317_v60 = vpop.f32.mrf.mxu2  ;;  %v2122_v35 = vpop.f32.mrf.mxu0 }
 0x391   :  { %v2318_v21 = vadd.f32 %v2317_v60, %v2219_v20  ;;  %v2416_v24 = vpop.f32.mrf.mxu3  ;;  %v2123_v18 = vadd.f32 %v2122_v35, %v4670_v6  ;;  %v2221_v28 = vpop.f32.mrf.mxu1  ;;  %v90_v6 = vld [vmem:[%s5923_s0 + $0x260] sm:$0xff] }
 0x392   :  { %v106_v20 = vld [vmem:[%s5923_s0 + $0x2e0] sm:$0xff] }
 0x393   :  { %v5351_v44 = vadd.f32 %v2416_v24, %v2318_v21  ;;  %v2222_v59 = vadd.f32 %v2221_v28, %v2123_v18  ;;  %2467 = vmatmul.bf16.gmra.mxu0 %v618_v36  ;;  %v634_v31 = vpack.c.bf16 %v106_v20, %v90_v6  ;;  %v636_v24 = vpack.c.bf16 %v108_v58, %v92_v41  ;;  %v123_v6 = vld [vmem:[%s5923_s0 + $0x368] sm:$0xff]  ;;  %v124_v20 = vld [vmem:[%s5923_s0 + $0x370] sm:$0xff]  ;;  %v141_v41 = vld [vmem:[%s5923_s0 + $0x3f8] sm:$0xff] }
 0x394   :  { %2566 = vmatmul.bf16.gmra.mxu1 %v619_v4 }
 0x395   :  { %2665 = vmatmul.bf16.gmra.mxu2 %v620_v54  ;;  %v637_v54 = vpack.c.bf16 %v109_v3, %v93_v19 }
 0x396   :  { %2764 = vmatmul.bf16.gmra.mxu3 %v621_v32 }
 0x398   :  { %v2320_v42 = vpop.f32.mrf.mxu2  ;;  %v2124_v12 = vpop.f32.mrf.mxu0 }
 0x399   :  { %v2321_v33 = vadd.f32 %v2320_v42, %v2222_v59  ;;  %v2419_v16 = vpop.f32.mrf.mxu3  ;;  %v2125_v40 = vadd.f32 %v2124_v12, %v4697_v49  ;;  %v2223_v9 = vpop.f32.mrf.mxu1  ;;  %v107_v49 = vld [vmem:[%s5923_s0 + $0x2e8] sm:$0xff] }
 0x39a   :  { %v635_v21 = vpack.c.bf16 %v107_v49, %v91_v56  ;;  %v140_v56 = vld [vmem:[%s5923_s0 + $0x3f0] sm:$0xff]  ;;  %v125_v49 = vld [vmem:[%s5923_s0 + $0x378] sm:$0xff] }
 0x39b   :  { %v5354_v0 = vadd.f32 %v2419_v16, %v2321_v33  ;;  %v2224_v5 = vadd.f32 %v2223_v9, %v2125_v40 }
 0x3a0   :  { %v2322_v57 = vpop.f32.mrf.mxu2  ;;  %v2127_v36 = vpop.f32.mrf.mxu0 }
 0x3a1   :  { %v2323_v51 = vadd.f32 %v2322_v57, %v2224_v5  ;;  %v2421_v60 = vpop.f32.mrf.mxu3  ;;  %v2128_v35 = vadd.f32 %v2127_v36, %v4700_v8  ;;  %v2226_v4 = vpop.f32.mrf.mxu1  ;;  %v122_v8 = vld [vmem:[%s5923_s0 + $0x360] sm:$0xff] }
 0x3a2   :  { %v138_v5 = vld [vmem:[%s5923_s0 + $0x3e0] sm:$0xff] }
 0x3a3   :  { %v5381_v18 = vadd.f32 %v2421_v60, %v2323_v51  ;;  %v2227_v28 = vadd.f32 %v2226_v4, %v2128_v35  ;;  %2472 = vmatmul.bf16.gmra.mxu0 %v634_v31  ;;  %v650_v19 = vpack.c.bf16 %v138_v5, %v122_v8  ;;  %v652_v60 = vpack.c.bf16 %v140_v56, %v124_v20  ;;  %v155_v8 = vld [vmem:[%s5923_s0 + $0x468] sm:$0xff]  ;;  %v156_v5 = vld [vmem:[%s5923_s0 + $0x470] sm:$0xff]  ;;  %v173_v20 = vld [vmem:[%s5923_s0 + $0x4f8] sm:$0xff] }
 0x3a4   :  { %2571 = vmatmul.bf16.gmra.mxu1 %v635_v21 }
 0x3a5   :  { %2670 = vmatmul.bf16.gmra.mxu2 %v636_v24  ;;  %v653_v24 = vpack.c.bf16 %v141_v41, %v125_v49 }
 0x3a6   :  { %2769 = vmatmul.bf16.gmra.mxu3 %v637_v54 }
 0x3a8   :  { %v2325_v32 = vpop.f32.mrf.mxu2  ;;  %v2129_v33 = vpop.f32.mrf.mxu0 }
 0x3a9   :  { %v2326_v59 = vadd.f32 %v2325_v32, %v2227_v28  ;;  %v2424_v42 = vpop.f32.mrf.mxu3  ;;  %v2130_v16 = vadd.f32 %v2129_v33, %v4745_v39  ;;  %v2228_v12 = vpop.f32.mrf.mxu1  ;;  %v139_v39 = vld [vmem:[%s5923_s0 + $0x3e8] sm:$0xff] }
 0x3aa   :  { %v651_v51 = vpack.c.bf16 %v139_v39, %v123_v6  ;;  %v172_v6 = vld [vmem:[%s5923_s0 + $0x4f0] sm:$0xff]  ;;  %v157_v39 = vld [vmem:[%s5923_s0 + $0x478] sm:$0xff] }
 0x3ab   :  { %v5384_v40 = vadd.f32 %v2424_v42, %v2326_v59  ;;  %v2229_v9 = vadd.f32 %v2228_v12, %v2130_v16 }
 0x3b0   :  { %v2327_v58 = vpop.f32.mrf.mxu2  ;;  %v2132_v31 = vpop.f32.mrf.mxu0 }
 0x3b1   :  { %v2328_v3 = vadd.f32 %v2327_v58, %v2229_v9  ;;  %v2426_v57 = vpop.f32.mrf.mxu3  ;;  %v2133_v36 = vadd.f32 %v2132_v31, %v4754_v52  ;;  %v2231_v21 = vpop.f32.mrf.mxu1  ;;  %v154_v52 = vld [vmem:[%s5923_s0 + $0x460] sm:$0xff] }
 0x3b2   :  { %v170_v9 = vld [vmem:[%s5923_s0 + $0x4e0] sm:$0xff] }
 0x3b3   :  { %v5411_v35 = vadd.f32 %v2426_v57, %v2328_v3  ;;  %v2232_v4 = vadd.f32 %v2231_v21, %v2133_v36  ;;  %2477 = vmatmul.bf16.gmra.mxu0 %v650_v19  ;;  %v666_v49 = vpack.c.bf16 %v170_v9, %v154_v52  ;;  %v668_v57 = vpack.c.bf16 %v172_v6, %v156_v5  ;;  %v187_v52 = vld [vmem:[%s5923_s0 + $0x568] sm:$0xff]  ;;  %v188_v9 = vld [vmem:[%s5923_s0 + $0x570] sm:$0xff]  ;;  %v205_v5 = vld [vmem:[%s5923_s0 + $0x5f8] sm:$0xff] }
 0x3b4   :  { %2576 = vmatmul.bf16.gmra.mxu1 %v651_v51 }
 0x3b5   :  { %2675 = vmatmul.bf16.gmra.mxu2 %v652_v60  ;;  %v669_v60 = vpack.c.bf16 %v173_v20, %v157_v39 }
 0x3b6   :  { %2774 = vmatmul.bf16.gmra.mxu3 %v653_v24 }
 0x3b8   :  { %v2330_v54 = vpop.f32.mrf.mxu2  ;;  %v2134_v59 = vpop.f32.mrf.mxu0 }
 0x3b9   :  { %v2331_v28 = vadd.f32 %v2330_v54, %v2232_v4  ;;  %v2429_v32 = vpop.f32.mrf.mxu3  ;;  %v2135_v42 = vadd.f32 %v2134_v59, %v4781_v45  ;;  %v2233_v33 = vpop.f32.mrf.mxu1  ;;  %v171_v45 = vld [vmem:[%s5923_s0 + $0x4e8] sm:$0xff] }
 0x3ba   :  { %v667_v3 = vpack.c.bf16 %v171_v45, %v155_v8  ;;  %v204_v8 = vld [vmem:[%s5923_s0 + $0x5f0] sm:$0xff]  ;;  %v189_v45 = vld [vmem:[%s5923_s0 + $0x578] sm:$0xff] }
 0x3bb   :  { %v5414_v16 = vadd.f32 %v2429_v32, %v2331_v28  ;;  %v2234_v12 = vadd.f32 %v2233_v33, %v2135_v42 }
 0x3c0   :  { %v2332_v56 = vpop.f32.mrf.mxu2  ;;  %v2137_v19 = vpop.f32.mrf.mxu0 }
 0x3c1   :  { %v2333_v41 = vadd.f32 %v2332_v56, %v2234_v12  ;;  %v2431_v58 = vpop.f32.mrf.mxu3  ;;  %v2138_v31 = vadd.f32 %v2137_v19, %v4784_v53  ;;  %v2236_v51 = vpop.f32.mrf.mxu1  ;;  %v186_v53 = vld [vmem:[%s5923_s0 + $0x560] sm:$0xff] }
 0x3c2   :  { %v202_v12 = vld [vmem:[%s5923_s0 + $0x5e0] sm:$0xff] }
 0x3c3   :  { %v5441_v36 = vadd.f32 %v2431_v58, %v2333_v41  ;;  %v2237_v21 = vadd.f32 %v2236_v51, %v2138_v31  ;;  %2482 = vmatmul.bf16.gmra.mxu0 %v666_v49  ;;  %v682_v39 = vpack.c.bf16 %v202_v12, %v186_v53  ;;  %v684_v58 = vpack.c.bf16 %v204_v8, %v188_v9  ;;  %v219_v53 = vld [vmem:[%s5923_s0 + $0x668] sm:$0xff]  ;;  %v220_v12 = vld [vmem:[%s5923_s0 + $0x670] sm:$0xff]  ;;  %v237_v9 = vld [vmem:[%s5923_s0 + $0x6f8] sm:$0xff] }
 0x3c4   :  { %2581 = vmatmul.bf16.gmra.mxu1 %v667_v3 }
 0x3c5   :  { %2680 = vmatmul.bf16.gmra.mxu2 %v668_v57  ;;  %v685_v57 = vpack.c.bf16 %v205_v5, %v189_v45 }
 0x3c6   :  { %2779 = vmatmul.bf16.gmra.mxu3 %v669_v60 }
 0x3c8   :  { %v2335_v24 = vpop.f32.mrf.mxu2  ;;  %v2139_v28 = vpop.f32.mrf.mxu0 }
 0x3c9   :  { %v2336_v4 = vadd.f32 %v2335_v24, %v2237_v21  ;;  %v2434_v54 = vpop.f32.mrf.mxu3  ;;  %v2140_v32 = vadd.f32 %v2139_v28, %v4811_v38  ;;  %v2238_v59 = vpop.f32.mrf.mxu1  ;;  %v203_v38 = vld [vmem:[%s5923_s0 + $0x5e8] sm:$0xff] }
 0x3ca   :  { %v683_v41 = vpack.c.bf16 %v203_v38, %v187_v52  ;;  %v236_v52 = vld [vmem:[%s5923_s0 + $0x6f0] sm:$0xff]  ;;  %v221_v38 = vld [vmem:[%s5923_s0 + $0x678] sm:$0xff] }
 0x3cb   :  { %v5444_v42 = vadd.f32 %v2434_v54, %v2336_v4  ;;  %v2239_v33 = vadd.f32 %v2238_v59, %v2140_v32 }
 0x3d0   :  { %v2337_v6 = vpop.f32.mrf.mxu2  ;;  %v2142_v49 = vpop.f32.mrf.mxu0 }
 0x3d1   :  { %v2338_v20 = vadd.f32 %v2337_v6, %v2239_v33  ;;  %v2436_v56 = vpop.f32.mrf.mxu3  ;;  %v2143_v19 = vadd.f32 %v2142_v49, %v4838_v30  ;;  %v2241_v3 = vpop.f32.mrf.mxu1  ;;  %v218_v30 = vld [vmem:[%s5923_s0 + $0x660] sm:$0xff] }
 0x3d2   :  { %v234_v33 = vld [vmem:[%s5923_s0 + $0x6e0] sm:$0xff] }
 0x3d3   :  { %v5471_v31 = vadd.f32 %v2436_v56, %v2338_v20  ;;  %v2242_v51 = vadd.f32 %v2241_v3, %v2143_v19  ;;  %2487 = vmatmul.bf16.gmra.mxu0 %v682_v39  ;;  %v698_v45 = vpack.c.bf16 %v234_v33, %v218_v30  ;;  %v700_v56 = vpack.c.bf16 %v236_v52, %v220_v12  ;;  %v251_v30 = vld [vmem:[%s5923_s0 + $0x768] sm:$0xff]  ;;  %v252_v33 = vld [vmem:[%s5923_s0 + $0x770] sm:$0xff]  ;;  %v269_v12 = vld [vmem:[%s5923_s0 + $0x7f8] sm:$0xff] }
 0x3d4   :  { %2586 = vmatmul.bf16.gmra.mxu1 %v683_v41 }
 0x3d5   :  { %2685 = vmatmul.bf16.gmra.mxu2 %v684_v58  ;;  %v701_v58 = vpack.c.bf16 %v237_v9, %v221_v38 }
 0x3d6   :  { %2784 = vmatmul.bf16.gmra.mxu3 %v685_v57 }
 0x3d8   :  { %v2340_v60 = vpop.f32.mrf.mxu2  ;;  %v2144_v4 = vpop.f32.mrf.mxu0 }
 0x3d9   :  { %v2341_v21 = vadd.f32 %v2340_v60, %v2242_v51  ;;  %v2439_v24 = vpop.f32.mrf.mxu3  ;;  %v2145_v54 = vadd.f32 %v2144_v4, %v4865_v14  ;;  %v2243_v28 = vpop.f32.mrf.mxu1  ;;  %v235_v14 = vld [vmem:[%s5923_s0 + $0x6e8] sm:$0xff] }
 0x3da   :  { %v699_v20 = vpack.c.bf16 %v235_v14, %v219_v53  ;;  %v268_v53 = vld [vmem:[%s5923_s0 + $0x7f0] sm:$0xff]  ;;  %v253_v14 = vld [vmem:[%s5923_s0 + $0x778] sm:$0xff] }
 0x3db   :  { %v5474_v32 = vadd.f32 %v2439_v24, %v2341_v21  ;;  %v2244_v59 = vadd.f32 %v2243_v28, %v2145_v54 }
 0x3e0   :  { %v2342_v8 = vpop.f32.mrf.mxu2  ;;  %v2147_v39 = vpop.f32.mrf.mxu0 }
 0x3e1   :  { %v2343_v5 = vadd.f32 %v2342_v8, %v2244_v59  ;;  %v2441_v6 = vpop.f32.mrf.mxu3  ;;  %v2148_v49 = vadd.f32 %v2147_v39, %v4868_v34  ;;  %v2246_v41 = vpop.f32.mrf.mxu1  ;;  %v250_v34 = vld [vmem:[%s5923_s0 + $0x760] sm:$0xff] }
 0x3e2   :  { %v266_v59 = vld [vmem:[%s5923_s0 + $0x7e0] sm:$0xff] }
 0x3e3   :  { %v5501_v19 = vadd.f32 %v2441_v6, %v2343_v5  ;;  %v2247_v3 = vadd.f32 %v2246_v41, %v2148_v49  ;;  %2492 = vmatmul.bf16.gmra.mxu0 %v698_v45  ;;  %v714_v38 = vpack.c.bf16 %v266_v59, %v250_v34  ;;  %v716_v6 = vpack.c.bf16 %v268_v53, %v252_v33  ;;  %v283_v34 = vld [vmem:[%s5923_s0 + $0x868] sm:$0xff]  ;;  %v284_v59 = vld [vmem:[%s5923_s0 + $0x870] sm:$0xff]  ;;  %v301_v33 = vld [vmem:[%s5923_s0 + $0x8f8] sm:$0xff] }
 0x3e4   :  { %2591 = vmatmul.bf16.gmra.mxu1 %v699_v20 }
 0x3e5   :  { %2690 = vmatmul.bf16.gmra.mxu2 %v700_v56  ;;  %v717_v56 = vpack.c.bf16 %v269_v12, %v253_v14 }
 0x3e6   :  { %2789 = vmatmul.bf16.gmra.mxu3 %v701_v58 }
 0x3e8   :  { %v2345_v57 = vpop.f32.mrf.mxu2  ;;  %v2149_v21 = vpop.f32.mrf.mxu0 }
 0x3e9   :  { %v2346_v51 = vadd.f32 %v2345_v57, %v2247_v3  ;;  %v2444_v60 = vpop.f32.mrf.mxu3  ;;  %v2150_v24 = vadd.f32 %v2149_v21, %v4895_v2  ;;  %v2248_v4 = vpop.f32.mrf.mxu1  ;;  %v267_v2 = vld [vmem:[%s5923_s0 + $0x7e8] sm:$0xff] }
 0x3ea   :  { %v715_v5 = vpack.c.bf16 %v267_v2, %v251_v30  ;;  %v300_v30 = vld [vmem:[%s5923_s0 + $0x8f0] sm:$0xff]  ;;  %v285_v2 = vld [vmem:[%s5923_s0 + $0x878] sm:$0xff] }
 0x3eb   :  { %v5504_v54 = vadd.f32 %v2444_v60, %v2346_v51  ;;  %v2249_v28 = vadd.f32 %v2248_v4, %v2150_v24 }
 0x3f0   :  { %v2347_v52 = vpop.f32.mrf.mxu2  ;;  %v2152_v45 = vpop.f32.mrf.mxu0 }
 0x3f1   :  { %v2348_v9 = vadd.f32 %v2347_v52, %v2249_v28  ;;  %v2446_v8 = vpop.f32.mrf.mxu3  ;;  %v2153_v39 = vadd.f32 %v2152_v45, %v4916_v22  ;;  %v2251_v20 = vpop.f32.mrf.mxu1  ;;  %v282_v22 = vld [vmem:[%s5923_s0 + $0x860] sm:$0xff] }
 0x3f2   :  { %v298_v28 = vld [vmem:[%s5923_s0 + $0x8e0] sm:$0xff] }
 0x3f3   :  { %v5531_v49 = vadd.f32 %v2446_v8, %v2348_v9  ;;  %v2252_v41 = vadd.f32 %v2251_v20, %v2153_v39  ;;  %2497 = vmatmul.bf16.gmra.mxu0 %v714_v38  ;;  %v730_v14 = vpack.c.bf16 %v298_v28, %v282_v22  ;;  %v732_v8 = vpack.c.bf16 %v300_v30, %v284_v59  ;;  %v315_v22 = vld [vmem:[%s5923_s0 + $0x968] sm:$0xff]  ;;  %v317_v59 = vld [vmem:[%s5923_s0 + $0x978] sm:$0xff] }
 0x3f4   :  { %2596 = vmatmul.bf16.gmra.mxu1 %v715_v5  ;;  %v733_v5 = vpack.c.bf16 %v301_v33, %v285_v2  ;;  %v331_v28 = vld [vmem:[%s5923_s0 + $0x9e8] sm:$0xff]  ;;  %v333_v30 = vld [vmem:[%s5923_s0 + $0x9f8] sm:$0xff] }
 0x3f5   :  { %2695 = vmatmul.bf16.gmra.mxu2 %v716_v6 }
 0x3f6   :  { %2794 = vmatmul.bf16.gmra.mxu3 %v717_v56 }
 0x3f8   :  { %v2350_v58 = vpop.f32.mrf.mxu2  ;;  %v2154_v51 = vpop.f32.mrf.mxu0 }
 0x3f9   :  { %v2351_v3 = vadd.f32 %v2350_v58, %v2252_v41  ;;  %v2449_v57 = vpop.f32.mrf.mxu3  ;;  %v2155_v60 = vadd.f32 %v2154_v51, %v4949_v7  ;;  %v2253_v21 = vpop.f32.mrf.mxu1  ;;  %v299_v7 = vld [vmem:[%s5923_s0 + $0x8e8] sm:$0xff] }
 0x3fa   :  { %v731_v9 = vpack.c.bf16 %v299_v7, %v283_v34  ;;  %v332_v34 = vld [vmem:[%s5923_s0 + $0x9f0] sm:$0xff] }
 0x3fb   :  { %v5534_v24 = vadd.f32 %v2449_v57, %v2351_v3  ;;  %v2254_v4 = vadd.f32 %v2253_v21, %v2155_v60 }
 0x400   :  { %v2352_v53 = vpop.f32.mrf.mxu2  ;;  %v2463_v38 = vpop.f32.mrf.mxu0 }
 0x401   :  { %v2353_v12 = vadd.f32 %v2352_v53, %v2254_v4  ;;  %v2451_v52 = vpop.f32.mrf.mxu3  ;;  %v2562_v45 = vpop.f32.mrf.mxu1  ;;  %v2464_v39 = vadd.f32 %v2463_v38, %v4952_v43  ;;  %v314_v4 = vld [vmem:[%s5923_s0 + $0x960] sm:$0xff] }
 0x402   :  { %v330_v43 = vld [vmem:[%s5923_s0 + $0x9e0] sm:$0xff] }
 0x403   :  { %v5560_v6 = vadd.f32 %v2451_v52, %v2353_v12  ;;  %2502 = vmatmul.bf16.gmra.mxu0 %v730_v14  ;;  %v2563_v20 = vadd.f32 %v2562_v45, %v2464_v39  ;;  %v746_v33 = vpack.c.bf16 %v330_v43, %v314_v4  ;;  %v747_v52 = vpack.c.bf16 %v331_v28, %v315_v22  ;;  %v362_v4 = vld [vmem:[%s5923_s0 + $0xae0] sm:$0xff]  ;;  %v347_v43 = vld [vmem:[%s5923_s0 + $0xa68] sm:$0xff]  ;;  %v364_v28 = vld [vmem:[%s5923_s0 + $0xaf0] sm:$0xff] }
 0x404   :  { %2601 = vmatmul.bf16.gmra.mxu1 %v731_v9  ;;  %v363_v22 = vld [vmem:[%s5923_s0 + $0xae8] sm:$0xff] }
 0x405   :  { %2700 = vmatmul.bf16.gmra.mxu2 %v732_v8  ;;  %v749_v8 = vpack.c.bf16 %v333_v30, %v317_v59 }
 0x406   :  { %2799 = vmatmul.bf16.gmra.mxu3 %v733_v5 }
 0x408   :  { %v2661_v56 = vpop.f32.mrf.mxu2  ;;  %v2465_v3 = vpop.f32.mrf.mxu0 }
 0x409   :  { %v2662_v41 = vadd.f32 %v2661_v56, %v2563_v20  ;;  %v2760_v58 = vpop.f32.mrf.mxu3  ;;  %v2564_v57 = vpop.f32.mrf.mxu1  ;;  %v2466_v60 = vadd.f32 %v2465_v3, %v4979_v17  ;;  %v316_v17 = vld [vmem:[%s5923_s0 + $0x970] sm:$0xff] }
 0x40a   :  { %v748_v38 = vpack.c.bf16 %v332_v34, %v316_v17  ;;  %v349_v34 = vld [vmem:[%s5923_s0 + $0xa78] sm:$0xff] }
 0x40b   :  { %v2761_v51 = vadd.f32 %v2760_v58, %v2662_v41  ;;  %v2565_v7 = vadd.f32 %v2564_v57, %v2466_v60 }
 0x40d   :  { %v2850_v21 = vmax.f32 %v2761_v51, 0.0 }
 0x40f   :  { %2886 = vst [vmem:[%s5925_s3] sm:$0xff] %v2850_v21 }
 0x410   :  { %v2663_v2 = vpop.f32.mrf.mxu2  ;;  %v2468_v12 = vpop.f32.mrf.mxu0 }
 0x411   :  { %v2664_v53 = vadd.f32 %v2663_v2, %v2565_v7  ;;  %v2762_v14 = vpop.f32.mrf.mxu3  ;;  %v2567_v9 = vpop.f32.mrf.mxu1  ;;  %v2469_v5 = vadd.f32 %v2468_v12, %v4982_v37  ;;  %v346_v37 = vld [vmem:[%s5923_s0 + $0xa60] sm:$0xff]  ;;  %v365_v7 = vld [vmem:[%s5923_s0 + $0xaf8] sm:$0xff] }
 0x412   :  { %v762_v30 = vpack.c.bf16 %v362_v4, %v346_v37  ;;  %v395_v37 = vld [vmem:[%s5923_s0 + $0xbe8] sm:$0xff]  ;;  %v396_v4 = vld [vmem:[%s5923_s0 + $0xbf0] sm:$0xff] }
 0x413   :  { %v2763_v45 = vadd.f32 %v2762_v14, %v2664_v53  ;;  %2507 = vmatmul.bf16.gmra.mxu0 %v746_v33  ;;  %v2568_v20 = vadd.f32 %v2567_v9, %v2469_v5  ;;  %v763_v14 = vpack.c.bf16 %v363_v22, %v347_v43  ;;  %v381_v22 = vld [vmem:[%s5923_s0 + $0xb78] sm:$0xff] }
 0x414   :  { %2606 = vmatmul.bf16.gmra.mxu1 %v747_v52 }
 0x415   :  { %v2851_v39 = vmax.f32 %v2763_v45, 0.0  ;;  %2705 = vmatmul.bf16.gmra.mxu2 %v748_v38  ;;  %v765_v38 = vpack.c.bf16 %v365_v7, %v349_v34 }
 0x416   :  { %2804 = vmatmul.bf16.gmra.mxu3 %v749_v8 }
 0x417   :  { %2887 = vst [vmem:[%s5925_s3 + $0x8] sm:$0xff] %v2851_v39 }
 0x418   :  { %v2666_v56 = vpop.f32.mrf.mxu2  ;;  %v2470_v3 = vpop.f32.mrf.mxu0 }
 0x419   :  { %v2667_v41 = vadd.f32 %v2666_v56, %v2568_v20  ;;  %v2765_v58 = vpop.f32.mrf.mxu3  ;;  %v2569_v57 = vpop.f32.mrf.mxu1  ;;  %v2471_v60 = vadd.f32 %v2470_v3, %v5033_v50  ;;  %v348_v50 = vld [vmem:[%s5923_s0 + $0xa70] sm:$0xff] }
 0x41a   :  { %v764_v12 = vpack.c.bf16 %v364_v28, %v348_v50  ;;  %v397_v50 = vld [vmem:[%s5923_s0 + $0xbf8] sm:$0xff] }
 0x41b   :  { %v2766_v51 = vadd.f32 %v2765_v58, %v2667_v41  ;;  %v2570_v17 = vadd.f32 %v2569_v57, %v2471_v60  ;;  %v394_v60 = vld [vmem:[%s5923_s0 + $0xbe0] sm:$0xff] }
 0x41d   :  { %v2852_v21 = vmax.f32 %v2766_v51, 0.0 }
 0x41f   :  { %2888 = vst [vmem:[%s5925_s3 + $0x10] sm:$0xff] %v2852_v21  ;;  %v379_v21 = vld [vmem:[%s5923_s0 + $0xb68] sm:$0xff] }
 0x420   :  { %v2668_v59 = vpop.f32.mrf.mxu2  ;;  %v2473_v53 = vpop.f32.mrf.mxu0 }
 0x421   :  { %v2669_v2 = vadd.f32 %v2668_v59, %v2570_v17  ;;  %v2767_v33 = vpop.f32.mrf.mxu3  ;;  %v2572_v52 = vpop.f32.mrf.mxu1  ;;  %v2474_v8 = vadd.f32 %v2473_v53, %v5036_v61  ;;  %v378_v61 = vld [vmem:[%s5923_s0 + $0xb60] sm:$0xff]  ;;  %v781_v53 = vpack.c.bf16 %v397_v50, %v381_v22 }
 0x422   :  { %v778_v17 = vpack.c.bf16 %v394_v60, %v378_v61  ;;  %v413_v60 = vld [vmem:[%s5923_s0 + $0xc78] sm:$0xff] }
 0x423   :  { %v2768_v9 = vadd.f32 %v2767_v33, %v2669_v2  ;;  %2512 = vmatmul.bf16.gmra.mxu0 %v762_v30  ;;  %v2573_v5 = vadd.f32 %v2572_v52, %v2474_v8  ;;  %v779_v30 = vpack.c.bf16 %v395_v37, %v379_v21  ;;  %v429_v21 = vld [vmem:[%s5923_s0 + $0xcf8] sm:$0xff] }
 0x424   :  { %2611 = vmatmul.bf16.gmra.mxu1 %v763_v14 }
 0x425   :  { %v2853_v45 = vmax.f32 %v2768_v9, 0.0  ;;  %2710 = vmatmul.bf16.gmra.mxu2 %v764_v12 }
 0x426   :  { %2809 = vmatmul.bf16.gmra.mxu3 %v765_v38 }
 0x427   :  { %2889 = vst [vmem:[%s5925_s3 + $0x18] sm:$0xff] %v2853_v45 }
 0x428   :  { %v2671_v39 = vpop.f32.mrf.mxu2  ;;  %v2475_v41 = vpop.f32.mrf.mxu0 }
 0x429   :  { %v2672_v20 = vadd.f32 %v2671_v39, %v2573_v5  ;;  %v2770_v56 = vpop.f32.mrf.mxu3  ;;  %v2574_v58 = vpop.f32.mrf.mxu1  ;;  %v2476_v57 = vadd.f32 %v2475_v41, %v5063_v29  ;;  %v380_v29 = vld [vmem:[%s5923_s0 + $0xb70] sm:$0xff] }
 0x42a   :  { %v780_v2 = vpack.c.bf16 %v396_v4, %v380_v29 }
 0x42b   :  { %v2771_v3 = vadd.f32 %v2770_v56, %v2672_v20  ;;  %v2575_v43 = vadd.f32 %v2574_v58, %v2476_v57  ;;  %v426_v58 = vld [vmem:[%s5923_s0 + $0xce0] sm:$0xff]  ;;  %v427_v57 = vld [vmem:[%s5923_s0 + $0xce8] sm:$0xff] }
 0x42d   :  { %v2854_v51 = vmax.f32 %v2771_v3, 0.0  ;;  %v411_v3 = vld [vmem:[%s5923_s0 + $0xc68] sm:$0xff] }
 0x42e   :  { %v795_v50 = vpack.c.bf16 %v427_v57, %v411_v3 }
 0x42f   :  { %2890 = vst [vmem:[%s5925_s3 + $0x20] sm:$0xff] %v2854_v51  ;;  %v428_v51 = vld [vmem:[%s5923_s0 + $0xcf0] sm:$0xff] }
 0x430   :  { %v2673_v28 = vpop.f32.mrf.mxu2  ;;  %v2478_v59 = vpop.f32.mrf.mxu0 }
 0x431   :  { %v2674_v34 = vadd.f32 %v2673_v28, %v2575_v43  ;;  %v2772_v7 = vpop.f32.mrf.mxu3  ;;  %v2577_v33 = vpop.f32.mrf.mxu1  ;;  %v2479_v12 = vadd.f32 %v2478_v59, %v5066_v10  ;;  %v410_v10 = vld [vmem:[%s5923_s0 + $0xc60] sm:$0xff] }
 0x432   :  { %v794_v29 = vpack.c.bf16 %v426_v58, %v410_v10  ;;  %v461_v10 = vld [vmem:[%s5923_s0 + $0xdf8] sm:$0xff] }
 0x433   :  { %v2773_v14 = vadd.f32 %v2772_v7, %v2674_v34  ;;  %2517 = vmatmul.bf16.gmra.mxu0 %v778_v17  ;;  %v2578_v38 = vadd.f32 %v2577_v33, %v2479_v12  ;;  %v797_v34 = vpack.c.bf16 %v429_v21, %v413_v60 }
 0x434   :  { %2616 = vmatmul.bf16.gmra.mxu1 %v779_v30 }
 0x435   :  { %v2855_v52 = vmax.f32 %v2773_v14, 0.0  ;;  %2715 = vmatmul.bf16.gmra.mxu2 %v780_v2 }
 0x436   :  { %2814 = vmatmul.bf16.gmra.mxu3 %v781_v53 }
 0x437   :  { %2891 = vst [vmem:[%s5925_s3 + $0x28] sm:$0xff] %v2855_v52 }
 0x438   :  { %v2676_v9 = vpop.f32.mrf.mxu2  ;;  %v2480_v5 = vpop.f32.mrf.mxu0 }
 0x439   :  { %v2677_v8 = vadd.f32 %v2676_v9, %v2578_v38  ;;  %v2775_v45 = vpop.f32.mrf.mxu3  ;;  %v2579_v39 = vpop.f32.mrf.mxu1  ;;  %v2481_v56 = vadd.f32 %v2480_v5, %v5111_v13  ;;  %v412_v13 = vld [vmem:[%s5923_s0 + $0xc70] sm:$0xff]  ;;  %v443_v5 = vld [vmem:[%s5923_s0 + $0xd68] sm:$0xff] }
 0x43a   :  { %v796_v28 = vpack.c.bf16 %v428_v51, %v412_v13 }
 0x43b   :  { %v2776_v20 = vadd.f32 %v2775_v45, %v2677_v8  ;;  %v2580_v61 = vadd.f32 %v2579_v39, %v2481_v56  ;;  %v458_v45 = vld [vmem:[%s5923_s0 + $0xde0] sm:$0xff]  ;;  %v459_v39 = vld [vmem:[%s5923_s0 + $0xde8] sm:$0xff] }
 0x43d   :  { %v2856_v41 = vmax.f32 %v2776_v20, 0.0  ;;  %v460_v20 = vld [vmem:[%s5923_s0 + $0xdf0] sm:$0xff] }
 0x43f   :  { %2892 = vst [vmem:[%s5925_s3 + $0x30] sm:$0xff] %v2856_v41  ;;  %v445_v41 = vld [vmem:[%s5923_s0 + $0xd78] sm:$0xff] }
 0x440   :  { %v2678_v37 = vpop.f32.mrf.mxu2  ;;  %v2483_v22 = vpop.f32.mrf.mxu0 }
 0x441   :  { %v2679_v4 = vadd.f32 %v2678_v37, %v2580_v61  ;;  %v2777_v43 = vpop.f32.mrf.mxu3  ;;  %v2582_v17 = vpop.f32.mrf.mxu1  ;;  %v2484_v59 = vadd.f32 %v2483_v22, %v5120_v62  ;;  %v442_v62 = vld [vmem:[%s5923_s0 + $0xd60] sm:$0xff]  ;;  %v811_v61 = vpack.c.bf16 %v459_v39, %v443_v5  ;;  %v813_v37 = vpack.c.bf16 %v461_v10, %v445_v41 }
 0x442   :  { %v810_v3 = vpack.c.bf16 %v458_v45, %v442_v62 }
 0x443   :  { %v2778_v7 = vadd.f32 %v2777_v43, %v2679_v4  ;;  %2522 = vmatmul.bf16.gmra.mxu0 %v794_v29  ;;  %v2583_v2 = vadd.f32 %v2582_v17, %v2484_v59 }
 0x444   :  { %2621 = vmatmul.bf16.gmra.mxu1 %v795_v50 }
 0x445   :  { %v2857_v30 = vmax.f32 %v2778_v7, 0.0  ;;  %2720 = vmatmul.bf16.gmra.mxu2 %v796_v28 }
 0x446   :  { %2819 = vmatmul.bf16.gmra.mxu3 %v797_v34 }
 0x447   :  { %2893 = vst [vmem:[%s5925_s3 + $0x38] sm:$0xff] %v2857_v30 }
 0x448   :  { %v2681_v33 = vpop.f32.mrf.mxu2  ;;  %v2485_v12 = vpop.f32.mrf.mxu0 }
 0x449   :  { %v2682_v53 = vadd.f32 %v2681_v33, %v2583_v2  ;;  %v2780_v14 = vpop.f32.mrf.mxu3  ;;  %v2584_v52 = vpop.f32.mrf.mxu1  ;;  %v2486_v9 = vadd.f32 %v2485_v12, %v5147_v11  ;;  %v444_v11 = vld [vmem:[%s5923_s0 + $0xd70] sm:$0xff]  ;;  %v490_v33 = vld [vmem:[%s5923_s0 + $0xee0] sm:$0xff] }
 0x44a   :  { %v812_v60 = vpack.c.bf16 %v460_v20, %v444_v11  ;;  %v492_v12 = vld [vmem:[%s5923_s0 + $0xef0] sm:$0xff] }
 0x44b   :  { %v2781_v38 = vadd.f32 %v2780_v14, %v2682_v53  ;;  %v2585_v56 = vadd.f32 %v2584_v52, %v2486_v9  ;;  %v475_v53 = vld [vmem:[%s5923_s0 + $0xe68] sm:$0xff]  ;;  %v493_v9 = vld [vmem:[%s5923_s0 + $0xef8] sm:$0xff] }
 0x44c   :  { %v491_v14 = vld [vmem:[%s5923_s0 + $0xee8] sm:$0xff] }
 0x44d   :  { %v2858_v8 = vmax.f32 %v2781_v38, 0.0  ;;  %v477_v38 = vld [vmem:[%s5923_s0 + $0xe78] sm:$0xff]  ;;  %v827_v11 = vpack.c.bf16 %v491_v14, %v475_v53 }
 0x44e   :  { %v829_v41 = vpack.c.bf16 %v493_v9, %v477_v38 }
 0x44f   :  { %2894 = vst [vmem:[%s5925_s3 + $0x40] sm:$0xff] %v2858_v8 }
 0x450   :  { %v2683_v58 = vpop.f32.mrf.mxu2  ;;  %v2488_v51 = vpop.f32.mrf.mxu0 }
 0x451   :  { %v2684_v57 = vadd.f32 %v2683_v58, %v2585_v56  ;;  %v2782_v13 = vpop.f32.mrf.mxu3  ;;  %v2587_v21 = vpop.f32.mrf.mxu1  ;;  %v2489_v4 = vadd.f32 %v2488_v51, %v5150_v63  ;;  %v474_v63 = vld [vmem:[%s5923_s0 + $0xe60] sm:$0xff] }
 0x452   :  { %v826_v62 = vpack.c.bf16 %v490_v33, %v474_v63 }
 0x453   :  { %v2783_v29 = vadd.f32 %v2782_v13, %v2684_v57  ;;  %2527 = vmatmul.bf16.gmra.mxu0 %v810_v3  ;;  %v2588_v22 = vadd.f32 %v2587_v21, %v2489_v4 }
 0x454   :  { %2626 = vmatmul.bf16.gmra.mxu1 %v811_v61 }
 0x455   :  { %v2859_v43 = vmax.f32 %v2783_v29, 0.0  ;;  %2725 = vmatmul.bf16.gmra.mxu2 %v812_v60 }
 0x456   :  { %2824 = vmatmul.bf16.gmra.mxu3 %v813_v37 }
 0x457   :  { %2895 = vst [vmem:[%s5925_s3 + $0x48] sm:$0xff] %v2859_v43  ;;  %v522_v43 = vld [vmem:[%s5923_s0 + $0xfe0] sm:$0xff] }
 0x458   :  { %v2686_v50 = vpop.f32.mrf.mxu2  ;;  %v2490_v34 = vpop.f32.mrf.mxu0 }
 0x459   :  { %v2687_v28 = vadd.f32 %v2686_v50, %v2588_v22  ;;  %v2785_v17 = vpop.f32.mrf.mxu3  ;;  %v2589_v7 = vpop.f32.mrf.mxu1  ;;  %v2491_v30 = vadd.f32 %v2490_v34, %v5177_v48  ;;  %v476_v48 = vld [vmem:[%s5923_s0 + $0xe70] sm:$0xff]  ;;  %v507_v22 = vld [vmem:[%s5923_s0 + $0xf68] sm:$0xff]  ;;  %v509_v34 = vld [vmem:[%s5923_s0 + $0xf78] sm:$0xff] }
 0x45a   :  { %v828_v20 = vpack.c.bf16 %v492_v12, %v476_v48  ;;  %v523_v50 = vld [vmem:[%s5923_s0 + $0xfe8] sm:$0xff] }
 0x45b   :  { %v2786_v59 = vadd.f32 %v2785_v17, %v2687_v28  ;;  %v2590_v52 = vadd.f32 %v2589_v7, %v2491_v30  ;;  %v524_v28 = vld [vmem:[%s5923_s0 + $0xff0] sm:$0xff]  ;;  %v525_v7 = vld [vmem:[%s5923_s0 + $0xff8] sm:$0xff]  ;;  %v843_v53 = vpack.c.bf16 %v523_v50, %v507_v22 }
 0x45c   :  { %v845_v12 = vpack.c.bf16 %v525_v7, %v509_v34 }
 0x45d   :  { %v2860_v2 = vmax.f32 %v2786_v59, 0.0 }
 0x45f   :  { %2896 = vst [vmem:[%s5925_s3 + $0x50] sm:$0xff] %v2860_v2 }
 0x460   :  { %v2688_v8 = vpop.f32.mrf.mxu2  ;;  %v2493_v39 = vpop.f32.mrf.mxu0 }
 0x461   :  { %v2689_v45 = vadd.f32 %v2688_v8, %v2590_v52  ;;  %v2787_v5 = vpop.f32.mrf.mxu3  ;;  %v2592_v56 = vpop.f32.mrf.mxu1  ;;  %v2494_v58 = vadd.f32 %v2493_v39, %v5204_v25  ;;  %v506_v25 = vld [vmem:[%s5923_s0 + $0xf60] sm:$0xff] }
 0x462   :  { %v842_v30 = vpack.c.bf16 %v522_v43, %v506_v25 }
 0x463   :  { %v2788_v10 = vadd.f32 %v2787_v5, %v2689_v45  ;;  %2532 = vmatmul.bf16.gmra.mxu0 %v826_v62  ;;  %v2593_v57 = vadd.f32 %v2592_v56, %v2494_v58  ;;  %v539_v58 = vld [vmem:[%s5923_s0 + $0x1068] sm:$0xff] }
 0x464   :  { %2631 = vmatmul.bf16.gmra.mxu1 %v827_v11 }
 0x465   :  { %v2861_v3 = vmax.f32 %v2788_v10, 0.0  ;;  %2730 = vmatmul.bf16.gmra.mxu2 %v828_v20  ;;  %v554_v10 = vld [vmem:[%s5923_s0 + $0x10e0] sm:$0xff] }
 0x466   :  { %2829 = vmatmul.bf16.gmra.mxu3 %v829_v41 }
 0x467   :  { %2897 = vst [vmem:[%s5925_s3 + $0x58] sm:$0xff] %v2861_v3  ;;  %v555_v3 = vld [vmem:[%s5923_s0 + $0x10e8] sm:$0xff] }
 0x468   :  { %v2691_v13 = vpop.f32.mrf.mxu2  ;;  %v2495_v60 = vpop.f32.mrf.mxu0  ;;  %v859_v25 = vpack.c.bf16 %v555_v3, %v539_v58 }
 0x469   :  { %v2692_v51 = vadd.f32 %v2691_v13, %v2593_v57  ;;  %v2790_v61 = vpop.f32.mrf.mxu3  ;;  %v2594_v21 = vpop.f32.mrf.mxu1  ;;  %v2496_v29 = vadd.f32 %v2495_v60, %v5231_v47  ;;  %v508_v47 = vld [vmem:[%s5923_s0 + $0xf70] sm:$0xff] }
 0x46a   :  { %v844_v14 = vpack.c.bf16 %v524_v28, %v508_v47  ;;  %v556_v57 = vld [vmem:[%s5923_s0 + $0x10f0] sm:$0xff] }
 0x46b   :  { %v2791_v37 = vadd.f32 %v2790_v61, %v2692_v51  ;;  %v2595_v17 = vadd.f32 %v2594_v21, %v2496_v29  ;;  %v541_v51 = vld [vmem:[%s5923_s0 + $0x1078] sm:$0xff] }
 0x46c   :  { %v557_v61 = vld [vmem:[%s5923_s0 + $0x10f8] sm:$0xff] }
 0x46d   :  { %v2862_v4 = vmax.f32 %v2791_v37, 0.0  ;;  %v861_v50 = vpack.c.bf16 %v557_v61, %v541_v51 }
 0x46f   :  { %2898 = vst [vmem:[%s5925_s3 + $0x60] sm:$0xff] %v2862_v4 }
 0x470   :  { %v2693_v59 = vpop.f32.mrf.mxu2  ;;  %v2498_v33 = vpop.f32.mrf.mxu0 }
 0x471   :  { %v2694_v2 = vadd.f32 %v2693_v59, %v2595_v17  ;;  %v2792_v63 = vpop.f32.mrf.mxu3  ;;  %v2597_v48 = vpop.f32.mrf.mxu1  ;;  %v2499_v38 = vadd.f32 %v2498_v33, %v5234_v23  ;;  %v538_v23 = vld [vmem:[%s5923_s0 + $0x1060] sm:$0xff] }
 0x472   :  { %v858_v21 = vpack.c.bf16 %v554_v10, %v538_v23 }
 0x473   :  { %v2793_v52 = vadd.f32 %v2792_v63, %v2694_v2  ;;  %2537 = vmatmul.bf16.gmra.mxu0 %v842_v30  ;;  %v2598_v8 = vadd.f32 %v2597_v48, %v2499_v38  ;;  %v586_v48 = vld [vmem:[%s5923_s0 + $0x11e0] sm:$0xff]  ;;  %v588_v38 = vld [vmem:[%s5923_s0 + $0x11f0] sm:$0xff] }
 0x474   :  { %2636 = vmatmul.bf16.gmra.mxu1 %v843_v53 }
 0x475   :  { %v2863_v9 = vmax.f32 %v2793_v52, 0.0  ;;  %2735 = vmatmul.bf16.gmra.mxu2 %v844_v14  ;;  %v587_v52 = vld [vmem:[%s5923_s0 + $0x11e8] sm:$0xff] }
 0x476   :  { %2834 = vmatmul.bf16.gmra.mxu3 %v845_v12  ;;  %v571_v12 = vld [vmem:[%s5923_s0 + $0x1168] sm:$0xff] }
 0x477   :  { %2899 = vst [vmem:[%s5925_s3 + $0x68] sm:$0xff] %v2863_v9 }
 0x478   :  { %v2696_v62 = vpop.f32.mrf.mxu2  ;;  %v2500_v39 = vpop.f32.mrf.mxu0 }
 0x479   :  { %v2697_v45 = vadd.f32 %v2696_v62, %v2598_v8  ;;  %v2795_v5 = vpop.f32.mrf.mxu3  ;;  %v2599_v11 = vpop.f32.mrf.mxu1  ;;  %v2501_v56 = vadd.f32 %v2500_v39, %v5261_v27  ;;  %v540_v27 = vld [vmem:[%s5923_s0 + $0x1070] sm:$0xff]  ;;  %v573_v8 = vld [vmem:[%s5923_s0 + $0x1178] sm:$0xff] }
 0x47a   :  { %v860_v43 = vpack.c.bf16 %v556_v57, %v540_v27  ;;  %v589_v62 = vld [vmem:[%s5923_s0 + $0x11f8] sm:$0xff] }
 0x47b   :  { %v2796_v20 = vadd.f32 %v2795_v5, %v2697_v45  ;;  %v2600_v13 = vadd.f32 %v2599_v11, %v2501_v56  ;;  %v875_v56 = vpack.c.bf16 %v587_v52, %v571_v12  ;;  %v877_v10 = vpack.c.bf16 %v589_v62, %v573_v8 }
 0x47d   :  { %v2864_v41 = vmax.f32 %v2796_v20, 0.0 }
 0x47f   :  { %2900 = vst [vmem:[%s5925_s3 + $0x70] sm:$0xff] %v2864_v41 }
 0x480   :  { %v2698_v60 = vpop.f32.mrf.mxu2  ;;  %v2503_v4 = vpop.f32.mrf.mxu0 }
 0x481   :  { %v2699_v37 = vadd.f32 %v2698_v60, %v2600_v13  ;;  %v2797_v29 = vpop.f32.mrf.mxu3  ;;  %v2602_v22 = vpop.f32.mrf.mxu1  ;;  %v2504_v28 = vadd.f32 %v2503_v4, %v5264_v15  ;;  %v570_v15 = vld [vmem:[%s5923_s0 + $0x1160] sm:$0xff] }
 0x482   :  { %v874_v5 = vpack.c.bf16 %v586_v48, %v570_v15 }
 0x483   :  { %v2798_v47 = vadd.f32 %v2797_v29, %v2699_v37  ;;  %2542 = vmatmul.bf16.gmra.mxu0 %v858_v21  ;;  %v2603_v34 = vadd.f32 %v2602_v22, %v2504_v28 }
 0x484   :  { %2641 = vmatmul.bf16.gmra.mxu1 %v859_v25 }
 0x485   :  { %v2865_v17 = vmax.f32 %v2798_v47, 0.0  ;;  %2740 = vmatmul.bf16.gmra.mxu2 %v860_v43 }
 0x486   :  { %2839 = vmatmul.bf16.gmra.mxu3 %v861_v50 }
 0x487   :  { %2901 = vst [vmem:[%s5925_s3 + $0x78] sm:$0xff] %v2865_v17 }
 0x488   :  { %v2701_v7 = vpop.f32.mrf.mxu2  ;;  %v2505_v2 = vpop.f32.mrf.mxu0 }
 0x489   :  { %v2702_v59 = vadd.f32 %v2701_v7, %v2603_v34  ;;  %v2800_v30 = vpop.f32.mrf.mxu3  ;;  %v2604_v63 = vpop.f32.mrf.mxu1  ;;  %v2506_v53 = vadd.f32 %v2505_v2, %v5291_v26  ;;  %v572_v26 = vld [vmem:[%s5923_s0 + $0x1170] sm:$0xff] }
 0x48a   :  { %v876_v41 = vpack.c.bf16 %v588_v38, %v572_v26 }
 0x48b   :  { %v2801_v33 = vadd.f32 %v2800_v30, %v2702_v59  ;;  %v2605_v9 = vadd.f32 %v2604_v63, %v2506_v53 }
 0x48d   :  { %v2866_v14 = vmax.f32 %v2801_v33, 0.0 }
 0x48f   :  { %2902 = vst [vmem:[%s5925_s3 + $0x80] sm:$0xff] %v2866_v14 }
 0x490   :  { %v2703_v45 = vpop.f32.mrf.mxu2  ;;  %v2508_v20 = vpop.f32.mrf.mxu0 }
 0x491   :  { %v2704_v39 = vadd.f32 %v2703_v45, %v2605_v9  ;;  %v2802_v11 = vpop.f32.mrf.mxu3  ;;  %v2607_v23 = vpop.f32.mrf.mxu1  ;;  %v2509_v3 = vadd.f32 %v2508_v20, %v5294_v55 }
 0x493   :  { %v2803_v58 = vadd.f32 %v2802_v11, %v2704_v39  ;;  %2547 = vmatmul.bf16.gmra.mxu0 %v874_v5  ;;  %v2608_v57 = vadd.f32 %v2607_v23, %v2509_v3 }
 0x494   :  { %2646 = vmatmul.bf16.gmra.mxu1 %v875_v56 }
 0x495   :  { %v2867_v27 = vmax.f32 %v2803_v58, 0.0  ;;  %2745 = vmatmul.bf16.gmra.mxu2 %v876_v41 }
 0x496   :  { %2844 = vmatmul.bf16.gmra.mxu3 %v877_v10 }
 0x497   :  { %2903 = vst [vmem:[%s5925_s3 + $0x88] sm:$0xff] %v2867_v27 }
 0x498   :  { %v2706_v13 = vpop.f32.mrf.mxu2  ;;  %v2510_v60 = vpop.f32.mrf.mxu0 }
 0x499   :  { %v2707_v51 = vadd.f32 %v2706_v13, %v2608_v57  ;;  %v2805_v61 = vpop.f32.mrf.mxu3  ;;  %v2609_v21 = vpop.f32.mrf.mxu1  ;;  %v2511_v29 = vadd.f32 %v2510_v60, %v5321_v1 }
 0x49b   :  { %v2806_v37 = vadd.f32 %v2805_v61, %v2707_v51  ;;  %v2610_v55 = vadd.f32 %v2609_v21, %v2511_v29 }
 0x49d   :  { %v2868_v4 = vmax.f32 %v2806_v37, 0.0 }
 0x49f   :  { %2904 = vst [vmem:[%s5925_s3 + $0x90] sm:$0xff] %v2868_v4 }
 0x4a0   :  { %v2708_v25 = vpop.f32.mrf.mxu2  ;;  %v2513_v50 = vpop.f32.mrf.mxu0 }
 0x4a1   :  { %v2709_v43 = vadd.f32 %v2708_v25, %v2610_v55  ;;  %v2807_v22 = vpop.f32.mrf.mxu3  ;;  %v2612_v47 = vpop.f32.mrf.mxu1  ;;  %v2514_v17 = vadd.f32 %v2513_v50, %v5324_v46 }
 0x4a3   :  { %v2808_v28 = vadd.f32 %v2807_v22, %v2709_v43  ;;  %v2613_v1 = vadd.f32 %v2612_v47, %v2514_v17 }
 0x4a5   :  { %v2869_v34 = vmax.f32 %v2808_v28, 0.0 }
 0x4a7   :  { %2905 = vst [vmem:[%s5925_s3 + $0x98] sm:$0xff] %v2869_v34 }
 0x4a8   :  { %v2711_v7 = vpop.f32.mrf.mxu2  ;;  %v2515_v2 = vpop.f32.mrf.mxu0 }
 0x4a9   :  { %v2712_v59 = vadd.f32 %v2711_v7, %v2613_v1  ;;  %v2810_v30 = vpop.f32.mrf.mxu3  ;;  %v2614_v63 = vpop.f32.mrf.mxu1  ;;  %v2516_v53 = vadd.f32 %v2515_v2, %v5351_v44 }
 0x4ab   :  { %v2811_v33 = vadd.f32 %v2810_v30, %v2712_v59  ;;  %v2615_v46 = vadd.f32 %v2614_v63, %v2516_v53 }
 0x4ad   :  { %v2870_v14 = vmax.f32 %v2811_v33, 0.0 }
 0x4af   :  { %2906 = vst [vmem:[%s5925_s3 + $0xa0] sm:$0xff] %v2870_v14 }
 0x4b0   :  { %v2713_v15 = vpop.f32.mrf.mxu2  ;;  %v2518_v52 = vpop.f32.mrf.mxu0 }
 0x4b1   :  { %v2714_v48 = vadd.f32 %v2713_v15, %v2615_v46  ;;  %v2812_v12 = vpop.f32.mrf.mxu3  ;;  %v2617_v26 = vpop.f32.mrf.mxu1  ;;  %v2519_v9 = vadd.f32 %v2518_v52, %v5354_v0 }
 0x4b3   :  { %v2813_v38 = vadd.f32 %v2812_v12, %v2714_v48  ;;  %v2618_v44 = vadd.f32 %v2617_v26, %v2519_v9 }
 0x4b5   :  { %v2871_v8 = vmax.f32 %v2813_v38, 0.0 }
 0x4b7   :  { %2907 = vst [vmem:[%s5925_s3 + $0xa8] sm:$0xff] %v2871_v8 }
 0x4b8   :  { %v2716_v62 = vpop.f32.mrf.mxu2  ;;  %v2520_v39 = vpop.f32.mrf.mxu0 }
 0x4b9   :  { %v2717_v45 = vadd.f32 %v2716_v62, %v2618_v44  ;;  %v2815_v5 = vpop.f32.mrf.mxu3  ;;  %v2619_v11 = vpop.f32.mrf.mxu1  ;;  %v2521_v56 = vadd.f32 %v2520_v39, %v5381_v18 }
 0x4bb   :  { %v2816_v20 = vadd.f32 %v2815_v5, %v2717_v45  ;;  %v2620_v0 = vadd.f32 %v2619_v11, %v2521_v56 }
 0x4bd   :  { %v2872_v41 = vmax.f32 %v2816_v20, 0.0 }
 0x4bf   :  { %2908 = vst [vmem:[%s5925_s3 + $0xb0] sm:$0xff] %v2872_v41 }
 0x4c0   :  { %v2718_v23 = vpop.f32.mrf.mxu2  ;;  %v2523_v3 = vpop.f32.mrf.mxu0 }
 0x4c1   :  { %v2719_v10 = vadd.f32 %v2718_v23, %v2620_v0  ;;  %v2817_v58 = vpop.f32.mrf.mxu3  ;;  %v2622_v27 = vpop.f32.mrf.mxu1  ;;  %v2524_v13 = vadd.f32 %v2523_v3, %v5384_v40 }
 0x4c3   :  { %v2818_v57 = vadd.f32 %v2817_v58, %v2719_v10  ;;  %v2623_v18 = vadd.f32 %v2622_v27, %v2524_v13 }
 0x4c5   :  { %v2873_v51 = vmax.f32 %v2818_v57, 0.0 }
 0x4c7   :  { %2909 = vst [vmem:[%s5925_s3 + $0xb8] sm:$0xff] %v2873_v51 }
 0x4c8   :  { %v2721_v61 = vpop.f32.mrf.mxu2  ;;  %v2525_v37 = vpop.f32.mrf.mxu0 }
 0x4c9   :  { %v2722_v60 = vadd.f32 %v2721_v61, %v2623_v18  ;;  %v2820_v21 = vpop.f32.mrf.mxu3  ;;  %v2624_v29 = vpop.f32.mrf.mxu1  ;;  %v2526_v55 = vadd.f32 %v2525_v37, %v5411_v35 }
 0x4cb   :  { %v2821_v4 = vadd.f32 %v2820_v21, %v2722_v60  ;;  %v2625_v40 = vadd.f32 %v2624_v29, %v2526_v55 }
 0x4cd   :  { %v2874_v25 = vmax.f32 %v2821_v4, 0.0 }
 0x4cf   :  { %2910 = vst [vmem:[%s5925_s3 + $0xc0] sm:$0xff] %v2874_v25 }
 0x4d0   :  { %v2723_v43 = vpop.f32.mrf.mxu2  ;;  %v2528_v47 = vpop.f32.mrf.mxu0 }
 0x4d1   :  { %v2724_v22 = vadd.f32 %v2723_v43, %v2625_v40  ;;  %v2822_v50 = vpop.f32.mrf.mxu3  ;;  %v2627_v28 = vpop.f32.mrf.mxu1  ;;  %v2529_v34 = vadd.f32 %v2528_v47, %v5414_v16 }
 0x4d3   :  { %v2823_v17 = vadd.f32 %v2822_v50, %v2724_v22  ;;  %v2628_v35 = vadd.f32 %v2627_v28, %v2529_v34 }
 0x4d5   :  { %v2875_v1 = vmax.f32 %v2823_v17, 0.0 }
 0x4d7   :  { %2911 = vst [vmem:[%s5925_s3 + $0xc8] sm:$0xff] %v2875_v1 }
 0x4d8   :  { %v2726_v7 = vpop.f32.mrf.mxu2  ;;  %v2530_v2 = vpop.f32.mrf.mxu0 }
 0x4d9   :  { %v2727_v59 = vadd.f32 %v2726_v7, %v2628_v35  ;;  %v2825_v30 = vpop.f32.mrf.mxu3  ;;  %v2629_v63 = vpop.f32.mrf.mxu1  ;;  %v2531_v53 = vadd.f32 %v2530_v2, %v5441_v36 }
 0x4db   :  { %v2826_v33 = vadd.f32 %v2825_v30, %v2727_v59  ;;  %v2630_v16 = vadd.f32 %v2629_v63, %v2531_v53 }
 0x4dd   :  { %v2876_v14 = vmax.f32 %v2826_v33, 0.0 }
 0x4df   :  { %2912 = vst [vmem:[%s5925_s3 + $0xd0] sm:$0xff] %v2876_v14 }
 0x4e0   :  { %v2728_v46 = vpop.f32.mrf.mxu2  ;;  %v2533_v12 = vpop.f32.mrf.mxu0 }
 0x4e1   :  { %v2729_v15 = vadd.f32 %v2728_v46, %v2630_v16  ;;  %v2827_v48 = vpop.f32.mrf.mxu3  ;;  %v2632_v52 = vpop.f32.mrf.mxu1  ;;  %v2534_v38 = vadd.f32 %v2533_v12, %v5444_v42 }
 0x4e3   :  { %v2828_v26 = vadd.f32 %v2827_v48, %v2729_v15  ;;  %v2633_v36 = vadd.f32 %v2632_v52, %v2534_v38 }
 0x4e5   :  { %v2877_v9 = vmax.f32 %v2828_v26, 0.0 }
 0x4e7   :  { %2913 = vst [vmem:[%s5925_s3 + $0xd8] sm:$0xff] %v2877_v9 }
 0x4e8   :  { %v2731_v8 = vpop.f32.mrf.mxu2  ;;  %v2535_v45 = vpop.f32.mrf.mxu0 }
 0x4e9   :  { %v2732_v44 = vadd.f32 %v2731_v8, %v2633_v36  ;;  %v2830_v62 = vpop.f32.mrf.mxu3  ;;  %v2634_v5 = vpop.f32.mrf.mxu1  ;;  %v2536_v11 = vadd.f32 %v2535_v45, %v5471_v31 }
 0x4eb   :  { %v2831_v39 = vadd.f32 %v2830_v62, %v2732_v44  ;;  %v2635_v42 = vadd.f32 %v2634_v5, %v2536_v11 }
 0x4ed   :  { %v2878_v20 = vmax.f32 %v2831_v39, 0.0 }
 0x4ef   :  { %2914 = vst [vmem:[%s5925_s3 + $0xe0] sm:$0xff] %v2878_v20 }
 0x4f0   :  { %v2733_v56 = vpop.f32.mrf.mxu2  ;;  %v2538_v23 = vpop.f32.mrf.mxu0 }
 0x4f1   :  { %v2734_v41 = vadd.f32 %v2733_v56, %v2635_v42  ;;  %v2832_v0 = vpop.f32.mrf.mxu3  ;;  %v2637_v10 = vpop.f32.mrf.mxu1  ;;  %v2539_v3 = vadd.f32 %v2538_v23, %v5474_v32 }
 0x4f3   :  { %v2833_v58 = vadd.f32 %v2832_v0, %v2734_v41  ;;  %v2638_v31 = vadd.f32 %v2637_v10, %v2539_v3 }
 0x4f5   :  { %v2879_v27 = vmax.f32 %v2833_v58, 0.0 }
 0x4f7   :  { %2915 = vst [vmem:[%s5925_s3 + $0xe8] sm:$0xff] %v2879_v27 }
 0x4f8   :  { %v2736_v57 = vpop.f32.mrf.mxu2  ;;  %v2540_v18 = vpop.f32.mrf.mxu0 }
 0x4f9   :  { %v2737_v13 = vadd.f32 %v2736_v57, %v2638_v31  ;;  %v2835_v51 = vpop.f32.mrf.mxu3  ;;  %v2639_v61 = vpop.f32.mrf.mxu1  ;;  %v2541_v21 = vadd.f32 %v2540_v18, %v5501_v19 }
 0x4fb   :  { %v2836_v60 = vadd.f32 %v2835_v51, %v2737_v13  ;;  %v2640_v32 = vadd.f32 %v2639_v61, %v2541_v21 }
 0x4fd   :  { %v2880_v37 = vmax.f32 %v2836_v60, 0.0 }
 0x4ff   :  { %2916 = vst [vmem:[%s5925_s3 + $0xf0] sm:$0xff] %v2880_v37 }
 0x500   :  { %v2738_v29 = vpop.f32.mrf.mxu2  ;;  %v2543_v25 = vpop.f32.mrf.mxu0 }
 0x501   :  { %v2739_v4 = vadd.f32 %v2738_v29, %v2640_v32  ;;  %v2837_v55 = vpop.f32.mrf.mxu3  ;;  %v2642_v40 = vpop.f32.mrf.mxu1  ;;  %v2544_v22 = vadd.f32 %v2543_v25, %v5504_v54 }
 0x503   :  { %v2838_v43 = vadd.f32 %v2837_v55, %v2739_v4  ;;  %v2643_v19 = vadd.f32 %v2642_v40, %v2544_v22 }
 0x505   :  { %v2881_v50 = vmax.f32 %v2838_v43, 0.0 }
 0x507   :  { %2917 = vst [vmem:[%s5925_s3 + $0xf8] sm:$0xff] %v2881_v50 }
 0x508   :  { %v2741_v47 = vpop.f32.mrf.mxu2  ;;  %v2545_v34 = vpop.f32.mrf.mxu0 }
 0x509   :  { %v2742_v28 = vadd.f32 %v2741_v47, %v2643_v19  ;;  %v2840_v17 = vpop.f32.mrf.mxu3  ;;  %v2644_v1 = vpop.f32.mrf.mxu1  ;;  %v2546_v7 = vadd.f32 %v2545_v34, %v5531_v49 }
 0x50b   :  { %v2841_v35 = vadd.f32 %v2840_v17, %v2742_v28  ;;  %v2645_v54 = vadd.f32 %v2644_v1, %v2546_v7 }
 0x50d   :  { %v2882_v59 = vmax.f32 %v2841_v35, 0.0 }
 0x50f   :  { %2918 = vst [vmem:[%s5925_s3 + $0x100] sm:$0xff] %v2882_v59 }
 0x510   :  { %v2743_v30 = vpop.f32.mrf.mxu2  ;;  %v2548_v33 = vpop.f32.mrf.mxu0 }
 0x511   :  { %v2744_v2 = vadd.f32 %v2743_v30, %v2645_v54  ;;  %v2842_v63 = vpop.f32.mrf.mxu3  ;;  %v2549_v14 = vadd.f32 %v2548_v33, %v5534_v24  ;;  %v2647_v16 = vpop.f32.mrf.mxu1 }
 0x513   :  { %v2843_v53 = vadd.f32 %v2842_v63, %v2744_v2  ;;  %v2648_v49 = vadd.f32 %v2647_v16, %v2549_v14 }
 0x515   :  { %v2883_v46 = vmax.f32 %v2843_v53, 0.0 }
 0x517   :  { %2919 = vst [vmem:[%s5925_s3 + $0x108] sm:$0xff] %v2883_v46 }
 0x518   :  { %v2746_v15 = vpop.f32.mrf.mxu2  ;;  %v2550_v52 = vpop.f32.mrf.mxu0 }
 0x519   :  { %v2747_v48 = vadd.f32 %v2746_v15, %v2648_v49  ;;  %v2845_v12 = vpop.f32.mrf.mxu3  ;;  %v2551_v38 = vadd.f32 %v2550_v52, %v5560_v6  ;;  %v2649_v36 = vpop.f32.mrf.mxu1 }
 0x51b   :  { %v2846_v26 = vadd.f32 %v2845_v12, %v2747_v48  ;;  %v2650_v24 = vadd.f32 %v2649_v36, %v2551_v38 }
 0x51d   :  { %v2884_v9 = vmax.f32 %v2846_v26, 0.0 }
 0x51f   :  { %2920 = vst [vmem:[%s5925_s3 + $0x110] sm:$0xff] %v2884_v9 }
 0x520   :  { %v2748_v8 = vpop.f32.mrf.mxu2 }
 0x521   :  { %v2749_v44 = vadd.f32 %v2748_v8, %v2650_v24  ;;  %v2847_v62 = vpop.f32.mrf.mxu3 }
 0x523   :  { %v2848_v45 = vadd.f32 %v2847_v62, %v2749_v44 }
 0x525   :  { %v2885_v5 = vmax.f32 %v2848_v45, 0.0 }
 0x527   :  { %2921 = vst [vmem:[%s5925_s3 + $0x118] sm:$0xff] %v2885_v5 }

// kernel: encoder_forward.8
= control target key start
LH: loop header
LB: loop body
LE: loop exit
PB: predicated region body
PF: predicated region fallthrough
CT: control target
= control target key end

     0   :  { %s2519_s1 = inlined_call_operand.vmem [shape: f32[2048,128], index: 1, kind: input, shape index: {}]   ;;  %s2520_s0 = inlined_call_operand.vmem [shape: f32[72,2048], index: 0, kind: input, shape index: {}]   ;;  %s2521_s2 = inlined_call_operand.vmem [shape: f32[1,128], index: 2, kind: input, shape index: {}]   ;;  %s2522_s3 = inlined_call_operand.vmem [shape: f32[72,128], index: 3, kind: output, shape index: {}]  }
   0x1   :  { %v252_v0 = vld [vmem:[%s2519_s1 + $0x70] sm:$0xff]  ;;  %v253_v1 = vld [vmem:[%s2519_s1 + $0x78] sm:$0xff]  ;;  %v250_v11 = vld [vmem:[%s2519_s1 + $0x60] sm:$0xff] }
   0x2   :  { %v268_v2 = vld [vmem:[%s2519_s1 + $0xf0] sm:$0xff]  ;;  %v501_v3 = vpack.c.bf16 %v253_v1, %v252_v0  ;;  %v269_v4 = vld [vmem:[%s2519_s1 + $0xf8] sm:$0xff]  ;;  %v251_v13 = vld [vmem:[%s2519_s1 + $0x68] sm:$0xff] }
   0x3   :  { %v284_v5 = vld [vmem:[%s2519_s1 + $0x170] sm:$0xff]  ;;  %v285_v6 = vld [vmem:[%s2519_s1 + $0x178] sm:$0xff]  ;;  %v509_v7 = vpack.c.bf16 %v269_v4, %v268_v2  ;;  %v266_v14 = vld [vmem:[%s2519_s1 + $0xe0] sm:$0xff]  ;;  %v500_v16 = vpack.c.bf16 %v251_v13, %v250_v11 }
   0x4   :  { %v517_v8 = vpack.c.bf16 %v285_v6, %v284_v5  ;;  %v300_v9 = vld [vmem:[%s2519_s1 + $0x1f0] sm:$0xff]  ;;  %v301_v10 = vld [vmem:[%s2519_s1 + $0x1f8] sm:$0xff]  ;;  %626 = vmatpush.bf16.msra.mxu0 %v501_v3  ;;  %v267_v15 = vld [vmem:[%s2519_s1 + $0xe8] sm:$0xff] }
   0x5   :  { %v525_v12 = vpack.c.bf16 %v301_v10, %v300_v9  ;;  %659 = vmatpush.bf16.msra.mxu1 %v509_v7  ;;  %v508_v17 = vpack.c.bf16 %v267_v15, %v266_v14  ;;  %v282_v18 = vld [vmem:[%s2519_s1 + $0x160] sm:$0xff]  ;;  %v283_v19 = vld [vmem:[%s2519_s1 + $0x168] sm:$0xff]  ;;  %v248_v23 = vld [vmem:[%s2519_s1 + $0x50] sm:$0xff] }
   0x6   :  { %692 = vmatpush.bf16.msra.mxu2 %v517_v8  ;;  %v298_v20 = vld [vmem:[%s2519_s1 + $0x1e0] sm:$0xff]  ;;  %v516_v21 = vpack.c.bf16 %v283_v19, %v282_v18  ;;  %v299_v22 = vld [vmem:[%s2519_s1 + $0x1e8] sm:$0xff]  ;;  %v249_v24 = vld [vmem:[%s2519_s1 + $0x58] sm:$0xff] }
   0x7   :  { %725 = vmatpush.bf16.msra.mxu3 %v525_v12  ;;  %v524_v25 = vpack.c.bf16 %v299_v22, %v298_v20  ;;  %v264_v26 = vld [vmem:[%s2519_s1 + $0xd0] sm:$0xff]  ;;  %v265_v27 = vld [vmem:[%s2519_s1 + $0xd8] sm:$0xff]  ;;  %v499_v29 = vpack.c.bf16 %v249_v24, %v248_v23  ;;  %v246_v35 = vld [vmem:[%s2519_s1 + $0x40] sm:$0xff] }
   0x8   :  { %v280_v28 = vld [vmem:[%s2519_s1 + $0x150] sm:$0xff]  ;;  %627 = vmatpush.bf16.msra.mxu0 %v500_v16  ;;  %v281_v30 = vld [vmem:[%s2519_s1 + $0x158] sm:$0xff]  ;;  %v507_v33 = vpack.c.bf16 %v265_v27, %v264_v26  ;;  %v247_v36 = vld [vmem:[%s2519_s1 + $0x48] sm:$0xff] }
   0x9   :  { %v296_v31 = vld [vmem:[%s2519_s1 + $0x1d0] sm:$0xff]  ;;  %v297_v32 = vld [vmem:[%s2519_s1 + $0x1d8] sm:$0xff]  ;;  %660 = vmatpush.bf16.msra.mxu1 %v508_v17  ;;  %v515_v34 = vpack.c.bf16 %v281_v30, %v280_v28  ;;  %v262_v37 = vld [vmem:[%s2519_s1 + $0xc0] sm:$0xff]  ;;  %v498_v44 = vpack.c.bf16 %v247_v36, %v246_v35 }
   0xa   :  { %693 = vmatpush.bf16.msra.mxu2 %v516_v21  ;;  %v523_v38 = vpack.c.bf16 %v297_v32, %v296_v31  ;;  %v263_v39 = vld [vmem:[%s2519_s1 + $0xc8] sm:$0xff]  ;;  %v278_v40 = vld [vmem:[%s2519_s1 + $0x140] sm:$0xff]  ;;  %v244_v47 = vld [vmem:[%s2519_s1 + $0x30] sm:$0xff] }
   0xb   :  { %726 = vmatpush.bf16.msra.mxu3 %v524_v25  ;;  %v279_v41 = vld [vmem:[%s2519_s1 + $0x148] sm:$0xff]  ;;  %v294_v42 = vld [vmem:[%s2519_s1 + $0x1c0] sm:$0xff]  ;;  %v506_v45 = vpack.c.bf16 %v263_v39, %v262_v37  ;;  %v245_v48 = vld [vmem:[%s2519_s1 + $0x38] sm:$0xff] }
   0xc   :  { %v295_v43 = vld [vmem:[%s2519_s1 + $0x1c8] sm:$0xff]  ;;  %628 = vmatpush.bf16.msra.mxu0 %v499_v29  ;;  %v514_v46 = vpack.c.bf16 %v279_v41, %v278_v40  ;;  %v260_v49 = vld [vmem:[%s2519_s1 + $0xb0] sm:$0xff]  ;;  %v261_v51 = vld [vmem:[%s2519_s1 + $0xb8] sm:$0xff]  ;;  %v497_v56 = vpack.c.bf16 %v245_v48, %v244_v47 }
   0xd   :  { %661 = vmatpush.bf16.msra.mxu1 %v507_v33  ;;  %v522_v50 = vpack.c.bf16 %v295_v43, %v294_v42  ;;  %v276_v52 = vld [vmem:[%s2519_s1 + $0x130] sm:$0xff]  ;;  %v277_v53 = vld [vmem:[%s2519_s1 + $0x138] sm:$0xff]  ;;  %v505_v57 = vpack.c.bf16 %v261_v51, %v260_v49  ;;  %v242_v59 = vld [vmem:[%s2519_s1 + $0x20] sm:$0xff] }
   0xe   :  { %694 = vmatpush.bf16.msra.mxu2 %v515_v34  ;;  %v292_v54 = vld [vmem:[%s2519_s1 + $0x1b0] sm:$0xff]  ;;  %v293_v55 = vld [vmem:[%s2519_s1 + $0x1b8] sm:$0xff]  ;;  %v513_v58 = vpack.c.bf16 %v277_v53, %v276_v52  ;;  %v243_v60 = vld [vmem:[%s2519_s1 + $0x28] sm:$0xff] }
   0xf   :  { %727 = vmatpush.bf16.msra.mxu3 %v523_v38  ;;  %v258_v61 = vld [vmem:[%s2519_s1 + $0xa0] sm:$0xff]  ;;  %v521_v62 = vpack.c.bf16 %v293_v55, %v292_v54  ;;  %v259_v63 = vld [vmem:[%s2519_s1 + $0xa8] sm:$0xff]  ;;  %v496_v4 = vpack.c.bf16 %v243_v60, %v242_v59  ;;  %v240_v7 = vld [vmem:[%s2519_s1 + $0x10] sm:$0xff] }
  0x10   :  { %629 = vmatpush.bf16.msra.mxu0 %v498_v44  ;;  %v274_v0 = vld [vmem:[%s2519_s1 + $0x120] sm:$0xff]  ;;  %v275_v1 = vld [vmem:[%s2519_s1 + $0x128] sm:$0xff]  ;;  %v504_v5 = vpack.c.bf16 %v259_v63, %v258_v61  ;;  %v241_v8 = vld [vmem:[%s2519_s1 + $0x18] sm:$0xff] }
  0x11   :  { %662 = vmatpush.bf16.msra.mxu1 %v506_v45  ;;  %v290_v2 = vld [vmem:[%s2519_s1 + $0x1a0] sm:$0xff]  ;;  %v291_v3 = vld [vmem:[%s2519_s1 + $0x1a8] sm:$0xff]  ;;  %v512_v6 = vpack.c.bf16 %v275_v1, %v274_v0  ;;  %v256_v9 = vld [vmem:[%s2519_s1 + $0x90] sm:$0xff]  ;;  %v495_v17 = vpack.c.bf16 %v241_v8, %v240_v7 }
  0x12   :  { %695 = vmatpush.bf16.msra.mxu2 %v514_v46  ;;  %v520_v10 = vpack.c.bf16 %v291_v3, %v290_v2  ;;  %v257_v11 = vld [vmem:[%s2519_s1 + $0x98] sm:$0xff]  ;;  %v272_v12 = vld [vmem:[%s2519_s1 + $0x110] sm:$0xff]  ;;  %v238_v16 = vld [vmem:[%s2519_s1] sm:$0xff] }
  0x13   :  { %728 = vmatpush.bf16.msra.mxu3 %v522_v50  ;;  %v273_v13 = vld [vmem:[%s2519_s1 + $0x118] sm:$0xff]  ;;  %v288_v14 = vld [vmem:[%s2519_s1 + $0x190] sm:$0xff]  ;;  %v239_v18 = vld [vmem:[%s2519_s1 + $0x8] sm:$0xff]  ;;  %v503_v21 = vpack.c.bf16 %v257_v11, %v256_v9 }
  0x14   :  { %630 = vmatpush.bf16.msra.mxu0 %v497_v56  ;;  %v289_v15 = vld [vmem:[%s2519_s1 + $0x198] sm:$0xff]  ;;  %v254_v19 = vld [vmem:[%s2519_s1 + $0x80] sm:$0xff]  ;;  %v255_v20 = vld [vmem:[%s2519_s1 + $0x88] sm:$0xff]  ;;  %v511_v22 = vpack.c.bf16 %v273_v13, %v272_v12  ;;  %v494_v34 = vpack.c.bf16 %v239_v18, %v238_v16 }
  0x15   :  { %663 = vmatpush.bf16.msra.mxu1 %v505_v57  ;;  %v270_v23 = vld [vmem:[%s2519_s1 + $0x100] sm:$0xff]  ;;  %v271_v24 = vld [vmem:[%s2519_s1 + $0x108] sm:$0xff]  ;;  %v519_v26 = vpack.c.bf16 %v289_v15, %v288_v14  ;;  %v348_v32 = vld [vmem:[%s2519_s1 + $0x370] sm:$0xff]  ;;  %v502_v38 = vpack.c.bf16 %v255_v20, %v254_v19 }
  0x16   :  { %696 = vmatpush.bf16.msra.mxu2 %v513_v58  ;;  %v286_v25 = vld [vmem:[%s2519_s1 + $0x180] sm:$0xff]  ;;  %v287_v27 = vld [vmem:[%s2519_s1 + $0x188] sm:$0xff]  ;;  %v349_v33 = vld [vmem:[%s2519_s1 + $0x378] sm:$0xff]  ;;  %v510_v39 = vpack.c.bf16 %v271_v24, %v270_v23 }
  0x17   :  { %729 = vmatpush.bf16.msra.mxu3 %v521_v62  ;;  %v14_v28 = vld [vmem:[%s2520_s0] sm:$0xff]  ;;  %v15_v30 = vld [vmem:[%s2520_s0 + $0x8] sm:$0xff]  ;;  %v16_v35 = vld [vmem:[%s2520_s0 + $0x10] sm:$0xff]  ;;  %v518_v43 = vpack.c.bf16 %v287_v27, %v286_v25  ;;  %v549_v44 = vpack.c.bf16 %v349_v33, %v348_v32 }
  0x18   :  { %631 = vmatpush.bf16.msra.mxu0 %v496_v4  ;;  %v30_v29 = vld [vmem:[%s2520_s0 + $0x80] sm:$0xff]  ;;  %v31_v31 = vld [vmem:[%s2520_s0 + $0x88] sm:$0xff]  ;;  %v364_v36 = vld [vmem:[%s2519_s1 + $0x3f0] sm:$0xff] }
  0x19   :  { %664 = vmatpush.bf16.msra.mxu1 %v504_v5  ;;  %v365_v37 = vld [vmem:[%s2519_s1 + $0x3f8] sm:$0xff]  ;;  %v32_v40 = vld [vmem:[%s2520_s0 + $0x90] sm:$0xff]  ;;  %v158_v48 = vpack.c.bf16 %v30_v29, %v14_v28  ;;  %v346_v51 = vld [vmem:[%s2519_s1 + $0x360] sm:$0xff]  ;;  %v159_v53 = vpack.c.bf16 %v31_v31, %v15_v30 }
  0x1a   :  { %697 = vmatpush.bf16.msra.mxu2 %v512_v6  ;;  %v17_v41 = vld [vmem:[%s2520_s0 + $0x18] sm:$0xff]  ;;  %v316_v45 = vld [vmem:[%s2519_s1 + $0x270] sm:$0xff]  ;;  %v557_v49 = vpack.c.bf16 %v365_v37, %v364_v36  ;;  %v347_v52 = vld [vmem:[%s2519_s1 + $0x368] sm:$0xff]  ;;  %v160_v54 = vpack.c.bf16 %v32_v40, %v16_v35 }
  0x1b   :  { %730 = vmatpush.bf16.msra.mxu3 %v520_v10  ;;  %v33_v42 = vld [vmem:[%s2520_s0 + $0x98] sm:$0xff]  ;;  %v332_v47 = vld [vmem:[%s2519_s1 + $0x2f0] sm:$0xff]  ;;  %v362_v55 = vld [vmem:[%s2519_s1 + $0x3e0] sm:$0xff]  ;;  %v548_v60 = vpack.c.bf16 %v347_v52, %v346_v51 }
  0x1c   :  { %632 = vmatpush.bf16.msra.mxu0 %v495_v17  ;;  %v317_v46 = vld [vmem:[%s2519_s1 + $0x278] sm:$0xff]  ;;  %v363_v56 = vld [vmem:[%s2519_s1 + $0x3e8] sm:$0xff]  ;;  %v161_v57 = vpack.c.bf16 %v33_v42, %v17_v41  ;;  %v314_v61 = vld [vmem:[%s2519_s1 + $0x260] sm:$0xff] }
  0x1d   :  { %665 = vmatpush.bf16.msra.mxu1 %v503_v21  ;;  %v333_v50 = vld [vmem:[%s2519_s1 + $0x2f8] sm:$0xff]  ;;  %v533_v58 = vpack.c.bf16 %v317_v46, %v316_v45  ;;  %v315_v62 = vld [vmem:[%s2519_s1 + $0x268] sm:$0xff]  ;;  %v330_v63 = vld [vmem:[%s2519_s1 + $0x2e0] sm:$0xff]  ;;  %v556_v0 = vpack.c.bf16 %v363_v56, %v362_v55 }
  0x1e   :  { %698 = vmatpush.bf16.msra.mxu2 %v511_v22  ;;  %v541_v59 = vpack.c.bf16 %v333_v50, %v332_v47  ;;  %v331_v1 = vld [vmem:[%s2519_s1 + $0x2e8] sm:$0xff]  ;;  %v344_v2 = vld [vmem:[%s2519_s1 + $0x350] sm:$0xff]  ;;  %v345_v3 = vld [vmem:[%s2519_s1 + $0x358] sm:$0xff]  ;;  %v532_v6 = vpack.c.bf16 %v315_v62, %v314_v61 }
  0x1f   :  { %731 = vmatpush.bf16.msra.mxu3 %v519_v26  ;;  %v360_v4 = vld [vmem:[%s2519_s1 + $0x3d0] sm:$0xff]  ;;  %v361_v5 = vld [vmem:[%s2519_s1 + $0x3d8] sm:$0xff]  ;;  %v540_v7 = vpack.c.bf16 %v331_v1, %v330_v63  ;;  %v547_v8 = vpack.c.bf16 %v345_v3, %v344_v2  ;;  %v342_v14 = vld [vmem:[%s2519_s1 + $0x340] sm:$0xff] }
  0x20   :  { %633 = vmatpush.bf16.msra.mxu0 %v494_v34  ;;  %v312_v9 = vld [vmem:[%s2519_s1 + $0x250] sm:$0xff]  ;;  %v313_v10 = vld [vmem:[%s2519_s1 + $0x258] sm:$0xff]  ;;  %v555_v12 = vpack.c.bf16 %v361_v5, %v360_v4  ;;  %v343_v15 = vld [vmem:[%s2519_s1 + $0x348] sm:$0xff] }
  0x21   :  { %666 = vmatpush.bf16.msra.mxu1 %v502_v38  ;;  %v328_v11 = vld [vmem:[%s2519_s1 + $0x2d0] sm:$0xff]  ;;  %v329_v13 = vld [vmem:[%s2519_s1 + $0x2d8] sm:$0xff]  ;;  %v358_v16 = vld [vmem:[%s2519_s1 + $0x3c0] sm:$0xff]  ;;  %v531_v18 = vpack.c.bf16 %v313_v10, %v312_v9  ;;  %v546_v22 = vpack.c.bf16 %v343_v15, %v342_v14 }
  0x22   :  { %699 = vmatpush.bf16.msra.mxu2 %v510_v39  ;;  %v359_v17 = vld [vmem:[%s2519_s1 + $0x3c8] sm:$0xff]  ;;  %v46_v19 = vld [vmem:[%s2520_s0 + $0x100] sm:$0xff]  ;;  %v539_v21 = vpack.c.bf16 %v329_v13, %v328_v11  ;;  %v340_v30 = vld [vmem:[%s2519_s1 + $0x330] sm:$0xff] }
  0x23   :  { %732 = vmatpush.bf16.msra.mxu3 %v518_v43  ;;  %634 = vmatmul.bf16.vlgmr.msra.gmra.mxu0 %v158_v48  ;;  %v62_v20 = vld [vmem:[%s2520_s0 + $0x180] sm:$0xff]  ;;  %v311_v24 = vld [vmem:[%s2519_s1 + $0x248] sm:$0xff]  ;;  %v554_v28 = vpack.c.bf16 %v359_v17, %v358_v16  ;;  %v341_v31 = vld [vmem:[%s2519_s1 + $0x338] sm:$0xff] }
  0x24   :  { %667 = vmatmul.bf16.vlgmr.msra.gmra.mxu1 %v159_v53  ;;  %758 = vmatpush.bf16.msrb.mxu0 %v533_v58  ;;  %v310_v23 = vld [vmem:[%s2519_s1 + $0x240] sm:$0xff]  ;;  %v47_v26 = vld [vmem:[%s2520_s0 + $0x108] sm:$0xff]  ;;  %v356_v32 = vld [vmem:[%s2519_s1 + $0x3b0] sm:$0xff]  ;;  %v545_v40 = vpack.c.bf16 %v341_v31, %v340_v30  ;;  %v174_v43 = vpack.c.bf16 %v62_v20, %v46_v19 }
  0x25   :  { %700 = vmatmul.bf16.vlgmr.msra.gmra.mxu2 %v160_v54  ;;  %791 = vmatpush.bf16.msrb.mxu1 %v541_v59  ;;  %v326_v25 = vld [vmem:[%s2519_s1 + $0x2c0] sm:$0xff]  ;;  %v63_v27 = vld [vmem:[%s2520_s0 + $0x188] sm:$0xff]  ;;  %v357_v33 = vld [vmem:[%s2519_s1 + $0x3b8] sm:$0xff]  ;;  %v530_v37 = vpack.c.bf16 %v311_v24, %v310_v23 }
  0x26   :  { %824 = vmatpush.bf16.msrb.mxu2 %v549_v44  ;;  %733 = vmatmul.bf16.vlgmr.msra.gmra.mxu3 %v161_v57  ;;  %v327_v29 = vld [vmem:[%s2519_s1 + $0x2c8] sm:$0xff]  ;;  %v48_v34 = vld [vmem:[%s2520_s0 + $0x110] sm:$0xff]  ;;  %v49_v36 = vld [vmem:[%s2520_s0 + $0x118] sm:$0xff]  ;;  %v553_v44 = vpack.c.bf16 %v357_v33, %v356_v32  ;;  %v175_v47 = vpack.c.bf16 %v63_v27, %v47_v26 }
  0x27   :  { %857 = vmatpush.bf16.msrb.mxu3 %v557_v49  ;;  %v64_v35 = vld [vmem:[%s2520_s0 + $0x190] sm:$0xff]  ;;  %v65_v38 = vld [vmem:[%s2520_s0 + $0x198] sm:$0xff]  ;;  %v538_v39 = vpack.c.bf16 %v327_v29, %v326_v25  ;;  %v338_v52 = vld [vmem:[%s2519_s1 + $0x320] sm:$0xff] }
  0x28   :  { %759 = vmatpush.bf16.msrb.mxu0 %v532_v6  ;;  %v308_v41 = vld [vmem:[%s2519_s1 + $0x230] sm:$0xff]  ;;  %v309_v42 = vld [vmem:[%s2519_s1 + $0x238] sm:$0xff]  ;;  %v176_v48 = vpack.c.bf16 %v64_v35, %v48_v34  ;;  %v177_v49 = vpack.c.bf16 %v65_v38, %v49_v36  ;;  %v339_v53 = vld [vmem:[%s2519_s1 + $0x328] sm:$0xff] }
  0x29   :  { %792 = vmatpush.bf16.msrb.mxu1 %v540_v7  ;;  %v324_v45 = vld [vmem:[%s2519_s1 + $0x2b0] sm:$0xff]  ;;  %v325_v46 = vld [vmem:[%s2519_s1 + $0x2b8] sm:$0xff]  ;;  %v529_v50 = vpack.c.bf16 %v309_v42, %v308_v41  ;;  %v354_v54 = vld [vmem:[%s2519_s1 + $0x3a0] sm:$0xff]  ;;  %v544_v55 = vpack.c.bf16 %v339_v53, %v338_v52 }
  0x2a   :  { %825 = vmatpush.bf16.msrb.mxu2 %v548_v60  ;;  %v537_v51 = vpack.c.bf16 %v325_v46, %v324_v45  ;;  %v355_v56 = vld [vmem:[%s2519_s1 + $0x3a8] sm:$0xff]  ;;  %v306_v57 = vld [vmem:[%s2519_s1 + $0x220] sm:$0xff]  ;;  %v336_v63 = vld [vmem:[%s2519_s1 + $0x310] sm:$0xff] }
  0x2b   :  { %858 = vmatpush.bf16.msrb.mxu3 %v556_v0  ;;  %v307_v58 = vld [vmem:[%s2519_s1 + $0x228] sm:$0xff]  ;;  %v552_v59 = vpack.c.bf16 %v355_v56, %v354_v54  ;;  %v322_v61 = vld [vmem:[%s2519_s1 + $0x2a0] sm:$0xff]  ;;  %v337_v1 = vld [vmem:[%s2519_s1 + $0x318] sm:$0xff] }
  0x2c   :  { %760 = vmatpush.bf16.msrb.mxu0 %v531_v18  ;;  %v528_v60 = vpack.c.bf16 %v307_v58, %v306_v57  ;;  %v323_v62 = vld [vmem:[%s2519_s1 + $0x2a8] sm:$0xff]  ;;  %v352_v2 = vld [vmem:[%s2519_s1 + $0x390] sm:$0xff]  ;;  %v353_v3 = vld [vmem:[%s2519_s1 + $0x398] sm:$0xff]  ;;  %v543_v4 = vpack.c.bf16 %v337_v1, %v336_v63 }
  0x2d   :  { %793 = vmatpush.bf16.msrb.mxu1 %v539_v21  ;;  %v536_v0 = vpack.c.bf16 %v323_v62, %v322_v61  ;;  %v551_v5 = vpack.c.bf16 %v353_v3, %v352_v2  ;;  %v304_v6 = vld [vmem:[%s2519_s1 + $0x210] sm:$0xff]  ;;  %v305_v7 = vld [vmem:[%s2519_s1 + $0x218] sm:$0xff]  ;;  %v78_v9 = vld [vmem:[%s2520_s0 + $0x200] sm:$0xff] }
  0x2e   :  { %826 = vmatpush.bf16.msrb.mxu2 %v547_v8  ;;  %v527_v8 = vpack.c.bf16 %v305_v7, %v304_v6  ;;  %v94_v10 = vld [vmem:[%s2520_s0 + $0x280] sm:$0xff]  ;;  %v79_v11 = vld [vmem:[%s2520_s0 + $0x208] sm:$0xff]  ;;  %v80_v13 = vld [vmem:[%s2520_s0 + $0x210] sm:$0xff] }
  0x2f   :  { %859 = vmatpush.bf16.msrb.mxu3 %v555_v12  ;;  %v95_v12 = vld [vmem:[%s2520_s0 + $0x288] sm:$0xff]  ;;  %v96_v14 = vld [vmem:[%s2520_s0 + $0x290] sm:$0xff]  ;;  %v81_v15 = vld [vmem:[%s2520_s0 + $0x218] sm:$0xff]  ;;  %v190_v17 = vpack.c.bf16 %v94_v10, %v78_v9 }
  0x30   :  { %761 = vmatpush.bf16.msrb.mxu0 %v530_v37  ;;  %v97_v16 = vld [vmem:[%s2520_s0 + $0x298] sm:$0xff]  ;;  %v191_v18 = vpack.c.bf16 %v95_v12, %v79_v11  ;;  %v192_v19 = vpack.c.bf16 %v96_v14, %v80_v13  ;;  %v320_v21 = vld [vmem:[%s2519_s1 + $0x290] sm:$0xff]  ;;  %v334_v23 = vld [vmem:[%s2519_s1 + $0x300] sm:$0xff] }
  0x31   :  { %794 = vmatpush.bf16.msrb.mxu1 %v538_v39  ;;  %v193_v20 = vpack.c.bf16 %v97_v16, %v81_v15  ;;  %v335_v25 = vld [vmem:[%s2519_s1 + $0x308] sm:$0xff]  ;;  %v350_v26 = vld [vmem:[%s2519_s1 + $0x380] sm:$0xff]  ;;  %v128_v41 = vld [vmem:[%s2520_s0 + $0x390] sm:$0xff] }
  0x32   :  { %827 = vmatpush.bf16.msrb.mxu2 %v546_v22  ;;  %v321_v22 = vld [vmem:[%s2519_s1 + $0x298] sm:$0xff]  ;;  %v351_v27 = vld [vmem:[%s2519_s1 + $0x388] sm:$0xff]  ;;  %v302_v30 = vld [vmem:[%s2519_s1 + $0x200] sm:$0xff] }
  0x33   :  { %860 = vmatpush.bf16.msrb.mxu3 %v554_v28  ;;  %639 = vmatmul.bf16.gmra.mxu0 %v174_v43  ;;  %v535_v24 = vpack.c.bf16 %v321_v22, %v320_v21  ;;  %v542_v28 = vpack.c.bf16 %v335_v25, %v334_v23  ;;  %v550_v29 = vpack.c.bf16 %v351_v27, %v350_v26  ;;  %v303_v31 = vld [vmem:[%s2519_s1 + $0x208] sm:$0xff]  ;;  %v318_v32 = vld [vmem:[%s2519_s1 + $0x280] sm:$0xff]  ;;  %v113_v42 = vld [vmem:[%s2520_s0 + $0x318] sm:$0xff] }
  0x34   :  { %672 = vmatmul.bf16.gmra.mxu1 %v175_v47  ;;  %762 = vmatpush.bf16.msrb.mxu0 %v529_v50  ;;  %v526_v33 = vpack.c.bf16 %v303_v31, %v302_v30  ;;  %v319_v34 = vld [vmem:[%s2519_s1 + $0x288] sm:$0xff]  ;;  %v110_v36 = vld [vmem:[%s2520_s0 + $0x300] sm:$0xff]  ;;  %v129_v43 = vld [vmem:[%s2520_s0 + $0x398] sm:$0xff] }
  0x35   :  { %705 = vmatmul.bf16.gmra.mxu2 %v176_v48  ;;  %795 = vmatpush.bf16.msrb.mxu1 %v537_v51  ;;  %v534_v35 = vpack.c.bf16 %v319_v34, %v318_v32  ;;  %v126_v37 = vld [vmem:[%s2520_s0 + $0x380] sm:$0xff]  ;;  %v111_v38 = vld [vmem:[%s2520_s0 + $0x308] sm:$0xff]  ;;  %v209_v47 = vpack.c.bf16 %v129_v43, %v113_v42  ;;  %v412_v48 = vld [vmem:[%s2519_s1 + $0x570] sm:$0xff] }
  0x36   :  { %828 = vmatpush.bf16.msrb.mxu2 %v545_v40  ;;  %738 = vmatmul.bf16.gmra.mxu3 %v177_v49  ;;  %v127_v39 = vld [vmem:[%s2520_s0 + $0x388] sm:$0xff]  ;;  %v112_v40 = vld [vmem:[%s2520_s0 + $0x310] sm:$0xff]  ;;  %v413_v49 = vld [vmem:[%s2519_s1 + $0x578] sm:$0xff] }
  0x37   :  { %861 = vmatpush.bf16.msrb.mxu3 %v553_v44  ;;  %v206_v44 = vpack.c.bf16 %v126_v37, %v110_v36  ;;  %v207_v45 = vpack.c.bf16 %v127_v39, %v111_v38  ;;  %v208_v46 = vpack.c.bf16 %v128_v41, %v112_v40  ;;  %v428_v50 = vld [vmem:[%s2519_s1 + $0x5f0] sm:$0xff]  ;;  %v581_v51 = vpack.c.bf16 %v413_v49, %v412_v48  ;;  %v429_v52 = vld [vmem:[%s2519_s1 + $0x5f8] sm:$0xff]  ;;  %v411_v61 = vld [vmem:[%s2519_s1 + $0x568] sm:$0xff] }
  0x38   :  { %763 = vmatpush.bf16.msrb.mxu0 %v528_v60  ;;  %v380_v53 = vld [vmem:[%s2519_s1 + $0x470] sm:$0xff]  ;;  %v381_v54 = vld [vmem:[%s2519_s1 + $0x478] sm:$0xff]  ;;  %v426_v62 = vld [vmem:[%s2519_s1 + $0x5e0] sm:$0xff] }
  0x39   :  { %796 = vmatpush.bf16.msrb.mxu1 %v536_v0  ;;  %v565_v56 = vpack.c.bf16 %v381_v54, %v380_v53  ;;  %v396_v57 = vld [vmem:[%s2519_s1 + $0x4f0] sm:$0xff]  ;;  %v397_v58 = vld [vmem:[%s2519_s1 + $0x4f8] sm:$0xff]  ;;  %v427_v63 = vld [vmem:[%s2519_s1 + $0x5e8] sm:$0xff] }
  0x3a   :  { %829 = vmatpush.bf16.msrb.mxu2 %v544_v55  ;;  %v589_v55 = vpack.c.bf16 %v429_v52, %v428_v50  ;;  %v573_v60 = vpack.c.bf16 %v397_v58, %v396_v57  ;;  %v588_v1 = vpack.c.bf16 %v427_v63, %v426_v62  ;;  %v378_v2 = vld [vmem:[%s2519_s1 + $0x460] sm:$0xff]  ;;  %v379_v3 = vld [vmem:[%s2519_s1 + $0x468] sm:$0xff]  ;;  %v144_v10 = vld [vmem:[%s2520_s0 + $0x410] sm:$0xff] }
  0x3b   :  { %862 = vmatpush.bf16.msrb.mxu3 %v552_v59  ;;  %v410_v59 = vld [vmem:[%s2519_s1 + $0x560] sm:$0xff]  ;;  %v395_v6 = vld [vmem:[%s2519_s1 + $0x4e8] sm:$0xff]  ;;  %v145_v11 = vld [vmem:[%s2520_s0 + $0x418] sm:$0xff]  ;;  %v224_v14 = vpack.c.bf16 %v144_v10, %v144_v10 }
  0x3c   :  { %764 = vmatpush.bf16.msrb.mxu0 %v527_v8  ;;  %v580_v0 = vpack.c.bf16 %v411_v61, %v410_v59  ;;  %v142_v8 = vld [vmem:[%s2520_s0 + $0x400] sm:$0xff]  ;;  %v143_v9 = vld [vmem:[%s2520_s0 + $0x408] sm:$0xff]  ;;  %v225_v15 = vpack.c.bf16 %v145_v11, %v145_v11  ;;  %v408_v16 = vld [vmem:[%s2519_s1 + $0x550] sm:$0xff] }
  0x3d   :  { %797 = vmatpush.bf16.msrb.mxu1 %v535_v24  ;;  %v222_v12 = vpack.c.bf16 %v142_v8, %v142_v8  ;;  %v223_v13 = vpack.c.bf16 %v143_v9, %v143_v9  ;;  %v376_v21 = vld [vmem:[%s2519_s1 + $0x450] sm:$0xff]  ;;  %v377_v22 = vld [vmem:[%s2519_s1 + $0x458] sm:$0xff]  ;;  %v406_v27 = vld [vmem:[%s2519_s1 + $0x540] sm:$0xff] }
  0x3e   :  { %830 = vmatpush.bf16.msrb.mxu2 %v543_v4  ;;  %v394_v4 = vld [vmem:[%s2519_s1 + $0x4e0] sm:$0xff]  ;;  %v563_v24 = vpack.c.bf16 %v377_v22, %v376_v21  ;;  %v392_v25 = vld [vmem:[%s2519_s1 + $0x4d0] sm:$0xff]  ;;  %v393_v26 = vld [vmem:[%s2519_s1 + $0x4d8] sm:$0xff] }
  0x3f   :  { %863 = vmatpush.bf16.msrb.mxu3 %v551_v5  ;;  %v564_v5 = vpack.c.bf16 %v379_v3, %v378_v2  ;;  %v572_v7 = vpack.c.bf16 %v395_v6, %v394_v4  ;;  %v422_v30 = vld [vmem:[%s2519_s1 + $0x5c0] sm:$0xff]  ;;  %v423_v31 = vld [vmem:[%s2519_s1 + $0x5c8] sm:$0xff]  ;;  %v20_v38 = vld [vmem:[%s2520_s0 + $0x30] sm:$0xff] }
  0x40   :  { %765 = vmatpush.bf16.msrb.mxu0 %v526_v33  ;;  %v586_v33 = vpack.c.bf16 %v423_v31, %v422_v30  ;;  %v18_v34 = vld [vmem:[%s2520_s0 + $0x20] sm:$0xff]  ;;  %v19_v36 = vld [vmem:[%s2520_s0 + $0x28] sm:$0xff]  ;;  %v36_v39 = vld [vmem:[%s2520_s0 + $0xb0] sm:$0xff] }
  0x41   :  { %798 = vmatpush.bf16.msrb.mxu1 %v534_v35  ;;  %v34_v35 = vld [vmem:[%s2520_s0 + $0xa0] sm:$0xff]  ;;  %v35_v37 = vld [vmem:[%s2520_s0 + $0xa8] sm:$0xff]  ;;  %v21_v40 = vld [vmem:[%s2520_s0 + $0x38] sm:$0xff] }
  0x42   :  { %831 = vmatpush.bf16.msrb.mxu2 %v542_v28  ;;  %v571_v28 = vpack.c.bf16 %v393_v26, %v392_v25  ;;  %v37_v41 = vld [vmem:[%s2520_s0 + $0xb8] sm:$0xff]  ;;  %v162_v42 = vpack.c.bf16 %v34_v35, %v18_v34  ;;  %v163_v43 = vpack.c.bf16 %v35_v37, %v19_v36  ;;  %v390_v48 = vld [vmem:[%s2519_s1 + $0x4c0] sm:$0xff]  ;;  %v391_v50 = vld [vmem:[%s2519_s1 + $0x4c8] sm:$0xff] }
  0x43   :  { %644 = vmatmul.bf16.gmra.mxu0 %v190_v17  ;;  %864 = vmatpush.bf16.msrb.mxu3 %v550_v29  ;;  %v409_v17 = vld [vmem:[%s2519_s1 + $0x558] sm:$0xff]  ;;  %v407_v29 = vld [vmem:[%s2519_s1 + $0x548] sm:$0xff]  ;;  %v570_v53 = vpack.c.bf16 %v391_v50, %v390_v48  ;;  %v372_v57 = vld [vmem:[%s2519_s1 + $0x430] sm:$0xff] }
  0x44   :  { %677 = vmatmul.bf16.gmra.mxu1 %v191_v18  ;;  %890 = vmatpush.bf16.msra.mxu0 %v565_v56  ;;  %v424_v18 = vld [vmem:[%s2519_s1 + $0x5d0] sm:$0xff]  ;;  %v578_v32 = vpack.c.bf16 %v407_v29, %v406_v27  ;;  %v405_v52 = vld [vmem:[%s2519_s1 + $0x538] sm:$0xff]  ;;  %v50_v61 = vld [vmem:[%s2520_s0 + $0x120] sm:$0xff] }
  0x45   :  { %710 = vmatmul.bf16.gmra.mxu2 %v192_v19  ;;  %923 = vmatpush.bf16.msra.mxu1 %v573_v60  ;;  %v579_v19 = vpack.c.bf16 %v409_v17, %v408_v16  ;;  %v421_v56 = vld [vmem:[%s2519_s1 + $0x5b8] sm:$0xff]  ;;  %v66_v62 = vld [vmem:[%s2520_s0 + $0x1a0] sm:$0xff]  ;;  %v51_v63 = vld [vmem:[%s2520_s0 + $0x128] sm:$0xff] }
  0x46   :  { %743 = vmatmul.bf16.gmra.mxu3 %v193_v20  ;;  %956 = vmatpush.bf16.msra.mxu2 %v581_v51  ;;  %v425_v20 = vld [vmem:[%s2519_s1 + $0x5d8] sm:$0xff]  ;;  %v404_v51 = vld [vmem:[%s2519_s1 + $0x530] sm:$0xff]  ;;  %v419_v16 = vld [vmem:[%s2519_s1 + $0x5a8] sm:$0xff] }
  0x47   :  { %989 = vmatpush.bf16.msra.mxu3 %v589_v55  ;;  %v587_v23 = vpack.c.bf16 %v425_v20, %v424_v18  ;;  %v577_v54 = vpack.c.bf16 %v405_v52, %v404_v51  ;;  %v420_v55 = vld [vmem:[%s2519_s1 + $0x5b0] sm:$0xff]  ;;  %v373_v59 = vld [vmem:[%s2519_s1 + $0x438] sm:$0xff]  ;;  %v82_v18 = vld [vmem:[%s2520_s0 + $0x220] sm:$0xff] }
  0x48   :  { %891 = vmatpush.bf16.msra.mxu0 %v564_v5  ;;  %v585_v58 = vpack.c.bf16 %v421_v56, %v420_v55  ;;  %v561_v60 = vpack.c.bf16 %v373_v59, %v372_v57  ;;  %v68_v2 = vld [vmem:[%s2520_s0 + $0x1b0] sm:$0xff]  ;;  %v53_v3 = vld [vmem:[%s2520_s0 + $0x138] sm:$0xff]  ;;  %v178_v5 = vpack.c.bf16 %v66_v62, %v50_v61  ;;  %v371_v20 = vld [vmem:[%s2519_s1 + $0x428] sm:$0xff] }
  0x49   :  { %924 = vmatpush.bf16.msra.mxu1 %v572_v7  ;;  %v69_v4 = vld [vmem:[%s2520_s0 + $0x1b8] sm:$0xff]  ;;  %v388_v9 = vld [vmem:[%s2519_s1 + $0x4b0] sm:$0xff]  ;;  %v386_v21 = vld [vmem:[%s2519_s1 + $0x4a0] sm:$0xff] }
  0x4a   :  { %957 = vmatpush.bf16.msra.mxu2 %v580_v0  ;;  %v67_v0 = vld [vmem:[%s2520_s0 + $0x1a8] sm:$0xff]  ;;  %v181_v8 = vpack.c.bf16 %v69_v4, %v53_v3  ;;  %v389_v10 = vld [vmem:[%s2519_s1 + $0x4b8] sm:$0xff]  ;;  %v98_v22 = vld [vmem:[%s2520_s0 + $0x2a0] sm:$0xff] }
  0x4b   :  { %990 = vmatpush.bf16.msra.mxu3 %v588_v1  ;;  %v52_v1 = vld [vmem:[%s2520_s0 + $0x130] sm:$0xff]  ;;  %v179_v6 = vpack.c.bf16 %v67_v0, %v51_v63  ;;  %v569_v11 = vpack.c.bf16 %v389_v10, %v388_v9  ;;  %v387_v25 = vld [vmem:[%s2519_s1 + $0x4a8] sm:$0xff]  ;;  %v85_v30 = vld [vmem:[%s2520_s0 + $0x238] sm:$0xff] }
  0x4c   :  { %892 = vmatpush.bf16.msra.mxu0 %v563_v24  ;;  %v180_v7 = vpack.c.bf16 %v68_v2, %v52_v1  ;;  %v99_v26 = vld [vmem:[%s2520_s0 + $0x2a8] sm:$0xff]  ;;  %v84_v27 = vld [vmem:[%s2520_s0 + $0x230] sm:$0xff]  ;;  %v568_v29 = vpack.c.bf16 %v387_v25, %v386_v21  ;;  %v101_v31 = vld [vmem:[%s2520_s0 + $0x2b8] sm:$0xff] }
  0x4d   :  { %925 = vmatpush.bf16.msra.mxu1 %v571_v28  ;;  %v100_v28 = vld [vmem:[%s2520_s0 + $0x2b0] sm:$0xff]  ;;  %v197_v35 = vpack.c.bf16 %v101_v31, %v85_v30  ;;  %v401_v37 = vld [vmem:[%s2519_s1 + $0x518] sm:$0xff]  ;;  %v114_v48 = vld [vmem:[%s2520_s0 + $0x320] sm:$0xff] }
  0x4e   :  { %958 = vmatpush.bf16.msra.mxu2 %v579_v19  ;;  %v370_v19 = vld [vmem:[%s2519_s1 + $0x420] sm:$0xff]  ;;  %v196_v34 = vpack.c.bf16 %v100_v28, %v84_v27  ;;  %v400_v36 = vld [vmem:[%s2519_s1 + $0x510] sm:$0xff]  ;;  %v115_v51 = vld [vmem:[%s2520_s0 + $0x328] sm:$0xff] }
  0x4f   :  { %991 = vmatpush.bf16.msra.mxu3 %v587_v23  ;;  %v83_v23 = vld [vmem:[%s2520_s0 + $0x228] sm:$0xff]  ;;  %v560_v24 = vpack.c.bf16 %v371_v20, %v370_v19  ;;  %v1938_v50 = vld [vmem:[%s2521_s2] ss:$0 sm:$0xff]  ;;  %v132_v61 = vld [vmem:[%s2520_s0 + $0x3b0] sm:$0xff] }
  0x50   :  { %v398_v52 = vld [vmem:[%s2519_s1 + $0x500] sm:$0xff]  ;;  %v415_v56 = vld [vmem:[%s2519_s1 + $0x588] sm:$0xff]  ;;  %v117_v0 = vld [vmem:[%s2520_s0 + $0x338] sm:$0xff] }
  0x51   :  { %926 = vmatpush.bf16.msra.mxu1 %v570_v53  ;;  %v399_v53 = vld [vmem:[%s2519_s1 + $0x508] sm:$0xff]  ;;  %v366_v57 = vld [vmem:[%s2519_s1 + $0x400] sm:$0xff]  ;;  %v133_v1 = vld [vmem:[%s2520_s0 + $0x3b8] sm:$0xff] }
  0x52   :  { %959 = vmatpush.bf16.msra.mxu2 %v578_v32  ;;  %v194_v32 = vpack.c.bf16 %v98_v22, %v82_v18  ;;  %v574_v55 = vpack.c.bf16 %v399_v53, %v398_v52  ;;  %v131_v59 = vld [vmem:[%s2520_s0 + $0x3a8] sm:$0xff]  ;;  %v382_v3 = vld [vmem:[%s2519_s1 + $0x480] sm:$0xff]  ;;  %v444_v27 = vld [vmem:[%s2519_s1 + $0x670] sm:$0xff] }
  0x53   :  { %649 = vmatmul.bf16.gmra.mxu0 %v206_v44  ;;  %992 = vmatpush.bf16.msra.mxu3 %v586_v33  ;;  %v164_v44 = vpack.c.bf16 %v36_v39, %v20_v38  ;;  %v195_v33 = vpack.c.bf16 %v99_v26, %v83_v23  ;;  %v416_v38 = vld [vmem:[%s2519_s1 + $0x590] sm:$0xff]  ;;  %v575_v39 = vpack.c.bf16 %v401_v37, %v400_v36  ;;  %v383_v4 = vld [vmem:[%s2519_s1 + $0x488] sm:$0xff]  ;;  %v146_v26 = vld [vmem:[%s2520_s0 + $0x420] sm:$0xff] }
  0x54   :  { %682 = vmatmul.bf16.gmra.mxu1 %v207_v45  ;;  %v165_v45 = vpack.c.bf16 %v37_v41, %v21_v40  ;;  %v417_v40 = vld [vmem:[%s2519_s1 + $0x598] sm:$0xff]  ;;  %v368_v41 = vld [vmem:[%s2519_s1 + $0x410] sm:$0xff]  ;;  %v490_v36 = vld [vmem:[%s2519_s1 + $0x7e0] sm:$0xff] }
  0x55   :  { %715 = vmatmul.bf16.gmra.mxu2 %v208_v46  ;;  %v374_v46 = vld [vmem:[%s2519_s1 + $0x440] sm:$0xff]  ;;  %927 = vmatpush.bf16.msra.mxu1 %v569_v11  ;;  %v213_v11 = vpack.c.bf16 %v133_v1, %v117_v0  ;;  %v445_v28 = vld [vmem:[%s2519_s1 + $0x678] sm:$0xff]  ;;  %v460_v31 = vld [vmem:[%s2519_s1 + $0x6f0] sm:$0xff] }
  0x56   :  { %748 = vmatmul.bf16.gmra.mxu3 %v209_v47  ;;  %v375_v47 = vld [vmem:[%s2519_s1 + $0x448] sm:$0xff]  ;;  %960 = vmatpush.bf16.msra.mxu2 %v577_v54  ;;  %v414_v54 = vld [vmem:[%s2519_s1 + $0x580] sm:$0xff]  ;;  %v597_v30 = vpack.c.bf16 %v445_v28, %v444_v27 }
  0x57   :  { %v562_v49 = vpack.c.bf16 %v375_v47, %v374_v46  ;;  %993 = vmatpush.bf16.msra.mxu3 %v585_v58  ;;  %v385_v46 = vld [vmem:[%s2519_s1 + $0x498] sm:$0xff]  ;;  %v367_v58 = vld [vmem:[%s2519_s1 + $0x408] sm:$0xff]  ;;  %v582_v62 = vpack.c.bf16 %v415_v56, %v414_v54  ;;  %v442_v56 = vld [vmem:[%s2519_s1 + $0x660] sm:$0xff] }
  0x58   :  { %v558_v63 = vpack.c.bf16 %v367_v58, %v366_v57  ;;  %v491_v37 = vld [vmem:[%s2519_s1 + $0x7e8] sm:$0xff]  ;;  %v458_v58 = vld [vmem:[%s2519_s1 + $0x6e0] sm:$0xff] }
  0x59   :  { %893 = vmatpush.bf16.msra.mxu0 %v562_v49  ;;  %928 = vmatpush.bf16.msra.mxu1 %v568_v29  ;;  %v130_v49 = vld [vmem:[%s2520_s0 + $0x3a0] sm:$0xff]  ;;  %v443_v57 = vld [vmem:[%s2519_s1 + $0x668] sm:$0xff] }
  0x5a   :  { %v210_v2 = vpack.c.bf16 %v130_v49, %v114_v48 }
  0x5d   :  { %894 = vmatpush.bf16.msra.mxu0 %v561_v60  ;;  %v116_v60 = vld [vmem:[%s2520_s0 + $0x330] sm:$0xff] }
  0x61   :  { %895 = vmatpush.bf16.msra.mxu0 %v560_v24 }
  0x63   :  { %654 = vmatmul.bf16.gmra.mxu0 %v222_v12  ;;  %v402_v12 = vld [vmem:[%s2519_s1 + $0x520] sm:$0xff] }
  0x64   :  { %687 = vmatmul.bf16.gmra.mxu1 %v223_v13  ;;  %v403_v13 = vld [vmem:[%s2519_s1 + $0x528] sm:$0xff] }
  0x65   :  { %720 = vmatmul.bf16.gmra.mxu2 %v224_v14  ;;  %v576_v14 = vpack.c.bf16 %v403_v13, %v402_v12  ;;  %v476_v13 = vld [vmem:[%s2519_s1 + $0x770] sm:$0xff] }
  0x66   :  { %753 = vmatmul.bf16.gmra.mxu3 %v225_v15  ;;  %v418_v15 = vld [vmem:[%s2519_s1 + $0x5a0] sm:$0xff] }
  0x67   :  { %v584_v17 = vpack.c.bf16 %v419_v16, %v418_v15  ;;  %961 = vmatpush.bf16.msra.mxu2 %v576_v14  ;;  %v477_v14 = vld [vmem:[%s2519_s1 + $0x778] sm:$0xff]  ;;  %v492_v15 = vld [vmem:[%s2519_s1 + $0x7f0] sm:$0xff] }
  0x68   :  { %v613_v16 = vpack.c.bf16 %v477_v14, %v476_v13  ;;  %v440_v13 = vld [vmem:[%s2519_s1 + $0x650] sm:$0xff]  ;;  %v441_v14 = vld [vmem:[%s2519_s1 + $0x658] sm:$0xff] }
  0x69   :  { %994 = vmatpush.bf16.msra.mxu3 %v584_v17  ;;  %v493_v17 = vld [vmem:[%s2519_s1 + $0x7f8] sm:$0xff] }
  0x6a   :  { %v621_v19 = vpack.c.bf16 %v493_v17, %v492_v15  ;;  %v23_v15 = vld [vmem:[%s2520_s0 + $0x48] sm:$0xff]  ;;  %v595_v17 = vpack.c.bf16 %v441_v14, %v440_v13 }
  0x6b   :  { %962 = vmatpush.bf16.msra.mxu2 %v575_v39  ;;  %v148_v39 = vld [vmem:[%s2520_s0 + $0x430] sm:$0xff] }
  0x6c   :  { %v228_v49 = vpack.c.bf16 %v148_v39, %v148_v39  ;;  %v470_v39 = vld [vmem:[%s2519_s1 + $0x740] sm:$0xff] }
  0x6f   :  { %963 = vmatpush.bf16.msra.mxu2 %v574_v55 }
  0x73   :  { %766 = vmatmul.bf16.vlgmr.msrb.gmra.mxu0 %v162_v42  ;;  %v369_v42 = vld [vmem:[%s2519_s1 + $0x418] sm:$0xff] }
  0x74   :  { %799 = vmatmul.bf16.vlgmr.msrb.gmra.mxu1 %v163_v43  ;;  %v583_v43 = vpack.c.bf16 %v417_v40, %v416_v38  ;;  %v147_v38 = vld [vmem:[%s2520_s0 + $0x428] sm:$0xff] }
  0x75   :  { %832 = vmatmul.bf16.vlgmr.msrb.gmra.mxu2 %v164_v44  ;;  %v559_v44 = vpack.c.bf16 %v369_v42, %v368_v41  ;;  %v620_v41 = vpack.c.bf16 %v491_v37, %v490_v36  ;;  %v149_v42 = vld [vmem:[%s2520_s0 + $0x438] sm:$0xff]  ;;  %v227_v48 = vpack.c.bf16 %v147_v38, %v147_v38 }
  0x76   :  { %865 = vmatmul.bf16.vlgmr.msrb.gmra.mxu3 %v165_v45  ;;  %v384_v45 = vld [vmem:[%s2519_s1 + $0x490] sm:$0xff]  ;;  %1088 = vmatpush.bf16.msrb.mxu2 %v613_v16  ;;  %v229_v53 = vpack.c.bf16 %v149_v42, %v149_v42 }
  0x77   :  { %995 = vmatpush.bf16.msra.mxu3 %v583_v43  ;;  %896 = vmatpush.bf16.msra.mxu0 %v559_v44  ;;  %v567_v47 = vpack.c.bf16 %v385_v46, %v384_v45  ;;  %v226_v44 = vpack.c.bf16 %v146_v26, %v146_v26  ;;  %v41_v26 = vld [vmem:[%s2520_s0 + $0xd8] sm:$0xff] }
  0x79   :  { %929 = vmatpush.bf16.msra.mxu1 %v567_v47 }
  0x7b   :  { %996 = vmatpush.bf16.msra.mxu3 %v582_v62  ;;  %897 = vmatpush.bf16.msra.mxu0 %v558_v63 }
  0x7f   :  { %1121 = vmatpush.bf16.msrb.mxu3 %v621_v19  ;;  %1022 = vmatpush.bf16.msrb.mxu0 %v597_v30  ;;  %v457_v19 = vld [vmem:[%s2519_s1 + $0x6d8] sm:$0xff] }
  0x83   :  { %771 = vmatmul.bf16.gmra.mxu0 %v178_v5  ;;  %1122 = vmatpush.bf16.msrb.mxu3 %v620_v41  ;;  %v486_v41 = vld [vmem:[%s2519_s1 + $0x7c0] sm:$0xff] }
  0x84   :  { %804 = vmatmul.bf16.gmra.mxu1 %v179_v6  ;;  %v211_v6 = vpack.c.bf16 %v131_v59, %v115_v51  ;;  %v596_v59 = vpack.c.bf16 %v443_v57, %v442_v56  ;;  %v454_v57 = vld [vmem:[%s2519_s1 + $0x6c0] sm:$0xff] }
  0x85   :  { %837 = vmatmul.bf16.gmra.mxu2 %v180_v7  ;;  %v212_v7 = vpack.c.bf16 %v132_v61, %v116_v60  ;;  %v459_v60 = vld [vmem:[%s2519_s1 + $0x6e8] sm:$0xff] }
  0x86   :  { %870 = vmatmul.bf16.gmra.mxu3 %v181_v8  ;;  %v566_v8 = vpack.c.bf16 %v383_v4, %v382_v3  ;;  %v604_v61 = vpack.c.bf16 %v459_v60, %v458_v58  ;;  %1023 = vmatpush.bf16.msrb.mxu0 %v596_v59  ;;  %v455_v58 = vld [vmem:[%s2519_s1 + $0x6c8] sm:$0xff]  ;;  %v468_v59 = vld [vmem:[%s2519_s1 + $0x730] sm:$0xff] }
  0x88   :  { %930 = vmatpush.bf16.msra.mxu1 %v566_v8  ;;  %v473_v8 = vld [vmem:[%s2519_s1 + $0x758] sm:$0xff] }
  0x8a   :  { %1024 = vmatpush.bf16.msrb.mxu0 %v595_v17 }
  0x93   :  { %776 = vmatmul.bf16.gmra.mxu0 %v194_v32  ;;  %v461_v32 = vld [vmem:[%s2519_s1 + $0x6f8] sm:$0xff] }
  0x94   :  { %809 = vmatmul.bf16.gmra.mxu1 %v195_v33  ;;  %v474_v33 = vld [vmem:[%s2519_s1 + $0x760] sm:$0xff] }
  0x95   :  { %842 = vmatmul.bf16.gmra.mxu2 %v196_v34  ;;  %v605_v34 = vpack.c.bf16 %v461_v32, %v460_v31 }
  0x96   :  { %875 = vmatmul.bf16.gmra.mxu3 %v197_v35  ;;  %v475_v35 = vld [vmem:[%s2519_s1 + $0x768] sm:$0xff] }
  0x97   :  { %v612_v40 = vpack.c.bf16 %v475_v35, %v474_v33  ;;  %1055 = vmatpush.bf16.msrb.mxu1 %v605_v34 }
  0x99   :  { %1089 = vmatpush.bf16.msrb.mxu2 %v612_v40  ;;  %v471_v40 = vld [vmem:[%s2519_s1 + $0x748] sm:$0xff] }
  0x9a   :  { %v610_v42 = vpack.c.bf16 %v471_v40, %v470_v39 }
  0x9b   :  { %1056 = vmatpush.bf16.msrb.mxu1 %v604_v61  ;;  %v602_v61 = vpack.c.bf16 %v455_v58, %v454_v57  ;;  %v103_v57 = vld [vmem:[%s2520_s0 + $0x2c8] sm:$0xff]  ;;  %v88_v58 = vld [vmem:[%s2520_s0 + $0x250] sm:$0xff] }
  0xa0   :  { %v635_v5 = vpop.f32.mrf.mxu0 }
  0xa1   :  { %v636_v9 = vadd.f32 %v1938_v50, %v635_v5  ;;  %v668_v10 = vpop.f32.mrf.mxu1  ;;  %v22_v5 = vld [vmem:[%s2520_s0 + $0x40] sm:$0xff] }
  0xa3   :  { %v669_v12 = vadd.f32 %v668_v10, %v636_v9  ;;  %781 = vmatmul.bf16.gmra.mxu0 %v210_v2  ;;  %v488_v9 = vld [vmem:[%s2519_s1 + $0x7d0] sm:$0xff] }
  0xa4   :  { %814 = vmatmul.bf16.gmra.mxu1 %v211_v6  ;;  %v38_v6 = vld [vmem:[%s2520_s0 + $0xc0] sm:$0xff] }
  0xa5   :  { %847 = vmatmul.bf16.gmra.mxu2 %v212_v7  ;;  %v472_v7 = vld [vmem:[%s2519_s1 + $0x750] sm:$0xff]  ;;  %v166_v28 = vpack.c.bf16 %v38_v6, %v22_v5 }
  0xa6   :  { %880 = vmatmul.bf16.gmra.mxu3 %v213_v11  ;;  %v611_v11 = vpack.c.bf16 %v473_v8, %v472_v7  ;;  %v71_v7 = vld [vmem:[%s2520_s0 + $0x1c8] sm:$0xff]  ;;  %v56_v8 = vld [vmem:[%s2520_s0 + $0x150] sm:$0xff] }
  0xa8   :  { %v701_v18 = vpop.f32.mrf.mxu2  ;;  %v637_v22 = vpop.f32.mrf.mxu0  ;;  %1090 = vmatpush.bf16.msrb.mxu2 %v611_v11  ;;  %v73_v11 = vld [vmem:[%s2520_s0 + $0x1d8] sm:$0xff] }
  0xa9   :  { %v702_v20 = vadd.f32 %v701_v18, %v669_v12  ;;  %v734_v21 = vpop.f32.mrf.mxu3  ;;  %v638_v23 = vadd.f32 %v1938_v50, %v637_v22  ;;  %v670_v24 = vpop.f32.mrf.mxu1  ;;  %v489_v12 = vld [vmem:[%s2519_s1 + $0x7d8] sm:$0xff]  ;;  %v456_v18 = vld [vmem:[%s2519_s1 + $0x6d0] sm:$0xff] }
  0xaa   :  { %v619_v16 = vpack.c.bf16 %v489_v12, %v488_v9  ;;  %v40_v22 = vld [vmem:[%s2520_s0 + $0xd0] sm:$0xff] }
  0xab   :  { %v1996_v25 = vadd.f32 %v734_v21, %v702_v20  ;;  %v671_v29 = vadd.f32 %v670_v24, %v638_v23  ;;  %v39_v20 = vld [vmem:[%s2520_s0 + $0xc8] sm:$0xff]  ;;  %v24_v21 = vld [vmem:[%s2520_s0 + $0x50] sm:$0xff]  ;;  %v603_v23 = vpack.c.bf16 %v457_v19, %v456_v18  ;;  %v25_v24 = vld [vmem:[%s2520_s0 + $0x58] sm:$0xff] }
  0xac   :  { %1123 = vmatpush.bf16.msrb.mxu3 %v619_v16  ;;  %v167_v32 = vpack.c.bf16 %v39_v20, %v23_v15  ;;  %v168_v33 = vpack.c.bf16 %v40_v22, %v24_v21  ;;  %v169_v36 = vpack.c.bf16 %v41_v26, %v25_v24  ;;  %1091 = vmatpush.bf16.msrb.mxu2 %v610_v42  ;;  %v72_v9 = vld [vmem:[%s2520_s0 + $0x1d0] sm:$0xff]  ;;  %v437_v20 = vld [vmem:[%s2519_s1 + $0x638] sm:$0xff] }
  0xad   :  { %1057 = vmatpush.bf16.msrb.mxu1 %v603_v23  ;;  %v184_v18 = vpack.c.bf16 %v72_v9, %v56_v8  ;;  %v436_v19 = vld [vmem:[%s2519_s1 + $0x630] sm:$0xff] }
  0xae   :  { %v593_v24 = vpack.c.bf16 %v437_v20, %v436_v19  ;;  %v448_v20 = vld [vmem:[%s2519_s1 + $0x690] sm:$0xff] }
  0xb0   :  { %v703_v43 = vpop.f32.mrf.mxu2  ;;  %v640_v47 = vpop.f32.mrf.mxu0 }
  0xb1   :  { %v704_v45 = vadd.f32 %v703_v43, %v671_v29  ;;  %v736_v46 = vpop.f32.mrf.mxu3  ;;  %v641_v51 = vadd.f32 %v1938_v50, %v640_v47  ;;  %v673_v52 = vpop.f32.mrf.mxu1  ;;  %v487_v43 = vld [vmem:[%s2519_s1 + $0x7c8] sm:$0xff]  ;;  %1058 = vmatpush.bf16.msrb.mxu1 %v602_v61  ;;  %v89_v61 = vld [vmem:[%s2520_s0 + $0x258] sm:$0xff] }
  0xb3   :  { %v2035_v54 = vadd.f32 %v736_v46, %v704_v45  ;;  %v674_v55 = vadd.f32 %v673_v52, %v641_v51  ;;  %786 = vmatmul.bf16.gmra.mxu0 %v226_v44  ;;  %v618_v44 = vpack.c.bf16 %v487_v43, %v486_v41  ;;  %v438_v45 = vld [vmem:[%s2519_s1 + $0x640] sm:$0xff]  ;;  %v439_v46 = vld [vmem:[%s2519_s1 + $0x648] sm:$0xff] }
  0xb4   :  { %819 = vmatmul.bf16.gmra.mxu1 %v227_v48  ;;  %v594_v48 = vpack.c.bf16 %v439_v46, %v438_v45  ;;  %v86_v45 = vld [vmem:[%s2520_s0 + $0x240] sm:$0xff] }
  0xb5   :  { %852 = vmatmul.bf16.gmra.mxu2 %v228_v49  ;;  %1124 = vmatpush.bf16.msrb.mxu3 %v618_v44 }
  0xb6   :  { %885 = vmatmul.bf16.gmra.mxu3 %v229_v53  ;;  %1025 = vmatpush.bf16.msrb.mxu0 %v594_v48  ;;  %v435_v48 = vld [vmem:[%s2519_s1 + $0x628] sm:$0xff] }
  0xb8   :  { %v706_v62 = vpop.f32.mrf.mxu2  ;;  %v642_v1 = vpop.f32.mrf.mxu0 }
  0xb9   :  { %v707_v63 = vadd.f32 %v706_v62, %v674_v55  ;;  %v739_v0 = vpop.f32.mrf.mxu3  ;;  %v643_v2 = vadd.f32 %v1938_v50, %v642_v1  ;;  %v675_v3 = vpop.f32.mrf.mxu1  ;;  %v469_v62 = vld [vmem:[%s2519_s1 + $0x738] sm:$0xff]  ;;  %v54_v1 = vld [vmem:[%s2520_s0 + $0x140] sm:$0xff] }
  0xba   :  { %v609_v5 = vpack.c.bf16 %v469_v62, %v468_v59  ;;  %1026 = vmatpush.bf16.msrb.mxu0 %v593_v24  ;;  %v104_v59 = vld [vmem:[%s2520_s0 + $0x2d0] sm:$0xff]  ;;  %v105_v62 = vld [vmem:[%s2520_s0 + $0x2d8] sm:$0xff] }
  0xbb   :  { %v2050_v4 = vadd.f32 %v739_v0, %v707_v63  ;;  %v676_v10 = vadd.f32 %v675_v3, %v643_v2  ;;  %v484_v63 = vld [vmem:[%s2519_s1 + $0x7b0] sm:$0xff]  ;;  %v485_v0 = vld [vmem:[%s2519_s1 + $0x7b8] sm:$0xff]  ;;  %v70_v2 = vld [vmem:[%s2520_s0 + $0x1c0] sm:$0xff]  ;;  %v201_v9 = vpack.c.bf16 %v105_v62, %v89_v61 }
  0xbc   :  { %v55_v3 = vld [vmem:[%s2520_s0 + $0x148] sm:$0xff]  ;;  %v617_v6 = vpack.c.bf16 %v485_v0, %v484_v63  ;;  %1092 = vmatpush.bf16.msrb.mxu2 %v609_v5  ;;  %v182_v13 = vpack.c.bf16 %v70_v2, %v54_v1 }
  0xbd   :  { %v183_v17 = vpack.c.bf16 %v71_v7, %v55_v3 }
  0xbe   :  { %1125 = vmatpush.bf16.msrb.mxu3 %v617_v6  ;;  %v200_v6 = vpack.c.bf16 %v104_v59, %v88_v58 }
  0xc0   :  { %v708_v27 = vpop.f32.mrf.mxu2  ;;  %v645_v31 = vpop.f32.mrf.mxu0 }
  0xc1   :  { %v709_v29 = vadd.f32 %v708_v27, %v676_v10  ;;  %v741_v30 = vpop.f32.mrf.mxu3  ;;  %v646_v34 = vadd.f32 %v1938_v50, %v645_v31  ;;  %v678_v35 = vpop.f32.mrf.mxu1  ;;  %v57_v10 = vld [vmem:[%s2520_s0 + $0x158] sm:$0xff]  ;;  %v466_v31 = vld [vmem:[%s2519_s1 + $0x720] sm:$0xff] }
  0xc2   :  { %v185_v23 = vpack.c.bf16 %v73_v11, %v57_v10  ;;  %v464_v11 = vld [vmem:[%s2519_s1 + $0x710] sm:$0xff] }
  0xc3   :  { %v2101_v37 = vadd.f32 %v741_v30, %v709_v29  ;;  %v679_v38 = vadd.f32 %v678_v35, %v646_v34  ;;  %898 = vmatmul.bf16.vlgmr.msra.gmra.mxu0 %v166_v28  ;;  %v452_v28 = vld [vmem:[%s2519_s1 + $0x6b0] sm:$0xff]  ;;  %v453_v29 = vld [vmem:[%s2519_s1 + $0x6b8] sm:$0xff]  ;;  %v482_v34 = vld [vmem:[%s2519_s1 + $0x7a0] sm:$0xff] }
  0xc4   :  { %931 = vmatmul.bf16.vlgmr.msra.gmra.mxu1 %v167_v32  ;;  %v601_v30 = vpack.c.bf16 %v453_v29, %v452_v28  ;;  %v467_v32 = vld [vmem:[%s2519_s1 + $0x728] sm:$0xff] }
  0xc5   :  { %964 = vmatmul.bf16.vlgmr.msra.gmra.mxu2 %v168_v33  ;;  %v608_v33 = vpack.c.bf16 %v467_v32, %v466_v31  ;;  %v483_v35 = vld [vmem:[%s2519_s1 + $0x7a8] sm:$0xff]  ;;  %v118_v31 = vld [vmem:[%s2520_s0 + $0x340] sm:$0xff] }
  0xc6   :  { %997 = vmatmul.bf16.vlgmr.msra.gmra.mxu3 %v169_v36  ;;  %1059 = vmatpush.bf16.msrb.mxu1 %v601_v30  ;;  %v134_v32 = vld [vmem:[%s2520_s0 + $0x3c0] sm:$0xff] }
  0xc7   :  { %1093 = vmatpush.bf16.msrb.mxu2 %v608_v33  ;;  %v119_v33 = vld [vmem:[%s2520_s0 + $0x348] sm:$0xff] }
  0xc8   :  { %v711_v47 = vpop.f32.mrf.mxu2  ;;  %v647_v52 = vpop.f32.mrf.mxu0 }
  0xc9   :  { %v712_v49 = vadd.f32 %v711_v47, %v679_v38  ;;  %v744_v51 = vpop.f32.mrf.mxu3  ;;  %v648_v53 = vadd.f32 %v1938_v50, %v647_v52  ;;  %v680_v55 = vpop.f32.mrf.mxu1  ;;  %v616_v38 = vpack.c.bf16 %v483_v35, %v482_v34  ;;  %v434_v47 = vld [vmem:[%s2519_s1 + $0x620] sm:$0xff]  ;;  %v87_v52 = vld [vmem:[%s2520_s0 + $0x248] sm:$0xff] }
  0xca   :  { %v199_v5 = vpack.c.bf16 %v103_v57, %v87_v52  ;;  %v462_v34 = vld [vmem:[%s2519_s1 + $0x700] sm:$0xff]  ;;  %v463_v35 = vld [vmem:[%s2519_s1 + $0x708] sm:$0xff]  ;;  %v214_v52 = vpack.c.bf16 %v134_v32, %v118_v31 }
  0xcb   :  { %v2122_v56 = vadd.f32 %v744_v51, %v712_v49  ;;  %v681_v60 = vadd.f32 %v680_v55, %v648_v53  ;;  %1126 = vmatpush.bf16.msrb.mxu3 %v616_v38  ;;  %v450_v49 = vld [vmem:[%s2519_s1 + $0x6a0] sm:$0xff]  ;;  %v592_v53 = vpack.c.bf16 %v435_v48, %v434_v47  ;;  %v451_v55 = vld [vmem:[%s2519_s1 + $0x6a8] sm:$0xff]  ;;  %v606_v38 = vpack.c.bf16 %v463_v35, %v462_v34  ;;  %v121_v48 = vld [vmem:[%s2520_s0 + $0x358] sm:$0xff] }
  0xcc   :  { %v102_v51 = vld [vmem:[%s2520_s0 + $0x2c0] sm:$0xff] }
  0xcd   :  { %1027 = vmatpush.bf16.msrb.mxu0 %v592_v53  ;;  %v198_v0 = vpack.c.bf16 %v102_v51, %v86_v45  ;;  %v136_v45 = vld [vmem:[%s2520_s0 + $0x3d0] sm:$0xff]  ;;  %v446_v53 = vld [vmem:[%s2519_s1 + $0x680] sm:$0xff] }
  0xd0   :  { %v713_v12 = vpop.f32.mrf.mxu2  ;;  %v650_v16 = vpop.f32.mrf.mxu0 }
  0xd1   :  { %v714_v14 = vadd.f32 %v713_v12, %v681_v60  ;;  %v746_v15 = vpop.f32.mrf.mxu3  ;;  %v651_v21 = vadd.f32 %v1938_v50, %v650_v16  ;;  %v683_v22 = vpop.f32.mrf.mxu1  ;;  %v600_v60 = vpack.c.bf16 %v451_v55, %v450_v49  ;;  %v465_v12 = vld [vmem:[%s2519_s1 + $0x718] sm:$0xff]  ;;  %v432_v16 = vld [vmem:[%s2519_s1 + $0x610] sm:$0xff]  ;;  %v447_v55 = vld [vmem:[%s2519_s1 + $0x688] sm:$0xff] }
  0xd2   :  { %v137_v49 = vld [vmem:[%s2520_s0 + $0x3d8] sm:$0xff]  ;;  %v598_v61 = vpack.c.bf16 %v447_v55, %v446_v53 }
  0xd3   :  { %v2173_v26 = vadd.f32 %v746_v15, %v714_v14  ;;  %v684_v27 = vadd.f32 %v683_v22, %v651_v21  ;;  %903 = vmatmul.bf16.gmra.mxu0 %v182_v13  ;;  %1060 = vmatpush.bf16.msrb.mxu1 %v600_v60  ;;  %v480_v13 = vld [vmem:[%s2519_s1 + $0x790] sm:$0xff]  ;;  %v607_v15 = vpack.c.bf16 %v465_v12, %v464_v11  ;;  %v449_v21 = vld [vmem:[%s2519_s1 + $0x698] sm:$0xff]  ;;  %v151_v12 = vld [vmem:[%s2520_s0 + $0x448] sm:$0xff] }
  0xd4   :  { %936 = vmatmul.bf16.gmra.mxu1 %v183_v17  ;;  %v433_v17 = vld [vmem:[%s2519_s1 + $0x618] sm:$0xff]  ;;  %v599_v22 = vpack.c.bf16 %v449_v21, %v448_v20 }
  0xd5   :  { %969 = vmatmul.bf16.gmra.mxu2 %v184_v18  ;;  %v591_v19 = vpack.c.bf16 %v433_v17, %v432_v16 }
  0xd6   :  { %1002 = vmatmul.bf16.gmra.mxu3 %v185_v23  ;;  %1094 = vmatpush.bf16.msrb.mxu2 %v607_v15 }
  0xd7   :  { %1028 = vmatpush.bf16.msrb.mxu0 %v591_v19  ;;  %1061 = vmatpush.bf16.msrb.mxu1 %v599_v22 }
  0xd8   :  { %v716_v36 = vpop.f32.mrf.mxu2  ;;  %v652_v41 = vpop.f32.mrf.mxu0 }
  0xd9   :  { %v717_v39 = vadd.f32 %v716_v36, %v684_v27  ;;  %v749_v40 = vpop.f32.mrf.mxu3  ;;  %v653_v42 = vadd.f32 %v1938_v50, %v652_v41  ;;  %v685_v43 = vpop.f32.mrf.mxu1  ;;  %v478_v36 = vld [vmem:[%s2519_s1 + $0x780] sm:$0xff]  ;;  %v431_v41 = vld [vmem:[%s2519_s1 + $0x608] sm:$0xff] }
  0xda   :  { %1095 = vmatpush.bf16.msrb.mxu2 %v606_v38  ;;  %v27_v38 = vld [vmem:[%s2520_s0 + $0x68] sm:$0xff] }
  0xdb   :  { %v2194_v44 = vadd.f32 %v749_v40, %v717_v39  ;;  %v686_v46 = vadd.f32 %v685_v43, %v653_v42  ;;  %v479_v39 = vld [vmem:[%s2519_s1 + $0x788] sm:$0xff]  ;;  %v430_v40 = vld [vmem:[%s2519_s1 + $0x600] sm:$0xff]  ;;  %v120_v43 = vld [vmem:[%s2520_s0 + $0x350] sm:$0xff]  ;;  %1062 = vmatpush.bf16.msrb.mxu1 %v598_v61 }
  0xdc   :  { %v135_v42 = vld [vmem:[%s2520_s0 + $0x3c8] sm:$0xff]  ;;  %v590_v47 = vpack.c.bf16 %v431_v41, %v430_v40  ;;  %v216_v60 = vpack.c.bf16 %v136_v45, %v120_v43  ;;  %v44_v40 = vld [vmem:[%s2520_s0 + $0xf0] sm:$0xff]  ;;  %v29_v41 = vld [vmem:[%s2520_s0 + $0x78] sm:$0xff] }
  0xdd   :  { %v215_v59 = vpack.c.bf16 %v135_v42, %v119_v33  ;;  %v45_v42 = vld [vmem:[%s2520_s0 + $0xf8] sm:$0xff] }
  0xde   :  { %1029 = vmatpush.bf16.msrb.mxu0 %v590_v47  ;;  %v173_v55 = vpack.c.bf16 %v45_v42, %v29_v41 }
  0xe0   :  { %v718_v63 = vpop.f32.mrf.mxu2  ;;  %v655_v3 = vpop.f32.mrf.mxu0 }
  0xe1   :  { %v719_v1 = vadd.f32 %v718_v63, %v686_v46  ;;  %v751_v2 = vpop.f32.mrf.mxu3  ;;  %v656_v7 = vadd.f32 %v1938_v50, %v655_v3  ;;  %v688_v8 = vpop.f32.mrf.mxu1  ;;  %v481_v50 = vld [vmem:[%s2519_s1 + $0x798] sm:$0xff]  ;;  %v614_v46 = vpack.c.bf16 %v479_v39, %v478_v36  ;;  %v42_v36 = vld [vmem:[%s2520_s0 + $0xe0] sm:$0xff]  ;;  %v28_v39 = vld [vmem:[%s2520_s0 + $0x70] sm:$0xff] }
  0xe2   :  { %v615_v18 = vpack.c.bf16 %v481_v50, %v480_v13  ;;  %v152_v13 = vld [vmem:[%s2520_s0 + $0x450] sm:$0xff] }
  0xe3   :  { %v2233_v10 = vadd.f32 %v751_v2, %v719_v1  ;;  %v689_v14 = vadd.f32 %v688_v8, %v656_v7  ;;  %908 = vmatmul.bf16.gmra.mxu0 %v198_v0  ;;  %v217_v0 = vpack.c.bf16 %v137_v49, %v121_v48  ;;  %v232_v19 = vpack.c.bf16 %v152_v13, %v152_v13 }
  0xe4   :  { %941 = vmatmul.bf16.gmra.mxu1 %v199_v5  ;;  %1127 = vmatpush.bf16.msrb.mxu3 %v615_v18  ;;  %v231_v18 = vpack.c.bf16 %v151_v12, %v151_v12 }
  0xe5   :  { %974 = vmatmul.bf16.gmra.mxu2 %v200_v6 }
  0xe6   :  { %1007 = vmatmul.bf16.gmra.mxu3 %v201_v9 }
  0xe8   :  { %v721_v23 = vpop.f32.mrf.mxu2  ;;  %v657_v28 = vpop.f32.mrf.mxu0  ;;  %1128 = vmatpush.bf16.msrb.mxu3 %v614_v46 }
  0xe9   :  { %v722_v24 = vadd.f32 %v721_v23, %v689_v14  ;;  %v754_v27 = vpop.f32.mrf.mxu3  ;;  %v690_v29 = vpop.f32.mrf.mxu1 }
  0xeb   :  { %v2259_v30 = vadd.f32 %v754_v27, %v722_v24 }
  0xf0   :  { %v723_v51 = vpop.f32.mrf.mxu2  ;;  %v767_v58 = vpop.f32.mrf.mxu0 }
  0xf1   :  { %v756_v57 = vpop.f32.mrf.mxu3  ;;  %v768_v62 = vadd.f32 %v767_v58, %v1996_v25  ;;  %v800_v63 = vpop.f32.mrf.mxu1  ;;  %v150_v25 = vld [vmem:[%s2520_s0 + $0x440] sm:$0xff]  ;;  %v172_v51 = vpack.c.bf16 %v44_v40, %v28_v39 }
  0xf2   :  { %v230_v15 = vpack.c.bf16 %v150_v25, %v150_v25 }
  0xf3   :  { %v801_v1 = vadd.f32 %v800_v63, %v768_v62  ;;  %913 = vmatmul.bf16.gmra.mxu0 %v214_v52 }
  0xf4   :  { %946 = vmatmul.bf16.gmra.mxu1 %v215_v59 }
  0xf5   :  { %979 = vmatmul.bf16.gmra.mxu2 %v216_v60 }
  0xf6   :  { %1012 = vmatmul.bf16.gmra.mxu3 %v217_v0 }
  0xf8   :  { %v833_v2 = vpop.f32.mrf.mxu2  ;;  %v769_v6 = vpop.f32.mrf.mxu0 }
  0xf9   :  { %v834_v3 = vadd.f32 %v833_v2, %v801_v1  ;;  %v866_v5 = vpop.f32.mrf.mxu3  ;;  %v770_v7 = vadd.f32 %v769_v6, %v2035_v54  ;;  %v802_v8 = vpop.f32.mrf.mxu1  ;;  %v153_v54 = vld [vmem:[%s2520_s0 + $0x458] sm:$0xff]  ;;  %v60_v6 = vld [vmem:[%s2520_s0 + $0x170] sm:$0xff] }
  0xfa   :  { %v233_v22 = vpack.c.bf16 %v153_v54, %v153_v54 }
  0xfb   :  { %v2311_v9 = vadd.f32 %v866_v5, %v834_v3  ;;  %v803_v11 = vadd.f32 %v802_v8, %v770_v7  ;;  %v74_v3 = vld [vmem:[%s2520_s0 + $0x1e0] sm:$0xff]  ;;  %v59_v5 = vld [vmem:[%s2520_s0 + $0x168] sm:$0xff]  ;;  %v76_v7 = vld [vmem:[%s2520_s0 + $0x1f0] sm:$0xff] }
  0xfc   :  { %v61_v8 = vld [vmem:[%s2520_s0 + $0x178] sm:$0xff] }
 0x100   :  { %v835_v14 = vpop.f32.mrf.mxu2  ;;  %v772_v17 = vpop.f32.mrf.mxu0 }
 0x101   :  { %v836_v50 = vadd.f32 %v835_v14, %v803_v11  ;;  %v868_v16 = vpop.f32.mrf.mxu3  ;;  %v773_v20 = vadd.f32 %v772_v17, %v2050_v4  ;;  %v805_v21 = vpop.f32.mrf.mxu1  ;;  %v26_v4 = vld [vmem:[%s2520_s0 + $0x60] sm:$0xff]  ;;  %v77_v11 = vld [vmem:[%s2520_s0 + $0x1f8] sm:$0xff] }
 0x102   :  { %v170_v45 = vpack.c.bf16 %v42_v36, %v26_v4  ;;  %v92_v4 = vld [vmem:[%s2520_s0 + $0x270] sm:$0xff] }
 0x103   :  { %v2326_v23 = vadd.f32 %v868_v16, %v836_v50  ;;  %v806_v24 = vadd.f32 %v805_v21, %v773_v20  ;;  %918 = vmatmul.bf16.gmra.mxu0 %v230_v15  ;;  %v188_v50 = vpack.c.bf16 %v76_v7, %v60_v6  ;;  %v108_v36 = vld [vmem:[%s2520_s0 + $0x2f0] sm:$0xff] }
 0x104   :  { %951 = vmatmul.bf16.gmra.mxu1 %v231_v18  ;;  %v189_v18 = vpack.c.bf16 %v77_v11, %v61_v8 }
 0x105   :  { %984 = vmatmul.bf16.gmra.mxu2 %v232_v19 }
 0x106   :  { %1017 = vmatmul.bf16.gmra.mxu3 %v233_v22 }
 0x108   :  { %v838_v27 = vpop.f32.mrf.mxu2  ;;  %v774_v31 = vpop.f32.mrf.mxu0 }
 0x109   :  { %v839_v28 = vadd.f32 %v838_v27, %v806_v24  ;;  %v871_v29 = vpop.f32.mrf.mxu3  ;;  %v775_v32 = vadd.f32 %v774_v31, %v2101_v37  ;;  %v807_v33 = vpop.f32.mrf.mxu1  ;;  %v43_v37 = vld [vmem:[%s2520_s0 + $0xe8] sm:$0xff] }
 0x10a   :  { %v171_v49 = vpack.c.bf16 %v43_v37, %v27_v38  ;;  %v93_v38 = vld [vmem:[%s2520_s0 + $0x278] sm:$0xff] }
 0x10b   :  { %v2329_v34 = vadd.f32 %v871_v29, %v839_v28  ;;  %v808_v35 = vadd.f32 %v807_v33, %v775_v32  ;;  %v106_v33 = vld [vmem:[%s2520_s0 + $0x2e0] sm:$0xff]  ;;  %v109_v37 = vld [vmem:[%s2520_s0 + $0x2f8] sm:$0xff] }
 0x110   :  { %v840_v43 = vpop.f32.mrf.mxu2  ;;  %v777_v48 = vpop.f32.mrf.mxu0 }
 0x111   :  { %v841_v46 = vadd.f32 %v840_v43, %v808_v35  ;;  %v873_v47 = vpop.f32.mrf.mxu3  ;;  %v778_v52 = vadd.f32 %v777_v48, %v2122_v56  ;;  %v810_v53 = vpop.f32.mrf.mxu1  ;;  %v58_v56 = vld [vmem:[%s2520_s0 + $0x160] sm:$0xff]  ;;  %v91_v35 = vld [vmem:[%s2520_s0 + $0x268] sm:$0xff] }
 0x112   :  { %v186_v12 = vpack.c.bf16 %v74_v3, %v58_v56  ;;  %v140_v56 = vld [vmem:[%s2520_s0 + $0x3f0] sm:$0xff]  ;;  %v125_v3 = vld [vmem:[%s2520_s0 + $0x378] sm:$0xff] }
 0x113   :  { %v2356_v57 = vadd.f32 %v873_v47, %v841_v46  ;;  %v811_v58 = vadd.f32 %v810_v53, %v778_v52  ;;  %1030 = vmatmul.bf16.vlgmr.msrb.gmra.mxu0 %v170_v45  ;;  %v204_v46 = vpack.c.bf16 %v108_v36, %v92_v4 }
 0x114   :  { %1063 = vmatmul.bf16.vlgmr.msrb.gmra.mxu1 %v171_v49  ;;  %v205_v49 = vpack.c.bf16 %v109_v37, %v93_v38 }
 0x115   :  { %1096 = vmatmul.bf16.vlgmr.msrb.gmra.mxu2 %v172_v51 }
 0x116   :  { %1129 = vmatmul.bf16.vlgmr.msrb.gmra.mxu3 %v173_v55 }
 0x118   :  { %v843_v59 = vpop.f32.mrf.mxu2  ;;  %v779_v62 = vpop.f32.mrf.mxu0 }
 0x119   :  { %v844_v60 = vadd.f32 %v843_v59, %v811_v58  ;;  %v876_v61 = vpop.f32.mrf.mxu3  ;;  %v780_v63 = vadd.f32 %v779_v62, %v2173_v26  ;;  %v812_v0 = vpop.f32.mrf.mxu1  ;;  %v75_v26 = vld [vmem:[%s2520_s0 + $0x1e8] sm:$0xff]  ;;  %v138_v62 = vld [vmem:[%s2520_s0 + $0x3e0] sm:$0xff] }
 0x11a   :  { %v187_v15 = vpack.c.bf16 %v75_v26, %v59_v5  ;;  %v141_v5 = vld [vmem:[%s2520_s0 + $0x3f8] sm:$0xff] }
 0x11b   :  { %v2359_v1 = vadd.f32 %v876_v61, %v844_v60  ;;  %v813_v2 = vadd.f32 %v812_v0, %v780_v63  ;;  %v123_v63 = vld [vmem:[%s2520_s0 + $0x368] sm:$0xff] }
 0x11c   :  { %v139_v0 = vld [vmem:[%s2520_s0 + $0x3e8] sm:$0xff] }
 0x11d   :  { %v219_v11 = vpack.c.bf16 %v139_v0, %v123_v63 }
 0x120   :  { %v845_v25 = vpop.f32.mrf.mxu2  ;;  %v782_v14 = vpop.f32.mrf.mxu0 }
 0x121   :  { %v846_v13 = vadd.f32 %v845_v25, %v813_v2  ;;  %v878_v54 = vpop.f32.mrf.mxu3  ;;  %v783_v16 = vadd.f32 %v782_v14, %v2194_v44  ;;  %v815_v17 = vpop.f32.mrf.mxu1  ;;  %v90_v44 = vld [vmem:[%s2520_s0 + $0x260] sm:$0xff]  ;;  %v124_v2 = vld [vmem:[%s2520_s0 + $0x370] sm:$0xff] }
 0x122   :  { %v202_v40 = vpack.c.bf16 %v106_v33, %v90_v44  ;;  %v220_v25 = vpack.c.bf16 %v140_v56, %v124_v2 }
 0x123   :  { %v2386_v19 = vadd.f32 %v878_v54, %v846_v13  ;;  %v816_v20 = vadd.f32 %v815_v17, %v783_v16  ;;  %1035 = vmatmul.bf16.gmra.mxu0 %v186_v12  ;;  %v221_v54 = vpack.c.bf16 %v141_v5, %v125_v3 }
 0x124   :  { %1068 = vmatmul.bf16.gmra.mxu1 %v187_v15 }
 0x125   :  { %1101 = vmatmul.bf16.gmra.mxu2 %v188_v50 }
 0x126   :  { %1134 = vmatmul.bf16.gmra.mxu3 %v189_v18 }
 0x128   :  { %v848_v21 = vpop.f32.mrf.mxu2  ;;  %v784_v27 = vpop.f32.mrf.mxu0 }
 0x129   :  { %v849_v22 = vadd.f32 %v848_v21, %v816_v20  ;;  %v881_v24 = vpop.f32.mrf.mxu3  ;;  %v785_v28 = vadd.f32 %v784_v27, %v2233_v10  ;;  %v817_v29 = vpop.f32.mrf.mxu1  ;;  %v107_v10 = vld [vmem:[%s2520_s0 + $0x2e8] sm:$0xff]  ;;  %v156_v27 = vld [vmem:[%s2520_s0 + $0x470] sm:$0xff] }
 0x12a   :  { %v203_v45 = vpack.c.bf16 %v107_v10, %v91_v35  ;;  %v236_v10 = vpack.c.bf16 %v156_v27, %v156_v27 }
 0x12b   :  { %v2389_v31 = vadd.f32 %v881_v24, %v849_v22  ;;  %v818_v32 = vadd.f32 %v817_v29, %v785_v28  ;;  %v155_v24 = vld [vmem:[%s2520_s0 + $0x468] sm:$0xff] }
 0x12c   :  { %v235_v35 = vpack.c.bf16 %v155_v24, %v155_v24 }
 0x130   :  { %v850_v39 = vpop.f32.mrf.mxu2  ;;  %v787_v43 = vpop.f32.mrf.mxu0 }
 0x131   :  { %v851_v41 = vadd.f32 %v850_v39, %v818_v32  ;;  %v883_v42 = vpop.f32.mrf.mxu3  ;;  %v788_v47 = vadd.f32 %v787_v43, %v2259_v30  ;;  %v820_v48 = vpop.f32.mrf.mxu1  ;;  %v122_v30 = vld [vmem:[%s2520_s0 + $0x360] sm:$0xff] }
 0x132   :  { %v218_v6 = vpack.c.bf16 %v138_v62, %v122_v30 }
 0x133   :  { %v2416_v51 = vadd.f32 %v883_v42, %v851_v41  ;;  %v821_v52 = vadd.f32 %v820_v48, %v788_v47  ;;  %1040 = vmatmul.bf16.gmra.mxu0 %v202_v40 }
 0x134   :  { %1073 = vmatmul.bf16.gmra.mxu1 %v203_v45 }
 0x135   :  { %1106 = vmatmul.bf16.gmra.mxu2 %v204_v46 }
 0x136   :  { %1139 = vmatmul.bf16.gmra.mxu3 %v205_v49 }
 0x138   :  { %v853_v53 = vpop.f32.mrf.mxu2  ;;  %v789_v59 = vpop.f32.mrf.mxu0 }
 0x139   :  { %v854_v55 = vadd.f32 %v853_v53, %v821_v52  ;;  %v886_v58 = vpop.f32.mrf.mxu3  ;;  %v822_v60 = vpop.f32.mrf.mxu1 }
 0x13b   :  { %v2418_v61 = vadd.f32 %v886_v58, %v854_v55 }
 0x140   :  { %v855_v26 = vpop.f32.mrf.mxu2  ;;  %v899_v8 = vpop.f32.mrf.mxu0 }
 0x141   :  { %v888_v7 = vpop.f32.mrf.mxu3  ;;  %v900_v12 = vadd.f32 %v899_v8, %v2311_v9  ;;  %v932_v13 = vpop.f32.mrf.mxu1  ;;  %v154_v9 = vld [vmem:[%s2520_s0 + $0x460] sm:$0xff] }
 0x142   :  { %v234_v29 = vpack.c.bf16 %v154_v9, %v154_v9 }
 0x143   :  { %v933_v14 = vadd.f32 %v932_v13, %v900_v12  ;;  %1045 = vmatmul.bf16.gmra.mxu0 %v218_v6 }
 0x144   :  { %1078 = vmatmul.bf16.gmra.mxu1 %v219_v11 }
 0x145   :  { %1111 = vmatmul.bf16.gmra.mxu2 %v220_v25 }
 0x146   :  { %1144 = vmatmul.bf16.gmra.mxu3 %v221_v54 }
 0x148   :  { %v965_v15 = vpop.f32.mrf.mxu2  ;;  %v901_v17 = vpop.f32.mrf.mxu0 }
 0x149   :  { %v966_v50 = vadd.f32 %v965_v15, %v933_v14  ;;  %v998_v16 = vpop.f32.mrf.mxu3  ;;  %v902_v18 = vadd.f32 %v901_v17, %v2326_v23  ;;  %v934_v20 = vpop.f32.mrf.mxu1  ;;  %v157_v23 = vld [vmem:[%s2520_s0 + $0x478] sm:$0xff] }
 0x14a   :  { %v237_v38 = vpack.c.bf16 %v157_v23, %v157_v23 }
 0x14b   :  { %v2446_v21 = vadd.f32 %v998_v16, %v966_v50  ;;  %v935_v22 = vadd.f32 %v934_v20, %v902_v18 }
 0x150   :  { %v967_v28 = vpop.f32.mrf.mxu2  ;;  %v904_v33 = vpop.f32.mrf.mxu0 }
 0x151   :  { %v968_v32 = vadd.f32 %v967_v28, %v935_v22  ;;  %v1000_v44 = vpop.f32.mrf.mxu3  ;;  %v905_v4 = vadd.f32 %v904_v33, %v2329_v34  ;;  %v937_v36 = vpop.f32.mrf.mxu1 }
 0x153   :  { %v2461_v37 = vadd.f32 %v1000_v44, %v968_v32  ;;  %v938_v39 = vadd.f32 %v937_v36, %v905_v4  ;;  %1050 = vmatmul.bf16.gmra.mxu0 %v234_v29 }
 0x154   :  { %1083 = vmatmul.bf16.gmra.mxu1 %v235_v35 }
 0x155   :  { %1116 = vmatmul.bf16.gmra.mxu2 %v236_v10 }
 0x156   :  { %1149 = vmatmul.bf16.gmra.mxu3 %v237_v38 }
 0x158   :  { %v970_v40 = vpop.f32.mrf.mxu2  ;;  %v906_v43 = vpop.f32.mrf.mxu0 }
 0x159   :  { %v971_v41 = vadd.f32 %v970_v40, %v938_v39  ;;  %v1003_v42 = vpop.f32.mrf.mxu3  ;;  %v907_v45 = vadd.f32 %v906_v43, %v2356_v57  ;;  %v939_v46 = vpop.f32.mrf.mxu1 }
 0x15b   :  { %v2464_v47 = vadd.f32 %v1003_v42, %v971_v41  ;;  %v940_v48 = vadd.f32 %v939_v46, %v907_v45 }
 0x160   :  { %v972_v34 = vpop.f32.mrf.mxu2  ;;  %v909_v53 = vpop.f32.mrf.mxu0 }
 0x161   :  { %v973_v49 = vadd.f32 %v972_v34, %v940_v48  ;;  %v1005_v52 = vpop.f32.mrf.mxu3  ;;  %v910_v55 = vadd.f32 %v909_v53, %v2359_v1  ;;  %v942_v58 = vpop.f32.mrf.mxu1 }
 0x163   :  { %v2467_v59 = vadd.f32 %v1005_v52, %v973_v49  ;;  %v943_v60 = vadd.f32 %v942_v58, %v910_v55 }
 0x168   :  { %v975_v30 = vpop.f32.mrf.mxu2  ;;  %v911_v0 = vpop.f32.mrf.mxu0 }
 0x169   :  { %v976_v62 = vadd.f32 %v975_v30, %v943_v60  ;;  %v1008_v63 = vpop.f32.mrf.mxu3  ;;  %v912_v57 = vadd.f32 %v911_v0, %v2386_v19  ;;  %v944_v2 = vpop.f32.mrf.mxu1 }
 0x16b   :  { %v2470_v56 = vadd.f32 %v1008_v63, %v976_v62  ;;  %v945_v3 = vadd.f32 %v944_v2, %v912_v57 }
 0x170   :  { %v977_v5 = vpop.f32.mrf.mxu2  ;;  %v914_v7 = vpop.f32.mrf.mxu0 }
 0x171   :  { %v978_v26 = vadd.f32 %v977_v5, %v945_v3  ;;  %v1010_v6 = vpop.f32.mrf.mxu3  ;;  %v915_v1 = vadd.f32 %v914_v7, %v2389_v31  ;;  %v947_v8 = vpop.f32.mrf.mxu1 }
 0x173   :  { %v2473_v11 = vadd.f32 %v1010_v6, %v978_v26  ;;  %v948_v25 = vadd.f32 %v947_v8, %v915_v1 }
 0x178   :  { %v980_v12 = vpop.f32.mrf.mxu2  ;;  %v916_v14 = vpop.f32.mrf.mxu0 }
 0x179   :  { %v981_v13 = vadd.f32 %v980_v12, %v948_v25  ;;  %v1013_v54 = vpop.f32.mrf.mxu3  ;;  %v917_v19 = vadd.f32 %v916_v14, %v2416_v51  ;;  %v949_v15 = vpop.f32.mrf.mxu1 }
 0x17b   :  { %v2476_v50 = vadd.f32 %v1013_v54, %v981_v13  ;;  %v950_v16 = vadd.f32 %v949_v15, %v917_v19 }
 0x180   :  { %v982_v17 = vpop.f32.mrf.mxu2  ;;  %v919_v22 = vpop.f32.mrf.mxu0 }
 0x181   :  { %v983_v18 = vadd.f32 %v982_v17, %v950_v16  ;;  %v1015_v20 = vpop.f32.mrf.mxu3  ;;  %v920_v31 = vadd.f32 %v919_v22, %v2418_v61  ;;  %v952_v9 = vpop.f32.mrf.mxu1 }
 0x183   :  { %v2479_v24 = vadd.f32 %v1015_v20, %v983_v18  ;;  %v953_v27 = vadd.f32 %v952_v9, %v920_v31 }
 0x188   :  { %v985_v23 = vpop.f32.mrf.mxu2  ;;  %v921_v32 = vpop.f32.mrf.mxu0 }
 0x189   :  { %v986_v28 = vadd.f32 %v985_v23, %v953_v27  ;;  %v1018_v29 = vpop.f32.mrf.mxu3  ;;  %v954_v44 = vpop.f32.mrf.mxu1 }
 0x18b   :  { %v2481_v51 = vadd.f32 %v1018_v29, %v986_v28 }
 0x190   :  { %v987_v33 = vpop.f32.mrf.mxu2  ;;  %v1031_v10 = vpop.f32.mrf.mxu0 }
 0x191   :  { %v1020_v35 = vpop.f32.mrf.mxu3  ;;  %v1064_v4 = vpop.f32.mrf.mxu1  ;;  %v1032_v36 = vadd.f32 %v1031_v10, %v2446_v21 }
 0x193   :  { %v1065_v38 = vadd.f32 %v1064_v4, %v1032_v36 }
 0x198   :  { %v1097_v39 = vpop.f32.mrf.mxu2  ;;  %v1033_v41 = vpop.f32.mrf.mxu0 }
 0x199   :  { %v1098_v61 = vadd.f32 %v1097_v39, %v1065_v38  ;;  %v1130_v40 = vpop.f32.mrf.mxu3  ;;  %v1066_v42 = vpop.f32.mrf.mxu1  ;;  %v1034_v45 = vadd.f32 %v1033_v41, %v2461_v37 }
 0x19b   :  { %v1131_v43 = vadd.f32 %v1130_v40, %v1098_v61  ;;  %v1067_v48 = vadd.f32 %v1066_v42, %v1034_v45 }
 0x19d   :  { %v1154_v46 = vmax.f32 %v1131_v43, 0.0 }
 0x19f   :  { %1163 = vst [vmem:[%s2522_s3] sm:$0xff] %v1154_v46 }
 0x1a0   :  { %v1099_v34 = vpop.f32.mrf.mxu2  ;;  %v1036_v53 = vpop.f32.mrf.mxu0 }
 0x1a1   :  { %v1100_v49 = vadd.f32 %v1099_v34, %v1067_v48  ;;  %v1132_v52 = vpop.f32.mrf.mxu3  ;;  %v1069_v21 = vpop.f32.mrf.mxu1  ;;  %v1037_v58 = vadd.f32 %v1036_v53, %v2464_v47 }
 0x1a3   :  { %v1133_v55 = vadd.f32 %v1132_v52, %v1100_v49  ;;  %v1070_v37 = vadd.f32 %v1069_v21, %v1037_v58 }
 0x1a5   :  { %v1155_v60 = vmax.f32 %v1133_v55, 0.0 }
 0x1a7   :  { %1164 = vst [vmem:[%s2522_s3 + $0x8] sm:$0xff] %v1155_v60 }
 0x1a8   :  { %v1102_v30 = vpop.f32.mrf.mxu2  ;;  %v1038_v0 = vpop.f32.mrf.mxu0 }
 0x1a9   :  { %v1103_v62 = vadd.f32 %v1102_v30, %v1070_v37  ;;  %v1135_v63 = vpop.f32.mrf.mxu3  ;;  %v1071_v57 = vpop.f32.mrf.mxu1  ;;  %v1039_v3 = vadd.f32 %v1038_v0, %v2467_v59 }
 0x1ab   :  { %v1136_v2 = vadd.f32 %v1135_v63, %v1103_v62  ;;  %v1072_v47 = vadd.f32 %v1071_v57, %v1039_v3 }
 0x1ad   :  { %v1156_v5 = vmax.f32 %v1136_v2, 0.0 }
 0x1af   :  { %1165 = vst [vmem:[%s2522_s3 + $0x10] sm:$0xff] %v1156_v5 }
 0x1b0   :  { %v1104_v26 = vpop.f32.mrf.mxu2  ;;  %v1041_v1 = vpop.f32.mrf.mxu0 }
 0x1b1   :  { %v1105_v6 = vadd.f32 %v1104_v26, %v1072_v47  ;;  %v1137_v7 = vpop.f32.mrf.mxu3  ;;  %v1074_v8 = vpop.f32.mrf.mxu1  ;;  %v1042_v12 = vadd.f32 %v1041_v1, %v2470_v56 }
 0x1b3   :  { %v1138_v25 = vadd.f32 %v1137_v7, %v1105_v6  ;;  %v1075_v59 = vadd.f32 %v1074_v8, %v1042_v12 }
 0x1b5   :  { %v1157_v13 = vmax.f32 %v1138_v25, 0.0 }
 0x1b7   :  { %1166 = vst [vmem:[%s2522_s3 + $0x18] sm:$0xff] %v1157_v13 }
 0x1b8   :  { %v1107_v54 = vpop.f32.mrf.mxu2  ;;  %v1043_v15 = vpop.f32.mrf.mxu0 }
 0x1b9   :  { %v1108_v14 = vadd.f32 %v1107_v54, %v1075_v59  ;;  %v1140_v19 = vpop.f32.mrf.mxu3  ;;  %v1076_v16 = vpop.f32.mrf.mxu1  ;;  %v1044_v18 = vadd.f32 %v1043_v15, %v2473_v11 }
 0x1bb   :  { %v1141_v17 = vadd.f32 %v1140_v19, %v1108_v14  ;;  %v1077_v56 = vadd.f32 %v1076_v16, %v1044_v18 }
 0x1bd   :  { %v1158_v20 = vmax.f32 %v1141_v17, 0.0 }
 0x1bf   :  { %1167 = vst [vmem:[%s2522_s3 + $0x20] sm:$0xff] %v1158_v20 }
 0x1c0   :  { %v1109_v22 = vpop.f32.mrf.mxu2  ;;  %v1046_v27 = vpop.f32.mrf.mxu0 }
 0x1c1   :  { %v1110_v31 = vadd.f32 %v1109_v22, %v1077_v56  ;;  %v1142_v9 = vpop.f32.mrf.mxu3  ;;  %v1079_v23 = vpop.f32.mrf.mxu1  ;;  %v1047_v29 = vadd.f32 %v1046_v27, %v2476_v50 }
 0x1c3   :  { %v1143_v28 = vadd.f32 %v1142_v9, %v1110_v31  ;;  %v1080_v11 = vadd.f32 %v1079_v23, %v1047_v29 }
 0x1c5   :  { %v1159_v32 = vmax.f32 %v1143_v28, 0.0 }
 0x1c7   :  { %1168 = vst [vmem:[%s2522_s3 + $0x28] sm:$0xff] %v1159_v32 }
 0x1c8   :  { %v1112_v44 = vpop.f32.mrf.mxu2  ;;  %v1048_v10 = vpop.f32.mrf.mxu0 }
 0x1c9   :  { %v1113_v33 = vadd.f32 %v1112_v44, %v1080_v11  ;;  %v1145_v35 = vpop.f32.mrf.mxu3  ;;  %v1081_v4 = vpop.f32.mrf.mxu1  ;;  %v1049_v38 = vadd.f32 %v1048_v10, %v2479_v24 }
 0x1cb   :  { %v1146_v36 = vadd.f32 %v1145_v35, %v1113_v33  ;;  %v1082_v50 = vadd.f32 %v1081_v4, %v1049_v38 }
 0x1cd   :  { %v1160_v39 = vmax.f32 %v1146_v36, 0.0 }
 0x1cf   :  { %1169 = vst [vmem:[%s2522_s3 + $0x30] sm:$0xff] %v1160_v39 }
 0x1d0   :  { %v1114_v61 = vpop.f32.mrf.mxu2  ;;  %v1051_v42 = vpop.f32.mrf.mxu0 }
 0x1d1   :  { %v1115_v40 = vadd.f32 %v1114_v61, %v1082_v50  ;;  %v1147_v41 = vpop.f32.mrf.mxu3  ;;  %v1084_v43 = vpop.f32.mrf.mxu1  ;;  %v1052_v46 = vadd.f32 %v1051_v42, %v2481_v51 }
 0x1d3   :  { %v1148_v45 = vadd.f32 %v1147_v41, %v1115_v40  ;;  %v1085_v24 = vadd.f32 %v1084_v43, %v1052_v46 }
 0x1d5   :  { %v1161_v48 = vmax.f32 %v1148_v45, 0.0 }
 0x1d7   :  { %1170 = vst [vmem:[%s2522_s3 + $0x38] sm:$0xff] %v1161_v48 }
 0x1d8   :  { %v1117_v34 = vpop.f32.mrf.mxu2  ;;  %v1053_v53 = vpop.f32.mrf.mxu0 }
 0x1d9   :  { %v1118_v49 = vadd.f32 %v1117_v34, %v1085_v24  ;;  %v1150_v52 = vpop.f32.mrf.mxu3  ;;  %v1086_v21 = vpop.f32.mrf.mxu1 }
 0x1db   :  { %v1151_v55 = vadd.f32 %v1150_v52, %v1118_v49 }
 0x1dd   :  { %v1162_v58 = vmax.f32 %v1151_v55, 0.0 }
 0x1df   :  { %1171 = vst [vmem:[%s2522_s3 + $0x40] sm:$0xff] %v1162_v58 }
 0x1e0   :  { %v1119_v60 = vpop.f32.mrf.mxu2 }
 0x1e1   :  { %v1152_v37 = vpop.f32.mrf.mxu3 }

// kernel: encoder_forward.9
= control target key start
LH: loop header
LB: loop body
LE: loop exit
PB: predicated region body
PF: predicated region fallthrough
CT: control target
= control target key end

     0   :  { %s1754_s2 = inlined_call_operand.vmem [shape: f32[1152,128], index: 2, kind: input, shape index: {}]   ;;  %s1755_s0 = inlined_call_operand.vmem [shape: f32[72,1152], index: 0, kind: input, shape index: {}]   ;;  %s1756_s3 = inlined_call_operand.vmem [shape: f32[1,128], index: 3, kind: input, shape index: {}]   ;;  %s1757_s4 = inlined_call_operand.vmem [shape: f32[128,128], index: 4, kind: input, shape index: {}]   ;;  %s1758_s5 = inlined_call_operand.vmem [shape: f32[1,128], index: 5, kind: input, shape index: {}]   ;;  %s1759_s1 = inlined_call_operand.vmem [shape: f32[72,128], index: 1, kind: input, shape index: {}]   ;;  %s1760_s6 = inlined_call_operand.vmem [shape: f32[72,128], index: 6, kind: output, shape index: {}]  }
   0x1   :  { %v244_v0 = vld [vmem:[%s1754_s2 + $0x70] sm:$0xff]  ;;  %v245_v1 = vld [vmem:[%s1754_s2 + $0x78] sm:$0xff]  ;;  %v242_v5 = vld [vmem:[%s1754_s2 + $0x60] sm:$0xff] }
   0x2   :  { %v260_v2 = vld [vmem:[%s1754_s2 + $0xf0] sm:$0xff]  ;;  %v381_v3 = vpack.c.bf16 %v245_v1, %v244_v0  ;;  %v261_v4 = vld [vmem:[%s1754_s2 + $0xf8] sm:$0xff]  ;;  %v243_v6 = vld [vmem:[%s1754_s2 + $0x68] sm:$0xff] }
   0x3   :  { %v389_v7 = vpack.c.bf16 %v261_v4, %v260_v2  ;;  %v258_v8 = vld [vmem:[%s1754_s2 + $0xe0] sm:$0xff]  ;;  %v259_v9 = vld [vmem:[%s1754_s2 + $0xe8] sm:$0xff]  ;;  %v380_v10 = vpack.c.bf16 %v243_v6, %v242_v5  ;;  %v240_v12 = vld [vmem:[%s1754_s2 + $0x50] sm:$0xff] }
   0x4   :  { %853 = vmatpush.bf16.msra.mxu2 %v381_v3  ;;  %450 = vmatpush.bf16.msra.mxu0 %v381_v3  ;;  %v388_v11 = vpack.c.bf16 %v259_v9, %v258_v8  ;;  %v241_v13 = vld [vmem:[%s1754_s2 + $0x58] sm:$0xff]  ;;  %v256_v14 = vld [vmem:[%s1754_s2 + $0xd0] sm:$0xff]  ;;  %v238_v18 = vld [vmem:[%s1754_s2 + $0x40] sm:$0xff] }
   0x5   :  { %861 = vmatpush.bf16.msra.mxu3 %v389_v7  ;;  %483 = vmatpush.bf16.msra.mxu1 %v389_v7  ;;  %v257_v15 = vld [vmem:[%s1754_s2 + $0xd8] sm:$0xff]  ;;  %v379_v16 = vpack.c.bf16 %v241_v13, %v240_v12  ;;  %v239_v19 = vld [vmem:[%s1754_s2 + $0x48] sm:$0xff]  ;;  %v254_v20 = vld [vmem:[%s1754_s2 + $0xc0] sm:$0xff] }
   0x6   :  { %v387_v17 = vpack.c.bf16 %v257_v15, %v256_v14  ;;  %v255_v21 = vld [vmem:[%s1754_s2 + $0xc8] sm:$0xff]  ;;  %v378_v22 = vpack.c.bf16 %v239_v19, %v238_v18  ;;  %v236_v24 = vld [vmem:[%s1754_s2 + $0x30] sm:$0xff]  ;;  %v237_v25 = vld [vmem:[%s1754_s2 + $0x38] sm:$0xff] }
   0x7   :  { %v386_v23 = vpack.c.bf16 %v255_v21, %v254_v20  ;;  %v252_v26 = vld [vmem:[%s1754_s2 + $0xb0] sm:$0xff]  ;;  %v253_v27 = vld [vmem:[%s1754_s2 + $0xb8] sm:$0xff]  ;;  %v377_v28 = vpack.c.bf16 %v237_v25, %v236_v24  ;;  %v234_v30 = vld [vmem:[%s1754_s2 + $0x20] sm:$0xff] }
   0x8   :  { %854 = vmatpush.bf16.msra.mxu2 %v380_v10  ;;  %451 = vmatpush.bf16.msra.mxu0 %v380_v10  ;;  %v385_v29 = vpack.c.bf16 %v253_v27, %v252_v26  ;;  %v235_v31 = vld [vmem:[%s1754_s2 + $0x28] sm:$0xff]  ;;  %v250_v32 = vld [vmem:[%s1754_s2 + $0xa0] sm:$0xff]  ;;  %v232_v36 = vld [vmem:[%s1754_s2 + $0x10] sm:$0xff] }
   0x9   :  { %862 = vmatpush.bf16.msra.mxu3 %v388_v11  ;;  %484 = vmatpush.bf16.msra.mxu1 %v388_v11  ;;  %v251_v33 = vld [vmem:[%s1754_s2 + $0xa8] sm:$0xff]  ;;  %v376_v34 = vpack.c.bf16 %v235_v31, %v234_v30  ;;  %v233_v37 = vld [vmem:[%s1754_s2 + $0x18] sm:$0xff]  ;;  %v248_v38 = vld [vmem:[%s1754_s2 + $0x90] sm:$0xff] }
   0xa   :  { %v384_v35 = vpack.c.bf16 %v251_v33, %v250_v32  ;;  %v249_v39 = vld [vmem:[%s1754_s2 + $0x98] sm:$0xff]  ;;  %v230_v40 = vld [vmem:[%s1754_s2] sm:$0xff]  ;;  %v231_v41 = vld [vmem:[%s1754_s2 + $0x8] sm:$0xff]  ;;  %v375_v43 = vpack.c.bf16 %v233_v37, %v232_v36 }
   0xb   :  { %v59_v42 = vld [vmem:[%s1755_s0 + $0x120] sm:$0xff]  ;;  %v247_v45 = vld [vmem:[%s1754_s2 + $0x88] sm:$0xff]  ;;  %v383_v49 = vpack.c.bf16 %v249_v39, %v248_v38  ;;  %v69_v51 = vld [vmem:[%s1755_s0 + $0x170] sm:$0xff]  ;;  %v374_v62 = vpack.c.bf16 %v231_v41, %v230_v40 }
   0xc   :  { %855 = vmatpush.bf16.msra.mxu2 %v379_v16  ;;  %452 = vmatpush.bf16.msra.mxu0 %v379_v16  ;;  %v246_v44 = vld [vmem:[%s1754_s2 + $0x80] sm:$0xff]  ;;  %v68_v46 = vld [vmem:[%s1755_s0 + $0x168] sm:$0xff]  ;;  %v276_v52 = vld [vmem:[%s1754_s2 + $0x170] sm:$0xff]  ;;  %v140_v56 = vmax.f32 %v59_v42, 0.0  ;;  %v150_v0 = vmax.f32 %v69_v51, 0.0 }
   0xd   :  { %863 = vmatpush.bf16.msra.mxu3 %v387_v17  ;;  %485 = vmatpush.bf16.msra.mxu1 %v387_v17  ;;  %v23_v47 = vld [vmem:[%s1755_s0] sm:$0xff]  ;;  %v32_v48 = vld [vmem:[%s1755_s0 + $0x48] sm:$0xff]  ;;  %v277_v53 = vld [vmem:[%s1754_s2 + $0x178] sm:$0xff]  ;;  %v149_v57 = vmax.f32 %v68_v46, 0.0  ;;  %v382_v1 = vpack.c.bf16 %v247_v45, %v246_v44 }
   0xe   :  { %v60_v50 = vld [vmem:[%s1755_s0 + $0x128] sm:$0xff]  ;;  %v33_v55 = vld [vmem:[%s1755_s0 + $0x50] sm:$0xff]  ;;  %v293_v59 = vld [vmem:[%s1754_s2 + $0x1f8] sm:$0xff]  ;;  %v104_v60 = vmax.f32 %v23_v47, 0.0  ;;  %v113_v61 = vmax.f32 %v32_v48, 0.0  ;;  %v397_v2 = vpack.c.bf16 %v277_v53, %v276_v52 }
   0xf   :  { %v24_v54 = vld [vmem:[%s1755_s0 + $0x8] sm:$0xff]  ;;  %v292_v58 = vld [vmem:[%s1754_s2 + $0x1f0] sm:$0xff]  ;;  %v141_v63 = vmax.f32 %v60_v50, 0.0  ;;  %v309_v4 = vld [vmem:[%s1754_s2 + $0x278] sm:$0xff]  ;;  %v114_v6 = vmax.f32 %v33_v55, 0.0  ;;  %v203_v11 = vpack.c.bf16 %v149_v57, %v140_v56 }
  0x10   :  { %856 = vmatpush.bf16.msra.mxu2 %v378_v22  ;;  %453 = vmatpush.bf16.msra.mxu0 %v378_v22  ;;  %v308_v3 = vld [vmem:[%s1754_s2 + $0x270] sm:$0xff]  ;;  %v105_v5 = vmax.f32 %v24_v54, 0.0  ;;  %v405_v7 = vpack.c.bf16 %v293_v59, %v292_v58  ;;  %v274_v8 = vld [vmem:[%s1754_s2 + $0x160] sm:$0xff]  ;;  %v275_v9 = vld [vmem:[%s1754_s2 + $0x168] sm:$0xff]  ;;  %v185_v13 = vpack.c.bf16 %v113_v61, %v104_v60 }
  0x11   :  { %864 = vmatpush.bf16.msra.mxu3 %v386_v23  ;;  %486 = vmatpush.bf16.msra.mxu1 %v386_v23  ;;  %v290_v10 = vld [vmem:[%s1754_s2 + $0x1e0] sm:$0xff]  ;;  %v291_v12 = vld [vmem:[%s1754_s2 + $0x1e8] sm:$0xff]  ;;  %v324_v14 = vld [vmem:[%s1754_s2 + $0x2f0] sm:$0xff]  ;;  %v204_v16 = vpack.c.bf16 %v150_v0, %v141_v63  ;;  %v413_v17 = vpack.c.bf16 %v309_v4, %v308_v3  ;;  %v396_v18 = vpack.c.bf16 %v275_v9, %v274_v8 }
  0x12   :  { %v325_v15 = vld [vmem:[%s1754_s2 + $0x2f8] sm:$0xff]  ;;  %v186_v19 = vpack.c.bf16 %v114_v6, %v105_v5  ;;  %v306_v20 = vld [vmem:[%s1754_s2 + $0x260] sm:$0xff]  ;;  %v307_v21 = vld [vmem:[%s1754_s2 + $0x268] sm:$0xff]  ;;  %v404_v22 = vpack.c.bf16 %v291_v12, %v290_v10 }
  0x13   :  { %v272_v23 = vld [vmem:[%s1754_s2 + $0x150] sm:$0xff]  ;;  %v273_v24 = vld [vmem:[%s1754_s2 + $0x158] sm:$0xff]  ;;  %v421_v26 = vpack.c.bf16 %v325_v15, %v324_v14  ;;  %v412_v30 = vpack.c.bf16 %v307_v21, %v306_v20  ;;  %v270_v37 = vld [vmem:[%s1754_s2 + $0x140] sm:$0xff] }
  0x14   :  { %857 = vmatpush.bf16.msra.mxu2 %v377_v28  ;;  %454 = vmatpush.bf16.msra.mxu0 %v377_v28  ;;  %v288_v25 = vld [vmem:[%s1754_s2 + $0x1d0] sm:$0xff]  ;;  %v289_v27 = vld [vmem:[%s1754_s2 + $0x1d8] sm:$0xff]  ;;  %v322_v28 = vld [vmem:[%s1754_s2 + $0x2e0] sm:$0xff]  ;;  %v395_v31 = vpack.c.bf16 %v273_v24, %v272_v23 }
  0x15   :  { %865 = vmatpush.bf16.msra.mxu3 %v385_v29  ;;  %487 = vmatpush.bf16.msra.mxu1 %v385_v29  ;;  %v323_v29 = vld [vmem:[%s1754_s2 + $0x2e8] sm:$0xff]  ;;  %v77_v32 = vld [vmem:[%s1755_s0 + $0x1b0] sm:$0xff]  ;;  %v86_v36 = vld [vmem:[%s1755_s0 + $0x1f8] sm:$0xff] }
  0x16   :  { %v304_v33 = vld [vmem:[%s1754_s2 + $0x250] sm:$0xff]  ;;  %v271_v38 = vld [vmem:[%s1754_s2 + $0x148] sm:$0xff]  ;;  %v286_v39 = vld [vmem:[%s1754_s2 + $0x1c0] sm:$0xff]  ;;  %v420_v40 = vpack.c.bf16 %v323_v29, %v322_v28  ;;  %v158_v54 = vmax.f32 %v77_v32, 0.0  ;;  %v167_v60 = vmax.f32 %v86_v36, 0.0 }
  0x17   :  { %v78_v41 = vld [vmem:[%s1755_s0 + $0x1b8] sm:$0xff]  ;;  %v87_v42 = vld [vmem:[%s1755_s0 + $0x200] sm:$0xff]  ;;  %v320_v44 = vld [vmem:[%s1754_s2 + $0x2d0] sm:$0xff]  ;;  %v394_v50 = vpack.c.bf16 %v271_v38, %v270_v37 }
  0x18   :  { %858 = vmatpush.bf16.msra.mxu2 %v376_v34  ;;  %455 = vmatpush.bf16.msra.mxu0 %v376_v34  ;;  %v305_v34 = vld [vmem:[%s1754_s2 + $0x258] sm:$0xff]  ;;  %v268_v46 = vld [vmem:[%s1754_s2 + $0x130] sm:$0xff]  ;;  %v302_v52 = vld [vmem:[%s1754_s2 + $0x240] sm:$0xff]  ;;  %v168_v3 = vmax.f32 %v87_v42, 0.0  ;;  %v212_v15 = vpack.c.bf16 %v167_v60, %v158_v54 }
  0x19   :  { %866 = vmatpush.bf16.msra.mxu3 %v384_v35  ;;  %488 = vmatpush.bf16.msra.mxu1 %v384_v35  ;;  %v403_v35 = vpack.c.bf16 %v289_v27, %v288_v25  ;;  %v321_v45 = vld [vmem:[%s1754_s2 + $0x2d8] sm:$0xff]  ;;  %v411_v47 = vpack.c.bf16 %v305_v34, %v304_v33  ;;  %v41_v48 = vld [vmem:[%s1755_s0 + $0x90] sm:$0xff]  ;;  %v303_v53 = vld [vmem:[%s1754_s2 + $0x248] sm:$0xff] }
  0x1a   :  { %v269_v51 = vld [vmem:[%s1754_s2 + $0x138] sm:$0xff]  ;;  %v284_v56 = vld [vmem:[%s1754_s2 + $0x1b0] sm:$0xff]  ;;  %v51_v58 = vld [vmem:[%s1755_s0 + $0xe0] sm:$0xff]  ;;  %v419_v59 = vpack.c.bf16 %v321_v45, %v320_v44  ;;  %v410_v4 = vpack.c.bf16 %v303_v53, %v302_v52 }
  0x1b   :  { %v42_v57 = vld [vmem:[%s1755_s0 + $0x98] sm:$0xff]  ;;  %v318_v0 = vld [vmem:[%s1754_s2 + $0x2c0] sm:$0xff]  ;;  %v393_v5 = vpack.c.bf16 %v269_v51, %v268_v46  ;;  %v300_v6 = vld [vmem:[%s1754_s2 + $0x230] sm:$0xff]  ;;  %v132_v9 = vmax.f32 %v51_v58, 0.0 }
  0x1c   :  { %859 = vmatpush.bf16.msra.mxu2 %v375_v43  ;;  %456 = vmatpush.bf16.msra.mxu0 %v375_v43  ;;  %v287_v43 = vld [vmem:[%s1754_s2 + $0x1c8] sm:$0xff]  ;;  %v285_v61 = vld [vmem:[%s1754_s2 + $0x1b8] sm:$0xff]  ;;  %v123_v8 = vmax.f32 %v42_v57, 0.0  ;;  %v298_v24 = vld [vmem:[%s1754_s2 + $0x220] sm:$0xff] }
  0x1d   :  { %867 = vmatpush.bf16.msra.mxu3 %v383_v49  ;;  %489 = vmatpush.bf16.msra.mxu1 %v383_v49  ;;  %v50_v49 = vld [vmem:[%s1755_s0 + $0xd8] sm:$0xff]  ;;  %v402_v55 = vpack.c.bf16 %v287_v43, %v286_v39  ;;  %v401_v10 = vpack.c.bf16 %v285_v61, %v284_v56  ;;  %v267_v12 = vld [vmem:[%s1754_s2 + $0x128] sm:$0xff]  ;;  %v264_v27 = vld [vmem:[%s1754_s2 + $0x110] sm:$0xff] }
  0x1e   :  { %v131_v63 = vmax.f32 %v50_v49, 0.0  ;;  %v195_v23 = vpack.c.bf16 %v132_v9, %v123_v8  ;;  %v299_v25 = vld [vmem:[%s1754_s2 + $0x228] sm:$0xff]  ;;  %v265_v28 = vld [vmem:[%s1754_s2 + $0x118] sm:$0xff]  ;;  %v280_v29 = vld [vmem:[%s1754_s2 + $0x190] sm:$0xff] }
  0x1f   :  { %v314_v32 = vld [vmem:[%s1754_s2 + $0x2a0] sm:$0xff]  ;;  %v315_v33 = vld [vmem:[%s1754_s2 + $0x2a8] sm:$0xff]  ;;  %v408_v34 = vpack.c.bf16 %v299_v25, %v298_v24  ;;  %v391_v38 = vpack.c.bf16 %v265_v28, %v264_v27  ;;  %v296_v39 = vld [vmem:[%s1754_s2 + $0x210] sm:$0xff] }
  0x20   :  { %860 = vmatpush.bf16.msra.mxu2 %v374_v62  ;;  %457 = vmatpush.bf16.msra.mxu0 %v374_v62  ;;  %v122_v62 = vmax.f32 %v41_v48, 0.0  ;;  %v263_v36 = vld [vmem:[%s1754_s2 + $0x108] sm:$0xff]  ;;  %v95_v37 = vld [vmem:[%s1755_s0 + $0x240] sm:$0xff]  ;;  %v416_v44 = vpack.c.bf16 %v315_v33, %v314_v32  ;;  %v341_v48 = vld [vmem:[%s1754_s2 + $0x378] sm:$0xff] }
  0x21   :  { %868 = vmatpush.bf16.msra.mxu3 %v382_v1  ;;  %490 = vmatpush.bf16.msra.mxu1 %v382_v1  ;;  %v319_v1 = vld [vmem:[%s1754_s2 + $0x2c8] sm:$0xff]  ;;  %v27_v45 = vld [vmem:[%s1755_s0 + $0x20] sm:$0xff]  ;;  %v356_v49 = vld [vmem:[%s1754_s2 + $0x3f0] sm:$0xff]  ;;  %v176_v58 = vmax.f32 %v95_v37, 0.0 }
  0x22   :  { %v418_v14 = vpack.c.bf16 %v319_v1, %v318_v0  ;;  %v279_v43 = vld [vmem:[%s1754_s2 + $0x188] sm:$0xff]  ;;  %v357_v51 = vld [vmem:[%s1754_s2 + $0x3f8] sm:$0xff]  ;;  %v312_v52 = vld [vmem:[%s1754_s2 + $0x290] sm:$0xff] }
  0x23   :  { %468 = vmatmul.bf16.vlgmr.msra.gmra.mxu2 %v203_v11  ;;  %458 = vmatmul.bf16.vlgmr.msra.gmra.mxu0 %v185_v13  ;;  %v266_v11 = vld [vmem:[%s1754_s2 + $0x120] sm:$0xff]  ;;  %v36_v46 = vld [vmem:[%s1755_s0 + $0x68] sm:$0xff]  ;;  %v313_v53 = vld [vmem:[%s1754_s2 + $0x298] sm:$0xff]  ;;  %v437_v1 = vpack.c.bf16 %v357_v51, %v356_v49 }
  0x24   :  { %516 = vmatpush.bf16.msrb.mxu2 %v397_v2  ;;  %501 = vmatmul.bf16.vlgmr.msra.gmra.mxu3 %v204_v16  ;;  %v159_v2 = vmax.f32 %v78_v41, 0.0  ;;  %v282_v13 = vld [vmem:[%s1754_s2 + $0x1a0] sm:$0xff]  ;;  %v283_v16 = vld [vmem:[%s1754_s2 + $0x1a8] sm:$0xff]  ;;  %v372_v61 = vld [vmem:[%s1754_s2 + $0x470] sm:$0xff]  ;;  %v117_v0 = vmax.f32 %v36_v46, 0.0 }
  0x25   :  { %549 = vmatpush.bf16.msrb.mxu3 %v405_v7  ;;  %582 = vmatpush.bf16.msrb.mxu0 %v413_v17  ;;  %v301_v7 = vld [vmem:[%s1754_s2 + $0x238] sm:$0xff]  ;;  %v194_v17 = vpack.c.bf16 %v131_v63, %v122_v62  ;;  %v278_v41 = vld [vmem:[%s1754_s2 + $0x180] sm:$0xff]  ;;  %v96_v54 = vld [vmem:[%s1755_s0 + $0x248] sm:$0xff]  ;;  %v108_v63 = vmax.f32 %v27_v45, 0.0 }
  0x26   :  { %491 = vmatmul.bf16.vlgmr.msra.gmra.mxu1 %v186_v19  ;;  %v317_v19 = vld [vmem:[%s1754_s2 + $0x2b8] sm:$0xff]  ;;  %v213_v20 = vpack.c.bf16 %v168_v3, %v159_v2  ;;  %v409_v21 = vpack.c.bf16 %v301_v7, %v300_v6  ;;  %v294_v56 = vld [vmem:[%s1754_s2 + $0x200] sm:$0xff]  ;;  %v295_v57 = vld [vmem:[%s1754_s2 + $0x208] sm:$0xff]  ;;  %v415_v2 = vpack.c.bf16 %v313_v53, %v312_v52 }
  0x27   :  { %615 = vmatpush.bf16.msrb.mxu1 %v421_v26  ;;  %v400_v26 = vpack.c.bf16 %v283_v16, %v282_v13  ;;  %v373_v62 = vld [vmem:[%s1754_s2 + $0x478] sm:$0xff]  ;;  %v338_v3 = vld [vmem:[%s1754_s2 + $0x360] sm:$0xff]  ;;  %v406_v6 = vpack.c.bf16 %v295_v57, %v294_v56  ;;  %v28_v7 = vld [vmem:[%s1755_s0 + $0x28] sm:$0xff]  ;;  %v189_v16 = vpack.c.bf16 %v117_v0, %v108_v63 }
  0x28   :  { %517 = vmatpush.bf16.msrb.mxu2 %v396_v18  ;;  %v316_v18 = vld [vmem:[%s1754_s2 + $0x2b0] sm:$0xff]  ;;  %v310_v9 = vld [vmem:[%s1754_s2 + $0x280] sm:$0xff]  ;;  %v337_v24 = vld [vmem:[%s1754_s2 + $0x358] sm:$0xff] }
  0x29   :  { %550 = vmatpush.bf16.msrb.mxu3 %v404_v22  ;;  %583 = vmatpush.bf16.msrb.mxu0 %v412_v30  ;;  %v392_v22 = vpack.c.bf16 %v267_v12, %v266_v11  ;;  %v417_v30 = vpack.c.bf16 %v317_v19, %v316_v18  ;;  %v37_v8 = vld [vmem:[%s1755_s0 + $0x70] sm:$0xff]  ;;  %v445_v11 = vpack.c.bf16 %v373_v62, %v372_v61  ;;  %v354_v13 = vld [vmem:[%s1754_s2 + $0x3e0] sm:$0xff]  ;;  %v371_v27 = vld [vmem:[%s1754_s2 + $0x468] sm:$0xff] }
  0x2a   :  { %v118_v18 = vmax.f32 %v37_v8, 0.0  ;;  %v370_v25 = vld [vmem:[%s1754_s2 + $0x460] sm:$0xff]  ;;  %v352_v28 = vld [vmem:[%s1754_s2 + $0x3d0] sm:$0xff]  ;;  %v34_v37 = vld [vmem:[%s1755_s0 + $0x58] sm:$0xff] }
  0x2b   :  { %616 = vmatpush.bf16.msrb.mxu1 %v420_v40  ;;  %v297_v40 = vld [vmem:[%s1754_s2 + $0x218] sm:$0xff]  ;;  %v334_v33 = vld [vmem:[%s1754_s2 + $0x340] sm:$0xff]  ;;  %v115_v45 = vmax.f32 %v34_v37, 0.0  ;;  %v367_v0 = vld [vmem:[%s1754_s2 + $0x448] sm:$0xff] }
  0x2c   :  { %518 = vmatpush.bf16.msrb.mxu2 %v395_v31  ;;  %v281_v31 = vld [vmem:[%s1754_s2 + $0x198] sm:$0xff]  ;;  %v55_v51 = vld [vmem:[%s1755_s0 + $0x100] sm:$0xff] }
  0x2d   :  { %551 = vmatpush.bf16.msrb.mxu3 %v403_v35  ;;  %584 = vmatpush.bf16.msrb.mxu0 %v411_v47  ;;  %v262_v35 = vld [vmem:[%s1754_s2 + $0x100] sm:$0xff]  ;;  %v399_v42 = vpack.c.bf16 %v281_v31, %v280_v29  ;;  %v340_v47 = vld [vmem:[%s1754_s2 + $0x370] sm:$0xff]  ;;  %v353_v29 = vld [vmem:[%s1754_s2 + $0x3d8] sm:$0xff]  ;;  %v444_v31 = vpack.c.bf16 %v371_v27, %v370_v25 }
  0x2e   :  { %v429_v60 = vpack.c.bf16 %v341_v48, %v340_v47  ;;  %v435_v32 = vpack.c.bf16 %v353_v29, %v352_v28  ;;  %v333_v62 = vld [vmem:[%s1754_s2 + $0x338] sm:$0xff]  ;;  %v366_v63 = vld [vmem:[%s1754_s2 + $0x440] sm:$0xff]  ;;  %v331_v27 = vld [vmem:[%s1754_s2 + $0x328] sm:$0xff] }
  0x2f   :  { %617 = vmatpush.bf16.msrb.mxu1 %v419_v59  ;;  %v398_v59 = vpack.c.bf16 %v279_v43, %v278_v41  ;;  %v35_v43 = vld [vmem:[%s1755_s0 + $0x60] sm:$0xff]  ;;  %v364_v28 = vld [vmem:[%s1754_s2 + $0x430] sm:$0xff] }
  0x30   :  { %519 = vmatpush.bf16.msrb.mxu2 %v394_v50  ;;  %v407_v50 = vpack.c.bf16 %v297_v40, %v296_v39  ;;  %v54_v39 = vld [vmem:[%s1755_s0 + $0xf8] sm:$0xff]  ;;  %v116_v49 = vmax.f32 %v35_v43, 0.0  ;;  %v63_v8 = vld [vmem:[%s1755_s0 + $0x140] sm:$0xff] }
  0x31   :  { %552 = vmatpush.bf16.msrb.mxu3 %v402_v55  ;;  %585 = vmatpush.bf16.msrb.mxu0 %v410_v4  ;;  %v390_v55 = vpack.c.bf16 %v263_v36, %v262_v35  ;;  %v339_v4 = vld [vmem:[%s1754_s2 + $0x368] sm:$0xff]  ;;  %v368_v35 = vld [vmem:[%s1754_s2 + $0x450] sm:$0xff]  ;;  %v369_v36 = vld [vmem:[%s1754_s2 + $0x458] sm:$0xff]  ;;  %v135_v47 = vmax.f32 %v54_v39, 0.0 }
  0x32   :  { %v428_v12 = vpack.c.bf16 %v339_v4, %v338_v3  ;;  %v443_v41 = vpack.c.bf16 %v369_v36, %v368_v35  ;;  %v348_v3 = vld [vmem:[%s1754_s2 + $0x3b0] sm:$0xff]  ;;  %v349_v4 = vld [vmem:[%s1754_s2 + $0x3b8] sm:$0xff] }
  0x33   :  { %618 = vmatpush.bf16.msrb.mxu1 %v418_v14  ;;  %473 = vmatmul.bf16.gmra.mxu2 %v212_v15  ;;  %v355_v14 = vld [vmem:[%s1754_s2 + $0x3e8] sm:$0xff]  ;;  %v221_v15 = vpack.c.bf16 %v176_v58, %v176_v58  ;;  %v350_v58 = vld [vmem:[%s1754_s2 + $0x3c0] sm:$0xff]  ;;  %v81_v35 = vld [vmem:[%s1755_s0 + $0x1d0] sm:$0xff] }
  0x34   :  { %520 = vmatpush.bf16.msrb.mxu2 %v393_v5  ;;  %463 = vmatmul.bf16.gmra.mxu0 %v194_v17  ;;  %v177_v5 = vmax.f32 %v96_v54, 0.0  ;;  %v109_v17 = vmax.f32 %v28_v7, 0.0  ;;  %v52_v7 = vld [vmem:[%s1755_s0 + $0xe8] sm:$0xff]  ;;  %v329_v39 = vld [vmem:[%s1754_s2 + $0x318] sm:$0xff] }
  0x35   :  { %553 = vmatpush.bf16.msrb.mxu3 %v401_v10  ;;  %586 = vmatpush.bf16.msrb.mxu0 %v409_v21  ;;  %v311_v10 = vld [vmem:[%s1754_s2 + $0x288] sm:$0xff]  ;;  %v436_v21 = vpack.c.bf16 %v355_v14, %v354_v13  ;;  %v133_v13 = vmax.f32 %v52_v7, 0.0  ;;  %v144_v14 = vmax.f32 %v63_v8, 0.0 }
  0x36   :  { %506 = vmatmul.bf16.gmra.mxu3 %v213_v20  ;;  %496 = vmatmul.bf16.gmra.mxu1 %v195_v23  ;;  %v222_v19 = vpack.c.bf16 %v177_v5, %v177_v5  ;;  %v414_v20 = vpack.c.bf16 %v311_v10, %v310_v9  ;;  %v336_v23 = vld [vmem:[%s1754_s2 + $0x350] sm:$0xff]  ;;  %v43_v5 = vld [vmem:[%s1755_s0 + $0xa0] sm:$0xff]  ;;  %v72_v9 = vld [vmem:[%s1755_s0 + $0x188] sm:$0xff] }
  0x37   :  { %619 = vmatpush.bf16.msrb.mxu1 %v417_v30  ;;  %v25_v30 = vld [vmem:[%s1755_s0 + $0x10] sm:$0xff]  ;;  %v44_v10 = vld [vmem:[%s1755_s0 + $0xa8] sm:$0xff] }
  0x38   :  { %521 = vmatpush.bf16.msrb.mxu2 %v392_v22  ;;  %v190_v22 = vpack.c.bf16 %v118_v18, %v109_v17  ;;  %v64_v18 = vld [vmem:[%s1755_s0 + $0x148] sm:$0xff] }
  0x39   :  { %554 = vmatpush.bf16.msrb.mxu3 %v400_v26  ;;  %587 = vmatpush.bf16.msrb.mxu0 %v408_v34  ;;  %v427_v26 = vpack.c.bf16 %v337_v24, %v336_v23  ;;  %v335_v34 = vld [vmem:[%s1754_s2 + $0x348] sm:$0xff] }
  0x3a   :  { %v426_v40 = vpack.c.bf16 %v335_v34, %v334_v33  ;;  %v61_v33 = vld [vmem:[%s1755_s0 + $0x130] sm:$0xff]  ;;  %v70_v34 = vld [vmem:[%s1755_s0 + $0x178] sm:$0xff] }
  0x3b   :  { %620 = vmatpush.bf16.msrb.mxu1 %v416_v44  ;;  %v106_v44 = vmax.f32 %v25_v30, 0.0  ;;  %v365_v30 = vld [vmem:[%s1754_s2 + $0x438] sm:$0xff] }
  0x3c   :  { %522 = vmatpush.bf16.msrb.mxu2 %v391_v38  ;;  %v45_v38 = vld [vmem:[%s1755_s0 + $0xb0] sm:$0xff]  ;;  %v441_v36 = vpack.c.bf16 %v365_v30, %v364_v28  ;;  %v40_v30 = vld [vmem:[%s1755_s0 + $0x88] sm:$0xff] }
  0x3d   :  { %555 = vmatpush.bf16.msrb.mxu3 %v399_v42  ;;  %588 = vmatpush.bf16.msrb.mxu0 %v407_v50  ;;  %v26_v42 = vld [vmem:[%s1755_s0 + $0x18] sm:$0xff]  ;;  %v126_v46 = vmax.f32 %v45_v38, 0.0  ;;  %v187_v52 = vpack.c.bf16 %v115_v45, %v106_v44  ;;  %v328_v38 = vld [vmem:[%s1754_s2 + $0x310] sm:$0xff] }
  0x3e   :  { %v107_v48 = vmax.f32 %v26_v42, 0.0  ;;  %v46_v50 = vld [vmem:[%s1755_s0 + $0xb8] sm:$0xff]  ;;  %v423_v43 = vpack.c.bf16 %v329_v39, %v328_v38  ;;  %v344_v45 = vld [vmem:[%s1754_s2 + $0x390] sm:$0xff] }
  0x3f   :  { %621 = vmatpush.bf16.msrb.mxu1 %v415_v2  ;;  %v198_v53 = vpack.c.bf16 %v135_v47, %v126_v46  ;;  %v127_v54 = vmax.f32 %v46_v50, 0.0  ;;  %v442_v2 = vpack.c.bf16 %v367_v0, %v366_v63  ;;  %v90_v42 = vld [vmem:[%s1755_s0 + $0x218] sm:$0xff]  ;;  %v142_v50 = vmax.f32 %v61_v33, 0.0  ;;  %v326_v0 = vld [vmem:[%s1754_s2 + $0x300] sm:$0xff]  ;;  %v97_v28 = vld [vmem:[%s1755_s0 + $0x250] sm:$0xff] }
  0x40   :  { %523 = vmatpush.bf16.msrb.mxu2 %v390_v55  ;;  %v136_v55 = vmax.f32 %v55_v51, 0.0  ;;  %v188_v56 = vpack.c.bf16 %v116_v49, %v107_v48  ;;  %v345_v46 = vld [vmem:[%s1754_s2 + $0x398] sm:$0xff]  ;;  %v71_v48 = vld [vmem:[%s1755_s0 + $0x180] sm:$0xff]  ;;  %v151_v51 = vmax.f32 %v70_v34, 0.0  ;;  %v121_v34 = vmax.f32 %v40_v30, 0.0  ;;  %v29_v39 = vld [vmem:[%s1755_s0 + $0x30] sm:$0xff] }
  0x41   :  { %556 = vmatpush.bf16.msrb.mxu3 %v398_v59  ;;  %589 = vmatpush.bf16.msrb.mxu0 %v406_v6  ;;  %v351_v59 = vld [vmem:[%s1754_s2 + $0x3c8] sm:$0xff]  ;;  %v433_v6 = vpack.c.bf16 %v349_v4, %v348_v3  ;;  %v62_v47 = vld [vmem:[%s1755_s0 + $0x138] sm:$0xff]  ;;  %v431_v49 = vpack.c.bf16 %v345_v46, %v344_v45  ;;  %v110_v45 = vmax.f32 %v29_v39, 0.0 }
  0x42   :  { %v199_v57 = vpack.c.bf16 %v136_v55, %v127_v54  ;;  %v434_v61 = vpack.c.bf16 %v351_v59, %v350_v58  ;;  %v143_v54 = vmax.f32 %v62_v47, 0.0  ;;  %v152_v55 = vmax.f32 %v71_v48, 0.0  ;;  %v361_v4 = vld [vmem:[%s1754_s2 + $0x418] sm:$0xff] }
  0x43   :  { %478 = vmatmul.bf16.gmra.mxu2 %v221_v15  ;;  %622 = vmatpush.bf16.msrb.mxu1 %v414_v20  ;;  %v153_v15 = vmax.f32 %v72_v9, 0.0  ;;  %v205_v58 = vpack.c.bf16 %v151_v51, %v142_v50  ;;  %v358_v9 = vld [vmem:[%s1754_s2 + $0x400] sm:$0xff]  ;;  %v74_v30 = vld [vmem:[%s1755_s0 + $0x198] sm:$0xff] }
  0x44   :  { %648 = vmatpush.bf16.msra.mxu2 %v429_v60  ;;  %590 = vmatmul.bf16.vlgmr.msrb.gmra.mxu0 %v189_v16  ;;  %v332_v60 = vld [vmem:[%s1754_s2 + $0x330] sm:$0xff]  ;;  %v125_v16 = vmax.f32 %v44_v10, 0.0  ;;  %v359_v10 = vld [vmem:[%s1754_s2 + $0x408] sm:$0xff] }
  0x45   :  { %681 = vmatpush.bf16.msra.mxu3 %v437_v1  ;;  %714 = vmatpush.bf16.msra.mxu0 %v445_v11  ;;  %v425_v1 = vpack.c.bf16 %v333_v62, %v332_v60  ;;  %v53_v11 = vld [vmem:[%s1755_s0 + $0xf0] sm:$0xff]  ;;  %v206_v62 = vpack.c.bf16 %v152_v55, %v143_v54 }
  0x46   :  { %511 = vmatmul.bf16.gmra.mxu3 %v222_v19  ;;  %623 = vmatmul.bf16.vlgmr.msrb.gmra.mxu1 %v190_v22  ;;  %v134_v17 = vmax.f32 %v53_v11, 0.0  ;;  %v73_v19 = vld [vmem:[%s1755_s0 + $0x190] sm:$0xff]  ;;  %v145_v22 = vmax.f32 %v64_v18, 0.0  ;;  %v79_v11 = vld [vmem:[%s1755_s0 + $0x1c0] sm:$0xff] }
  0x47   :  { %v154_v23 = vmax.f32 %v73_v19, 0.0 }
  0x48   :  { %649 = vmatpush.bf16.msra.mxu2 %v428_v12  ;;  %v124_v12 = vmax.f32 %v43_v5, 0.0  ;;  %v197_v24 = vpack.c.bf16 %v134_v17, %v125_v16  ;;  %v342_v5 = vld [vmem:[%s1754_s2 + $0x380] sm:$0xff]  ;;  %v89_v16 = vld [vmem:[%s1755_s0 + $0x210] sm:$0xff]  ;;  %v160_v17 = vmax.f32 %v79_v11, 0.0 }
  0x49   :  { %682 = vmatpush.bf16.msra.mxu3 %v436_v21  ;;  %715 = vmatpush.bf16.msra.mxu0 %v444_v31  ;;  %v207_v21 = vpack.c.bf16 %v153_v15, %v144_v14  ;;  %v208_v25 = vpack.c.bf16 %v154_v23, %v145_v22  ;;  %v346_v31 = vld [vmem:[%s1754_s2 + $0x3a0] sm:$0xff]  ;;  %v438_v14 = vpack.c.bf16 %v359_v10, %v358_v9  ;;  %v80_v15 = vld [vmem:[%s1755_s0 + $0x1c8] sm:$0xff] }
  0x4a   :  { %v196_v20 = vpack.c.bf16 %v133_v13, %v124_v12  ;;  %v88_v12 = vld [vmem:[%s1755_s0 + $0x208] sm:$0xff]  ;;  %v99_v13 = vld [vmem:[%s1755_s0 + $0x260] sm:$0xff] }
  0x4b   :  { %v169_v18 = vmax.f32 %v88_v12, 0.0  ;;  %v180_v19 = vmax.f32 %v99_v13, 0.0  ;;  %v100_v22 = vld [vmem:[%s1755_s0 + $0x268] sm:$0xff] }
  0x4c   :  { %650 = vmatpush.bf16.msra.mxu2 %v427_v26  ;;  %v330_v26 = vld [vmem:[%s1754_s2 + $0x320] sm:$0xff] }
  0x4d   :  { %683 = vmatpush.bf16.msra.mxu3 %v435_v32  ;;  %716 = vmatpush.bf16.msra.mxu0 %v443_v41  ;;  %v424_v29 = vpack.c.bf16 %v331_v27, %v330_v26  ;;  %v347_v32 = vld [vmem:[%s1754_s2 + $0x3a8] sm:$0xff]  ;;  %v214_v23 = vpack.c.bf16 %v169_v18, %v160_v17 }
  0x4e   :  { %v432_v37 = vpack.c.bf16 %v347_v32, %v346_v31  ;;  %v363_v41 = vld [vmem:[%s1754_s2 + $0x428] sm:$0xff]  ;;  %v98_v31 = vld [vmem:[%s1755_s0 + $0x258] sm:$0xff]  ;;  %v178_v32 = vmax.f32 %v97_v28, 0.0 }
  0x50   :  { %651 = vmatpush.bf16.msra.mxu2 %v426_v40  ;;  %v362_v40 = vld [vmem:[%s1754_s2 + $0x420] sm:$0xff] }
  0x51   :  { %684 = vmatpush.bf16.msra.mxu3 %v434_v61  ;;  %717 = vmatpush.bf16.msra.mxu0 %v442_v2  ;;  %v440_v44 = vpack.c.bf16 %v363_v41, %v362_v40  ;;  %v360_v2 = vld [vmem:[%s1754_s2 + $0x410] sm:$0xff]  ;;  %v38_v40 = vld [vmem:[%s1755_s0 + $0x78] sm:$0xff] }
  0x52   :  { %v439_v7 = vpack.c.bf16 %v361_v4, %v360_v2  ;;  %v49_v41 = vld [vmem:[%s1755_s0 + $0xd0] sm:$0xff]  ;;  %v119_v46 = vmax.f32 %v38_v40, 0.0  ;;  %v76_v2 = vld [vmem:[%s1755_s0 + $0x1a8] sm:$0xff]  ;;  %v155_v40 = vmax.f32 %v74_v30, 0.0 }
  0x53   :  { %524 = vmatmul.bf16.vlgmr.msrb.gmra.mxu2 %v187_v52  ;;  %v162_v52 = vmax.f32 %v81_v35, 0.0  ;;  %v179_v35 = vmax.f32 %v98_v31, 0.0  ;;  %v130_v47 = vmax.f32 %v49_v41, 0.0  ;;  %v48_v4 = vld [vmem:[%s1755_s0 + $0xc8] sm:$0xff]  ;;  %v157_v12 = vmax.f32 %v76_v2, 0.0  ;;  %v776_v2 = vld [vmem:[%s1757_s4 + $0x78] sm:$0xff] }
  0x54   :  { %595 = vmatmul.bf16.gmra.mxu0 %v198_v53  ;;  %652 = vmatpush.bf16.msra.mxu2 %v425_v1  ;;  %v171_v53 = vmax.f32 %v90_v42, 0.0  ;;  %v327_v1 = vld [vmem:[%s1754_s2 + $0x308] sm:$0xff]  ;;  %v58_v42 = vld [vmem:[%s1755_s0 + $0x118] sm:$0xff]  ;;  %v191_v51 = vpack.c.bf16 %v119_v46, %v110_v45  ;;  %v129_v13 = vmax.f32 %v48_v4, 0.0  ;;  %v103_v4 = vld [vmem:[%s1755_s0 + $0x280] sm:$0xff] }
  0x55   :  { %685 = vmatpush.bf16.msra.mxu3 %v433_v6  ;;  %718 = vmatpush.bf16.msra.mxu0 %v441_v36  ;;  %v422_v3 = vpack.c.bf16 %v327_v1, %v326_v0  ;;  %v343_v6 = vld [vmem:[%s1754_s2 + $0x388] sm:$0xff]  ;;  %v223_v36 = vpack.c.bf16 %v178_v32, %v178_v32  ;;  %v224_v38 = vpack.c.bf16 %v179_v35, %v179_v35  ;;  %v139_v48 = vmax.f32 %v58_v42, 0.0  ;;  %v67_v1 = vld [vmem:[%s1755_s0 + $0x160] sm:$0xff]  ;;  %v85_v32 = vld [vmem:[%s1755_s0 + $0x1f0] sm:$0xff] }
  0x56   :  { %557 = vmatmul.bf16.vlgmr.msrb.gmra.mxu3 %v188_v56  ;;  %628 = vmatmul.bf16.gmra.mxu1 %v199_v57  ;;  %v82_v56 = vld [vmem:[%s1755_s0 + $0x1d8] sm:$0xff]  ;;  %v91_v57 = vld [vmem:[%s1755_s0 + $0x220] sm:$0xff]  ;;  %v216_v59 = vpack.c.bf16 %v171_v53, %v162_v52  ;;  %v430_v8 = vpack.c.bf16 %v343_v6, %v342_v5  ;;  %v57_v5 = vld [vmem:[%s1755_s0 + $0x110] sm:$0xff]  ;;  %v148_v11 = vmax.f32 %v67_v1, 0.0  ;;  %v166_v42 = vmax.f32 %v85_v32, 0.0 }
  0x57   :  { %v163_v60 = vmax.f32 %v82_v56, 0.0  ;;  %v172_v61 = vmax.f32 %v91_v57, 0.0  ;;  %v1527_v52 = vld [vmem:[%s1756_s3] ss:$0 sm:$0xff]  ;;  %v202_v53 = vpack.c.bf16 %v139_v48, %v130_v47  ;;  %v66_v35 = vld [vmem:[%s1755_s0 + $0x158] sm:$0xff] }
  0x58   :  { %653 = vmatpush.bf16.msra.mxu2 %v424_v29  ;;  %v31_v29 = vld [vmem:[%s1755_s0 + $0x40] sm:$0xff] }
  0x59   :  { %686 = vmatpush.bf16.msra.mxu3 %v432_v37  ;;  %719 = vmatpush.bf16.msra.mxu0 %v440_v44  ;;  %v217_v63 = vpack.c.bf16 %v172_v61, %v163_v60  ;;  %v112_v33 = vmax.f32 %v31_v29, 0.0  ;;  %v39_v44 = vld [vmem:[%s1755_s0 + $0x80] sm:$0xff]  ;;  %v65_v29 = vld [vmem:[%s1755_s0 + $0x150] sm:$0xff] }
  0x5a   :  { %v120_v50 = vmax.f32 %v39_v44, 0.0  ;;  %v147_v44 = vmax.f32 %v66_v35, 0.0 }
  0x5b   :  { %v193_v37 = vpack.c.bf16 %v121_v34, %v112_v33  ;;  %v94_v33 = vld [vmem:[%s1755_s0 + $0x238] sm:$0xff] }
  0x5c   :  { %654 = vmatpush.bf16.msra.mxu2 %v423_v43  ;;  %v30_v43 = vld [vmem:[%s1755_s0 + $0x38] sm:$0xff] }
  0x5d   :  { %687 = vmatpush.bf16.msra.mxu3 %v431_v49  ;;  %720 = vmatpush.bf16.msra.mxu0 %v439_v7  ;;  %v111_v49 = vmax.f32 %v30_v43, 0.0  ;;  %v175_v43 = vmax.f32 %v94_v33, 0.0 }
  0x5f   :  { %v192_v54 = vpack.c.bf16 %v120_v50, %v111_v49  ;;  %v220_v50 = vpack.c.bf16 %v175_v43, %v166_v42 }
  0x60   :  { %655 = vmatpush.bf16.msra.mxu2 %v422_v3 }
  0x61   :  { %688 = vmatpush.bf16.msra.mxu3 %v430_v8  ;;  %721 = vmatpush.bf16.msra.mxu0 %v438_v14  ;;  %v138_v14 = vmax.f32 %v57_v5, 0.0 }
  0x63   :  { %529 = vmatmul.bf16.gmra.mxu2 %v196_v20  ;;  %v161_v20 = vmax.f32 %v80_v15, 0.0 }
  0x64   :  { %600 = vmatmul.bf16.gmra.mxu0 %v207_v21  ;;  %v170_v21 = vmax.f32 %v89_v16, 0.0 }
  0x66   :  { %562 = vmatmul.bf16.gmra.mxu3 %v197_v24  ;;  %633 = vmatmul.bf16.gmra.mxu1 %v208_v25  ;;  %v225_v24 = vpack.c.bf16 %v180_v19, %v180_v19  ;;  %v181_v25 = vmax.f32 %v100_v22, 0.0  ;;  %v215_v26 = vpack.c.bf16 %v170_v21, %v161_v20  ;;  %v211_v19 = vpack.c.bf16 %v157_v12, %v148_v11 }
  0x67   :  { %v201_v20 = vpack.c.bf16 %v138_v14, %v129_v13 }
  0x68   :  { %v226_v27 = vpack.c.bf16 %v181_v25, %v181_v25 }
  0x73   :  { %534 = vmatmul.bf16.gmra.mxu2 %v205_v58 }
  0x74   :  { %605 = vmatmul.bf16.gmra.mxu0 %v216_v59 }
  0x76   :  { %567 = vmatmul.bf16.gmra.mxu3 %v206_v62  ;;  %638 = vmatmul.bf16.gmra.mxu1 %v217_v63  ;;  %v47_v62 = vld [vmem:[%s1755_s0 + $0xc0] sm:$0xff]  ;;  %v56_v63 = vld [vmem:[%s1755_s0 + $0x108] sm:$0xff] }
  0x77   :  { %v128_v7 = vmax.f32 %v47_v62, 0.0  ;;  %v137_v9 = vmax.f32 %v56_v63, 0.0  ;;  %v84_v62 = vld [vmem:[%s1755_s0 + $0x1e8] sm:$0xff]  ;;  %v93_v63 = vld [vmem:[%s1755_s0 + $0x230] sm:$0xff] }
  0x78   :  { %v174_v11 = vmax.f32 %v93_v63, 0.0 }
  0x79   :  { %v200_v18 = vpack.c.bf16 %v137_v9, %v128_v7  ;;  %v165_v9 = vmax.f32 %v84_v62, 0.0 }
  0x83   :  { %539 = vmatmul.bf16.gmra.mxu2 %v214_v23 }
  0x84   :  { %610 = vmatmul.bf16.gmra.mxu0 %v225_v24 }
  0x86   :  { %572 = vmatmul.bf16.gmra.mxu3 %v215_v26  ;;  %643 = vmatmul.bf16.gmra.mxu1 %v226_v27 }
  0x93   :  { %544 = vmatmul.bf16.gmra.mxu2 %v223_v36  ;;  %v75_v36 = vld [vmem:[%s1755_s0 + $0x1a0] sm:$0xff] }
  0x94   :  { %722 = vmatmul.bf16.vlgmr.msra.gmra.mxu0 %v193_v37  ;;  %v156_v45 = vmax.f32 %v75_v36, 0.0 }
  0x96   :  { %577 = vmatmul.bf16.gmra.mxu3 %v224_v38  ;;  %v146_v38 = vmax.f32 %v65_v29, 0.0 }
  0x98   :  { %v209_v49 = vpack.c.bf16 %v155_v40, %v146_v38  ;;  %v772_v38 = vld [vmem:[%s1757_s4 + $0x58] sm:$0xff] }
  0xa0   :  { %v459_v55 = vpop.f32.mrf.mxu0 }
  0xa1   :  { %v460_v56 = vadd.f32 %v1527_v52, %v459_v55 }
  0xa3   :  { %v492_v57 = vpop.f32.mrf.mxu1  ;;  %656 = vmatmul.bf16.vlgmr.msra.gmra.mxu2 %v191_v51  ;;  %v210_v51 = vpack.c.bf16 %v156_v45, %v147_v44 }
  0xa4   :  { %v1530_v58 = vadd.f32 %v492_v57, %v460_v56  ;;  %727 = vmatmul.bf16.gmra.mxu0 %v202_v53 }
  0xa6   :  { %689 = vmatmul.bf16.vlgmr.msra.gmra.mxu3 %v192_v54  ;;  %v469_v59 = vpop.f32.mrf.mxu2 }
  0xa7   :  { %v470_v60 = vadd.f32 %v1527_v52, %v469_v59  ;;  %v502_v61 = vpop.f32.mrf.mxu3 }
  0xa8   :  { %v461_v0 = vpop.f32.mrf.mxu0 }
  0xa9   :  { %v1545_v3 = vadd.f32 %v502_v61, %v470_v60  ;;  %v462_v6 = vadd.f32 %v1527_v52, %v461_v0  ;;  %v83_v60 = vld [vmem:[%s1755_s0 + $0x1e0] sm:$0xff]  ;;  %v92_v61 = vld [vmem:[%s1755_s0 + $0x228] sm:$0xff] }
  0xaa   :  { %v173_v7 = vmax.f32 %v92_v61, 0.0 }
  0xab   :  { %v494_v8 = vpop.f32.mrf.mxu1 }
  0xac   :  { %v1554_v10 = vadd.f32 %v494_v8, %v462_v6  ;;  %v164_v6 = vmax.f32 %v83_v60, 0.0  ;;  %v184_v8 = vmax.f32 %v103_v4, 0.0 }
  0xae   :  { %v471_v15 = vpop.f32.mrf.mxu2 }
  0xaf   :  { %v472_v16 = vadd.f32 %v1527_v52, %v471_v15  ;;  %v504_v17 = vpop.f32.mrf.mxu3  ;;  %v218_v15 = vpack.c.bf16 %v173_v7, %v164_v6  ;;  %v768_v6 = vld [vmem:[%s1757_s4 + $0x38] sm:$0xff] }
  0xb1   :  { %v464_v21 = vpop.f32.mrf.mxu0  ;;  %v1557_v22 = vadd.f32 %v504_v17, %v472_v16  ;;  %v229_v16 = vpack.c.bf16 %v184_v8, %v184_v8  ;;  %v219_v17 = vpack.c.bf16 %v174_v11, %v165_v9 }
  0xb2   :  { %v465_v23 = vadd.f32 %v1527_v52, %v464_v21 }
  0xb3   :  { %v497_v24 = vpop.f32.mrf.mxu1  ;;  %661 = vmatmul.bf16.gmra.mxu2 %v200_v18 }
  0xb4   :  { %v1560_v25 = vadd.f32 %v497_v24, %v465_v23  ;;  %732 = vmatmul.bf16.gmra.mxu0 %v211_v19  ;;  %v773_v19 = vld [vmem:[%s1757_s4 + $0x60] sm:$0xff] }
  0xb6   :  { %694 = vmatmul.bf16.gmra.mxu3 %v201_v20  ;;  %v474_v26 = vpop.f32.mrf.mxu2  ;;  %v774_v20 = vld [vmem:[%s1757_s4 + $0x68] sm:$0xff] }
  0xb7   :  { %v475_v27 = vadd.f32 %v1527_v52, %v474_v26  ;;  %v783_v21 = vpack.c.bf16 %v774_v20, %v773_v19 }
  0xb9   :  { %v507_v28 = vpop.f32.mrf.mxu3  ;;  %v466_v31 = vpop.f32.mrf.mxu0 }
  0xba   :  { %v1575_v34 = vadd.f32 %v507_v28, %v475_v27  ;;  %v467_v37 = vadd.f32 %v1527_v52, %v466_v31  ;;  %v101_v28 = vld [vmem:[%s1755_s0 + $0x270] sm:$0xff]  ;;  %v102_v31 = vld [vmem:[%s1755_s0 + $0x278] sm:$0xff] }
  0xbb   :  { %v499_v39 = vpop.f32.mrf.mxu1  ;;  %v182_v33 = vmax.f32 %v101_v28, 0.0  ;;  %v183_v35 = vmax.f32 %v102_v31, 0.0 }
  0xbc   :  { %v1584_v41 = vadd.f32 %v499_v39, %v467_v37 }
  0xbd   :  { %v227_v44 = vpack.c.bf16 %v182_v33, %v182_v33  ;;  %v228_v45 = vpack.c.bf16 %v183_v35, %v183_v35 }
  0xbe   :  { %v476_v46 = vpop.f32.mrf.mxu2 }
  0xbf   :  { %v477_v47 = vadd.f32 %v1527_v52, %v476_v46 }
  0xc1   :  { %v509_v48 = vpop.f32.mrf.mxu3  ;;  %v591_v53 = vpop.f32.mrf.mxu0 }
  0xc2   :  { %v1587_v54 = vadd.f32 %v509_v48, %v477_v47 }
  0xc3   :  { %666 = vmatmul.bf16.gmra.mxu2 %v209_v49  ;;  %v624_v55 = vpop.f32.mrf.mxu1 }
  0xc4   :  { %737 = vmatmul.bf16.gmra.mxu0 %v220_v50 }
  0xc6   :  { %699 = vmatmul.bf16.gmra.mxu3 %v210_v51  ;;  %v479_v56 = vpop.f32.mrf.mxu2 }
  0xc7   :  { %v480_v57 = vadd.f32 %v1527_v52, %v479_v56  ;;  %v775_v52 = vld [vmem:[%s1757_s4 + $0x70] sm:$0xff] }
  0xc8   :  { %v784_v5 = vpack.c.bf16 %v776_v2, %v775_v52 }
  0xc9   :  { %v512_v59 = vpop.f32.mrf.mxu3  ;;  %v593_v0 = vpop.f32.mrf.mxu0 }
  0xca   :  { %v1602_v1 = vadd.f32 %v512_v59, %v480_v57  ;;  %789 = vmatpush.bf16.msra.mxu1 %v784_v5  ;;  %v770_v59 = vld [vmem:[%s1757_s4 + $0x48] sm:$0xff]  ;;  %v767_v5 = vld [vmem:[%s1757_s4 + $0x30] sm:$0xff] }
  0xcb   :  { %v626_v12 = vpop.f32.mrf.mxu1  ;;  %v780_v7 = vpack.c.bf16 %v768_v6, %v767_v5 }
  0xce   :  { %v481_v13 = vpop.f32.mrf.mxu2  ;;  %790 = vmatpush.bf16.msra.mxu1 %v783_v21 }
  0xd1   :  { %v514_v14 = vpop.f32.mrf.mxu3  ;;  %v596_v18 = vpop.f32.mrf.mxu0 }
  0xd3   :  { %671 = vmatmul.bf16.gmra.mxu2 %v218_v15  ;;  %v629_v23 = vpop.f32.mrf.mxu1 }
  0xd4   :  { %742 = vmatmul.bf16.gmra.mxu0 %v229_v16  ;;  %v765_v16 = vld [vmem:[%s1757_s4 + $0x20] sm:$0xff] }
  0xd6   :  { %704 = vmatmul.bf16.gmra.mxu3 %v219_v17  ;;  %v525_v24 = vpop.f32.mrf.mxu2  ;;  %v766_v17 = vld [vmem:[%s1757_s4 + $0x28] sm:$0xff] }
  0xd7   :  { %v526_v26 = vadd.f32 %v525_v24, %v1530_v58  ;;  %v771_v58 = vld [vmem:[%s1757_s4 + $0x50] sm:$0xff] }
  0xd8   :  { %v782_v40 = vpack.c.bf16 %v772_v38, %v771_v58 }
  0xd9   :  { %v558_v27 = vpop.f32.mrf.mxu3  ;;  %v598_v29 = vpop.f32.mrf.mxu0 }
  0xda   :  { %v559_v30 = vadd.f32 %v558_v27, %v526_v26  ;;  %791 = vmatpush.bf16.msra.mxu1 %v782_v40  ;;  %v763_v26 = vld [vmem:[%s1757_s4 + $0x10] sm:$0xff]  ;;  %v764_v27 = vld [vmem:[%s1757_s4 + $0x18] sm:$0xff] }
  0xdb   :  { %v631_v36 = vpop.f32.mrf.mxu1 }
  0xdc   :  { %v592_v32 = vadd.f32 %v591_v53, %v559_v30 }
  0xde   :  { %v1626_v37 = vadd.f32 %v624_v55, %v592_v32  ;;  %v527_v39 = vpop.f32.mrf.mxu2 }
  0xdf   :  { %v528_v42 = vadd.f32 %v527_v39, %v1554_v10  ;;  %v769_v10 = vld [vmem:[%s1757_s4 + $0x40] sm:$0xff] }
  0xe0   :  { %v781_v60 = vpack.c.bf16 %v770_v59, %v769_v10 }
  0xe1   :  { %v560_v43 = vpop.f32.mrf.mxu3  ;;  %v601_v46 = vpop.f32.mrf.mxu0 }
  0xe2   :  { %v561_v47 = vadd.f32 %v560_v43, %v528_v42  ;;  %792 = vmatpush.bf16.msra.mxu1 %v781_v60 }
  0xe3   :  { %676 = vmatmul.bf16.gmra.mxu2 %v227_v44  ;;  %v634_v49 = vpop.f32.mrf.mxu1 }
  0xe4   :  { %v594_v48 = vadd.f32 %v593_v0, %v561_v47 }
  0xe6   :  { %709 = vmatmul.bf16.gmra.mxu3 %v228_v45  ;;  %v1635_v50 = vadd.f32 %v626_v12, %v594_v48  ;;  %v530_v51 = vpop.f32.mrf.mxu2  ;;  %793 = vmatpush.bf16.msra.mxu1 %v780_v7 }
  0xe7   :  { %v531_v53 = vadd.f32 %v530_v51, %v1560_v25 }
  0xe9   :  { %v563_v55 = vpop.f32.mrf.mxu3  ;;  %v603_v56 = vpop.f32.mrf.mxu0 }
  0xea   :  { %v564_v57 = vadd.f32 %v563_v55, %v531_v53 }
  0xeb   :  { %v636_v62 = vpop.f32.mrf.mxu1 }
  0xec   :  { %v597_v61 = vadd.f32 %v596_v18, %v564_v57  ;;  %v779_v18 = vpack.c.bf16 %v766_v17, %v765_v16 }
  0xee   :  { %v1644_v63 = vadd.f32 %v629_v23, %v597_v61  ;;  %v532_v0 = vpop.f32.mrf.mxu2  ;;  %794 = vmatpush.bf16.msra.mxu1 %v779_v18 }
  0xef   :  { %v533_v25 = vadd.f32 %v532_v0, %v1584_v41 }
  0xf1   :  { %v565_v52 = vpop.f32.mrf.mxu3  ;;  %v606_v2 = vpop.f32.mrf.mxu0 }
  0xf2   :  { %v566_v4 = vadd.f32 %v565_v52, %v533_v25 }
  0xf3   :  { %v639_v9 = vpop.f32.mrf.mxu1 }
  0xf4   :  { %v599_v8 = vadd.f32 %v598_v29, %v566_v4  ;;  %v778_v29 = vpack.c.bf16 %v764_v27, %v763_v26 }
  0xf6   :  { %v1653_v11 = vadd.f32 %v631_v36, %v599_v8  ;;  %v535_v12 = vpop.f32.mrf.mxu2  ;;  %795 = vmatpush.bf16.msra.mxu1 %v778_v29 }
  0xf7   :  { %v536_v41 = vadd.f32 %v535_v12, %v1545_v3 }
  0xf9   :  { %v568_v13 = vpop.f32.mrf.mxu3  ;;  %v608_v14 = vpop.f32.mrf.mxu0 }
  0xfa   :  { %v569_v15 = vadd.f32 %v568_v13, %v536_v41 }
  0xfb   :  { %v641_v20 = vpop.f32.mrf.mxu1 }
  0xfc   :  { %v602_v19 = vadd.f32 %v601_v46, %v569_v15 }
  0xfe   :  { %v1662_v21 = vadd.f32 %v634_v49, %v602_v19  ;;  %v537_v23 = vpop.f32.mrf.mxu2  ;;  %v761_v49 = vld [vmem:[%s1757_s4] sm:$0xff] }
  0xff   :  { %v538_v3 = vadd.f32 %v537_v23, %v1557_v22 }
 0x101   :  { %v570_v24 = vpop.f32.mrf.mxu3  ;;  %v611_v28 = vpop.f32.mrf.mxu0 }
 0x102   :  { %v571_v30 = vadd.f32 %v570_v24, %v538_v3 }
 0x103   :  { %v644_v32 = vpop.f32.mrf.mxu1 }
 0x104   :  { %v604_v31 = vadd.f32 %v603_v56, %v571_v30 }
 0x106   :  { %v1671_v33 = vadd.f32 %v636_v62, %v604_v31  ;;  %v540_v35 = vpop.f32.mrf.mxu2 }
 0x107   :  { %v541_v22 = vadd.f32 %v540_v35, %v1575_v34  ;;  %v762_v34 = vld [vmem:[%s1757_s4 + $0x8] sm:$0xff] }
 0x108   :  { %v777_v53 = vpack.c.bf16 %v762_v34, %v761_v49 }
 0x109   :  { %v573_v36 = vpop.f32.mrf.mxu3  ;;  %v613_v58 = vpop.f32.mrf.mxu0 }
 0x10a   :  { %v574_v38 = vadd.f32 %v573_v36, %v541_v22  ;;  %796 = vmatpush.bf16.msra.mxu1 %v777_v53 }
 0x10b   :  { %v646_v40 = vpop.f32.mrf.mxu1 }
 0x10c   :  { %v607_v39 = vadd.f32 %v606_v2, %v574_v38 }
 0x10e   :  { %v1674_v42 = vadd.f32 %v639_v9, %v607_v39  ;;  %v542_v43 = vpop.f32.mrf.mxu2 }
 0x10f   :  { %v543_v44 = vadd.f32 %v542_v43, %v1587_v54 }
 0x111   :  { %v575_v45 = vpop.f32.mrf.mxu3  ;;  %v723_v46 = vpop.f32.mrf.mxu0 }
 0x112   :  { %v576_v47 = vadd.f32 %v575_v45, %v543_v44 }
 0x114   :  { %v609_v48 = vadd.f32 %v608_v14, %v576_v47 }
 0x116   :  { %v1683_v51 = vadd.f32 %v641_v20, %v609_v48  ;;  %v545_v55 = vpop.f32.mrf.mxu2 }
 0x117   :  { %v546_v56 = vadd.f32 %v545_v55, %v1602_v1 }
 0x119   :  { %v578_v57 = vpop.f32.mrf.mxu3  ;;  %v725_v54 = vpop.f32.mrf.mxu0 }
 0x11a   :  { %v579_v10 = vadd.f32 %v578_v57, %v546_v56 }
 0x11c   :  { %v612_v59 = vadd.f32 %v611_v28, %v579_v10 }
 0x11e   :  { %v1686_v60 = vadd.f32 %v644_v32, %v612_v59  ;;  %v547_v61 = vpop.f32.mrf.mxu2 }
 0x121   :  { %v580_v62 = vpop.f32.mrf.mxu3  ;;  %v728_v0 = vpop.f32.mrf.mxu0 }
 0x126   :  { %v657_v25 = vpop.f32.mrf.mxu2 }
 0x127   :  { %v658_v4 = vadd.f32 %v657_v25, %v1626_v37 }
 0x129   :  { %v690_v52 = vpop.f32.mrf.mxu3  ;;  %v730_v2 = vpop.f32.mrf.mxu0 }
 0x12a   :  { %v691_v5 = vadd.f32 %v690_v52, %v658_v4 }
 0x12c   :  { %v724_v9 = vadd.f32 %v723_v46, %v691_v5 }
 0x12e   :  { %v659_v6 = vpop.f32.mrf.mxu2  ;;  %v747_v13 = vmax.f32 %v724_v9, 0.0 }
 0x12f   :  { %v660_v7 = vadd.f32 %v659_v6, %v1635_v50 }
 0x131   :  { %v692_v1 = vpop.f32.mrf.mxu3  ;;  %v733_v8 = vpop.f32.mrf.mxu0 }
 0x132   :  { %v693_v12 = vadd.f32 %v692_v1, %v660_v7  ;;  %v822_v1 = vld [vmem:[%s1759_s1] sm:$0xff] }
 0x134   :  { %v726_v41 = vadd.f32 %v725_v54, %v693_v12  ;;  %v823_v12 = vld [vmem:[%s1759_s1 + $0x8] sm:$0xff] }
 0x136   :  { %v748_v14 = vmax.f32 %v726_v41, 0.0  ;;  %v662_v15 = vpop.f32.mrf.mxu2 }
 0x137   :  { %v663_v19 = vadd.f32 %v662_v15, %v1644_v63  ;;  %v824_v15 = vld [vmem:[%s1759_s1 + $0x10] sm:$0xff] }
 0x138   :  { %v756_v16 = vpack.c.bf16 %v748_v14, %v747_v13 }
 0x139   :  { %v695_v17 = vpop.f32.mrf.mxu3  ;;  %v735_v18 = vpop.f32.mrf.mxu0 }
 0x13a   :  { %797 = vmatmul.bf16.vlgmr.msra.gmra.mxu1 %v756_v16  ;;  %v696_v20 = vadd.f32 %v695_v17, %v663_v19  ;;  %v825_v19 = vld [vmem:[%s1759_s1 + $0x18] sm:$0xff] }
 0x13c   :  { %v729_v24 = vadd.f32 %v728_v0, %v696_v20 }
 0x13e   :  { %v664_v37 = vpop.f32.mrf.mxu2  ;;  %v749_v28 = vmax.f32 %v729_v24, 0.0 }
 0x13f   :  { %v665_v23 = vadd.f32 %v664_v37, %v1653_v11 }
 0x141   :  { %v697_v3 = vpop.f32.mrf.mxu3  ;;  %v738_v50 = vpop.f32.mrf.mxu0 }
 0x142   :  { %v698_v26 = vadd.f32 %v697_v3, %v665_v23  ;;  %v826_v3 = vld [vmem:[%s1759_s1 + $0x20] sm:$0xff] }
 0x144   :  { %v731_v27 = vadd.f32 %v730_v2, %v698_v26 }
 0x146   :  { %v750_v29 = vmax.f32 %v731_v27, 0.0  ;;  %v667_v30 = vpop.f32.mrf.mxu2  ;;  %v827_v27 = vld [vmem:[%s1759_s1 + $0x28] sm:$0xff] }
 0x147   :  { %v668_v22 = vadd.f32 %v667_v30, %v1662_v21 }
 0x148   :  { %v757_v32 = vpack.c.bf16 %v750_v29, %v749_v28 }
 0x149   :  { %v700_v31 = vpop.f32.mrf.mxu3  ;;  %v740_v35 = vpop.f32.mrf.mxu0 }
 0x14a   :  { %802 = vmatmul.bf16.gmra.mxu1 %v757_v32  ;;  %v701_v63 = vadd.f32 %v700_v31, %v668_v22  ;;  %v828_v31 = vld [vmem:[%s1759_s1 + $0x30] sm:$0xff] }
 0x14c   :  { %v734_v39 = vadd.f32 %v733_v8, %v701_v63  ;;  %v829_v63 = vld [vmem:[%s1759_s1 + $0x38] sm:$0xff] }
 0x14e   :  { %v669_v36 = vpop.f32.mrf.mxu2  ;;  %v751_v44 = vmax.f32 %v734_v39, 0.0 }
 0x14f   :  { %v670_v58 = vadd.f32 %v669_v36, %v1671_v33 }
 0x151   :  { %v702_v38 = vpop.f32.mrf.mxu3  ;;  %v743_v11 = vpop.f32.mrf.mxu0 }
 0x152   :  { %v703_v40 = vadd.f32 %v702_v38, %v670_v58 }
 0x154   :  { %v736_v43 = vadd.f32 %v735_v18, %v703_v40 }
 0x156   :  { %v752_v45 = vmax.f32 %v736_v43, 0.0  ;;  %v672_v46 = vpop.f32.mrf.mxu2 }
 0x157   :  { %v673_v34 = vadd.f32 %v672_v46, %v1674_v42 }
 0x158   :  { %v758_v48 = vpack.c.bf16 %v752_v45, %v751_v44 }
 0x159   :  { %v705_v47 = vpop.f32.mrf.mxu3  ;;  %v745_v49 = vpop.f32.mrf.mxu0 }
 0x15a   :  { %807 = vmatmul.bf16.gmra.mxu1 %v758_v48  ;;  %v706_v21 = vadd.f32 %v705_v47, %v673_v34 }
 0x15c   :  { %v739_v33 = vadd.f32 %v738_v50, %v706_v21 }
 0x15e   :  { %v674_v53 = vpop.f32.mrf.mxu2  ;;  %v753_v10 = vmax.f32 %v739_v33, 0.0 }
 0x15f   :  { %v675_v55 = vadd.f32 %v674_v53, %v1683_v51  ;;  %v870_v51 = vld [vmem:[%s1758_s5] ss:$0 sm:$0xff] }
 0x161   :  { %v707_v56 = vpop.f32.mrf.mxu3 }
 0x162   :  { %v708_v57 = vadd.f32 %v707_v56, %v675_v55 }
 0x164   :  { %v741_v54 = vadd.f32 %v740_v35, %v708_v57 }
 0x166   :  { %v754_v59 = vmax.f32 %v741_v54, 0.0  ;;  %v677_v61 = vpop.f32.mrf.mxu2 }
 0x167   :  { %v678_v62 = vadd.f32 %v677_v61, %v1686_v60 }
 0x168   :  { %v759_v25 = vpack.c.bf16 %v754_v59, %v753_v10 }
 0x169   :  { %v710_v0 = vpop.f32.mrf.mxu3 }
 0x16a   :  { %812 = vmatmul.bf16.gmra.mxu1 %v759_v25  ;;  %v711_v52 = vadd.f32 %v710_v0, %v678_v62 }
 0x16c   :  { %v744_v42 = vadd.f32 %v743_v11, %v711_v52  ;;  %v830_v11 = vld [vmem:[%s1759_s1 + $0x40] sm:$0xff] }
 0x16e   :  { %v679_v2 = vpop.f32.mrf.mxu2  ;;  %v755_v5 = vmax.f32 %v744_v42, 0.0 }
 0x170   :  { %v760_v6 = vpack.c.bf16 %v755_v5, %v755_v5 }
 0x171   :  { %v712_v4 = vpop.f32.mrf.mxu3 }
 0x17a   :  { %817 = vmatmul.bf16.gmra.mxu1 %v760_v6 }
 0x1b7   :  { %v798_v7 = vpop.f32.mrf.mxu1 }
 0x1b8   :  { %v799_v60 = vadd.f32 %v870_v51, %v798_v7 }
 0x1ba   :  { %v831_v8 = vadd.f32 %v822_v1, %v799_v60 }
 0x1bc   :  { %840 = vst [vmem:[%s1760_s6] sm:$0xff] %v831_v8 }
 0x1bf   :  { %v800_v9 = vpop.f32.mrf.mxu1 }
 0x1c0   :  { %v801_v41 = vadd.f32 %v870_v51, %v800_v9 }
 0x1c2   :  { %v832_v13 = vadd.f32 %v823_v12, %v801_v41 }
 0x1c4   :  { %841 = vst [vmem:[%s1760_s6 + $0x8] sm:$0xff] %v832_v13 }
 0x1c7   :  { %v803_v14 = vpop.f32.mrf.mxu1 }
 0x1c8   :  { %v804_v16 = vadd.f32 %v870_v51, %v803_v14 }
 0x1ca   :  { %v833_v17 = vadd.f32 %v824_v15, %v804_v16 }
 0x1cc   :  { %842 = vst [vmem:[%s1760_s6 + $0x10] sm:$0xff] %v833_v17 }
 0x1cf   :  { %v805_v18 = vpop.f32.mrf.mxu1 }
 0x1d0   :  { %v806_v20 = vadd.f32 %v870_v51, %v805_v18 }
 0x1d2   :  { %v834_v37 = vadd.f32 %v825_v19, %v806_v20 }
 0x1d4   :  { %843 = vst [vmem:[%s1760_s6 + $0x18] sm:$0xff] %v834_v37 }
 0x1d7   :  { %v808_v23 = vpop.f32.mrf.mxu1 }
 0x1d8   :  { %v809_v50 = vadd.f32 %v870_v51, %v808_v23 }
 0x1da   :  { %v835_v24 = vadd.f32 %v826_v3, %v809_v50 }
 0x1dc   :  { %844 = vst [vmem:[%s1760_s6 + $0x20] sm:$0xff] %v835_v24 }
 0x1df   :  { %v810_v26 = vpop.f32.mrf.mxu1 }
 0x1e0   :  { %v811_v28 = vadd.f32 %v870_v51, %v810_v26 }
 0x1e2   :  { %v836_v29 = vadd.f32 %v827_v27, %v811_v28 }
 0x1e4   :  { %845 = vst [vmem:[%s1760_s6 + $0x28] sm:$0xff] %v836_v29 }
 0x1e7   :  { %v813_v30 = vpop.f32.mrf.mxu1 }
 0x1e8   :  { %v814_v32 = vadd.f32 %v870_v51, %v813_v30 }
 0x1ea   :  { %v837_v35 = vadd.f32 %v828_v31, %v814_v32 }
 0x1ec   :  { %846 = vst [vmem:[%s1760_s6 + $0x30] sm:$0xff] %v837_v35 }
 0x1ef   :  { %v815_v22 = vpop.f32.mrf.mxu1 }
 0x1f0   :  { %v816_v36 = vadd.f32 %v870_v51, %v815_v22 }
 0x1f2   :  { %v838_v58 = vadd.f32 %v829_v63, %v816_v36 }
 0x1f4   :  { %847 = vst [vmem:[%s1760_s6 + $0x38] sm:$0xff] %v838_v58 }
 0x1f7   :  { %v818_v38 = vpop.f32.mrf.mxu1 }
 0x1f8   :  { %v819_v39 = vadd.f32 %v870_v51, %v818_v38 }
 0x1fa   :  { %v839_v40 = vadd.f32 %v830_v11, %v819_v39 }
 0x1fc   :  { %848 = vst [vmem:[%s1760_s6 + $0x40] sm:$0xff] %v839_v40 }
 0x1ff   :  { %v820_v43 = vpop.f32.mrf.mxu1 }

// kernel: encoder_forward.11
= control target key start
LH: loop header
LB: loop body
LE: loop exit
PB: predicated region body
PF: predicated region fallthrough
CT: control target
= control target key end

     0   :  { %s860_s1 = inlined_call_operand.vmem [shape: f32[1152,128], index: 1, kind: input, shape index: {}]   ;;  %s861_s0 = inlined_call_operand.vmem [shape: f32[8,1152], index: 0, kind: input, shape index: {}]   ;;  %s862_s2 = inlined_call_operand.vmem [shape: f32[1,128], index: 2, kind: input, shape index: {}]   ;;  %s863_s3 = inlined_call_operand.vmem [shape: f32[8,128], index: 3, kind: output, shape index: {}]  }
   0x1   :  { %v46_v0 = vld [vmem:[%s860_s1 + $0x70] sm:$0xff]  ;;  %v47_v1 = vld [vmem:[%s860_s1 + $0x78] sm:$0xff]  ;;  %v44_v5 = vld [vmem:[%s860_s1 + $0x60] sm:$0xff] }
   0x2   :  { %v78_v2 = vld [vmem:[%s860_s1 + $0x170] sm:$0xff]  ;;  %v183_v3 = vpack.c.bf16 %v47_v1, %v46_v0  ;;  %v79_v4 = vld [vmem:[%s860_s1 + $0x178] sm:$0xff]  ;;  %v45_v6 = vld [vmem:[%s860_s1 + $0x68] sm:$0xff] }
   0x3   :  { %v199_v7 = vpack.c.bf16 %v79_v4, %v78_v2  ;;  %v94_v8 = vld [vmem:[%s860_s1 + $0x1f0] sm:$0xff]  ;;  %v95_v9 = vld [vmem:[%s860_s1 + $0x1f8] sm:$0xff]  ;;  %v182_v11 = vpack.c.bf16 %v45_v6, %v44_v5  ;;  %v76_v14 = vld [vmem:[%s860_s1 + $0x160] sm:$0xff] }
   0x4   :  { %v62_v10 = vld [vmem:[%s860_s1 + $0xf0] sm:$0xff]  ;;  %252 = vmatpush.bf16.msra.mxu0 %v183_v3  ;;  %v207_v12 = vpack.c.bf16 %v95_v9, %v94_v8  ;;  %v63_v13 = vld [vmem:[%s860_s1 + $0xf8] sm:$0xff]  ;;  %v77_v15 = vld [vmem:[%s860_s1 + $0x168] sm:$0xff] }
   0x5   :  { %278 = vmatpush.bf16.msra.mxu2 %v199_v7  ;;  %v191_v16 = vpack.c.bf16 %v63_v13, %v62_v10  ;;  %v198_v17 = vpack.c.bf16 %v77_v15, %v76_v14  ;;  %v42_v18 = vld [vmem:[%s860_s1 + $0x50] sm:$0xff]  ;;  %v43_v19 = vld [vmem:[%s860_s1 + $0x58] sm:$0xff]  ;;  %v92_v20 = vld [vmem:[%s860_s1 + $0x1e0] sm:$0xff] }
   0x6   :  { %291 = vmatpush.bf16.msra.mxu3 %v207_v12  ;;  %v93_v21 = vld [vmem:[%s860_s1 + $0x1e8] sm:$0xff]  ;;  %v60_v22 = vld [vmem:[%s860_s1 + $0xe0] sm:$0xff]  ;;  %v74_v26 = vld [vmem:[%s860_s1 + $0x150] sm:$0xff]  ;;  %v181_v28 = vpack.c.bf16 %v43_v19, %v42_v18 }
   0x7   :  { %v61_v23 = vld [vmem:[%s860_s1 + $0xe8] sm:$0xff]  ;;  %265 = vmatpush.bf16.msra.mxu1 %v191_v16  ;;  %v206_v24 = vpack.c.bf16 %v93_v21, %v92_v20  ;;  %v75_v27 = vld [vmem:[%s860_s1 + $0x158] sm:$0xff]  ;;  %v40_v29 = vld [vmem:[%s860_s1 + $0x40] sm:$0xff] }
   0x8   :  { %v190_v25 = vpack.c.bf16 %v61_v23, %v60_v22  ;;  %253 = vmatpush.bf16.msra.mxu0 %v182_v11  ;;  %v90_v30 = vld [vmem:[%s860_s1 + $0x1d0] sm:$0xff]  ;;  %v91_v31 = vld [vmem:[%s860_s1 + $0x1d8] sm:$0xff]  ;;  %v197_v32 = vpack.c.bf16 %v75_v27, %v74_v26  ;;  %v41_v33 = vld [vmem:[%s860_s1 + $0x48] sm:$0xff] }
   0x9   :  { %279 = vmatpush.bf16.msra.mxu2 %v198_v17  ;;  %v58_v34 = vld [vmem:[%s860_s1 + $0xd0] sm:$0xff]  ;;  %v59_v35 = vld [vmem:[%s860_s1 + $0xd8] sm:$0xff]  ;;  %v205_v36 = vpack.c.bf16 %v91_v31, %v90_v30  ;;  %v72_v37 = vld [vmem:[%s860_s1 + $0x140] sm:$0xff]  ;;  %v180_v42 = vpack.c.bf16 %v41_v33, %v40_v29 }
   0xa   :  { %292 = vmatpush.bf16.msra.mxu3 %v206_v24  ;;  %v73_v38 = vld [vmem:[%s860_s1 + $0x148] sm:$0xff]  ;;  %v189_v39 = vpack.c.bf16 %v59_v35, %v58_v34  ;;  %v88_v40 = vld [vmem:[%s860_s1 + $0x1c0] sm:$0xff]  ;;  %v38_v46 = vld [vmem:[%s860_s1 + $0x30] sm:$0xff] }
   0xb   :  { %266 = vmatpush.bf16.msra.mxu1 %v190_v25  ;;  %v89_v41 = vld [vmem:[%s860_s1 + $0x1c8] sm:$0xff]  ;;  %v56_v43 = vld [vmem:[%s860_s1 + $0xc0] sm:$0xff]  ;;  %v196_v45 = vpack.c.bf16 %v73_v38, %v72_v37  ;;  %v39_v47 = vld [vmem:[%s860_s1 + $0x38] sm:$0xff] }
   0xc   :  { %254 = vmatpush.bf16.msra.mxu0 %v181_v28  ;;  %v57_v44 = vld [vmem:[%s860_s1 + $0xc8] sm:$0xff]  ;;  %v204_v48 = vpack.c.bf16 %v89_v41, %v88_v40  ;;  %v70_v49 = vld [vmem:[%s860_s1 + $0x130] sm:$0xff]  ;;  %v71_v50 = vld [vmem:[%s860_s1 + $0x138] sm:$0xff]  ;;  %v179_v54 = vpack.c.bf16 %v39_v47, %v38_v46 }
   0xd   :  { %280 = vmatpush.bf16.msra.mxu2 %v197_v32  ;;  %v188_v51 = vpack.c.bf16 %v57_v44, %v56_v43  ;;  %v86_v52 = vld [vmem:[%s860_s1 + $0x1b0] sm:$0xff]  ;;  %v87_v53 = vld [vmem:[%s860_s1 + $0x1b8] sm:$0xff]  ;;  %v195_v57 = vpack.c.bf16 %v71_v50, %v70_v49  ;;  %v36_v58 = vld [vmem:[%s860_s1 + $0x20] sm:$0xff] }
   0xe   :  { %293 = vmatpush.bf16.msra.mxu3 %v205_v36  ;;  %v54_v55 = vld [vmem:[%s860_s1 + $0xb0] sm:$0xff]  ;;  %v55_v56 = vld [vmem:[%s860_s1 + $0xb8] sm:$0xff]  ;;  %v37_v59 = vld [vmem:[%s860_s1 + $0x28] sm:$0xff]  ;;  %v203_v60 = vpack.c.bf16 %v87_v53, %v86_v52 }
   0xf   :  { %267 = vmatpush.bf16.msra.mxu1 %v189_v39  ;;  %v68_v61 = vld [vmem:[%s860_s1 + $0x120] sm:$0xff]  ;;  %v69_v62 = vld [vmem:[%s860_s1 + $0x128] sm:$0xff]  ;;  %v187_v63 = vpack.c.bf16 %v55_v56, %v54_v55  ;;  %v178_v2 = vpack.c.bf16 %v37_v59, %v36_v58  ;;  %v34_v6 = vld [vmem:[%s860_s1 + $0x10] sm:$0xff] }
  0x10   :  { %255 = vmatpush.bf16.msra.mxu0 %v180_v42  ;;  %v84_v0 = vld [vmem:[%s860_s1 + $0x1a0] sm:$0xff]  ;;  %v85_v1 = vld [vmem:[%s860_s1 + $0x1a8] sm:$0xff]  ;;  %v194_v5 = vpack.c.bf16 %v69_v62, %v68_v61  ;;  %v35_v7 = vld [vmem:[%s860_s1 + $0x18] sm:$0xff] }
  0x11   :  { %281 = vmatpush.bf16.msra.mxu2 %v196_v45  ;;  %v52_v3 = vld [vmem:[%s860_s1 + $0xa0] sm:$0xff]  ;;  %v53_v4 = vld [vmem:[%s860_s1 + $0xa8] sm:$0xff]  ;;  %v202_v8 = vpack.c.bf16 %v85_v1, %v84_v0  ;;  %v66_v9 = vld [vmem:[%s860_s1 + $0x110] sm:$0xff]  ;;  %v177_v15 = vpack.c.bf16 %v35_v7, %v34_v6 }
  0x12   :  { %294 = vmatpush.bf16.msra.mxu3 %v204_v48  ;;  %v67_v10 = vld [vmem:[%s860_s1 + $0x118] sm:$0xff]  ;;  %v186_v11 = vpack.c.bf16 %v53_v4, %v52_v3  ;;  %v32_v12 = vld [vmem:[%s860_s1] sm:$0xff]  ;;  %v82_v13 = vld [vmem:[%s860_s1 + $0x190] sm:$0xff] }
  0x13   :  { %268 = vmatpush.bf16.msra.mxu1 %v188_v51  ;;  %v83_v14 = vld [vmem:[%s860_s1 + $0x198] sm:$0xff]  ;;  %v33_v16 = vld [vmem:[%s860_s1 + $0x8] sm:$0xff]  ;;  %v50_v17 = vld [vmem:[%s860_s1 + $0x90] sm:$0xff]  ;;  %v193_v19 = vpack.c.bf16 %v67_v10, %v66_v9 }
  0x14   :  { %256 = vmatpush.bf16.msra.mxu0 %v179_v54  ;;  %v51_v18 = vld [vmem:[%s860_s1 + $0x98] sm:$0xff]  ;;  %v110_v20 = vld [vmem:[%s860_s1 + $0x270] sm:$0xff]  ;;  %v64_v22 = vld [vmem:[%s860_s1 + $0x100] sm:$0xff]  ;;  %v201_v23 = vpack.c.bf16 %v83_v14, %v82_v13  ;;  %v176_v31 = vpack.c.bf16 %v33_v16, %v32_v12 }
  0x15   :  { %282 = vmatpush.bf16.msra.mxu2 %v195_v57  ;;  %v111_v21 = vld [vmem:[%s860_s1 + $0x278] sm:$0xff]  ;;  %v65_v24 = vld [vmem:[%s860_s1 + $0x108] sm:$0xff]  ;;  %v142_v25 = vld [vmem:[%s860_s1 + $0x370] sm:$0xff]  ;;  %v185_v27 = vpack.c.bf16 %v51_v18, %v50_v17 }
  0x16   :  { %295 = vmatpush.bf16.msra.mxu3 %v203_v60  ;;  %v143_v26 = vld [vmem:[%s860_s1 + $0x378] sm:$0xff]  ;;  %v80_v28 = vld [vmem:[%s860_s1 + $0x180] sm:$0xff]  ;;  %v81_v29 = vld [vmem:[%s860_s1 + $0x188] sm:$0xff]  ;;  %v215_v35 = vpack.c.bf16 %v111_v21, %v110_v20  ;;  %v192_v36 = vpack.c.bf16 %v65_v24, %v64_v22 }
  0x17   :  { %269 = vmatpush.bf16.msra.mxu1 %v187_v63  ;;  %v158_v30 = vld [vmem:[%s860_s1 + $0x3f0] sm:$0xff]  ;;  %v159_v32 = vld [vmem:[%s860_s1 + $0x3f8] sm:$0xff]  ;;  %v48_v33 = vld [vmem:[%s860_s1 + $0x80] sm:$0xff]  ;;  %v231_v39 = vpack.c.bf16 %v143_v26, %v142_v25  ;;  %v200_v40 = vpack.c.bf16 %v81_v29, %v80_v28 }
  0x18   :  { %257 = vmatpush.bf16.msra.mxu0 %v178_v2  ;;  %v49_v34 = vld [vmem:[%s860_s1 + $0x88] sm:$0xff]  ;;  %v126_v37 = vld [vmem:[%s860_s1 + $0x2f0] sm:$0xff]  ;;  %v127_v38 = vld [vmem:[%s860_s1 + $0x2f8] sm:$0xff]  ;;  %v239_v43 = vpack.c.bf16 %v159_v32, %v158_v30 }
  0x19   :  { %283 = vmatpush.bf16.msra.mxu2 %v194_v5  ;;  %v108_v41 = vld [vmem:[%s860_s1 + $0x260] sm:$0xff]  ;;  %v109_v42 = vld [vmem:[%s860_s1 + $0x268] sm:$0xff]  ;;  %v184_v44 = vpack.c.bf16 %v49_v34, %v48_v33  ;;  %v223_v47 = vpack.c.bf16 %v127_v38, %v126_v37  ;;  %v16_v53 = vld [vmem:[%s861_s0 + $0x10] sm:$0xff] }
  0x1a   :  { %296 = vmatpush.bf16.msra.mxu3 %v202_v8  ;;  %v140_v45 = vld [vmem:[%s860_s1 + $0x360] sm:$0xff]  ;;  %v141_v46 = vld [vmem:[%s860_s1 + $0x368] sm:$0xff]  ;;  %v214_v50 = vpack.c.bf16 %v109_v42, %v108_v41  ;;  %v106_v55 = vld [vmem:[%s860_s1 + $0x250] sm:$0xff]  ;;  %v25_v57 = vpack.c.bf16 %v16_v53, %v16_v53 }
  0x1b   :  { %270 = vmatpush.bf16.msra.mxu1 %v186_v11  ;;  %v156_v48 = vld [vmem:[%s860_s1 + $0x3e0] sm:$0xff]  ;;  %v157_v49 = vld [vmem:[%s860_s1 + $0x3e8] sm:$0xff]  ;;  %v230_v54 = vpack.c.bf16 %v141_v46, %v140_v45  ;;  %v107_v56 = vld [vmem:[%s860_s1 + $0x258] sm:$0xff] }
  0x1c   :  { %258 = vmatpush.bf16.msra.mxu0 %v177_v15  ;;  %v124_v51 = vld [vmem:[%s860_s1 + $0x2e0] sm:$0xff]  ;;  %v125_v52 = vld [vmem:[%s860_s1 + $0x2e8] sm:$0xff]  ;;  %v238_v59 = vpack.c.bf16 %v157_v49, %v156_v48  ;;  %v138_v60 = vld [vmem:[%s860_s1 + $0x350] sm:$0xff]  ;;  %v213_v5 = vpack.c.bf16 %v107_v56, %v106_v55 }
  0x1d   :  { %284 = vmatpush.bf16.msra.mxu2 %v193_v19  ;;  %v14_v58 = vld [vmem:[%s861_s0] sm:$0xff]  ;;  %v139_v61 = vld [vmem:[%s860_s1 + $0x358] sm:$0xff]  ;;  %v222_v0 = vpack.c.bf16 %v125_v52, %v124_v51  ;;  %v154_v1 = vld [vmem:[%s860_s1 + $0x3d0] sm:$0xff] }
  0x1e   :  { %297 = vmatpush.bf16.msra.mxu3 %v201_v23  ;;  %v23_v62 = vpack.c.bf16 %v14_v58, %v14_v58  ;;  %v17_v63 = vld [vmem:[%s861_s0 + $0x18] sm:$0xff]  ;;  %v15_v4 = vld [vmem:[%s861_s0 + $0x8] sm:$0xff]  ;;  %v122_v6 = vld [vmem:[%s860_s1 + $0x2d0] sm:$0xff]  ;;  %v229_v9 = vpack.c.bf16 %v139_v61, %v138_v60 }
  0x1f   :  { %271 = vmatpush.bf16.msra.mxu1 %v185_v27  ;;  %v155_v2 = vld [vmem:[%s860_s1 + $0x3d8] sm:$0xff]  ;;  %v26_v3 = vpack.c.bf16 %v17_v63, %v17_v63  ;;  %v24_v8 = vpack.c.bf16 %v15_v4, %v15_v4  ;;  %v104_v10 = vld [vmem:[%s860_s1 + $0x240] sm:$0xff]  ;;  %v105_v11 = vld [vmem:[%s860_s1 + $0x248] sm:$0xff] }
  0x20   :  { %259 = vmatpush.bf16.msra.mxu0 %v176_v31  ;;  %v123_v7 = vld [vmem:[%s860_s1 + $0x2d8] sm:$0xff]  ;;  %v237_v12 = vpack.c.bf16 %v155_v2, %v154_v1  ;;  %v136_v13 = vld [vmem:[%s860_s1 + $0x340] sm:$0xff]  ;;  %v137_v14 = vld [vmem:[%s860_s1 + $0x348] sm:$0xff]  ;;  %v212_v18 = vpack.c.bf16 %v105_v11, %v104_v10 }
  0x21   :  { %285 = vmatpush.bf16.msra.mxu2 %v192_v36  ;;  %v221_v15 = vpack.c.bf16 %v123_v7, %v122_v6  ;;  %v152_v16 = vld [vmem:[%s860_s1 + $0x3c0] sm:$0xff]  ;;  %v153_v17 = vld [vmem:[%s860_s1 + $0x3c8] sm:$0xff]  ;;  %v228_v21 = vpack.c.bf16 %v137_v14, %v136_v13  ;;  %v102_v22 = vld [vmem:[%s860_s1 + $0x230] sm:$0xff] }
  0x22   :  { %298 = vmatpush.bf16.msra.mxu3 %v200_v40  ;;  %v120_v19 = vld [vmem:[%s860_s1 + $0x2c0] sm:$0xff]  ;;  %v121_v20 = vld [vmem:[%s860_s1 + $0x2c8] sm:$0xff]  ;;  %v103_v23 = vld [vmem:[%s860_s1 + $0x238] sm:$0xff]  ;;  %v236_v24 = vpack.c.bf16 %v153_v17, %v152_v16 }
  0x23   :  { %272 = vmatpush.bf16.msra.mxu1 %v184_v44  ;;  %260 = vmatmul.bf16.vlgmr.msra.gmra.mxu0 %v23_v62  ;;  %v134_v25 = vld [vmem:[%s860_s1 + $0x330] sm:$0xff]  ;;  %v135_v26 = vld [vmem:[%s860_s1 + $0x338] sm:$0xff]  ;;  %v220_v27 = vpack.c.bf16 %v121_v20, %v120_v19  ;;  %v211_v30 = vpack.c.bf16 %v103_v23, %v102_v22  ;;  %v100_v34 = vld [vmem:[%s860_s1 + $0x220] sm:$0xff] }
  0x24   :  { %304 = vmatpush.bf16.msrb.mxu0 %v215_v35  ;;  %286 = vmatmul.bf16.vlgmr.msra.gmra.mxu2 %v25_v57  ;;  %v150_v28 = vld [vmem:[%s860_s1 + $0x3b0] sm:$0xff]  ;;  %v151_v29 = vld [vmem:[%s860_s1 + $0x3b8] sm:$0xff]  ;;  %v227_v33 = vpack.c.bf16 %v135_v26, %v134_v25  ;;  %v101_v35 = vld [vmem:[%s860_s1 + $0x228] sm:$0xff] }
  0x25   :  { %330 = vmatpush.bf16.msrb.mxu2 %v231_v39  ;;  %299 = vmatmul.bf16.vlgmr.msra.gmra.mxu3 %v26_v3  ;;  %v118_v31 = vld [vmem:[%s860_s1 + $0x2b0] sm:$0xff]  ;;  %v119_v32 = vld [vmem:[%s860_s1 + $0x2b8] sm:$0xff]  ;;  %v235_v36 = vpack.c.bf16 %v151_v29, %v150_v28  ;;  %v132_v37 = vld [vmem:[%s860_s1 + $0x320] sm:$0xff]  ;;  %v210_v42 = vpack.c.bf16 %v101_v35, %v100_v34 }
  0x26   :  { %343 = vmatpush.bf16.msrb.mxu3 %v239_v43  ;;  %273 = vmatmul.bf16.vlgmr.msra.gmra.mxu1 %v24_v8  ;;  %v133_v38 = vld [vmem:[%s860_s1 + $0x328] sm:$0xff]  ;;  %v219_v39 = vpack.c.bf16 %v119_v32, %v118_v31  ;;  %v148_v40 = vld [vmem:[%s860_s1 + $0x3a0] sm:$0xff]  ;;  %v98_v46 = vld [vmem:[%s860_s1 + $0x210] sm:$0xff] }
  0x27   :  { %317 = vmatpush.bf16.msrb.mxu1 %v223_v47  ;;  %v149_v41 = vld [vmem:[%s860_s1 + $0x3a8] sm:$0xff]  ;;  %v116_v43 = vld [vmem:[%s860_s1 + $0x2a0] sm:$0xff]  ;;  %v226_v45 = vpack.c.bf16 %v133_v38, %v132_v37  ;;  %v99_v47 = vld [vmem:[%s860_s1 + $0x218] sm:$0xff] }
  0x28   :  { %305 = vmatpush.bf16.msrb.mxu0 %v214_v50  ;;  %v117_v44 = vld [vmem:[%s860_s1 + $0x2a8] sm:$0xff]  ;;  %v234_v48 = vpack.c.bf16 %v149_v41, %v148_v40  ;;  %v130_v49 = vld [vmem:[%s860_s1 + $0x310] sm:$0xff]  ;;  %v131_v50 = vld [vmem:[%s860_s1 + $0x318] sm:$0xff] }
  0x29   :  { %331 = vmatpush.bf16.msrb.mxu2 %v230_v54  ;;  %v218_v51 = vpack.c.bf16 %v117_v44, %v116_v43  ;;  %v146_v52 = vld [vmem:[%s860_s1 + $0x390] sm:$0xff]  ;;  %v147_v53 = vld [vmem:[%s860_s1 + $0x398] sm:$0xff]  ;;  %v209_v54 = vpack.c.bf16 %v99_v47, %v98_v46  ;;  %v225_v57 = vpack.c.bf16 %v131_v50, %v130_v49  ;;  %v96_v58 = vld [vmem:[%s860_s1 + $0x200] sm:$0xff] }
  0x2a   :  { %344 = vmatpush.bf16.msrb.mxu3 %v238_v59  ;;  %v114_v55 = vld [vmem:[%s860_s1 + $0x290] sm:$0xff]  ;;  %v115_v56 = vld [vmem:[%s860_s1 + $0x298] sm:$0xff]  ;;  %v97_v59 = vld [vmem:[%s860_s1 + $0x208] sm:$0xff]  ;;  %v233_v61 = vpack.c.bf16 %v147_v53, %v146_v52 }
  0x2b   :  { %318 = vmatpush.bf16.msrb.mxu1 %v222_v0  ;;  %v174_v60 = vld [vmem:[%s860_s1 + $0x470] sm:$0xff]  ;;  %v175_v62 = vld [vmem:[%s860_s1 + $0x478] sm:$0xff]  ;;  %v128_v63 = vld [vmem:[%s860_s1 + $0x300] sm:$0xff]  ;;  %v217_v1 = vpack.c.bf16 %v115_v56, %v114_v55  ;;  %v208_v4 = vpack.c.bf16 %v97_v59, %v96_v58 }
  0x2c   :  { %306 = vmatpush.bf16.msrb.mxu0 %v213_v5  ;;  %v129_v0 = vld [vmem:[%s860_s1 + $0x308] sm:$0xff]  ;;  %v144_v2 = vld [vmem:[%s860_s1 + $0x380] sm:$0xff]  ;;  %v247_v8 = vpack.c.bf16 %v175_v62, %v174_v60  ;;  %v20_v10 = vld [vmem:[%s861_s0 + $0x30] sm:$0xff] }
  0x2d   :  { %332 = vmatpush.bf16.msrb.mxu2 %v229_v9  ;;  %v145_v3 = vld [vmem:[%s860_s1 + $0x388] sm:$0xff]  ;;  %v112_v5 = vld [vmem:[%s860_s1 + $0x280] sm:$0xff]  ;;  %v224_v9 = vpack.c.bf16 %v129_v0, %v128_v63  ;;  %v21_v14 = vld [vmem:[%s861_s0 + $0x38] sm:$0xff] }
  0x2e   :  { %345 = vmatpush.bf16.msrb.mxu3 %v237_v12  ;;  %v113_v6 = vld [vmem:[%s860_s1 + $0x288] sm:$0xff]  ;;  %v18_v7 = vld [vmem:[%s861_s0 + $0x20] sm:$0xff]  ;;  %v232_v11 = vpack.c.bf16 %v145_v3, %v144_v2  ;;  %v30_v20 = vpack.c.bf16 %v21_v14, %v21_v14  ;;  %v171_v22 = vld [vmem:[%s860_s1 + $0x458] sm:$0xff] }
  0x2f   :  { %319 = vmatpush.bf16.msrb.mxu1 %v221_v15  ;;  %v172_v12 = vld [vmem:[%s860_s1 + $0x460] sm:$0xff]  ;;  %v173_v13 = vld [vmem:[%s860_s1 + $0x468] sm:$0xff]  ;;  %v216_v15 = vpack.c.bf16 %v113_v6, %v112_v5  ;;  %v27_v16 = vpack.c.bf16 %v18_v7, %v18_v7  ;;  %v166_v28 = vld [vmem:[%s860_s1 + $0x430] sm:$0xff] }
  0x30   :  { %307 = vmatpush.bf16.msrb.mxu0 %v212_v18  ;;  %v19_v17 = vld [vmem:[%s861_s0 + $0x28] sm:$0xff]  ;;  %v29_v18 = vpack.c.bf16 %v20_v10, %v20_v10  ;;  %v246_v19 = vpack.c.bf16 %v173_v13, %v172_v12  ;;  %v168_v25 = vld [vmem:[%s860_s1 + $0x440] sm:$0xff]  ;;  %v167_v29 = vld [vmem:[%s860_s1 + $0x438] sm:$0xff] }
  0x31   :  { %333 = vmatpush.bf16.msrb.mxu2 %v228_v21  ;;  %v170_v21 = vld [vmem:[%s860_s1 + $0x450] sm:$0xff]  ;;  %v28_v23 = vpack.c.bf16 %v19_v17, %v19_v17  ;;  %v169_v26 = vld [vmem:[%s860_s1 + $0x448] sm:$0xff]  ;;  %v164_v31 = vld [vmem:[%s860_s1 + $0x420] sm:$0xff] }
  0x32   :  { %346 = vmatpush.bf16.msrb.mxu3 %v236_v24  ;;  %v245_v24 = vpack.c.bf16 %v171_v22, %v170_v21  ;;  %v165_v32 = vld [vmem:[%s860_s1 + $0x428] sm:$0xff]  ;;  %v162_v34 = vld [vmem:[%s860_s1 + $0x410] sm:$0xff]  ;;  %v163_v35 = vld [vmem:[%s860_s1 + $0x418] sm:$0xff] }
  0x33   :  { %320 = vmatpush.bf16.msrb.mxu1 %v220_v27  ;;  %v244_v27 = vpack.c.bf16 %v169_v26, %v168_v25  ;;  %v160_v37 = vld [vmem:[%s860_s1 + $0x400] sm:$0xff]  ;;  %v161_v38 = vld [vmem:[%s860_s1 + $0x408] sm:$0xff] }
  0x34   :  { %308 = vmatpush.bf16.msrb.mxu0 %v211_v30  ;;  %v243_v30 = vpack.c.bf16 %v167_v29, %v166_v28  ;;  %v22_v40 = vld [vmem:[%s861_s0 + $0x40] sm:$0xff] }
  0x35   :  { %334 = vmatpush.bf16.msrb.mxu2 %v227_v33  ;;  %v242_v33 = vpack.c.bf16 %v165_v32, %v164_v31  ;;  %v31_v41 = vpack.c.bf16 %v22_v40, %v22_v40  ;;  %v374_v50 = vld [vmem:[%s862_s2] ss:$0 sm:$0xff] }
  0x36   :  { %347 = vmatpush.bf16.msrb.mxu3 %v235_v36  ;;  %v241_v36 = vpack.c.bf16 %v163_v35, %v162_v34 }
  0x37   :  { %321 = vmatpush.bf16.msrb.mxu1 %v219_v39  ;;  %v240_v39 = vpack.c.bf16 %v161_v38, %v160_v37 }
  0x38   :  { %309 = vmatpush.bf16.msrb.mxu0 %v210_v42 }
  0x39   :  { %335 = vmatpush.bf16.msrb.mxu2 %v226_v45 }
  0x3a   :  { %348 = vmatpush.bf16.msrb.mxu3 %v234_v48 }
  0x3b   :  { %322 = vmatpush.bf16.msrb.mxu1 %v218_v51 }
  0x3c   :  { %310 = vmatpush.bf16.msrb.mxu0 %v209_v54 }
  0x3d   :  { %336 = vmatpush.bf16.msrb.mxu2 %v225_v57 }
  0x3e   :  { %349 = vmatpush.bf16.msrb.mxu3 %v233_v61 }
  0x3f   :  { %323 = vmatpush.bf16.msrb.mxu1 %v217_v1 }
  0x40   :  { %311 = vmatpush.bf16.msrb.mxu0 %v208_v4 }
  0x41   :  { %337 = vmatpush.bf16.msrb.mxu2 %v224_v9 }
  0x42   :  { %350 = vmatpush.bf16.msrb.mxu3 %v232_v11 }
  0x43   :  { %324 = vmatpush.bf16.msrb.mxu1 %v216_v15  ;;  %312 = vmatmul.bf16.vlgmr.msrb.gmra.mxu0 %v27_v16 }
  0x44   :  { %356 = vmatpush.bf16.msra.mxu0 %v247_v8  ;;  %338 = vmatmul.bf16.vlgmr.msrb.gmra.mxu2 %v29_v18 }
  0x45   :  { %351 = vmatmul.bf16.vlgmr.msrb.gmra.mxu3 %v30_v20 }
  0x46   :  { %325 = vmatmul.bf16.vlgmr.msrb.gmra.mxu1 %v28_v23 }
  0x48   :  { %357 = vmatpush.bf16.msra.mxu0 %v246_v19 }
  0x4c   :  { %358 = vmatpush.bf16.msra.mxu0 %v245_v24 }
  0x50   :  { %359 = vmatpush.bf16.msra.mxu0 %v244_v27 }
  0x54   :  { %360 = vmatpush.bf16.msra.mxu0 %v243_v30 }
  0x58   :  { %361 = vmatpush.bf16.msra.mxu0 %v242_v33 }
  0x5c   :  { %362 = vmatpush.bf16.msra.mxu0 %v241_v36 }
  0x60   :  { %363 = vmatpush.bf16.msra.mxu0 %v240_v39 }
  0x63   :  { %364 = vmatmul.bf16.vlgmr.msra.gmra.mxu0 %v31_v41 }
  0xa0   :  { %v261_v42 = vpop.f32.mrf.mxu0 }
  0xa1   :  { %v262_v51 = vadd.f32 %v374_v50, %v261_v42 }
  0xa3   :  { %v274_v43 = vpop.f32.mrf.mxu1 }
  0xa4   :  { %v275_v54 = vadd.f32 %v274_v43, %v262_v51 }
  0xa7   :  { %v287_v44 = vpop.f32.mrf.mxu2 }
  0xa8   :  { %v300_v45 = vpop.f32.mrf.mxu3  ;;  %v263_v46 = vpop.f32.mrf.mxu0  ;;  %v288_v56 = vadd.f32 %v287_v44, %v275_v54 }
  0xaa   :  { %v301_v60 = vadd.f32 %v300_v45, %v288_v56 }
  0xab   :  { %v276_v47 = vpop.f32.mrf.mxu1 }
  0xaf   :  { %v289_v48 = vpop.f32.mrf.mxu2 }
  0xb0   :  { %v302_v49 = vpop.f32.mrf.mxu3 }
  0xc0   :  { %v313_v52 = vpop.f32.mrf.mxu0 }
  0xc1   :  { %v314_v62 = vadd.f32 %v313_v52, %v301_v60 }
  0xc3   :  { %v326_v53 = vpop.f32.mrf.mxu1 }
  0xc4   :  { %v327_v0 = vadd.f32 %v326_v53, %v314_v62 }
  0xc7   :  { %v339_v55 = vpop.f32.mrf.mxu2 }
  0xc8   :  { %v352_v57 = vpop.f32.mrf.mxu3  ;;  %v315_v58 = vpop.f32.mrf.mxu0  ;;  %v340_v1 = vadd.f32 %v339_v55, %v327_v0 }
  0xca   :  { %v353_v2 = vadd.f32 %v352_v57, %v340_v1 }
  0xcb   :  { %v328_v59 = vpop.f32.mrf.mxu1 }
  0xcf   :  { %v341_v61 = vpop.f32.mrf.mxu2 }
  0xd0   :  { %v354_v63 = vpop.f32.mrf.mxu3 }
  0xe0   :  { %v365_v3 = vpop.f32.mrf.mxu0 }
  0xe1   :  { %v366_v4 = vadd.f32 %v365_v3, %v353_v2 }
  0xe3   :  { %369 = vst [vmem:[%s863_s3] sm:$0xff] %v366_v4 }
  0xe8   :  { %v367_v5 = vpop.f32.mrf.mxu0 }

</bundles_post_ra>
